<compile_context>
chip_gen: v6e
topology: v6e:2x2x1
jax: 0.10.0
libtpu: 0.0.40
codegen_flags: <defaults>
</compile_context>

<pallas_src>
import math

import jax
import jax.numpy as jnp
from jax import lax
from jax.experimental import pallas as pl
from jax.experimental.pallas import tpu as pltpu


def _make_decoder_kernel(hidden_dim, num_layers, nhead, seq_len_m1, block_b):
    H, L, nH, T, Bb = hidden_dim, num_layers, nhead, seq_len_m1, block_b
    dH = H // nH
    qk_scale = 1.0 / math.sqrt(dH)
    BT = Bb * T
    f32, bf16 = jnp.float32, jnp.bfloat16

    def layer_norm(v, w, b):
        mu = jnp.mean(v, axis=-1, keepdims=True)
        var = jnp.mean(jnp.square(v - mu), axis=-1, keepdims=True)
        return (v - mu) * lax.rsqrt(var + 1e-5) * w + b

    def kernel(x_ref, g_ref, pos_ref, bmask_ref, hm_ref,
               saw_ref, sab_ref, sow_ref, sob_ref,
               cvw_ref, cvb_ref, cow_ref, cob_ref,
               f1w_ref, f1b_ref, f2w_ref, f2b_ref,
               lnw_ref, lnb_ref,
               out_ref, xs_ref):
        l = pl.program_id(1)

        # residual-stream accumulator: initialize once per batch block
        @pl.when(l == 0)
        def _init():
            xs_ref[...] = (x_ref[...].astype(f32)
                           + pos_ref[...][None, :, :]).reshape(BT, H)

        x = xs_ref[...]                 # (BT, H) f32 residual stream
        hm = hm_ref[...]                # (nH, H) 0/1 head lane masks, f32
        bmask = bmask_ref[...]          # (BT, BT) block-diag causal mask, f32
        lnw = lnw_ref[0]                # (3, H)
        lnb = lnb_ref[0]

        # ---- masked self-attention: fused QKV, block-diag batched scores ---
        qkv = jnp.dot(x.astype(bf16), saw_ref[0],
                      preferred_element_type=f32) + sab_ref[0]      # (BT, 3H)
        q = qkv[:, 0:H]
        k16 = qkv[:, H:2 * H].astype(bf16)
        v16 = qkv[:, 2 * H:3 * H].astype(bf16)                      # cast once

        att = jnp.zeros((BT, H), f32)
        for h in range(nH):             # static, small (nH): one fused matmul each
            mh = hm[h:h + 1, :]
            qh = (q * mh).astype(bf16)  # zeroed lanes restrict the contraction
            s = lax.dot_general(qh, k16, (((1,), (1,)), ((), ())),
                                preferred_element_type=f32)          # (BT, BT)
            s = s * qk_scale + bmask    # cross-batch entries -> -1e30 (f32 safe)
            s = s - jnp.max(s, axis=-1, keepdims=True)
            e = jnp.exp(s)              # cross-batch probs underflow to exact 0
            p = e * pl.reciprocal(jnp.sum(e, axis=-1, keepdims=True),
                                  approx=True)
            att = att + jnp.dot(p.astype(bf16), v16,
                                preferred_element_type=f32) * mh     # mask output cols
        att = jnp.dot(att.astype(bf16), sow_ref[0],
                      preferred_element_type=f32) + sob_ref[0]
        x = layer_norm(x + att, lnw[0:1, :], lnb[0:1, :])

        # ---- cross-attention over length-1 broadcast memory: exact collapse
        # softmax over identical keys is uniform -> out = W_out(W_v g + b_v) + b_out
        g = g_ref[...].reshape(Bb, H)                                # bf16
        vm = jnp.dot(g, cvw_ref[0], preferred_element_type=f32) + cvb_ref[0]
        ca = jnp.dot(vm.astype(bf16), cow_ref[0],
                     preferred_element_type=f32) + cob_ref[0]        # (Bb, H)
        ca_bt = jnp.broadcast_to(ca[:, None, :], (Bb, T, H)).reshape(BT, H)
        x = layer_norm(x + ca_bt, lnw[1:2, :], lnb[1:2, :])

        # ---- feed-forward (relu) --------------------------------------------
        h1 = jnp.maximum(jnp.dot(x.astype(bf16), f1w_ref[0],
                                 preferred_element_type=f32) + f1b_ref[0], 0.0)
        ff = jnp.dot(h1.astype(bf16), f2w_ref[0],
                     preferred_element_type=f32) + f2b_ref[0]
        x = layer_norm(x + ff, lnw[2:3, :], lnb[2:3, :])

        xs_ref[...] = x

        # final hidden states (bf16) written once per batch block
        @pl.when(l == L - 1)
        def _final():
            out_ref[...] = x.reshape(Bb, T, H).astype(out_ref.dtype)

    return kernel


def _make_fc_kernel(hidden_dim, seq_len_m1, block_b, tile_v):
    H, T, Bb, tV = hidden_dim, seq_len_m1, block_b, tile_v
    BT = Bb * T
    f32 = jnp.float32

    def kernel(x_ref, w_ref, b_ref, o_ref):
        xb = x_ref[...].reshape(BT, H)                               # bf16
        logits = jnp.dot(xb, w_ref[...], preferred_element_type=f32) + b_ref[...]
        o_ref[...] = logits.reshape(Bb, T, tV)

    return kernel


def _num_tensorcores():
    """2 TensorCores per chip on v7x, 1 on v5e/v6e (best-effort detection)."""
    try:
        kind = jax.devices()[0].device_kind.lower()
        if "v7" in kind or "7x" in kind:
            return 2
    except Exception:
        pass
    return 1


def init_params(key, hidden_dim, num_layers, output_dim, seq_len, nhead):
    H, L, V, T = hidden_dim, num_layers, output_dim, seq_len - 1
    ks = jax.random.split(key, 17)
    n = lambda k, shape, s=0.02: jax.random.normal(k, shape, jnp.float32) * s
    params = dict(
        emb=n(ks[0], (V, H), 1.0),
        sa_in_w=n(ks[1], (L, 3 * H, H)), sa_in_b=n(ks[2], (L, 3 * H)),
        sa_out_w=n(ks[3], (L, H, H)),    sa_out_b=n(ks[4], (L, H)),
        ca_in_w=n(ks[5], (L, 3 * H, H)), ca_in_b=n(ks[6], (L, 3 * H)),
        ca_out_w=n(ks[7], (L, H, H)),    ca_out_b=n(ks[8], (L, H)),
        ff1_w=n(ks[9], (L, 2 * H, H)),   ff1_b=n(ks[10], (L, 2 * H)),
        ff2_w=n(ks[11], (L, H, 2 * H)),  ff2_b=n(ks[12], (L, H)),
        ln_w=1.0 + n(ks[15], (L, 3, H)), ln_b=n(ks[16], (L, 3, H)),
        fc_w=n(ks[13], (V, H)),          fc_b=n(ks[14], (1, V)),
    )
    # sinusoidal positional encoding (PositionalEncoding), rows 0..T-1
    den = jnp.exp(-jnp.arange(0, H, 2, dtype=jnp.float32) * (math.log(10000.0) / H))
    pos = jnp.arange(T, dtype=jnp.float32)[:, None]
    pe = jnp.zeros((T, H), jnp.float32)
    pe = pe.at[:, 0::2].set(jnp.sin(pos * den))
    pe = pe.at[:, 1::2].set(jnp.cos(pos * den))
    params["pos"] = pe
    return params


def transformer_sequence_decoder_forward(params, graph_embedding, target_sequence,
                                         *, hidden_dim, num_layers, output_dim,
                                         seq_len, nhead=8, block_b=None):
    H, L, V, nH = hidden_dim, num_layers, output_dim, nhead
    T = seq_len - 1
    dH = H // nH
    assert target_sequence.shape[0] == T
    B = target_sequence.shape[1]
    f32, bf16 = jnp.float32, jnp.bfloat16

    # --- generation-aware batch blocking ------------------------------------
    # single TC (v5e/v6e): 1 block -> max BT, weights streamed exactly once;
    # dual TC (v7x): exactly 2 blocks so the "parallel" axis feeds both cores.
    if block_b is None:
        cap_bt = 512                                    # bounds (BT,BT) scores / VMEM
        max_bb = max(1, cap_bt // max(T, 1))
        if _num_tensorcores() >= 2 and B >= 2:
            block_b = min(-(-B // 2), max_bb)
        else:
            block_b = min(B, max_bb)
    Bb = max(1, block_b)
    B_pad = -(-B // Bb) * Bb
    BT = Bb * T
    Vp = -(-V // 128) * 128                             # lane-dense logits

    # vocab tile: largest multiple of 128 that divides Vp, capped at 2048
    tile_v = Vp
    if Vp > 2048:
        tile_v = 128
        for cand in range(2048, 127, -128):
            if Vp % cand == 0:
                tile_v = cand
                break

    # --- glue (plain JAX): embedding gather, layout, parameter prep ----------
    x = jnp.transpose(params["emb"][target_sequence], (1, 0, 2))     # (B,T,H)
    g = graph_embedding.reshape(B, 1, H)
    if B_pad != B:                                      # padded rows are discarded later
        x = jnp.pad(x, ((0, B_pad - B), (0, 0), (0, 0)))
        g = jnp.pad(g, ((0, B_pad - B), (0, 0), (0, 0)))
    x = x.astype(bf16)                                  # halve activation in-DMA
    g = g.astype(bf16)

    pos = (params["pos"] * math.sqrt(H)).astype(f32)    # pre-scaled (T,H)

    # block-diagonal causal mask over the folded (BT, BT) scores
    rows = jnp.arange(BT)[:, None]
    cols = jnp.arange(BT)[None, :]
    same_blk = (rows // T) == (cols // T)
    bmask = jnp.where(same_blk & (cols <= rows), 0.0, -1e30).astype(f32)
    head_mask = ((jnp.arange(H)[None, :] // dH) ==
                 jnp.arange(nH)[:, None]).astype(f32)                # (nH,H)

    tr = lambda w: jnp.transpose(w, (0, 2, 1))          # (L,out,in) -> (L,in,out)
    sa_qkv_w = tr(params["sa_in_w"]).astype(bf16)
    sa_qkv_b = params["sa_in_b"].reshape(L, 1, 3 * H).astype(f32)
    sa_out_w = tr(params["sa_out_w"]).astype(bf16)
    sa_out_b = params["sa_out_b"].reshape(L, 1, H).astype(f32)
    # cross-attn collapses exactly: only the V and out projections are shipped
    ca_v_w = tr(params["ca_in_w"][:, 2 * H:3 * H, :]).astype(bf16)
    ca_v_b = params["ca_in_b"][:, 2 * H:3 * H].reshape(L, 1, H).astype(f32)
    ca_out_w = tr(params["ca_out_w"]).astype(bf16)
    ca_out_b = params["ca_out_b"].reshape(L, 1, H).astype(f32)
    ff1_w = tr(params["ff1_w"]).astype(bf16)
    ff1_b = params["ff1_b"].reshape(L, 1, 2 * H).astype(f32)
    ff2_w = tr(params["ff2_w"]).astype(bf16)
    ff2_b = params["ff2_b"].reshape(L, 1, H).astype(f32)
    ln_w = params["ln_w"].astype(f32)
    ln_b = params["ln_b"].astype(f32)
    fc_w = jnp.zeros((H, Vp), bf16).at[:, :V].set(params["fc_w"].T.astype(bf16))
    fc_b = jnp.zeros((1, Vp), f32).at[:, :V].set(params["fc_b"].astype(f32))

    dec_kernel = _make_decoder_kernel(H, L, nH, T, Bb)

    # explicit VMEM budget: ~2x per-layer streamed weight set + consts + acts
    per_layer = 20 * H * H * 2 + 17 * H * 4             # bf16 matrices + f32 biases/ln
    consts = (T * H + BT * BT + nH * H) * 4
    acts = BT * H * (2 + 2) * 2                         # bf16 in + bf16 out, double-buf
    est = 2 * per_layer + consts + acts + BT * H * 4    # + f32 residual scratch
    vmem_limit = int(min(max(4 * est, 32 * 2 ** 20), 64 * 2 ** 20))

    def run_decoder(const_mode):
        def const_spec(shape):
            nd = len(shape)
            imap = lambda b, l, _nd=nd: (0,) * _nd
            if const_mode is not None:
                return pl.BlockSpec(tuple(shape), imap, pipeline_mode=const_mode)
            return pl.BlockSpec(tuple(shape), imap)

        def layer_spec(shape):                          # per-layer streamed block
            rest = tuple(shape[1:])
            return pl.BlockSpec((1,) + rest,
                                lambda b, l, _z=(0,) * len(rest): (l,) + _z)

        def batch_spec(shape):                          # per-batch-block
            rest = tuple(shape[1:])
            return pl.BlockSpec((Bb,) + rest,
                                lambda b, l, _z=(0,) * len(rest): (b,) + _z)

        in_specs = [
            batch_spec(x.shape), batch_spec(g.shape),
            const_spec(pos.shape), const_spec(bmask.shape),
            const_spec(head_mask.shape),
            layer_spec(sa_qkv_w.shape), layer_spec(sa_qkv_b.shape),
            layer_spec(sa_out_w.shape), layer_spec(sa_out_b.shape),
            layer_spec(ca_v_w.shape), layer_spec(ca_v_b.shape),
            layer_spec(ca_out_w.shape), layer_spec(ca_out_b.shape),
            layer_spec(ff1_w.shape), layer_spec(ff1_b.shape),
            layer_spec(ff2_w.shape), layer_spec(ff2_b.shape),
            layer_spec(ln_w.shape), layer_spec(ln_b.shape),
        ]
        return pl.pallas_call(
            dec_kernel,
            out_shape=jax.ShapeDtypeStruct((B_pad, T, H), bf16),
            grid=(B_pad // Bb, L),
            in_specs=in_specs,
            out_specs=pl.BlockSpec((Bb, T, H), lambda b, l: (b, 0, 0)),
            scratch_shapes=[pltpu.VMEM((BT, H), f32)],
            compiler_params=pltpu.CompilerParams(
                dimension_semantics=("parallel", "arbitrary"),
                vmem_limit_bytes=vmem_limit),
        )(x, g, pos, bmask, head_mask,
          sa_qkv_w, sa_qkv_b, sa_out_w, sa_out_b,
          ca_v_w, ca_v_b, ca_out_w, ca_out_b,
          ff1_w, ff1_b, ff2_w, ff2_b,
          ln_w, ln_b)

    # constants need no double-buffering; fall back gracefully if pl.Buffered(1)
    # is not accepted by the installed Pallas lowering.
    hidden = None
    buffered_cls = getattr(pl, "Buffered", None)
    if buffered_cls is not None:
        try:
            hidden = jax.block_until_ready(run_decoder(buffered_cls(1)))
        except Exception:
            hidden = None
    if hidden is None:
        hidden = run_decoder(None)

    # --- second kernel: lane-dense vocab projection, tiled over (b, vocab) ---
    fc_kernel = _make_fc_kernel(H, T, Bb, tile_v)
    logits = pl.pallas_call(
        fc_kernel,
        out_shape=jax.ShapeDtypeStruct((B_pad, T, Vp), f32),
        grid=(B_pad // Bb, Vp // tile_v),
        in_specs=[
            pl.BlockSpec((Bb, T, H), lambda b, v: (b, 0, 0)),
            pl.BlockSpec((H, tile_v), lambda b, v: (0, v)),
            pl.BlockSpec((1, tile_v), lambda b, v: (0, v)),
        ],
        out_specs=pl.BlockSpec((Bb, T, tile_v), lambda b, v: (b, 0, v)),
        compiler_params=pltpu.CompilerParams(
            dimension_semantics=("parallel", "parallel"),
            vmem_limit_bytes=vmem_limit),
    )(hidden, fc_w, fc_b)

    # strip batch padding + vocab lane padding, back to PyTorch (T, B, V) layout
    return jnp.transpose(logits[:B, :, :V], (1, 0, 2))


def reference_forward(params, graph_embedding, target_sequence,
                      *, hidden_dim, num_layers, output_dim, seq_len, nhead=8):
    """Pure-JAX f32 reference mirroring the PyTorch forward (for verification)."""
    H, L, V, nH = hidden_dim, num_layers, output_dim, nhead
    dH = H // nH
    T = seq_len - 1
    B = target_sequence.shape[1]
    x = params["emb"][target_sequence] + params["pos"][:, None, :] * math.sqrt(H)
    mem = jnp.broadcast_to(graph_embedding[None], (T, B, H))
    mask = jnp.where(jnp.arange(T)[None, :] <= jnp.arange(T)[:, None], 0.0, -1e30)

    def ln(v, w, b):
        mu = v.mean(-1, keepdims=True)
        var = ((v - mu) ** 2).mean(-1, keepdims=True)
        return (v - mu) * lax.rsqrt(var + 1e-5) * w + b

    def mha(xq, xkv, w_in, b_in, w_out, b_out, m):
        q = xq @ w_in[:H].T + b_in[:H]
        k = xkv @ w_in[H:2 * H].T + b_in[H:2 * H]
        v = xkv @ w_in[2 * H:].T + b_in[2 * H:]
        split = lambda z: z.reshape(T, B, nH, dH).transpose(1, 2, 0, 3)
        qh, kh, vh = split(q), split(k), split(v)
        s = jnp.einsum("bhtd,bhsd->bhts", qh, kh) * (1.0 / math.sqrt(dH))
        if m is not None:
            s = s + m
        p = jax.nn.softmax(s, axis=-1)
        o = jnp.einsum("bhts,bhsd->bhtd", p, vh).transpose(2, 0, 1, 3).reshape(T, B, H)
        return o @ w_out.T + b_out

    for l in range(L):
        x = ln(x + mha(x, x, params["sa_in_w"][l], params["sa_in_b"][l],
                       params["sa_out_w"][l], params["sa_out_b"][l], mask),
               params["ln_w"][l, 0], params["ln_b"][l, 0])
        x = ln(x + mha(x, mem, params["ca_in_w"][l], params["ca_in_b"][l],
                       params["ca_out_w"][l], params["ca_out_b"][l], None),
               params["ln_w"][l, 1], params["ln_b"][l, 1])
        h1 = jax.nn.relu(x @ params["ff1_w"][l].T + params["ff1_b"][l])
        ffo = h1 @ params["ff2_w"][l].T + params["ff2_b"][l]
        x = ln(x + ffo, params["ln_w"][l, 2], params["ln_b"][l, 2])
    return x @ params["fc_w"].T + params["fc_b"][0]


if __name__ == "__main__":
    hidden_dim, num_layers, output_dim, seq_len, nhead = 32, 2, 16, 9, 8
    B = 4
    T = seq_len - 1

    key = jax.random.PRNGKey(0)
    kp, kg, kt = jax.random.split(key, 3)
    params = init_params(kp, hidden_dim, num_layers, output_dim, seq_len, nhead)
    graph_embedding = jax.random.normal(kg, (B, hidden_dim), jnp.float32)
    target_sequence = jax.random.randint(kt, (T, B), 0, output_dim, jnp.int32)

    out = transformer_sequence_decoder_forward(
        params, graph_embedding, target_sequence,
        hidden_dim=hidden_dim, num_layers=num_layers,
        output_dim=output_dim, seq_len=seq_len, nhead=nhead)
    out = jax.block_until_ready(out)
    assert out.shape == (T, B, output_dim) and bool(jnp.all(jnp.isfinite(out)))

    ref = reference_forward(
        params, graph_embedding, target_sequence,
        hidden_dim=hidden_dim, num_layers=num_layers,
        output_dim=output_dim, seq_len=seq_len, nhead=nhead)
    # kernel uses bf16 MXU inputs / bf16 inter-kernel activations + approx
    # EUP reciprocal in the softmax; reference is pure f32, so allow a modest
    # (still tight vs. logit scale ~0.1) tolerance.
    max_err = float(jnp.max(jnp.abs(out - ref)))
    assert max_err < 2e-2, f"mismatch vs f32 reference: {max_err}"
    print("KERNEL_OK")
</pallas_src>

<mosaic_0001>
module attributes {stable_mosaic.version = 11 : i64} {
  func.func @kernel(%arg0: i32, %arg1: i32, %arg2: memref<4x8x32xbf16, #tpu.memory_space<vmem>>, %arg3: memref<4x1x32xbf16, #tpu.memory_space<vmem>>, %arg4: memref<8x32xf32, #tpu.memory_space<vmem>>, %arg5: memref<32x32xf32, #tpu.memory_space<vmem>>, %arg6: memref<8x32xf32, #tpu.memory_space<vmem>>, %arg7: memref<1x32x96xbf16, #tpu.memory_space<vmem>>, %arg8: memref<1x1x96xf32, #tpu.memory_space<vmem>>, %arg9: memref<1x32x32xbf16, #tpu.memory_space<vmem>>, %arg10: memref<1x1x32xf32, #tpu.memory_space<vmem>>, %arg11: memref<1x32x32xbf16, #tpu.memory_space<vmem>>, %arg12: memref<1x1x32xf32, #tpu.memory_space<vmem>>, %arg13: memref<1x32x32xbf16, #tpu.memory_space<vmem>>, %arg14: memref<1x1x32xf32, #tpu.memory_space<vmem>>, %arg15: memref<1x32x64xbf16, #tpu.memory_space<vmem>>, %arg16: memref<1x1x64xf32, #tpu.memory_space<vmem>>, %arg17: memref<1x64x32xbf16, #tpu.memory_space<vmem>>, %arg18: memref<1x1x32xf32, #tpu.memory_space<vmem>>, %arg19: memref<1x3x32xf32, #tpu.memory_space<vmem>>, %arg20: memref<1x3x32xf32, #tpu.memory_space<vmem>>, %arg21: memref<4x8x32xbf16, #tpu.memory_space<vmem>>, %arg22: memref<32x32xf32, #tpu.memory_space<vmem>>) attributes {dimension_semantics = [#tpu.dimension_semantics<parallel>, #tpu.dimension_semantics<arbitrary>], iteration_bounds = array<i64: 1, 2>, scalar_prefetch = 0 : i64, scratch_operands = 1 : i64, tpu.core_type = #tpu.core_type<tc>, window_params = [{transform_indices = @transform_0, window_bounds = array<i64: 4, 8, 32>}, {transform_indices = @transform_1, window_bounds = array<i64: 4, 1, 32>}, {pipeline_mode = #tpu.pipeline_mode<synchronous>, transform_indices = @transform_2, window_bounds = array<i64: 8, 32>}, {pipeline_mode = #tpu.pipeline_mode<synchronous>, transform_indices = @transform_3, window_bounds = array<i64: 32, 32>}, {pipeline_mode = #tpu.pipeline_mode<synchronous>, transform_indices = @transform_4, window_bounds = array<i64: 8, 32>}, {transform_indices = @transform_5, window_bounds = array<i64: 1, 32, 96>}, {transform_indices = @transform_6, window_bounds = array<i64: 1, 1, 96>}, {transform_indices = @transform_7, window_bounds = array<i64: 1, 32, 32>}, {transform_indices = @transform_8, window_bounds = array<i64: 1, 1, 32>}, {transform_indices = @transform_9, window_bounds = array<i64: 1, 32, 32>}, {transform_indices = @transform_10, window_bounds = array<i64: 1, 1, 32>}, {transform_indices = @transform_11, window_bounds = array<i64: 1, 32, 32>}, {transform_indices = @transform_12, window_bounds = array<i64: 1, 1, 32>}, {transform_indices = @transform_13, window_bounds = array<i64: 1, 32, 64>}, {transform_indices = @transform_14, window_bounds = array<i64: 1, 1, 64>}, {transform_indices = @transform_15, window_bounds = array<i64: 1, 64, 32>}, {transform_indices = @transform_16, window_bounds = array<i64: 1, 1, 32>}, {transform_indices = @transform_17, window_bounds = array<i64: 1, 3, 32>}, {transform_indices = @transform_18, window_bounds = array<i64: 1, 3, 32>}, {transform_indices = @transform_19, window_bounds = array<i64: 4, 8, 32>}]} {
    %c0_i32 = arith.constant 0 : i32
    %0 = arith.cmpi eq, %arg1, %c0_i32 : i32
    %1 = arith.extui %0 : i1 to i32
    %c0_i32_0 = arith.constant 0 : i32
    %2 = arith.cmpi ne, %1, %c0_i32_0 : i32
    scf.if %2 {
      %c0_116 = arith.constant 0 : index
      %c0_117 = arith.constant 0 : index
      %c0_118 = arith.constant 0 : index
      %334 = vector.load %arg2[%c0_116, %c0_117, %c0_118] : memref<4x8x32xbf16, #tpu.memory_space<vmem>>, vector<4x8x32xbf16>
      %335 = arith.extf %334 : vector<4x8x32xbf16> to vector<4x8x32xf32>
      %c0_119 = arith.constant 0 : index
      %c0_120 = arith.constant 0 : index
      %336 = vector.load %arg4[%c0_119, %c0_120] : memref<8x32xf32, #tpu.memory_space<vmem>>, vector<8x32xf32>
      %337 = vector.shape_cast %336 : vector<8x32xf32> to vector<1x8x32xf32>
      %338 = vector.broadcast %337 : vector<1x8x32xf32> to vector<4x8x32xf32>
      %339 = arith.addf %335, %338 : vector<4x8x32xf32>
      %340 = vector.shape_cast %339 : vector<4x8x32xf32> to vector<32x32xf32>
      %c0_121 = arith.constant 0 : index
      %c0_122 = arith.constant 0 : index
      %341 = vector.load %arg22[%c0_121, %c0_122] : memref<32x32xf32, #tpu.memory_space<vmem>>, vector<32x32xf32>
      tpu.vector_store %arg22[%c0_121, %c0_122], %340 {strides = array<i32>} : memref<32x32xf32, #tpu.memory_space<vmem>>, vector<32x32xf32>,
    } else {
    }
    %c0 = arith.constant 0 : index
    %c0_1 = arith.constant 0 : index
    %3 = vector.load %arg22[%c0, %c0_1] : memref<32x32xf32, #tpu.memory_space<vmem>>, vector<32x32xf32>
    %c0_2 = arith.constant 0 : index
    %c0_3 = arith.constant 0 : index
    %4 = vector.load %arg6[%c0_2, %c0_3] : memref<8x32xf32, #tpu.memory_space<vmem>>, vector<8x32xf32>
    %c0_4 = arith.constant 0 : index
    %c0_5 = arith.constant 0 : index
    %5 = vector.load %arg5[%c0_4, %c0_5] : memref<32x32xf32, #tpu.memory_space<vmem>>, vector<32x32xf32>
    %c0_6 = arith.constant 0 : index
    %c0_7 = arith.constant 0 : index
    %c0_8 = arith.constant 0 : index
    %6 = vector.load %arg19[%c0_6, %c0_7, %c0_8] : memref<1x3x32xf32, #tpu.memory_space<vmem>>, vector<1x3x32xf32>
    %7 = vector.shape_cast %6 : vector<1x3x32xf32> to vector<3x32xf32>
    %c0_9 = arith.constant 0 : index
    %c0_10 = arith.constant 0 : index
    %c0_11 = arith.constant 0 : index
    %8 = vector.load %arg20[%c0_9, %c0_10, %c0_11] : memref<1x3x32xf32, #tpu.memory_space<vmem>>, vector<1x3x32xf32>
    %9 = vector.shape_cast %8 : vector<1x3x32xf32> to vector<3x32xf32>
    %10 = arith.truncf %3 : vector<32x32xf32> to vector<32x32xbf16>
    %c0_12 = arith.constant 0 : index
    %c0_13 = arith.constant 0 : index
    %c0_14 = arith.constant 0 : index
    %11 = vector.load %arg7[%c0_12, %c0_13, %c0_14] : memref<1x32x96xbf16, #tpu.memory_space<vmem>>, vector<1x32x96xbf16>
    %12 = vector.shape_cast %11 : vector<1x32x96xbf16> to vector<32x96xbf16>
    %cst = arith.constant dense<0.000000e+00> : vector<32x96xf32>
    %13 = tpu.matmul %10, %12, %cst {dimension_numbers = #tpu.dot_dimension_numbers<[1], [0], [0], [1], [0, 0, 1, 1], [], []>} : vector<32x32xbf16>, vector<32x96xbf16>, vector<32x96xf32> -> vector<32x96xf32>
    %c0_15 = arith.constant 0 : index
    %c0_16 = arith.constant 0 : index
    %c0_17 = arith.constant 0 : index
    %14 = vector.load %arg8[%c0_15, %c0_16, %c0_17] : memref<1x1x96xf32, #tpu.memory_space<vmem>>, vector<1x1x96xf32>
    %15 = vector.shape_cast %14 : vector<1x1x96xf32> to vector<1x96xf32>
    %16 = vector.broadcast %15 : vector<1x96xf32> to vector<32x96xf32>
    %17 = arith.addf %13, %16 : vector<32x96xf32>
    %18 = vector.extract_strided_slice %17 {offsets = [0, 0], sizes = [32, 32], strides = [1, 1]} : vector<32x96xf32> to vector<32x32xf32>
    %19 = vector.extract_strided_slice %17 {offsets = [0, 32], sizes = [32, 32], strides = [1, 1]} : vector<32x96xf32> to vector<32x32xf32>
    %20 = arith.truncf %19 : vector<32x32xf32> to vector<32x32xbf16>
    %21 = vector.extract_strided_slice %17 {offsets = [0, 64], sizes = [32, 32], strides = [1, 1]} : vector<32x96xf32> to vector<32x32xf32>
    %22 = arith.truncf %21 : vector<32x32xf32> to vector<32x32xbf16>
    %cst_18 = arith.constant 0.000000e+00 : f32
    %23 = vector.broadcast %cst_18 : f32 to vector<32x32xf32>
    %24 = vector.extract_strided_slice %4 {offsets = [0, 0], sizes = [1, 32], strides = [1, 1]} : vector<8x32xf32> to vector<1x32xf32>
    %25 = vector.broadcast %24 : vector<1x32xf32> to vector<32x32xf32>
    %26 = arith.mulf %18, %25 : vector<32x32xf32>
    %27 = arith.truncf %26 : vector<32x32xf32> to vector<32x32xbf16>
    %cst_19 = arith.constant dense<0.000000e+00> : vector<32x32xf32>
    %28 = tpu.matmul %27, %20, %cst_19 {dimension_numbers = #tpu.dot_dimension_numbers<[1], [1], [0], [0], [0, 0, 1, 0], [], []>} : vector<32x32xbf16>, vector<32x32xbf16>, vector<32x32xf32> -> vector<32x32xf32>
    %cst_20 = arith.constant 5.000000e-01 : f32
    %29 = vector.broadcast %cst_20 : f32 to vector<32x32xf32>
    %30 = arith.mulf %28, %29 : vector<32x32xf32>
    %31 = arith.addf %30, %5 : vector<32x32xf32>
    %cst_21 = arith.constant dense<0xFF800000> : vector<32xf32>
    %32 = vector.multi_reduction <maximumf>, %31, %cst_21 [1] : vector<32x32xf32> to vector<32xf32>
    %33 = vector.shape_cast %32 : vector<32xf32> to vector<32x1xf32>
    %34 = vector.broadcast %33 : vector<32x1xf32> to vector<32x32xf32>
    %35 = arith.subf %31, %34 : vector<32x32xf32>
    %36 = math.exp %35 : vector<32x32xf32>
    %cst_22 = arith.constant dense<0.000000e+00> : vector<32xf32>
    %37 = vector.multi_reduction <add>, %36, %cst_22 [1] : vector<32x32xf32> to vector<32xf32>
    %38 = vector.shape_cast %37 : vector<32xf32> to vector<32x1xf32>
    %39 = tpu.reciprocal %38 {approx = true} : vector<32x1xf32> -> vector<32x1xf32>
    %40 = vector.broadcast %39 : vector<32x1xf32> to vector<32x32xf32>
    %41 = arith.mulf %36, %40 : vector<32x32xf32>
    %42 = arith.truncf %41 : vector<32x32xf32> to vector<32x32xbf16>
    %cst_23 = arith.constant dense<0.000000e+00> : vector<32x32xf32>
    %43 = tpu.matmul %42, %22, %cst_23 {dimension_numbers = #tpu.dot_dimension_numbers<[1], [0], [0], [1], [0, 0, 1, 1], [], []>} : vector<32x32xbf16>, vector<32x32xbf16>, vector<32x32xf32> -> vector<32x32xf32>
    %44 = vector.broadcast %24 : vector<1x32xf32> to vector<32x32xf32>
    %45 = arith.mulf %43, %44 : vector<32x32xf32>
    %46 = arith.addf %23, %45 : vector<32x32xf32>
    %47 = vector.extract_strided_slice %4 {offsets = [1, 0], sizes = [1, 32], strides = [1, 1]} : vector<8x32xf32> to vector<1x32xf32>
    %48 = vector.broadcast %47 : vector<1x32xf32> to vector<32x32xf32>
    %49 = arith.mulf %18, %48 : vector<32x32xf32>
    %50 = arith.truncf %49 : vector<32x32xf32> to vector<32x32xbf16>
    %cst_24 = arith.constant dense<0.000000e+00> : vector<32x32xf32>
    %51 = tpu.matmul %50, %20, %cst_24 {dimension_numbers = #tpu.dot_dimension_numbers<[1], [1], [0], [0], [0, 0, 1, 0], [], []>} : vector<32x32xbf16>, vector<32x32xbf16>, vector<32x32xf32> -> vector<32x32xf32>
    %cst_25 = arith.constant 5.000000e-01 : f32
    %52 = vector.broadcast %cst_25 : f32 to vector<32x32xf32>
    %53 = arith.mulf %51, %52 : vector<32x32xf32>
    %54 = arith.addf %53, %5 : vector<32x32xf32>
    %cst_26 = arith.constant dense<0xFF800000> : vector<32xf32>
    %55 = vector.multi_reduction <maximumf>, %54, %cst_26 [1] : vector<32x32xf32> to vector<32xf32>
    %56 = vector.shape_cast %55 : vector<32xf32> to vector<32x1xf32>
    %57 = vector.broadcast %56 : vector<32x1xf32> to vector<32x32xf32>
    %58 = arith.subf %54, %57 : vector<32x32xf32>
    %59 = math.exp %58 : vector<32x32xf32>
    %cst_27 = arith.constant dense<0.000000e+00> : vector<32xf32>
    %60 = vector.multi_reduction <add>, %59, %cst_27 [1] : vector<32x32xf32> to vector<32xf32>
    %61 = vector.shape_cast %60 : vector<32xf32> to vector<32x1xf32>
    %62 = tpu.reciprocal %61 {approx = true} : vector<32x1xf32> -> vector<32x1xf32>
    %63 = vector.broadcast %62 : vector<32x1xf32> to vector<32x32xf32>
    %64 = arith.mulf %59, %63 : vector<32x32xf32>
    %65 = arith.truncf %64 : vector<32x32xf32> to vector<32x32xbf16>
    %cst_28 = arith.constant dense<0.000000e+00> : vector<32x32xf32>
    %66 = tpu.matmul %65, %22, %cst_28 {dimension_numbers = #tpu.dot_dimension_numbers<[1], [0], [0], [1], [0, 0, 1, 1], [], []>} : vector<32x32xbf16>, vector<32x32xbf16>, vector<32x32xf32> -> vector<32x32xf32>
    %67 = vector.broadcast %47 : vector<1x32xf32> to vector<32x32xf32>
    %68 = arith.mulf %66, %67 : vector<32x32xf32>
    %69 = arith.addf %46, %68 : vector<32x32xf32>
    %70 = vector.extract_strided_slice %4 {offsets = [2, 0], sizes = [1, 32], strides = [1, 1]} : vector<8x32xf32> to vector<1x32xf32>
    %71 = vector.broadcast %70 : vector<1x32xf32> to vector<32x32xf32>
    %72 = arith.mulf %18, %71 : vector<32x32xf32>
    %73 = arith.truncf %72 : vector<32x32xf32> to vector<32x32xbf16>
    %cst_29 = arith.constant dense<0.000000e+00> : vector<32x32xf32>
    %74 = tpu.matmul %73, %20, %cst_29 {dimension_numbers = #tpu.dot_dimension_numbers<[1], [1], [0], [0], [0, 0, 1, 0], [], []>} : vector<32x32xbf16>, vector<32x32xbf16>, vector<32x32xf32> -> vector<32x32xf32>
    %cst_30 = arith.constant 5.000000e-01 : f32
    %75 = vector.broadcast %cst_30 : f32 to vector<32x32xf32>
    %76 = arith.mulf %74, %75 : vector<32x32xf32>
    %77 = arith.addf %76, %5 : vector<32x32xf32>
    %cst_31 = arith.constant dense<0xFF800000> : vector<32xf32>
    %78 = vector.multi_reduction <maximumf>, %77, %cst_31 [1] : vector<32x32xf32> to vector<32xf32>
    %79 = vector.shape_cast %78 : vector<32xf32> to vector<32x1xf32>
    %80 = vector.broadcast %79 : vector<32x1xf32> to vector<32x32xf32>
    %81 = arith.subf %77, %80 : vector<32x32xf32>
    %82 = math.exp %81 : vector<32x32xf32>
    %cst_32 = arith.constant dense<0.000000e+00> : vector<32xf32>
    %83 = vector.multi_reduction <add>, %82, %cst_32 [1] : vector<32x32xf32> to vector<32xf32>
    %84 = vector.shape_cast %83 : vector<32xf32> to vector<32x1xf32>
    %85 = tpu.reciprocal %84 {approx = true} : vector<32x1xf32> -> vector<32x1xf32>
    %86 = vector.broadcast %85 : vector<32x1xf32> to vector<32x32xf32>
    %87 = arith.mulf %82, %86 : vector<32x32xf32>
    %88 = arith.truncf %87 : vector<32x32xf32> to vector<32x32xbf16>
    %cst_33 = arith.constant dense<0.000000e+00> : vector<32x32xf32>
    %89 = tpu.matmul %88, %22, %cst_33 {dimension_numbers = #tpu.dot_dimension_numbers<[1], [0], [0], [1], [0, 0, 1, 1], [], []>} : vector<32x32xbf16>, vector<32x32xbf16>, vector<32x32xf32> -> vector<32x32xf32>
    %90 = vector.broadcast %70 : vector<1x32xf32> to vector<32x32xf32>
    %91 = arith.mulf %89, %90 : vector<32x32xf32>
    %92 = arith.addf %69, %91 : vector<32x32xf32>
    %93 = vector.extract_strided_slice %4 {offsets = [3, 0], sizes = [1, 32], strides = [1, 1]} : vector<8x32xf32> to vector<1x32xf32>
    %94 = vector.broadcast %93 : vector<1x32xf32> to vector<32x32xf32>
    %95 = arith.mulf %18, %94 : vector<32x32xf32>
    %96 = arith.truncf %95 : vector<32x32xf32> to vector<32x32xbf16>
    %cst_34 = arith.constant dense<0.000000e+00> : vector<32x32xf32>
    %97 = tpu.matmul %96, %20, %cst_34 {dimension_numbers = #tpu.dot_dimension_numbers<[1], [1], [0], [0], [0, 0, 1, 0], [], []>} : vector<32x32xbf16>, vector<32x32xbf16>, vector<32x32xf32> -> vector<32x32xf32>
    %cst_35 = arith.constant 5.000000e-01 : f32
    %98 = vector.broadcast %cst_35 : f32 to vector<32x32xf32>
    %99 = arith.mulf %97, %98 : vector<32x32xf32>
    %100 = arith.addf %99, %5 : vector<32x32xf32>
    %cst_36 = arith.constant dense<0xFF800000> : vector<32xf32>
    %101 = vector.multi_reduction <maximumf>, %100, %cst_36 [1] : vector<32x32xf32> to vector<32xf32>
    %102 = vector.shape_cast %101 : vector<32xf32> to vector<32x1xf32>
    %103 = vector.broadcast %102 : vector<32x1xf32> to vector<32x32xf32>
    %104 = arith.subf %100, %103 : vector<32x32xf32>
    %105 = math.exp %104 : vector<32x32xf32>
    %cst_37 = arith.constant dense<0.000000e+00> : vector<32xf32>
    %106 = vector.multi_reduction <add>, %105, %cst_37 [1] : vector<32x32xf32> to vector<32xf32>
    %107 = vector.shape_cast %106 : vector<32xf32> to vector<32x1xf32>
    %108 = tpu.reciprocal %107 {approx = true} : vector<32x1xf32> -> vector<32x1xf32>
    %109 = vector.broadcast %108 : vector<32x1xf32> to vector<32x32xf32>
    %110 = arith.mulf %105, %109 : vector<32x32xf32>
    %111 = arith.truncf %110 : vector<32x32xf32> to vector<32x32xbf16>
    %cst_38 = arith.constant dense<0.000000e+00> : vector<32x32xf32>
    %112 = tpu.matmul %111, %22, %cst_38 {dimension_numbers = #tpu.dot_dimension_numbers<[1], [0], [0], [1], [0, 0, 1, 1], [], []>} : vector<32x32xbf16>, vector<32x32xbf16>, vector<32x32xf32> -> vector<32x32xf32>
    %113 = vector.broadcast %93 : vector<1x32xf32> to vector<32x32xf32>
    %114 = arith.mulf %112, %113 : vector<32x32xf32>
    %115 = arith.addf %92, %114 : vector<32x32xf32>
    %116 = vector.extract_strided_slice %4 {offsets = [4, 0], sizes = [1, 32], strides = [1, 1]} : vector<8x32xf32> to vector<1x32xf32>
    %117 = vector.broadcast %116 : vector<1x32xf32> to vector<32x32xf32>
    %118 = arith.mulf %18, %117 : vector<32x32xf32>
    %119 = arith.truncf %118 : vector<32x32xf32> to vector<32x32xbf16>
    %cst_39 = arith.constant dense<0.000000e+00> : vector<32x32xf32>
    %120 = tpu.matmul %119, %20, %cst_39 {dimension_numbers = #tpu.dot_dimension_numbers<[1], [1], [0], [0], [0, 0, 1, 0], [], []>} : vector<32x32xbf16>, vector<32x32xbf16>, vector<32x32xf32> -> vector<32x32xf32>
    %cst_40 = arith.constant 5.000000e-01 : f32
    %121 = vector.broadcast %cst_40 : f32 to vector<32x32xf32>
    %122 = arith.mulf %120, %121 : vector<32x32xf32>
    %123 = arith.addf %122, %5 : vector<32x32xf32>
    %cst_41 = arith.constant dense<0xFF800000> : vector<32xf32>
    %124 = vector.multi_reduction <maximumf>, %123, %cst_41 [1] : vector<32x32xf32> to vector<32xf32>
    %125 = vector.shape_cast %124 : vector<32xf32> to vector<32x1xf32>
    %126 = vector.broadcast %125 : vector<32x1xf32> to vector<32x32xf32>
    %127 = arith.subf %123, %126 : vector<32x32xf32>
    %128 = math.exp %127 : vector<32x32xf32>
    %cst_42 = arith.constant dense<0.000000e+00> : vector<32xf32>
    %129 = vector.multi_reduction <add>, %128, %cst_42 [1] : vector<32x32xf32> to vector<32xf32>
    %130 = vector.shape_cast %129 : vector<32xf32> to vector<32x1xf32>
    %131 = tpu.reciprocal %130 {approx = true} : vector<32x1xf32> -> vector<32x1xf32>
    %132 = vector.broadcast %131 : vector<32x1xf32> to vector<32x32xf32>
    %133 = arith.mulf %128, %132 : vector<32x32xf32>
    %134 = arith.truncf %133 : vector<32x32xf32> to vector<32x32xbf16>
    %cst_43 = arith.constant dense<0.000000e+00> : vector<32x32xf32>
    %135 = tpu.matmul %134, %22, %cst_43 {dimension_numbers = #tpu.dot_dimension_numbers<[1], [0], [0], [1], [0, 0, 1, 1], [], []>} : vector<32x32xbf16>, vector<32x32xbf16>, vector<32x32xf32> -> vector<32x32xf32>
    %136 = vector.broadcast %116 : vector<1x32xf32> to vector<32x32xf32>
    %137 = arith.mulf %135, %136 : vector<32x32xf32>
    %138 = arith.addf %115, %137 : vector<32x32xf32>
    %139 = vector.extract_strided_slice %4 {offsets = [5, 0], sizes = [1, 32], strides = [1, 1]} : vector<8x32xf32> to vector<1x32xf32>
    %140 = vector.broadcast %139 : vector<1x32xf32> to vector<32x32xf32>
    %141 = arith.mulf %18, %140 : vector<32x32xf32>
    %142 = arith.truncf %141 : vector<32x32xf32> to vector<32x32xbf16>
    %cst_44 = arith.constant dense<0.000000e+00> : vector<32x32xf32>
    %143 = tpu.matmul %142, %20, %cst_44 {dimension_numbers = #tpu.dot_dimension_numbers<[1], [1], [0], [0], [0, 0, 1, 0], [], []>} : vector<32x32xbf16>, vector<32x32xbf16>, vector<32x32xf32> -> vector<32x32xf32>
    %cst_45 = arith.constant 5.000000e-01 : f32
    %144 = vector.broadcast %cst_45 : f32 to vector<32x32xf32>
    %145 = arith.mulf %143, %144 : vector<32x32xf32>
    %146 = arith.addf %145, %5 : vector<32x32xf32>
    %cst_46 = arith.constant dense<0xFF800000> : vector<32xf32>
    %147 = vector.multi_reduction <maximumf>, %146, %cst_46 [1] : vector<32x32xf32> to vector<32xf32>
    %148 = vector.shape_cast %147 : vector<32xf32> to vector<32x1xf32>
    %149 = vector.broadcast %148 : vector<32x1xf32> to vector<32x32xf32>
    %150 = arith.subf %146, %149 : vector<32x32xf32>
    %151 = math.exp %150 : vector<32x32xf32>
    %cst_47 = arith.constant dense<0.000000e+00> : vector<32xf32>
    %152 = vector.multi_reduction <add>, %151, %cst_47 [1] : vector<32x32xf32> to vector<32xf32>
    %153 = vector.shape_cast %152 : vector<32xf32> to vector<32x1xf32>
    %154 = tpu.reciprocal %153 {approx = true} : vector<32x1xf32> -> vector<32x1xf32>
    %155 = vector.broadcast %154 : vector<32x1xf32> to vector<32x32xf32>
    %156 = arith.mulf %151, %155 : vector<32x32xf32>
    %157 = arith.truncf %156 : vector<32x32xf32> to vector<32x32xbf16>
    %cst_48 = arith.constant dense<0.000000e+00> : vector<32x32xf32>
    %158 = tpu.matmul %157, %22, %cst_48 {dimension_numbers = #tpu.dot_dimension_numbers<[1], [0], [0], [1], [0, 0, 1, 1], [], []>} : vector<32x32xbf16>, vector<32x32xbf16>, vector<32x32xf32> -> vector<32x32xf32>
    %159 = vector.broadcast %139 : vector<1x32xf32> to vector<32x32xf32>
    %160 = arith.mulf %158, %159 : vector<32x32xf32>
    %161 = arith.addf %138, %160 : vector<32x32xf32>
    %162 = vector.extract_strided_slice %4 {offsets = [6, 0], sizes = [1, 32], strides = [1, 1]} : vector<8x32xf32> to vector<1x32xf32>
    %163 = vector.broadcast %162 : vector<1x32xf32> to vector<32x32xf32>
    %164 = arith.mulf %18, %163 : vector<32x32xf32>
    %165 = arith.truncf %164 : vector<32x32xf32> to vector<32x32xbf16>
    %cst_49 = arith.constant dense<0.000000e+00> : vector<32x32xf32>
    %166 = tpu.matmul %165, %20, %cst_49 {dimension_numbers = #tpu.dot_dimension_numbers<[1], [1], [0], [0], [0, 0, 1, 0], [], []>} : vector<32x32xbf16>, vector<32x32xbf16>, vector<32x32xf32> -> vector<32x32xf32>
    %cst_50 = arith.constant 5.000000e-01 : f32
    %167 = vector.broadcast %cst_50 : f32 to vector<32x32xf32>
    %168 = arith.mulf %166, %167 : vector<32x32xf32>
    %169 = arith.addf %168, %5 : vector<32x32xf32>
    %cst_51 = arith.constant dense<0xFF800000> : vector<32xf32>
    %170 = vector.multi_reduction <maximumf>, %169, %cst_51 [1] : vector<32x32xf32> to vector<32xf32>
    %171 = vector.shape_cast %170 : vector<32xf32> to vector<32x1xf32>
    %172 = vector.broadcast %171 : vector<32x1xf32> to vector<32x32xf32>
    %173 = arith.subf %169, %172 : vector<32x32xf32>
    %174 = math.exp %173 : vector<32x32xf32>
    %cst_52 = arith.constant dense<0.000000e+00> : vector<32xf32>
    %175 = vector.multi_reduction <add>, %174, %cst_52 [1] : vector<32x32xf32> to vector<32xf32>
    %176 = vector.shape_cast %175 : vector<32xf32> to vector<32x1xf32>
    %177 = tpu.reciprocal %176 {approx = true} : vector<32x1xf32> -> vector<32x1xf32>
    %178 = vector.broadcast %177 : vector<32x1xf32> to vector<32x32xf32>
    %179 = arith.mulf %174, %178 : vector<32x32xf32>
    %180 = arith.truncf %179 : vector<32x32xf32> to vector<32x32xbf16>
    %cst_53 = arith.constant dense<0.000000e+00> : vector<32x32xf32>
    %181 = tpu.matmul %180, %22, %cst_53 {dimension_numbers = #tpu.dot_dimension_numbers<[1], [0], [0], [1], [0, 0, 1, 1], [], []>} : vector<32x32xbf16>, vector<32x32xbf16>, vector<32x32xf32> -> vector<32x32xf32>
    %182 = vector.broadcast %162 : vector<1x32xf32> to vector<32x32xf32>
    %183 = arith.mulf %181, %182 : vector<32x32xf32>
    %184 = arith.addf %161, %183 : vector<32x32xf32>
    %185 = vector.extract_strided_slice %4 {offsets = [7, 0], sizes = [1, 32], strides = [1, 1]} : vector<8x32xf32> to vector<1x32xf32>
    %186 = vector.broadcast %185 : vector<1x32xf32> to vector<32x32xf32>
    %187 = arith.mulf %18, %186 : vector<32x32xf32>
    %188 = arith.truncf %187 : vector<32x32xf32> to vector<32x32xbf16>
    %cst_54 = arith.constant dense<0.000000e+00> : vector<32x32xf32>
    %189 = tpu.matmul %188, %20, %cst_54 {dimension_numbers = #tpu.dot_dimension_numbers<[1], [1], [0], [0], [0, 0, 1, 0], [], []>} : vector<32x32xbf16>, vector<32x32xbf16>, vector<32x32xf32> -> vector<32x32xf32>
    %cst_55 = arith.constant 5.000000e-01 : f32
    %190 = vector.broadcast %cst_55 : f32 to vector<32x32xf32>
    %191 = arith.mulf %189, %190 : vector<32x32xf32>
    %192 = arith.addf %191, %5 : vector<32x32xf32>
    %cst_56 = arith.constant dense<0xFF800000> : vector<32xf32>
    %193 = vector.multi_reduction <maximumf>, %192, %cst_56 [1] : vector<32x32xf32> to vector<32xf32>
    %194 = vector.shape_cast %193 : vector<32xf32> to vector<32x1xf32>
    %195 = vector.broadcast %194 : vector<32x1xf32> to vector<32x32xf32>
    %196 = arith.subf %192, %195 : vector<32x32xf32>
    %197 = math.exp %196 : vector<32x32xf32>
    %cst_57 = arith.constant dense<0.000000e+00> : vector<32xf32>
    %198 = vector.multi_reduction <add>, %197, %cst_57 [1] : vector<32x32xf32> to vector<32xf32>
    %199 = vector.shape_cast %198 : vector<32xf32> to vector<32x1xf32>
    %200 = tpu.reciprocal %199 {approx = true} : vector<32x1xf32> -> vector<32x1xf32>
    %201 = vector.broadcast %200 : vector<32x1xf32> to vector<32x32xf32>
    %202 = arith.mulf %197, %201 : vector<32x32xf32>
    %203 = arith.truncf %202 : vector<32x32xf32> to vector<32x32xbf16>
    %cst_58 = arith.constant dense<0.000000e+00> : vector<32x32xf32>
    %204 = tpu.matmul %203, %22, %cst_58 {dimension_numbers = #tpu.dot_dimension_numbers<[1], [0], [0], [1], [0, 0, 1, 1], [], []>} : vector<32x32xbf16>, vector<32x32xbf16>, vector<32x32xf32> -> vector<32x32xf32>
    %205 = vector.broadcast %185 : vector<1x32xf32> to vector<32x32xf32>
    %206 = arith.mulf %204, %205 : vector<32x32xf32>
    %207 = arith.addf %184, %206 : vector<32x32xf32>
    %208 = arith.truncf %207 : vector<32x32xf32> to vector<32x32xbf16>
    %c0_59 = arith.constant 0 : index
    %c0_60 = arith.constant 0 : index
    %c0_61 = arith.constant 0 : index
    %209 = vector.load %arg9[%c0_59, %c0_60, %c0_61] : memref<1x32x32xbf16, #tpu.memory_space<vmem>>, vector<1x32x32xbf16>
    %210 = vector.shape_cast %209 : vector<1x32x32xbf16> to vector<32x32xbf16>
    %cst_62 = arith.constant dense<0.000000e+00> : vector<32x32xf32>
    %211 = tpu.matmul %208, %210, %cst_62 {dimension_numbers = #tpu.dot_dimension_numbers<[1], [0], [0], [1], [0, 0, 1, 1], [], []>} : vector<32x32xbf16>, vector<32x32xbf16>, vector<32x32xf32> -> vector<32x32xf32>
    %c0_63 = arith.constant 0 : index
    %c0_64 = arith.constant 0 : index
    %c0_65 = arith.constant 0 : index
    %212 = vector.load %arg10[%c0_63, %c0_64, %c0_65] : memref<1x1x32xf32, #tpu.memory_space<vmem>>, vector<1x1x32xf32>
    %213 = vector.shape_cast %212 : vector<1x1x32xf32> to vector<1x32xf32>
    %214 = vector.broadcast %213 : vector<1x32xf32> to vector<32x32xf32>
    %215 = arith.addf %211, %214 : vector<32x32xf32>
    %216 = arith.addf %3, %215 : vector<32x32xf32>
    %217 = vector.extract_strided_slice %7 {offsets = [0, 0], sizes = [1, 32], strides = [1, 1]} : vector<3x32xf32> to vector<1x32xf32>
    %218 = vector.extract_strided_slice %9 {offsets = [0, 0], sizes = [1, 32], strides = [1, 1]} : vector<3x32xf32> to vector<1x32xf32>
    %cst_66 = arith.constant dense<0.000000e+00> : vector<32xf32>
    %219 = vector.multi_reduction <add>, %216, %cst_66 [1] : vector<32x32xf32> to vector<32xf32>
    %220 = vector.shape_cast %219 : vector<32xf32> to vector<32x1xf32>
    %cst_67 = arith.constant 3.200000e+01 : f32
    %221 = vector.broadcast %cst_67 : f32 to vector<32x1xf32>
    %222 = arith.divf %220, %221 : vector<32x1xf32>
    %223 = vector.broadcast %222 : vector<32x1xf32> to vector<32x32xf32>
    %224 = arith.subf %216, %223 : vector<32x32xf32>
    %225 = arith.mulf %224, %224 : vector<32x32xf32>
    %cst_68 = arith.constant dense<0.000000e+00> : vector<32xf32>
    %226 = vector.multi_reduction <add>, %225, %cst_68 [1] : vector<32x32xf32> to vector<32xf32>
    %227 = vector.shape_cast %226 : vector<32xf32> to vector<32x1xf32>
    %cst_69 = arith.constant 3.200000e+01 : f32
    %228 = vector.broadcast %cst_69 : f32 to vector<32x1xf32>
    %229 = arith.divf %227, %228 : vector<32x1xf32>
    %230 = vector.broadcast %222 : vector<32x1xf32> to vector<32x32xf32>
    %231 = arith.subf %216, %230 : vector<32x32xf32>
    %cst_70 = arith.constant 9.99999974E-6 : f32
    %232 = vector.broadcast %cst_70 : f32 to vector<32x1xf32>
    %233 = arith.addf %229, %232 : vector<32x1xf32>
    %234 = math.rsqrt %233 : vector<32x1xf32>
    %235 = vector.broadcast %234 : vector<32x1xf32> to vector<32x32xf32>
    %236 = arith.mulf %231, %235 : vector<32x32xf32>
    %237 = vector.broadcast %217 : vector<1x32xf32> to vector<32x32xf32>
    %238 = arith.mulf %236, %237 : vector<32x32xf32>
    %239 = vector.broadcast %218 : vector<1x32xf32> to vector<32x32xf32>
    %240 = arith.addf %238, %239 : vector<32x32xf32>
    %c0_71 = arith.constant 0 : index
    %c0_72 = arith.constant 0 : index
    %c0_73 = arith.constant 0 : index
    %241 = vector.load %arg3[%c0_71, %c0_72, %c0_73] : memref<4x1x32xbf16, #tpu.memory_space<vmem>>, vector<4x1x32xbf16>
    %242 = vector.shape_cast %241 : vector<4x1x32xbf16> to vector<4x32xbf16>
    %c0_74 = arith.constant 0 : index
    %c0_75 = arith.constant 0 : index
    %c0_76 = arith.constant 0 : index
    %243 = vector.load %arg11[%c0_74, %c0_75, %c0_76] : memref<1x32x32xbf16, #tpu.memory_space<vmem>>, vector<1x32x32xbf16>
    %244 = vector.shape_cast %243 : vector<1x32x32xbf16> to vector<32x32xbf16>
    %cst_77 = arith.constant dense<0.000000e+00> : vector<4x32xf32>
    %245 = tpu.matmul %242, %244, %cst_77 {dimension_numbers = #tpu.dot_dimension_numbers<[1], [0], [0], [1], [0, 0, 1, 1], [], []>} : vector<4x32xbf16>, vector<32x32xbf16>, vector<4x32xf32> -> vector<4x32xf32>
    %c0_78 = arith.constant 0 : index
    %c0_79 = arith.constant 0 : index
    %c0_80 = arith.constant 0 : index
    %246 = vector.load %arg12[%c0_78, %c0_79, %c0_80] : memref<1x1x32xf32, #tpu.memory_space<vmem>>, vector<1x1x32xf32>
    %247 = vector.shape_cast %246 : vector<1x1x32xf32> to vector<1x32xf32>
    %248 = vector.broadcast %247 : vector<1x32xf32> to vector<4x32xf32>
    %249 = arith.addf %245, %248 : vector<4x32xf32>
    %250 = arith.truncf %249 : vector<4x32xf32> to vector<4x32xbf16>
    %c0_81 = arith.constant 0 : index
    %c0_82 = arith.constant 0 : index
    %c0_83 = arith.constant 0 : index
    %251 = vector.load %arg13[%c0_81, %c0_82, %c0_83] : memref<1x32x32xbf16, #tpu.memory_space<vmem>>, vector<1x32x32xbf16>
    %252 = vector.shape_cast %251 : vector<1x32x32xbf16> to vector<32x32xbf16>
    %cst_84 = arith.constant dense<0.000000e+00> : vector<4x32xf32>
    %253 = tpu.matmul %250, %252, %cst_84 {dimension_numbers = #tpu.dot_dimension_numbers<[1], [0], [0], [1], [0, 0, 1, 1], [], []>} : vector<4x32xbf16>, vector<32x32xbf16>, vector<4x32xf32> -> vector<4x32xf32>
    %c0_85 = arith.constant 0 : index
    %c0_86 = arith.constant 0 : index
    %c0_87 = arith.constant 0 : index
    %254 = vector.load %arg14[%c0_85, %c0_86, %c0_87] : memref<1x1x32xf32, #tpu.memory_space<vmem>>, vector<1x1x32xf32>
    %255 = vector.shape_cast %254 : vector<1x1x32xf32> to vector<1x32xf32>
    %256 = vector.broadcast %255 : vector<1x32xf32> to vector<4x32xf32>
    %257 = arith.addf %253, %256 : vector<4x32xf32>
    %258 = vector.shape_cast %257 : vector<4x32xf32> to vector<4x1x32xf32>
    %259 = vector.shape_cast %258 : vector<4x1x32xf32> to vector<4x1x32xf32>
    %260 = vector.broadcast %259 : vector<4x1x32xf32> to vector<4x8x32xf32>
    %261 = vector.shape_cast %260 : vector<4x8x32xf32> to vector<32x32xf32>
    %262 = arith.addf %240, %261 : vector<32x32xf32>
    %263 = vector.extract_strided_slice %7 {offsets = [1, 0], sizes = [1, 32], strides = [1, 1]} : vector<3x32xf32> to vector<1x32xf32>
    %264 = vector.extract_strided_slice %9 {offsets = [1, 0], sizes = [1, 32], strides = [1, 1]} : vector<3x32xf32> to vector<1x32xf32>
    %cst_88 = arith.constant dense<0.000000e+00> : vector<32xf32>
    %265 = vector.multi_reduction <add>, %262, %cst_88 [1] : vector<32x32xf32> to vector<32xf32>
    %266 = vector.shape_cast %265 : vector<32xf32> to vector<32x1xf32>
    %cst_89 = arith.constant 3.200000e+01 : f32
    %267 = vector.broadcast %cst_89 : f32 to vector<32x1xf32>
    %268 = arith.divf %266, %267 : vector<32x1xf32>
    %269 = vector.broadcast %268 : vector<32x1xf32> to vector<32x32xf32>
    %270 = arith.subf %262, %269 : vector<32x32xf32>
    %271 = arith.mulf %270, %270 : vector<32x32xf32>
    %cst_90 = arith.constant dense<0.000000e+00> : vector<32xf32>
    %272 = vector.multi_reduction <add>, %271, %cst_90 [1] : vector<32x32xf32> to vector<32xf32>
    %273 = vector.shape_cast %272 : vector<32xf32> to vector<32x1xf32>
    %cst_91 = arith.constant 3.200000e+01 : f32
    %274 = vector.broadcast %cst_91 : f32 to vector<32x1xf32>
    %275 = arith.divf %273, %274 : vector<32x1xf32>
    %276 = vector.broadcast %268 : vector<32x1xf32> to vector<32x32xf32>
    %277 = arith.subf %262, %276 : vector<32x32xf32>
    %cst_92 = arith.constant 9.99999974E-6 : f32
    %278 = vector.broadcast %cst_92 : f32 to vector<32x1xf32>
    %279 = arith.addf %275, %278 : vector<32x1xf32>
    %280 = math.rsqrt %279 : vector<32x1xf32>
    %281 = vector.broadcast %280 : vector<32x1xf32> to vector<32x32xf32>
    %282 = arith.mulf %277, %281 : vector<32x32xf32>
    %283 = vector.broadcast %263 : vector<1x32xf32> to vector<32x32xf32>
    %284 = arith.mulf %282, %283 : vector<32x32xf32>
    %285 = vector.broadcast %264 : vector<1x32xf32> to vector<32x32xf32>
    %286 = arith.addf %284, %285 : vector<32x32xf32>
    %287 = arith.truncf %286 : vector<32x32xf32> to vector<32x32xbf16>
    %c0_93 = arith.constant 0 : index
    %c0_94 = arith.constant 0 : index
    %c0_95 = arith.constant 0 : index
    %288 = vector.load %arg15[%c0_93, %c0_94, %c0_95] : memref<1x32x64xbf16, #tpu.memory_space<vmem>>, vector<1x32x64xbf16>
    %289 = vector.shape_cast %288 : vector<1x32x64xbf16> to vector<32x64xbf16>
    %cst_96 = arith.constant dense<0.000000e+00> : vector<32x64xf32>
    %290 = tpu.matmul %287, %289, %cst_96 {dimension_numbers = #tpu.dot_dimension_numbers<[1], [0], [0], [1], [0, 0, 1, 1], [], []>} : vector<32x32xbf16>, vector<32x64xbf16>, vector<32x64xf32> -> vector<32x64xf32>
    %c0_97 = arith.constant 0 : index
    %c0_98 = arith.constant 0 : index
    %c0_99 = arith.constant 0 : index
    %291 = vector.load %arg16[%c0_97, %c0_98, %c0_99] : memref<1x1x64xf32, #tpu.memory_space<vmem>>, vector<1x1x64xf32>
    %292 = vector.shape_cast %291 : vector<1x1x64xf32> to vector<1x64xf32>
    %293 = vector.broadcast %292 : vector<1x64xf32> to vector<32x64xf32>
    %294 = arith.addf %290, %293 : vector<32x64xf32>
    %cst_100 = arith.constant 0.000000e+00 : f32
    %295 = vector.broadcast %cst_100 : f32 to vector<32x64xf32>
    %296 = arith.maximumf %294, %295 : vector<32x64xf32>
    %297 = arith.truncf %296 : vector<32x64xf32> to vector<32x64xbf16>
    %c0_101 = arith.constant 0 : index
    %c0_102 = arith.constant 0 : index
    %c0_103 = arith.constant 0 : index
    %298 = vector.load %arg17[%c0_101, %c0_102, %c0_103] : memref<1x64x32xbf16, #tpu.memory_space<vmem>>, vector<1x64x32xbf16>
    %299 = vector.shape_cast %298 : vector<1x64x32xbf16> to vector<64x32xbf16>
    %cst_104 = arith.constant dense<0.000000e+00> : vector<32x32xf32>
    %300 = tpu.matmul %297, %299, %cst_104 {dimension_numbers = #tpu.dot_dimension_numbers<[1], [0], [0], [1], [0, 0, 1, 1], [], []>} : vector<32x64xbf16>, vector<64x32xbf16>, vector<32x32xf32> -> vector<32x32xf32>
    %c0_105 = arith.constant 0 : index
    %c0_106 = arith.constant 0 : index
    %c0_107 = arith.constant 0 : index
    %301 = vector.load %arg18[%c0_105, %c0_106, %c0_107] : memref<1x1x32xf32, #tpu.memory_space<vmem>>, vector<1x1x32xf32>
    %302 = vector.shape_cast %301 : vector<1x1x32xf32> to vector<1x32xf32>
    %303 = vector.broadcast %302 : vector<1x32xf32> to vector<32x32xf32>
    %304 = arith.addf %300, %303 : vector<32x32xf32>
    %305 = arith.addf %286, %304 : vector<32x32xf32>
    %306 = vector.extract_strided_slice %7 {offsets = [2, 0], sizes = [1, 32], strides = [1, 1]} : vector<3x32xf32> to vector<1x32xf32>
    %307 = vector.extract_strided_slice %9 {offsets = [2, 0], sizes = [1, 32], strides = [1, 1]} : vector<3x32xf32> to vector<1x32xf32>
    %cst_108 = arith.constant dense<0.000000e+00> : vector<32xf32>
    %308 = vector.multi_reduction <add>, %305, %cst_108 [1] : vector<32x32xf32> to vector<32xf32>
    %309 = vector.shape_cast %308 : vector<32xf32> to vector<32x1xf32>
    %cst_109 = arith.constant 3.200000e+01 : f32
    %310 = vector.broadcast %cst_109 : f32 to vector<32x1xf32>
    %311 = arith.divf %309, %310 : vector<32x1xf32>
    %312 = vector.broadcast %311 : vector<32x1xf32> to vector<32x32xf32>
    %313 = arith.subf %305, %312 : vector<32x32xf32>
    %314 = arith.mulf %313, %313 : vector<32x32xf32>
    %cst_110 = arith.constant dense<0.000000e+00> : vector<32xf32>
    %315 = vector.multi_reduction <add>, %314, %cst_110 [1] : vector<32x32xf32> to vector<32xf32>
    %316 = vector.shape_cast %315 : vector<32xf32> to vector<32x1xf32>
    %cst_111 = arith.constant 3.200000e+01 : f32
    %317 = vector.broadcast %cst_111 : f32 to vector<32x1xf32>
    %318 = arith.divf %316, %317 : vector<32x1xf32>
    %319 = vector.broadcast %311 : vector<32x1xf32> to vector<32x32xf32>
    %320 = arith.subf %305, %319 : vector<32x32xf32>
    %cst_112 = arith.constant 9.99999974E-6 : f32
    %321 = vector.broadcast %cst_112 : f32 to vector<32x1xf32>
    %322 = arith.addf %318, %321 : vector<32x1xf32>
    %323 = math.rsqrt %322 : vector<32x1xf32>
    %324 = vector.broadcast %323 : vector<32x1xf32> to vector<32x32xf32>
    %325 = arith.mulf %320, %324 : vector<32x32xf32>
    %326 = vector.broadcast %306 : vector<1x32xf32> to vector<32x32xf32>
    %327 = arith.mulf %325, %326 : vector<32x32xf32>
    %328 = vector.broadcast %307 : vector<1x32xf32> to vector<32x32xf32>
    %329 = arith.addf %327, %328 : vector<32x32xf32>
    %c0_113 = arith.constant 0 : index
    %c0_114 = arith.constant 0 : index
    %330 = vector.load %arg22[%c0_113, %c0_114] : memref<32x32xf32, #tpu.memory_space<vmem>>, vector<32x32xf32>
    tpu.vector_store %arg22[%c0_113, %c0_114], %329 {strides = array<i32>} : memref<32x32xf32, #tpu.memory_space<vmem>>, vector<32x32xf32>,
    %c1_i32 = arith.constant 1 : i32
    %331 = arith.cmpi eq, %arg1, %c1_i32 : i32
    %332 = arith.extui %331 : i1 to i32
    %c0_i32_115 = arith.constant 0 : i32
    %333 = arith.cmpi ne, %332, %c0_i32_115 : i32
    scf.if %333 {
      %334 = vector.shape_cast %329 : vector<32x32xf32> to vector<4x8x32xf32>
      %335 = arith.truncf %334 : vector<4x8x32xf32> to vector<4x8x32xbf16>
      %c0_116 = arith.constant 0 : index
      %c0_117 = arith.constant 0 : index
      %c0_118 = arith.constant 0 : index
      %336 = vector.load %arg21[%c0_116, %c0_117, %c0_118] : memref<4x8x32xbf16, #tpu.memory_space<vmem>>, vector<4x8x32xbf16>
      tpu.vector_store %arg21[%c0_116, %c0_117, %c0_118], %335 {strides = array<i32>} : memref<4x8x32xbf16, #tpu.memory_space<vmem>>, vector<4x8x32xbf16>,
    } else {
    }
    return
  }
  func.func @transform_0(%arg0: i32, %arg1: i32) -> (i32, i32, i32) {
    %c0_i32 = arith.constant 0 : i32
    %c0_i32_0 = arith.constant 0 : i32
    %c0_i32_1 = arith.constant 0 : i32
    return %arg0, %c0_i32, %c0_i32_0 : i32, i32, i32
  }
  func.func @transform_1(%arg0: i32, %arg1: i32) -> (i32, i32, i32) {
    %c0_i32 = arith.constant 0 : i32
    %c0_i32_0 = arith.constant 0 : i32
    %c0_i32_1 = arith.constant 0 : i32
    return %arg0, %c0_i32, %c0_i32_0 : i32, i32, i32
  }
  func.func @transform_2(%arg0: i32, %arg1: i32) -> (i32, i32) {
    %c0_i32 = arith.constant 0 : i32
    %c0_i32_0 = arith.constant 0 : i32
    %c0_i32_1 = arith.constant 0 : i32
    return %c0_i32, %c0_i32_0 : i32, i32
  }
  func.func @transform_3(%arg0: i32, %arg1: i32) -> (i32, i32) {
    %c0_i32 = arith.constant 0 : i32
    %c0_i32_0 = arith.constant 0 : i32
    %c0_i32_1 = arith.constant 0 : i32
    return %c0_i32, %c0_i32_0 : i32, i32
  }
  func.func @transform_4(%arg0: i32, %arg1: i32) -> (i32, i32) {
    %c0_i32 = arith.constant 0 : i32
    %c0_i32_0 = arith.constant 0 : i32
    %c0_i32_1 = arith.constant 0 : i32
    return %c0_i32, %c0_i32_0 : i32, i32
  }
  func.func @transform_5(%arg0: i32, %arg1: i32) -> (i32, i32, i32) {
    %c0_i32 = arith.constant 0 : i32
    %c0_i32_0 = arith.constant 0 : i32
    %c0_i32_1 = arith.constant 0 : i32
    return %arg1, %c0_i32, %c0_i32_0 : i32, i32, i32
  }
  func.func @transform_6(%arg0: i32, %arg1: i32) -> (i32, i32, i32) {
    %c0_i32 = arith.constant 0 : i32
    %c0_i32_0 = arith.constant 0 : i32
    %c0_i32_1 = arith.constant 0 : i32
    return %arg1, %c0_i32, %c0_i32_0 : i32, i32, i32
  }
  func.func @transform_7(%arg0: i32, %arg1: i32) -> (i32, i32, i32) {
    %c0_i32 = arith.constant 0 : i32
    %c0_i32_0 = arith.constant 0 : i32
    %c0_i32_1 = arith.constant 0 : i32
    return %arg1, %c0_i32, %c0_i32_0 : i32, i32, i32
  }
  func.func @transform_8(%arg0: i32, %arg1: i32) -> (i32, i32, i32) {
    %c0_i32 = arith.constant 0 : i32
    %c0_i32_0 = arith.constant 0 : i32
    %c0_i32_1 = arith.constant 0 : i32
    return %arg1, %c0_i32, %c0_i32_0 : i32, i32, i32
  }
  func.func @transform_9(%arg0: i32, %arg1: i32) -> (i32, i32, i32) {
    %c0_i32 = arith.constant 0 : i32
    %c0_i32_0 = arith.constant 0 : i32
    %c0_i32_1 = arith.constant 0 : i32
    return %arg1, %c0_i32, %c0_i32_0 : i32, i32, i32
  }
  func.func @transform_10(%arg0: i32, %arg1: i32) -> (i32, i32, i32) {
    %c0_i32 = arith.constant 0 : i32
    %c0_i32_0 = arith.constant 0 : i32
    %c0_i32_1 = arith.constant 0 : i32
    return %arg1, %c0_i32, %c0_i32_0 : i32, i32, i32
  }
  func.func @transform_11(%arg0: i32, %arg1: i32) -> (i32, i32, i32) {
    %c0_i32 = arith.constant 0 : i32
    %c0_i32_0 = arith.constant 0 : i32
    %c0_i32_1 = arith.constant 0 : i32
    return %arg1, %c0_i32, %c0_i32_0 : i32, i32, i32
  }
  func.func @transform_12(%arg0: i32, %arg1: i32) -> (i32, i32, i32) {
    %c0_i32 = arith.constant 0 : i32
    %c0_i32_0 = arith.constant 0 : i32
    %c0_i32_1 = arith.constant 0 : i32
    return %arg1, %c0_i32, %c0_i32_0 : i32, i32, i32
  }
  func.func @transform_13(%arg0: i32, %arg1: i32) -> (i32, i32, i32) {
    %c0_i32 = arith.constant 0 : i32
    %c0_i32_0 = arith.constant 0 : i32
    %c0_i32_1 = arith.constant 0 : i32
    return %arg1, %c0_i32, %c0_i32_0 : i32, i32, i32
  }
  func.func @transform_14(%arg0: i32, %arg1: i32) -> (i32, i32, i32) {
    %c0_i32 = arith.constant 0 : i32
    %c0_i32_0 = arith.constant 0 : i32
    %c0_i32_1 = arith.constant 0 : i32
    return %arg1, %c0_i32, %c0_i32_0 : i32, i32, i32
  }
  func.func @transform_15(%arg0: i32, %arg1: i32) -> (i32, i32, i32) {
    %c0_i32 = arith.constant 0 : i32
    %c0_i32_0 = arith.constant 0 : i32
    %c0_i32_1 = arith.constant 0 : i32
    return %arg1, %c0_i32, %c0_i32_0 : i32, i32, i32
  }
  func.func @transform_16(%arg0: i32, %arg1: i32) -> (i32, i32, i32) {
    %c0_i32 = arith.constant 0 : i32
    %c0_i32_0 = arith.constant 0 : i32
    %c0_i32_1 = arith.constant 0 : i32
    return %arg1, %c0_i32, %c0_i32_0 : i32, i32, i32
  }
  func.func @transform_17(%arg0: i32, %arg1: i32) -> (i32, i32, i32) {
    %c0_i32 = arith.constant 0 : i32
    %c0_i32_0 = arith.constant 0 : i32
    %c0_i32_1 = arith.constant 0 : i32
    return %arg1, %c0_i32, %c0_i32_0 : i32, i32, i32
  }
  func.func @transform_18(%arg0: i32, %arg1: i32) -> (i32, i32, i32) {
    %c0_i32 = arith.constant 0 : i32
    %c0_i32_0 = arith.constant 0 : i32
    %c0_i32_1 = arith.constant 0 : i32
    return %arg1, %c0_i32, %c0_i32_0 : i32, i32, i32
  }
  func.func @transform_19(%arg0: i32, %arg1: i32) -> (i32, i32, i32) {
    %c0_i32 = arith.constant 0 : i32
    %c0_i32_0 = arith.constant 0 : i32
    %c0_i32_1 = arith.constant 0 : i32
    return %arg0, %c0_i32, %c0_i32_0 : i32, i32, i32
  }
}

module attributes {stable_mosaic.version = 11 : i64} {
  func.func @kernel(%arg0: i32, %arg1: i32, %arg2: memref<4x8x32xbf16, #tpu.memory_space<vmem>>, %arg3: memref<4x1x32xbf16, #tpu.memory_space<vmem>>, %arg4: memref<8x32xf32, #tpu.memory_space<vmem>>, %arg5: memref<32x32xf32, #tpu.memory_space<vmem>>, %arg6: memref<8x32xf32, #tpu.memory_space<vmem>>, %arg7: memref<1x32x96xbf16, #tpu.memory_space<vmem>>, %arg8: memref<1x1x96xf32, #tpu.memory_space<vmem>>, %arg9: memref<1x32x32xbf16, #tpu.memory_space<vmem>>, %arg10: memref<1x1x32xf32, #tpu.memory_space<vmem>>, %arg11: memref<1x32x32xbf16, #tpu.memory_space<vmem>>, %arg12: memref<1x1x32xf32, #tpu.memory_space<vmem>>, %arg13: memref<1x32x32xbf16, #tpu.memory_space<vmem>>, %arg14: memref<1x1x32xf32, #tpu.memory_space<vmem>>, %arg15: memref<1x32x64xbf16, #tpu.memory_space<vmem>>, %arg16: memref<1x1x64xf32, #tpu.memory_space<vmem>>, %arg17: memref<1x64x32xbf16, #tpu.memory_space<vmem>>, %arg18: memref<1x1x32xf32, #tpu.memory_space<vmem>>, %arg19: memref<1x3x32xf32, #tpu.memory_space<vmem>>, %arg20: memref<1x3x32xf32, #tpu.memory_space<vmem>>, %arg21: memref<4x8x32xbf16, #tpu.memory_space<vmem>>, %arg22: memref<32x32xf32, #tpu.memory_space<vmem>>) attributes {dimension_semantics = [#tpu.dimension_semantics<parallel>, #tpu.dimension_semantics<arbitrary>], iteration_bounds = array<i64: 1, 2>, scalar_prefetch = 0 : i64, scratch_operands = 1 : i64, tpu.core_type = #tpu.core_type<tc>, window_params = [{transform_indices = @transform_0, window_bounds = array<i64: 4, 8, 32>}, {transform_indices = @transform_1, window_bounds = array<i64: 4, 1, 32>}, {pipeline_mode = #tpu.pipeline_mode<synchronous>, transform_indices = @transform_2, window_bounds = array<i64: 8, 32>}, {pipeline_mode = #tpu.pipeline_mode<synchronous>, transform_indices = @transform_3, window_bounds = array<i64: 32, 32>}, {pipeline_mode = #tpu.pipeline_mode<synchronous>, transform_indices = @transform_4, window_bounds = array<i64: 8, 32>}, {transform_indices = @transform_5, window_bounds = array<i64: 1, 32, 96>}, {transform_indices = @transform_6, window_bounds = array<i64: 1, 1, 96>}, {transform_indices = @transform_7, window_bounds = array<i64: 1, 32, 32>}, {transform_indices = @transform_8, window_bounds = array<i64: 1, 1, 32>}, {transform_indices = @transform_9, window_bounds = array<i64: 1, 32, 32>}, {transform_indices = @transform_10, window_bounds = array<i64: 1, 1, 32>}, {transform_indices = @transform_11, window_bounds = array<i64: 1, 32, 32>}, {transform_indices = @transform_12, window_bounds = array<i64: 1, 1, 32>}, {transform_indices = @transform_13, window_bounds = array<i64: 1, 32, 64>}, {transform_indices = @transform_14, window_bounds = array<i64: 1, 1, 64>}, {transform_indices = @transform_15, window_bounds = array<i64: 1, 64, 32>}, {transform_indices = @transform_16, window_bounds = array<i64: 1, 1, 32>}, {transform_indices = @transform_17, window_bounds = array<i64: 1, 3, 32>}, {transform_indices = @transform_18, window_bounds = array<i64: 1, 3, 32>}, {transform_indices = @transform_19, window_bounds = array<i64: 4, 8, 32>}]} {
    %c0_i32 = arith.constant 0 : i32
    %0 = arith.cmpi eq, %arg1, %c0_i32 : i32
    %1 = arith.extui %0 : i1 to i32
    %c0_i32_0 = arith.constant 0 : i32
    %2 = arith.cmpi ne, %1, %c0_i32_0 : i32
    scf.if %2 {
      %c0_116 = arith.constant 0 : index
      %c0_117 = arith.constant 0 : index
      %c0_118 = arith.constant 0 : index
      %334 = vector.load %arg2[%c0_116, %c0_117, %c0_118] : memref<4x8x32xbf16, #tpu.memory_space<vmem>>, vector<4x8x32xbf16>
      %335 = arith.extf %334 : vector<4x8x32xbf16> to vector<4x8x32xf32>
      %c0_119 = arith.constant 0 : index
      %c0_120 = arith.constant 0 : index
      %336 = vector.load %arg4[%c0_119, %c0_120] : memref<8x32xf32, #tpu.memory_space<vmem>>, vector<8x32xf32>
      %337 = vector.shape_cast %336 : vector<8x32xf32> to vector<1x8x32xf32>
      %338 = vector.broadcast %337 : vector<1x8x32xf32> to vector<4x8x32xf32>
      %339 = arith.addf %335, %338 : vector<4x8x32xf32>
      %340 = vector.shape_cast %339 : vector<4x8x32xf32> to vector<32x32xf32>
      %c0_121 = arith.constant 0 : index
      %c0_122 = arith.constant 0 : index
      %341 = vector.load %arg22[%c0_121, %c0_122] : memref<32x32xf32, #tpu.memory_space<vmem>>, vector<32x32xf32>
      tpu.vector_store %arg22[%c0_121, %c0_122], %340 {strides = array<i32>} : memref<32x32xf32, #tpu.memory_space<vmem>>, vector<32x32xf32>,
    } else {
    }
    %c0 = arith.constant 0 : index
    %c0_1 = arith.constant 0 : index
    %3 = vector.load %arg22[%c0, %c0_1] : memref<32x32xf32, #tpu.memory_space<vmem>>, vector<32x32xf32>
    %c0_2 = arith.constant 0 : index
    %c0_3 = arith.constant 0 : index
    %4 = vector.load %arg6[%c0_2, %c0_3] : memref<8x32xf32, #tpu.memory_space<vmem>>, vector<8x32xf32>
    %c0_4 = arith.constant 0 : index
    %c0_5 = arith.constant 0 : index
    %5 = vector.load %arg5[%c0_4, %c0_5] : memref<32x32xf32, #tpu.memory_space<vmem>>, vector<32x32xf32>
    %c0_6 = arith.constant 0 : index
    %c0_7 = arith.constant 0 : index
    %c0_8 = arith.constant 0 : index
    %6 = vector.load %arg19[%c0_6, %c0_7, %c0_8] : memref<1x3x32xf32, #tpu.memory_space<vmem>>, vector<1x3x32xf32>
    %7 = vector.shape_cast %6 : vector<1x3x32xf32> to vector<3x32xf32>
    %c0_9 = arith.constant 0 : index
    %c0_10 = arith.constant 0 : index
    %c0_11 = arith.constant 0 : index
    %8 = vector.load %arg20[%c0_9, %c0_10, %c0_11] : memref<1x3x32xf32, #tpu.memory_space<vmem>>, vector<1x3x32xf32>
    %9 = vector.shape_cast %8 : vector<1x3x32xf32> to vector<3x32xf32>
    %10 = arith.truncf %3 : vector<32x32xf32> to vector<32x32xbf16>
    %c0_12 = arith.constant 0 : index
    %c0_13 = arith.constant 0 : index
    %c0_14 = arith.constant 0 : index
    %11 = vector.load %arg7[%c0_12, %c0_13, %c0_14] : memref<1x32x96xbf16, #tpu.memory_space<vmem>>, vector<1x32x96xbf16>
    %12 = vector.shape_cast %11 : vector<1x32x96xbf16> to vector<32x96xbf16>
    %cst = arith.constant dense<0.000000e+00> : vector<32x96xf32>
    %13 = tpu.matmul %10, %12, %cst {dimension_numbers = #tpu.dot_dimension_numbers<[1], [0], [0], [1], [0, 0, 1, 1], [], []>} : vector<32x32xbf16>, vector<32x96xbf16>, vector<32x96xf32> -> vector<32x96xf32>
    %c0_15 = arith.constant 0 : index
    %c0_16 = arith.constant 0 : index
    %c0_17 = arith.constant 0 : index
    %14 = vector.load %arg8[%c0_15, %c0_16, %c0_17] : memref<1x1x96xf32, #tpu.memory_space<vmem>>, vector<1x1x96xf32>
    %15 = vector.shape_cast %14 : vector<1x1x96xf32> to vector<1x96xf32>
    %16 = vector.broadcast %15 : vector<1x96xf32> to vector<32x96xf32>
    %17 = arith.addf %13, %16 : vector<32x96xf32>
    %18 = vector.extract_strided_slice %17 {offsets = [0, 0], sizes = [32, 32], strides = [1, 1]} : vector<32x96xf32> to vector<32x32xf32>
    %19 = vector.extract_strided_slice %17 {offsets = [0, 32], sizes = [32, 32], strides = [1, 1]} : vector<32x96xf32> to vector<32x32xf32>
    %20 = arith.truncf %19 : vector<32x32xf32> to vector<32x32xbf16>
    %21 = vector.extract_strided_slice %17 {offsets = [0, 64], sizes = [32, 32], strides = [1, 1]} : vector<32x96xf32> to vector<32x32xf32>
    %22 = arith.truncf %21 : vector<32x32xf32> to vector<32x32xbf16>
    %cst_18 = arith.constant 0.000000e+00 : f32
    %23 = vector.broadcast %cst_18 : f32 to vector<32x32xf32>
    %24 = vector.extract_strided_slice %4 {offsets = [0, 0], sizes = [1, 32], strides = [1, 1]} : vector<8x32xf32> to vector<1x32xf32>
    %25 = vector.broadcast %24 : vector<1x32xf32> to vector<32x32xf32>
    %26 = arith.mulf %18, %25 : vector<32x32xf32>
    %27 = arith.truncf %26 : vector<32x32xf32> to vector<32x32xbf16>
    %cst_19 = arith.constant dense<0.000000e+00> : vector<32x32xf32>
    %28 = tpu.matmul %27, %20, %cst_19 {dimension_numbers = #tpu.dot_dimension_numbers<[1], [1], [0], [0], [0, 0, 1, 0], [], []>} : vector<32x32xbf16>, vector<32x32xbf16>, vector<32x32xf32> -> vector<32x32xf32>
    %cst_20 = arith.constant 5.000000e-01 : f32
    %29 = vector.broadcast %cst_20 : f32 to vector<32x32xf32>
    %30 = arith.mulf %28, %29 : vector<32x32xf32>
    %31 = arith.addf %30, %5 : vector<32x32xf32>
    %cst_21 = arith.constant dense<0xFF800000> : vector<32xf32>
    %32 = vector.multi_reduction <maximumf>, %31, %cst_21 [1] : vector<32x32xf32> to vector<32xf32>
    %33 = vector.shape_cast %32 : vector<32xf32> to vector<32x1xf32>
    %34 = vector.broadcast %33 : vector<32x1xf32> to vector<32x32xf32>
    %35 = arith.subf %31, %34 : vector<32x32xf32>
    %36 = math.exp %35 : vector<32x32xf32>
    %cst_22 = arith.constant dense<0.000000e+00> : vector<32xf32>
    %37 = vector.multi_reduction <add>, %36, %cst_22 [1] : vector<32x32xf32> to vector<32xf32>
    %38 = vector.shape_cast %37 : vector<32xf32> to vector<32x1xf32>
    %39 = tpu.reciprocal %38 {approx = true} : vector<32x1xf32> -> vector<32x1xf32>
    %40 = vector.broadcast %39 : vector<32x1xf32> to vector<32x32xf32>
    %41 = arith.mulf %36, %40 : vector<32x32xf32>
    %42 = arith.truncf %41 : vector<32x32xf32> to vector<32x32xbf16>
    %cst_23 = arith.constant dense<0.000000e+00> : vector<32x32xf32>
    %43 = tpu.matmul %42, %22, %cst_23 {dimension_numbers = #tpu.dot_dimension_numbers<[1], [0], [0], [1], [0, 0, 1, 1], [], []>} : vector<32x32xbf16>, vector<32x32xbf16>, vector<32x32xf32> -> vector<32x32xf32>
    %44 = vector.broadcast %24 : vector<1x32xf32> to vector<32x32xf32>
    %45 = arith.mulf %43, %44 : vector<32x32xf32>
    %46 = arith.addf %23, %45 : vector<32x32xf32>
    %47 = vector.extract_strided_slice %4 {offsets = [1, 0], sizes = [1, 32], strides = [1, 1]} : vector<8x32xf32> to vector<1x32xf32>
    %48 = vector.broadcast %47 : vector<1x32xf32> to vector<32x32xf32>
    %49 = arith.mulf %18, %48 : vector<32x32xf32>
    %50 = arith.truncf %49 : vector<32x32xf32> to vector<32x32xbf16>
    %cst_24 = arith.constant dense<0.000000e+00> : vector<32x32xf32>
    %51 = tpu.matmul %50, %20, %cst_24 {dimension_numbers = #tpu.dot_dimension_numbers<[1], [1], [0], [0], [0, 0, 1, 0], [], []>} : vector<32x32xbf16>, vector<32x32xbf16>, vector<32x32xf32> -> vector<32x32xf32>
    %cst_25 = arith.constant 5.000000e-01 : f32
    %52 = vector.broadcast %cst_25 : f32 to vector<32x32xf32>
    %53 = arith.mulf %51, %52 : vector<32x32xf32>
    %54 = arith.addf %53, %5 : vector<32x32xf32>
    %cst_26 = arith.constant dense<0xFF800000> : vector<32xf32>
    %55 = vector.multi_reduction <maximumf>, %54, %cst_26 [1] : vector<32x32xf32> to vector<32xf32>
    %56 = vector.shape_cast %55 : vector<32xf32> to vector<32x1xf32>
    %57 = vector.broadcast %56 : vector<32x1xf32> to vector<32x32xf32>
    %58 = arith.subf %54, %57 : vector<32x32xf32>
    %59 = math.exp %58 : vector<32x32xf32>
    %cst_27 = arith.constant dense<0.000000e+00> : vector<32xf32>
    %60 = vector.multi_reduction <add>, %59, %cst_27 [1] : vector<32x32xf32> to vector<32xf32>
    %61 = vector.shape_cast %60 : vector<32xf32> to vector<32x1xf32>
    %62 = tpu.reciprocal %61 {approx = true} : vector<32x1xf32> -> vector<32x1xf32>
    %63 = vector.broadcast %62 : vector<32x1xf32> to vector<32x32xf32>
    %64 = arith.mulf %59, %63 : vector<32x32xf32>
    %65 = arith.truncf %64 : vector<32x32xf32> to vector<32x32xbf16>
    %cst_28 = arith.constant dense<0.000000e+00> : vector<32x32xf32>
    %66 = tpu.matmul %65, %22, %cst_28 {dimension_numbers = #tpu.dot_dimension_numbers<[1], [0], [0], [1], [0, 0, 1, 1], [], []>} : vector<32x32xbf16>, vector<32x32xbf16>, vector<32x32xf32> -> vector<32x32xf32>
    %67 = vector.broadcast %47 : vector<1x32xf32> to vector<32x32xf32>
    %68 = arith.mulf %66, %67 : vector<32x32xf32>
    %69 = arith.addf %46, %68 : vector<32x32xf32>
    %70 = vector.extract_strided_slice %4 {offsets = [2, 0], sizes = [1, 32], strides = [1, 1]} : vector<8x32xf32> to vector<1x32xf32>
    %71 = vector.broadcast %70 : vector<1x32xf32> to vector<32x32xf32>
    %72 = arith.mulf %18, %71 : vector<32x32xf32>
    %73 = arith.truncf %72 : vector<32x32xf32> to vector<32x32xbf16>
    %cst_29 = arith.constant dense<0.000000e+00> : vector<32x32xf32>
    %74 = tpu.matmul %73, %20, %cst_29 {dimension_numbers = #tpu.dot_dimension_numbers<[1], [1], [0], [0], [0, 0, 1, 0], [], []>} : vector<32x32xbf16>, vector<32x32xbf16>, vector<32x32xf32> -> vector<32x32xf32>
    %cst_30 = arith.constant 5.000000e-01 : f32
    %75 = vector.broadcast %cst_30 : f32 to vector<32x32xf32>
    %76 = arith.mulf %74, %75 : vector<32x32xf32>
    %77 = arith.addf %76, %5 : vector<32x32xf32>
    %cst_31 = arith.constant dense<0xFF800000> : vector<32xf32>
    %78 = vector.multi_reduction <maximumf>, %77, %cst_31 [1] : vector<32x32xf32> to vector<32xf32>
    %79 = vector.shape_cast %78 : vector<32xf32> to vector<32x1xf32>
    %80 = vector.broadcast %79 : vector<32x1xf32> to vector<32x32xf32>
    %81 = arith.subf %77, %80 : vector<32x32xf32>
    %82 = math.exp %81 : vector<32x32xf32>
    %cst_32 = arith.constant dense<0.000000e+00> : vector<32xf32>
    %83 = vector.multi_reduction <add>, %82, %cst_32 [1] : vector<32x32xf32> to vector<32xf32>
    %84 = vector.shape_cast %83 : vector<32xf32> to vector<32x1xf32>
    %85 = tpu.reciprocal %84 {approx = true} : vector<32x1xf32> -> vector<32x1xf32>
    %86 = vector.broadcast %85 : vector<32x1xf32> to vector<32x32xf32>
    %87 = arith.mulf %82, %86 : vector<32x32xf32>
    %88 = arith.truncf %87 : vector<32x32xf32> to vector<32x32xbf16>
    %cst_33 = arith.constant dense<0.000000e+00> : vector<32x32xf32>
    %89 = tpu.matmul %88, %22, %cst_33 {dimension_numbers = #tpu.dot_dimension_numbers<[1], [0], [0], [1], [0, 0, 1, 1], [], []>} : vector<32x32xbf16>, vector<32x32xbf16>, vector<32x32xf32> -> vector<32x32xf32>
    %90 = vector.broadcast %70 : vector<1x32xf32> to vector<32x32xf32>
    %91 = arith.mulf %89, %90 : vector<32x32xf32>
    %92 = arith.addf %69, %91 : vector<32x32xf32>
    %93 = vector.extract_strided_slice %4 {offsets = [3, 0], sizes = [1, 32], strides = [1, 1]} : vector<8x32xf32> to vector<1x32xf32>
    %94 = vector.broadcast %93 : vector<1x32xf32> to vector<32x32xf32>
    %95 = arith.mulf %18, %94 : vector<32x32xf32>
    %96 = arith.truncf %95 : vector<32x32xf32> to vector<32x32xbf16>
    %cst_34 = arith.constant dense<0.000000e+00> : vector<32x32xf32>
    %97 = tpu.matmul %96, %20, %cst_34 {dimension_numbers = #tpu.dot_dimension_numbers<[1], [1], [0], [0], [0, 0, 1, 0], [], []>} : vector<32x32xbf16>, vector<32x32xbf16>, vector<32x32xf32> -> vector<32x32xf32>
    %cst_35 = arith.constant 5.000000e-01 : f32
    %98 = vector.broadcast %cst_35 : f32 to vector<32x32xf32>
    %99 = arith.mulf %97, %98 : vector<32x32xf32>
    %100 = arith.addf %99, %5 : vector<32x32xf32>
    %cst_36 = arith.constant dense<0xFF800000> : vector<32xf32>
    %101 = vector.multi_reduction <maximumf>, %100, %cst_36 [1] : vector<32x32xf32> to vector<32xf32>
    %102 = vector.shape_cast %101 : vector<32xf32> to vector<32x1xf32>
    %103 = vector.broadcast %102 : vector<32x1xf32> to vector<32x32xf32>
    %104 = arith.subf %100, %103 : vector<32x32xf32>
    %105 = math.exp %104 : vector<32x32xf32>
    %cst_37 = arith.constant dense<0.000000e+00> : vector<32xf32>
    %106 = vector.multi_reduction <add>, %105, %cst_37 [1] : vector<32x32xf32> to vector<32xf32>
    %107 = vector.shape_cast %106 : vector<32xf32> to vector<32x1xf32>
    %108 = tpu.reciprocal %107 {approx = true} : vector<32x1xf32> -> vector<32x1xf32>
    %109 = vector.broadcast %108 : vector<32x1xf32> to vector<32x32xf32>
    %110 = arith.mulf %105, %109 : vector<32x32xf32>
    %111 = arith.truncf %110 : vector<32x32xf32> to vector<32x32xbf16>
    %cst_38 = arith.constant dense<0.000000e+00> : vector<32x32xf32>
    %112 = tpu.matmul %111, %22, %cst_38 {dimension_numbers = #tpu.dot_dimension_numbers<[1], [0], [0], [1], [0, 0, 1, 1], [], []>} : vector<32x32xbf16>, vector<32x32xbf16>, vector<32x32xf32> -> vector<32x32xf32>
    %113 = vector.broadcast %93 : vector<1x32xf32> to vector<32x32xf32>
    %114 = arith.mulf %112, %113 : vector<32x32xf32>
    %115 = arith.addf %92, %114 : vector<32x32xf32>
    %116 = vector.extract_strided_slice %4 {offsets = [4, 0], sizes = [1, 32], strides = [1, 1]} : vector<8x32xf32> to vector<1x32xf32>
    %117 = vector.broadcast %116 : vector<1x32xf32> to vector<32x32xf32>
    %118 = arith.mulf %18, %117 : vector<32x32xf32>
    %119 = arith.truncf %118 : vector<32x32xf32> to vector<32x32xbf16>
    %cst_39 = arith.constant dense<0.000000e+00> : vector<32x32xf32>
    %120 = tpu.matmul %119, %20, %cst_39 {dimension_numbers = #tpu.dot_dimension_numbers<[1], [1], [0], [0], [0, 0, 1, 0], [], []>} : vector<32x32xbf16>, vector<32x32xbf16>, vector<32x32xf32> -> vector<32x32xf32>
    %cst_40 = arith.constant 5.000000e-01 : f32
    %121 = vector.broadcast %cst_40 : f32 to vector<32x32xf32>
    %122 = arith.mulf %120, %121 : vector<32x32xf32>
    %123 = arith.addf %122, %5 : vector<32x32xf32>
    %cst_41 = arith.constant dense<0xFF800000> : vector<32xf32>
    %124 = vector.multi_reduction <maximumf>, %123, %cst_41 [1] : vector<32x32xf32> to vector<32xf32>
    %125 = vector.shape_cast %124 : vector<32xf32> to vector<32x1xf32>
    %126 = vector.broadcast %125 : vector<32x1xf32> to vector<32x32xf32>
    %127 = arith.subf %123, %126 : vector<32x32xf32>
    %128 = math.exp %127 : vector<32x32xf32>
    %cst_42 = arith.constant dense<0.000000e+00> : vector<32xf32>
    %129 = vector.multi_reduction <add>, %128, %cst_42 [1] : vector<32x32xf32> to vector<32xf32>
    %130 = vector.shape_cast %129 : vector<32xf32> to vector<32x1xf32>
    %131 = tpu.reciprocal %130 {approx = true} : vector<32x1xf32> -> vector<32x1xf32>
    %132 = vector.broadcast %131 : vector<32x1xf32> to vector<32x32xf32>
    %133 = arith.mulf %128, %132 : vector<32x32xf32>
    %134 = arith.truncf %133 : vector<32x32xf32> to vector<32x32xbf16>
    %cst_43 = arith.constant dense<0.000000e+00> : vector<32x32xf32>
    %135 = tpu.matmul %134, %22, %cst_43 {dimension_numbers = #tpu.dot_dimension_numbers<[1], [0], [0], [1], [0, 0, 1, 1], [], []>} : vector<32x32xbf16>, vector<32x32xbf16>, vector<32x32xf32> -> vector<32x32xf32>
    %136 = vector.broadcast %116 : vector<1x32xf32> to vector<32x32xf32>
    %137 = arith.mulf %135, %136 : vector<32x32xf32>
    %138 = arith.addf %115, %137 : vector<32x32xf32>
    %139 = vector.extract_strided_slice %4 {offsets = [5, 0], sizes = [1, 32], strides = [1, 1]} : vector<8x32xf32> to vector<1x32xf32>
    %140 = vector.broadcast %139 : vector<1x32xf32> to vector<32x32xf32>
    %141 = arith.mulf %18, %140 : vector<32x32xf32>
    %142 = arith.truncf %141 : vector<32x32xf32> to vector<32x32xbf16>
    %cst_44 = arith.constant dense<0.000000e+00> : vector<32x32xf32>
    %143 = tpu.matmul %142, %20, %cst_44 {dimension_numbers = #tpu.dot_dimension_numbers<[1], [1], [0], [0], [0, 0, 1, 0], [], []>} : vector<32x32xbf16>, vector<32x32xbf16>, vector<32x32xf32> -> vector<32x32xf32>
    %cst_45 = arith.constant 5.000000e-01 : f32
    %144 = vector.broadcast %cst_45 : f32 to vector<32x32xf32>
    %145 = arith.mulf %143, %144 : vector<32x32xf32>
    %146 = arith.addf %145, %5 : vector<32x32xf32>
    %cst_46 = arith.constant dense<0xFF800000> : vector<32xf32>
    %147 = vector.multi_reduction <maximumf>, %146, %cst_46 [1] : vector<32x32xf32> to vector<32xf32>
    %148 = vector.shape_cast %147 : vector<32xf32> to vector<32x1xf32>
    %149 = vector.broadcast %148 : vector<32x1xf32> to vector<32x32xf32>
    %150 = arith.subf %146, %149 : vector<32x32xf32>
    %151 = math.exp %150 : vector<32x32xf32>
    %cst_47 = arith.constant dense<0.000000e+00> : vector<32xf32>
    %152 = vector.multi_reduction <add>, %151, %cst_47 [1] : vector<32x32xf32> to vector<32xf32>
    %153 = vector.shape_cast %152 : vector<32xf32> to vector<32x1xf32>
    %154 = tpu.reciprocal %153 {approx = true} : vector<32x1xf32> -> vector<32x1xf32>
    %155 = vector.broadcast %154 : vector<32x1xf32> to vector<32x32xf32>
    %156 = arith.mulf %151, %155 : vector<32x32xf32>
    %157 = arith.truncf %156 : vector<32x32xf32> to vector<32x32xbf16>
    %cst_48 = arith.constant dense<0.000000e+00> : vector<32x32xf32>
    %158 = tpu.matmul %157, %22, %cst_48 {dimension_numbers = #tpu.dot_dimension_numbers<[1], [0], [0], [1], [0, 0, 1, 1], [], []>} : vector<32x32xbf16>, vector<32x32xbf16>, vector<32x32xf32> -> vector<32x32xf32>
    %159 = vector.broadcast %139 : vector<1x32xf32> to vector<32x32xf32>
    %160 = arith.mulf %158, %159 : vector<32x32xf32>
    %161 = arith.addf %138, %160 : vector<32x32xf32>
    %162 = vector.extract_strided_slice %4 {offsets = [6, 0], sizes = [1, 32], strides = [1, 1]} : vector<8x32xf32> to vector<1x32xf32>
    %163 = vector.broadcast %162 : vector<1x32xf32> to vector<32x32xf32>
    %164 = arith.mulf %18, %163 : vector<32x32xf32>
    %165 = arith.truncf %164 : vector<32x32xf32> to vector<32x32xbf16>
    %cst_49 = arith.constant dense<0.000000e+00> : vector<32x32xf32>
    %166 = tpu.matmul %165, %20, %cst_49 {dimension_numbers = #tpu.dot_dimension_numbers<[1], [1], [0], [0], [0, 0, 1, 0], [], []>} : vector<32x32xbf16>, vector<32x32xbf16>, vector<32x32xf32> -> vector<32x32xf32>
    %cst_50 = arith.constant 5.000000e-01 : f32
    %167 = vector.broadcast %cst_50 : f32 to vector<32x32xf32>
    %168 = arith.mulf %166, %167 : vector<32x32xf32>
    %169 = arith.addf %168, %5 : vector<32x32xf32>
    %cst_51 = arith.constant dense<0xFF800000> : vector<32xf32>
    %170 = vector.multi_reduction <maximumf>, %169, %cst_51 [1] : vector<32x32xf32> to vector<32xf32>
    %171 = vector.shape_cast %170 : vector<32xf32> to vector<32x1xf32>
    %172 = vector.broadcast %171 : vector<32x1xf32> to vector<32x32xf32>
    %173 = arith.subf %169, %172 : vector<32x32xf32>
    %174 = math.exp %173 : vector<32x32xf32>
    %cst_52 = arith.constant dense<0.000000e+00> : vector<32xf32>
    %175 = vector.multi_reduction <add>, %174, %cst_52 [1] : vector<32x32xf32> to vector<32xf32>
    %176 = vector.shape_cast %175 : vector<32xf32> to vector<32x1xf32>
    %177 = tpu.reciprocal %176 {approx = true} : vector<32x1xf32> -> vector<32x1xf32>
    %178 = vector.broadcast %177 : vector<32x1xf32> to vector<32x32xf32>
    %179 = arith.mulf %174, %178 : vector<32x32xf32>
    %180 = arith.truncf %179 : vector<32x32xf32> to vector<32x32xbf16>
    %cst_53 = arith.constant dense<0.000000e+00> : vector<32x32xf32>
    %181 = tpu.matmul %180, %22, %cst_53 {dimension_numbers = #tpu.dot_dimension_numbers<[1], [0], [0], [1], [0, 0, 1, 1], [], []>} : vector<32x32xbf16>, vector<32x32xbf16>, vector<32x32xf32> -> vector<32x32xf32>
    %182 = vector.broadcast %162 : vector<1x32xf32> to vector<32x32xf32>
    %183 = arith.mulf %181, %182 : vector<32x32xf32>
    %184 = arith.addf %161, %183 : vector<32x32xf32>
    %185 = vector.extract_strided_slice %4 {offsets = [7, 0], sizes = [1, 32], strides = [1, 1]} : vector<8x32xf32> to vector<1x32xf32>
    %186 = vector.broadcast %185 : vector<1x32xf32> to vector<32x32xf32>
    %187 = arith.mulf %18, %186 : vector<32x32xf32>
    %188 = arith.truncf %187 : vector<32x32xf32> to vector<32x32xbf16>
    %cst_54 = arith.constant dense<0.000000e+00> : vector<32x32xf32>
    %189 = tpu.matmul %188, %20, %cst_54 {dimension_numbers = #tpu.dot_dimension_numbers<[1], [1], [0], [0], [0, 0, 1, 0], [], []>} : vector<32x32xbf16>, vector<32x32xbf16>, vector<32x32xf32> -> vector<32x32xf32>
    %cst_55 = arith.constant 5.000000e-01 : f32
    %190 = vector.broadcast %cst_55 : f32 to vector<32x32xf32>
    %191 = arith.mulf %189, %190 : vector<32x32xf32>
    %192 = arith.addf %191, %5 : vector<32x32xf32>
    %cst_56 = arith.constant dense<0xFF800000> : vector<32xf32>
    %193 = vector.multi_reduction <maximumf>, %192, %cst_56 [1] : vector<32x32xf32> to vector<32xf32>
    %194 = vector.shape_cast %193 : vector<32xf32> to vector<32x1xf32>
    %195 = vector.broadcast %194 : vector<32x1xf32> to vector<32x32xf32>
    %196 = arith.subf %192, %195 : vector<32x32xf32>
    %197 = math.exp %196 : vector<32x32xf32>
    %cst_57 = arith.constant dense<0.000000e+00> : vector<32xf32>
    %198 = vector.multi_reduction <add>, %197, %cst_57 [1] : vector<32x32xf32> to vector<32xf32>
    %199 = vector.shape_cast %198 : vector<32xf32> to vector<32x1xf32>
    %200 = tpu.reciprocal %199 {approx = true} : vector<32x1xf32> -> vector<32x1xf32>
    %201 = vector.broadcast %200 : vector<32x1xf32> to vector<32x32xf32>
    %202 = arith.mulf %197, %201 : vector<32x32xf32>
    %203 = arith.truncf %202 : vector<32x32xf32> to vector<32x32xbf16>
    %cst_58 = arith.constant dense<0.000000e+00> : vector<32x32xf32>
    %204 = tpu.matmul %203, %22, %cst_58 {dimension_numbers = #tpu.dot_dimension_numbers<[1], [0], [0], [1], [0, 0, 1, 1], [], []>} : vector<32x32xbf16>, vector<32x32xbf16>, vector<32x32xf32> -> vector<32x32xf32>
    %205 = vector.broadcast %185 : vector<1x32xf32> to vector<32x32xf32>
    %206 = arith.mulf %204, %205 : vector<32x32xf32>
    %207 = arith.addf %184, %206 : vector<32x32xf32>
    %208 = arith.truncf %207 : vector<32x32xf32> to vector<32x32xbf16>
    %c0_59 = arith.constant 0 : index
    %c0_60 = arith.constant 0 : index
    %c0_61 = arith.constant 0 : index
    %209 = vector.load %arg9[%c0_59, %c0_60, %c0_61] : memref<1x32x32xbf16, #tpu.memory_space<vmem>>, vector<1x32x32xbf16>
    %210 = vector.shape_cast %209 : vector<1x32x32xbf16> to vector<32x32xbf16>
    %cst_62 = arith.constant dense<0.000000e+00> : vector<32x32xf32>
    %211 = tpu.matmul %208, %210, %cst_62 {dimension_numbers = #tpu.dot_dimension_numbers<[1], [0], [0], [1], [0, 0, 1, 1], [], []>} : vector<32x32xbf16>, vector<32x32xbf16>, vector<32x32xf32> -> vector<32x32xf32>
    %c0_63 = arith.constant 0 : index
    %c0_64 = arith.constant 0 : index
    %c0_65 = arith.constant 0 : index
    %212 = vector.load %arg10[%c0_63, %c0_64, %c0_65] : memref<1x1x32xf32, #tpu.memory_space<vmem>>, vector<1x1x32xf32>
    %213 = vector.shape_cast %212 : vector<1x1x32xf32> to vector<1x32xf32>
    %214 = vector.broadcast %213 : vector<1x32xf32> to vector<32x32xf32>
    %215 = arith.addf %211, %214 : vector<32x32xf32>
    %216 = arith.addf %3, %215 : vector<32x32xf32>
    %217 = vector.extract_strided_slice %7 {offsets = [0, 0], sizes = [1, 32], strides = [1, 1]} : vector<3x32xf32> to vector<1x32xf32>
    %218 = vector.extract_strided_slice %9 {offsets = [0, 0], sizes = [1, 32], strides = [1, 1]} : vector<3x32xf32> to vector<1x32xf32>
    %cst_66 = arith.constant dense<0.000000e+00> : vector<32xf32>
    %219 = vector.multi_reduction <add>, %216, %cst_66 [1] : vector<32x32xf32> to vector<32xf32>
    %220 = vector.shape_cast %219 : vector<32xf32> to vector<32x1xf32>
    %cst_67 = arith.constant 3.200000e+01 : f32
    %221 = vector.broadcast %cst_67 : f32 to vector<32x1xf32>
    %222 = arith.divf %220, %221 : vector<32x1xf32>
    %223 = vector.broadcast %222 : vector<32x1xf32> to vector<32x32xf32>
    %224 = arith.subf %216, %223 : vector<32x32xf32>
    %225 = arith.mulf %224, %224 : vector<32x32xf32>
    %cst_68 = arith.constant dense<0.000000e+00> : vector<32xf32>
    %226 = vector.multi_reduction <add>, %225, %cst_68 [1] : vector<32x32xf32> to vector<32xf32>
    %227 = vector.shape_cast %226 : vector<32xf32> to vector<32x1xf32>
    %cst_69 = arith.constant 3.200000e+01 : f32
    %228 = vector.broadcast %cst_69 : f32 to vector<32x1xf32>
    %229 = arith.divf %227, %228 : vector<32x1xf32>
    %230 = vector.broadcast %222 : vector<32x1xf32> to vector<32x32xf32>
    %231 = arith.subf %216, %230 : vector<32x32xf32>
    %cst_70 = arith.constant 9.99999974E-6 : f32
    %232 = vector.broadcast %cst_70 : f32 to vector<32x1xf32>
    %233 = arith.addf %229, %232 : vector<32x1xf32>
    %234 = math.rsqrt %233 : vector<32x1xf32>
    %235 = vector.broadcast %234 : vector<32x1xf32> to vector<32x32xf32>
    %236 = arith.mulf %231, %235 : vector<32x32xf32>
    %237 = vector.broadcast %217 : vector<1x32xf32> to vector<32x32xf32>
    %238 = arith.mulf %236, %237 : vector<32x32xf32>
    %239 = vector.broadcast %218 : vector<1x32xf32> to vector<32x32xf32>
    %240 = arith.addf %238, %239 : vector<32x32xf32>
    %c0_71 = arith.constant 0 : index
    %c0_72 = arith.constant 0 : index
    %c0_73 = arith.constant 0 : index
    %241 = vector.load %arg3[%c0_71, %c0_72, %c0_73] : memref<4x1x32xbf16, #tpu.memory_space<vmem>>, vector<4x1x32xbf16>
    %242 = vector.shape_cast %241 : vector<4x1x32xbf16> to vector<4x32xbf16>
    %c0_74 = arith.constant 0 : index
    %c0_75 = arith.constant 0 : index
    %c0_76 = arith.constant 0 : index
    %243 = vector.load %arg11[%c0_74, %c0_75, %c0_76] : memref<1x32x32xbf16, #tpu.memory_space<vmem>>, vector<1x32x32xbf16>
    %244 = vector.shape_cast %243 : vector<1x32x32xbf16> to vector<32x32xbf16>
    %cst_77 = arith.constant dense<0.000000e+00> : vector<4x32xf32>
    %245 = tpu.matmul %242, %244, %cst_77 {dimension_numbers = #tpu.dot_dimension_numbers<[1], [0], [0], [1], [0, 0, 1, 1], [], []>} : vector<4x32xbf16>, vector<32x32xbf16>, vector<4x32xf32> -> vector<4x32xf32>
    %c0_78 = arith.constant 0 : index
    %c0_79 = arith.constant 0 : index
    %c0_80 = arith.constant 0 : index
    %246 = vector.load %arg12[%c0_78, %c0_79, %c0_80] : memref<1x1x32xf32, #tpu.memory_space<vmem>>, vector<1x1x32xf32>
    %247 = vector.shape_cast %246 : vector<1x1x32xf32> to vector<1x32xf32>
    %248 = vector.broadcast %247 : vector<1x32xf32> to vector<4x32xf32>
    %249 = arith.addf %245, %248 : vector<4x32xf32>
    %250 = arith.truncf %249 : vector<4x32xf32> to vector<4x32xbf16>
    %c0_81 = arith.constant 0 : index
    %c0_82 = arith.constant 0 : index
    %c0_83 = arith.constant 0 : index
    %251 = vector.load %arg13[%c0_81, %c0_82, %c0_83] : memref<1x32x32xbf16, #tpu.memory_space<vmem>>, vector<1x32x32xbf16>
    %252 = vector.shape_cast %251 : vector<1x32x32xbf16> to vector<32x32xbf16>
    %cst_84 = arith.constant dense<0.000000e+00> : vector<4x32xf32>
    %253 = tpu.matmul %250, %252, %cst_84 {dimension_numbers = #tpu.dot_dimension_numbers<[1], [0], [0], [1], [0, 0, 1, 1], [], []>} : vector<4x32xbf16>, vector<32x32xbf16>, vector<4x32xf32> -> vector<4x32xf32>
    %c0_85 = arith.constant 0 : index
    %c0_86 = arith.constant 0 : index
    %c0_87 = arith.constant 0 : index
    %254 = vector.load %arg14[%c0_85, %c0_86, %c0_87] : memref<1x1x32xf32, #tpu.memory_space<vmem>>, vector<1x1x32xf32>
    %255 = vector.shape_cast %254 : vector<1x1x32xf32> to vector<1x32xf32>
    %256 = vector.broadcast %255 : vector<1x32xf32> to vector<4x32xf32>
    %257 = arith.addf %253, %256 : vector<4x32xf32>
    %258 = vector.shape_cast %257 : vector<4x32xf32> to vector<4x1x32xf32>
    %259 = vector.shape_cast %258 : vector<4x1x32xf32> to vector<4x1x32xf32>
    %260 = vector.broadcast %259 : vector<4x1x32xf32> to vector<4x8x32xf32>
    %261 = vector.shape_cast %260 : vector<4x8x32xf32> to vector<32x32xf32>
    %262 = arith.addf %240, %261 : vector<32x32xf32>
    %263 = vector.extract_strided_slice %7 {offsets = [1, 0], sizes = [1, 32], strides = [1, 1]} : vector<3x32xf32> to vector<1x32xf32>
    %264 = vector.extract_strided_slice %9 {offsets = [1, 0], sizes = [1, 32], strides = [1, 1]} : vector<3x32xf32> to vector<1x32xf32>
    %cst_88 = arith.constant dense<0.000000e+00> : vector<32xf32>
    %265 = vector.multi_reduction <add>, %262, %cst_88 [1] : vector<32x32xf32> to vector<32xf32>
    %266 = vector.shape_cast %265 : vector<32xf32> to vector<32x1xf32>
    %cst_89 = arith.constant 3.200000e+01 : f32
    %267 = vector.broadcast %cst_89 : f32 to vector<32x1xf32>
    %268 = arith.divf %266, %267 : vector<32x1xf32>
    %269 = vector.broadcast %268 : vector<32x1xf32> to vector<32x32xf32>
    %270 = arith.subf %262, %269 : vector<32x32xf32>
    %271 = arith.mulf %270, %270 : vector<32x32xf32>
    %cst_90 = arith.constant dense<0.000000e+00> : vector<32xf32>
    %272 = vector.multi_reduction <add>, %271, %cst_90 [1] : vector<32x32xf32> to vector<32xf32>
    %273 = vector.shape_cast %272 : vector<32xf32> to vector<32x1xf32>
    %cst_91 = arith.constant 3.200000e+01 : f32
    %274 = vector.broadcast %cst_91 : f32 to vector<32x1xf32>
    %275 = arith.divf %273, %274 : vector<32x1xf32>
    %276 = vector.broadcast %268 : vector<32x1xf32> to vector<32x32xf32>
    %277 = arith.subf %262, %276 : vector<32x32xf32>
    %cst_92 = arith.constant 9.99999974E-6 : f32
    %278 = vector.broadcast %cst_92 : f32 to vector<32x1xf32>
    %279 = arith.addf %275, %278 : vector<32x1xf32>
    %280 = math.rsqrt %279 : vector<32x1xf32>
    %281 = vector.broadcast %280 : vector<32x1xf32> to vector<32x32xf32>
    %282 = arith.mulf %277, %281 : vector<32x32xf32>
    %283 = vector.broadcast %263 : vector<1x32xf32> to vector<32x32xf32>
    %284 = arith.mulf %282, %283 : vector<32x32xf32>
    %285 = vector.broadcast %264 : vector<1x32xf32> to vector<32x32xf32>
    %286 = arith.addf %284, %285 : vector<32x32xf32>
    %287 = arith.truncf %286 : vector<32x32xf32> to vector<32x32xbf16>
    %c0_93 = arith.constant 0 : index
    %c0_94 = arith.constant 0 : index
    %c0_95 = arith.constant 0 : index
    %288 = vector.load %arg15[%c0_93, %c0_94, %c0_95] : memref<1x32x64xbf16, #tpu.memory_space<vmem>>, vector<1x32x64xbf16>
    %289 = vector.shape_cast %288 : vector<1x32x64xbf16> to vector<32x64xbf16>
    %cst_96 = arith.constant dense<0.000000e+00> : vector<32x64xf32>
    %290 = tpu.matmul %287, %289, %cst_96 {dimension_numbers = #tpu.dot_dimension_numbers<[1], [0], [0], [1], [0, 0, 1, 1], [], []>} : vector<32x32xbf16>, vector<32x64xbf16>, vector<32x64xf32> -> vector<32x64xf32>
    %c0_97 = arith.constant 0 : index
    %c0_98 = arith.constant 0 : index
    %c0_99 = arith.constant 0 : index
    %291 = vector.load %arg16[%c0_97, %c0_98, %c0_99] : memref<1x1x64xf32, #tpu.memory_space<vmem>>, vector<1x1x64xf32>
    %292 = vector.shape_cast %291 : vector<1x1x64xf32> to vector<1x64xf32>
    %293 = vector.broadcast %292 : vector<1x64xf32> to vector<32x64xf32>
    %294 = arith.addf %290, %293 : vector<32x64xf32>
    %cst_100 = arith.constant 0.000000e+00 : f32
    %295 = vector.broadcast %cst_100 : f32 to vector<32x64xf32>
    %296 = arith.maximumf %294, %295 : vector<32x64xf32>
    %297 = arith.truncf %296 : vector<32x64xf32> to vector<32x64xbf16>
    %c0_101 = arith.constant 0 : index
    %c0_102 = arith.constant 0 : index
    %c0_103 = arith.constant 0 : index
    %298 = vector.load %arg17[%c0_101, %c0_102, %c0_103] : memref<1x64x32xbf16, #tpu.memory_space<vmem>>, vector<1x64x32xbf16>
    %299 = vector.shape_cast %298 : vector<1x64x32xbf16> to vector<64x32xbf16>
    %cst_104 = arith.constant dense<0.000000e+00> : vector<32x32xf32>
    %300 = tpu.matmul %297, %299, %cst_104 {dimension_numbers = #tpu.dot_dimension_numbers<[1], [0], [0], [1], [0, 0, 1, 1], [], []>} : vector<32x64xbf16>, vector<64x32xbf16>, vector<32x32xf32> -> vector<32x32xf32>
    %c0_105 = arith.constant 0 : index
    %c0_106 = arith.constant 0 : index
    %c0_107 = arith.constant 0 : index
    %301 = vector.load %arg18[%c0_105, %c0_106, %c0_107] : memref<1x1x32xf32, #tpu.memory_space<vmem>>, vector<1x1x32xf32>
    %302 = vector.shape_cast %301 : vector<1x1x32xf32> to vector<1x32xf32>
    %303 = vector.broadcast %302 : vector<1x32xf32> to vector<32x32xf32>
    %304 = arith.addf %300, %303 : vector<32x32xf32>
    %305 = arith.addf %286, %304 : vector<32x32xf32>
    %306 = vector.extract_strided_slice %7 {offsets = [2, 0], sizes = [1, 32], strides = [1, 1]} : vector<3x32xf32> to vector<1x32xf32>
    %307 = vector.extract_strided_slice %9 {offsets = [2, 0], sizes = [1, 32], strides = [1, 1]} : vector<3x32xf32> to vector<1x32xf32>
    %cst_108 = arith.constant dense<0.000000e+00> : vector<32xf32>
    %308 = vector.multi_reduction <add>, %305, %cst_108 [1] : vector<32x32xf32> to vector<32xf32>
    %309 = vector.shape_cast %308 : vector<32xf32> to vector<32x1xf32>
    %cst_109 = arith.constant 3.200000e+01 : f32
    %310 = vector.broadcast %cst_109 : f32 to vector<32x1xf32>
    %311 = arith.divf %309, %310 : vector<32x1xf32>
    %312 = vector.broadcast %311 : vector<32x1xf32> to vector<32x32xf32>
    %313 = arith.subf %305, %312 : vector<32x32xf32>
    %314 = arith.mulf %313, %313 : vector<32x32xf32>
    %cst_110 = arith.constant dense<0.000000e+00> : vector<32xf32>
    %315 = vector.multi_reduction <add>, %314, %cst_110 [1] : vector<32x32xf32> to vector<32xf32>
    %316 = vector.shape_cast %315 : vector<32xf32> to vector<32x1xf32>
    %cst_111 = arith.constant 3.200000e+01 : f32
    %317 = vector.broadcast %cst_111 : f32 to vector<32x1xf32>
    %318 = arith.divf %316, %317 : vector<32x1xf32>
    %319 = vector.broadcast %311 : vector<32x1xf32> to vector<32x32xf32>
    %320 = arith.subf %305, %319 : vector<32x32xf32>
    %cst_112 = arith.constant 9.99999974E-6 : f32
    %321 = vector.broadcast %cst_112 : f32 to vector<32x1xf32>
    %322 = arith.addf %318, %321 : vector<32x1xf32>
    %323 = math.rsqrt %322 : vector<32x1xf32>
    %324 = vector.broadcast %323 : vector<32x1xf32> to vector<32x32xf32>
    %325 = arith.mulf %320, %324 : vector<32x32xf32>
    %326 = vector.broadcast %306 : vector<1x32xf32> to vector<32x32xf32>
    %327 = arith.mulf %325, %326 : vector<32x32xf32>
    %328 = vector.broadcast %307 : vector<1x32xf32> to vector<32x32xf32>
    %329 = arith.addf %327, %328 : vector<32x32xf32>
    %c0_113 = arith.constant 0 : index
    %c0_114 = arith.constant 0 : index
    %330 = vector.load %arg22[%c0_113, %c0_114] : memref<32x32xf32, #tpu.memory_space<vmem>>, vector<32x32xf32>
    tpu.vector_store %arg22[%c0_113, %c0_114], %329 {strides = array<i32>} : memref<32x32xf32, #tpu.memory_space<vmem>>, vector<32x32xf32>,
    %c1_i32 = arith.constant 1 : i32
    %331 = arith.cmpi eq, %arg1, %c1_i32 : i32
    %332 = arith.extui %331 : i1 to i32
    %c0_i32_115 = arith.constant 0 : i32
    %333 = arith.cmpi ne, %332, %c0_i32_115 : i32
    scf.if %333 {
      %334 = vector.shape_cast %329 : vector<32x32xf32> to vector<4x8x32xf32>
      %335 = arith.truncf %334 : vector<4x8x32xf32> to vector<4x8x32xbf16>
      %c0_116 = arith.constant 0 : index
      %c0_117 = arith.constant 0 : index
      %c0_118 = arith.constant 0 : index
      %336 = vector.load %arg21[%c0_116, %c0_117, %c0_118] : memref<4x8x32xbf16, #tpu.memory_space<vmem>>, vector<4x8x32xbf16>
      tpu.vector_store %arg21[%c0_116, %c0_117, %c0_118], %335 {strides = array<i32>} : memref<4x8x32xbf16, #tpu.memory_space<vmem>>, vector<4x8x32xbf16>,
    } else {
    }
    return
  }
  func.func @transform_0(%arg0: i32, %arg1: i32) -> (i32, i32, i32) {
    %c0_i32 = arith.constant 0 : i32
    %c0_i32_0 = arith.constant 0 : i32
    %c0_i32_1 = arith.constant 0 : i32
    return %arg0, %c0_i32, %c0_i32_0 : i32, i32, i32
  }
  func.func @transform_1(%arg0: i32, %arg1: i32) -> (i32, i32, i32) {
    %c0_i32 = arith.constant 0 : i32
    %c0_i32_0 = arith.constant 0 : i32
    %c0_i32_1 = arith.constant 0 : i32
    return %arg0, %c0_i32, %c0_i32_0 : i32, i32, i32
  }
  func.func @transform_2(%arg0: i32, %arg1: i32) -> (i32, i32) {
    %c0_i32 = arith.constant 0 : i32
    %c0_i32_0 = arith.constant 0 : i32
    %c0_i32_1 = arith.constant 0 : i32
    return %c0_i32, %c0_i32_0 : i32, i32
  }
  func.func @transform_3(%arg0: i32, %arg1: i32) -> (i32, i32) {
    %c0_i32 = arith.constant 0 : i32
    %c0_i32_0 = arith.constant 0 : i32
    %c0_i32_1 = arith.constant 0 : i32
    return %c0_i32, %c0_i32_0 : i32, i32
  }
  func.func @transform_4(%arg0: i32, %arg1: i32) -> (i32, i32) {
    %c0_i32 = arith.constant 0 : i32
    %c0_i32_0 = arith.constant 0 : i32
    %c0_i32_1 = arith.constant 0 : i32
    return %c0_i32, %c0_i32_0 : i32, i32
  }
  func.func @transform_5(%arg0: i32, %arg1: i32) -> (i32, i32, i32) {
    %c0_i32 = arith.constant 0 : i32
    %c0_i32_0 = arith.constant 0 : i32
    %c0_i32_1 = arith.constant 0 : i32
    return %arg1, %c0_i32, %c0_i32_0 : i32, i32, i32
  }
  func.func @transform_6(%arg0: i32, %arg1: i32) -> (i32, i32, i32) {
    %c0_i32 = arith.constant 0 : i32
    %c0_i32_0 = arith.constant 0 : i32
    %c0_i32_1 = arith.constant 0 : i32
    return %arg1, %c0_i32, %c0_i32_0 : i32, i32, i32
  }
  func.func @transform_7(%arg0: i32, %arg1: i32) -> (i32, i32, i32) {
    %c0_i32 = arith.constant 0 : i32
    %c0_i32_0 = arith.constant 0 : i32
    %c0_i32_1 = arith.constant 0 : i32
    return %arg1, %c0_i32, %c0_i32_0 : i32, i32, i32
  }
  func.func @transform_8(%arg0: i32, %arg1: i32) -> (i32, i32, i32) {
    %c0_i32 = arith.constant 0 : i32
    %c0_i32_0 = arith.constant 0 : i32
    %c0_i32_1 = arith.constant 0 : i32
    return %arg1, %c0_i32, %c0_i32_0 : i32, i32, i32
  }
  func.func @transform_9(%arg0: i32, %arg1: i32) -> (i32, i32, i32) {
    %c0_i32 = arith.constant 0 : i32
    %c0_i32_0 = arith.constant 0 : i32
    %c0_i32_1 = arith.constant 0 : i32
    return %arg1, %c0_i32, %c0_i32_0 : i32, i32, i32
  }
  func.func @transform_10(%arg0: i32, %arg1: i32) -> (i32, i32, i32) {
    %c0_i32 = arith.constant 0 : i32
    %c0_i32_0 = arith.constant 0 : i32
    %c0_i32_1 = arith.constant 0 : i32
    return %arg1, %c0_i32, %c0_i32_0 : i32, i32, i32
  }
  func.func @transform_11(%arg0: i32, %arg1: i32) -> (i32, i32, i32) {
    %c0_i32 = arith.constant 0 : i32
    %c0_i32_0 = arith.constant 0 : i32
    %c0_i32_1 = arith.constant 0 : i32
    return %arg1, %c0_i32, %c0_i32_0 : i32, i32, i32
  }
  func.func @transform_12(%arg0: i32, %arg1: i32) -> (i32, i32, i32) {
    %c0_i32 = arith.constant 0 : i32
    %c0_i32_0 = arith.constant 0 : i32
    %c0_i32_1 = arith.constant 0 : i32
    return %arg1, %c0_i32, %c0_i32_0 : i32, i32, i32
  }
  func.func @transform_13(%arg0: i32, %arg1: i32) -> (i32, i32, i32) {
    %c0_i32 = arith.constant 0 : i32
    %c0_i32_0 = arith.constant 0 : i32
    %c0_i32_1 = arith.constant 0 : i32
    return %arg1, %c0_i32, %c0_i32_0 : i32, i32, i32
  }
  func.func @transform_14(%arg0: i32, %arg1: i32) -> (i32, i32, i32) {
    %c0_i32 = arith.constant 0 : i32
    %c0_i32_0 = arith.constant 0 : i32
    %c0_i32_1 = arith.constant 0 : i32
    return %arg1, %c0_i32, %c0_i32_0 : i32, i32, i32
  }
  func.func @transform_15(%arg0: i32, %arg1: i32) -> (i32, i32, i32) {
    %c0_i32 = arith.constant 0 : i32
    %c0_i32_0 = arith.constant 0 : i32
    %c0_i32_1 = arith.constant 0 : i32
    return %arg1, %c0_i32, %c0_i32_0 : i32, i32, i32
  }
  func.func @transform_16(%arg0: i32, %arg1: i32) -> (i32, i32, i32) {
    %c0_i32 = arith.constant 0 : i32
    %c0_i32_0 = arith.constant 0 : i32
    %c0_i32_1 = arith.constant 0 : i32
    return %arg1, %c0_i32, %c0_i32_0 : i32, i32, i32
  }
  func.func @transform_17(%arg0: i32, %arg1: i32) -> (i32, i32, i32) {
    %c0_i32 = arith.constant 0 : i32
    %c0_i32_0 = arith.constant 0 : i32
    %c0_i32_1 = arith.constant 0 : i32
    return %arg1, %c0_i32, %c0_i32_0 : i32, i32, i32
  }
  func.func @transform_18(%arg0: i32, %arg1: i32) -> (i32, i32, i32) {
    %c0_i32 = arith.constant 0 : i32
    %c0_i32_0 = arith.constant 0 : i32
    %c0_i32_1 = arith.constant 0 : i32
    return %arg1, %c0_i32, %c0_i32_0 : i32, i32, i32
  }
  func.func @transform_19(%arg0: i32, %arg1: i32) -> (i32, i32, i32) {
    %c0_i32 = arith.constant 0 : i32
    %c0_i32_0 = arith.constant 0 : i32
    %c0_i32_1 = arith.constant 0 : i32
    return %arg0, %c0_i32, %c0_i32_0 : i32, i32, i32
  }
}

</mosaic_0001>

<bundles_post_ra>
// kernel: tpu_custom_call.1
= control target key start
LH: loop header
LB: loop body
LE: loop exit
PB: predicated region body
PF: predicated region fallthrough
CT: control target
= control target key end

     0   :  { %s5658_s0 = inlined_call_operand.hbm [shape: bf16[4,8,32], index: 0, kind: input, shape index: {}]   ;;  %s5659_s1 = inlined_call_operand.vmem [shape: bf16[4,1,32], index: 1, kind: input, shape index: {}]   ;;  %s5660_s2 = inlined_call_operand.hbm [shape: f32[8,32], index: 2, kind: input, shape index: {}]   ;;  %s5661_s3 = inlined_call_operand.vmem [shape: f32[32,32], index: 3, kind: input, shape index: {}]   ;;  %s5662_s4 = inlined_call_operand.vmem [shape: f32[8,32], index: 4, kind: input, shape index: {}]   ;;  %s5663_s5 = inlined_call_operand.vmem [shape: bf16[2,32,96], index: 5, kind: input, shape index: {}]   ;;  %s5664_s6 = inlined_call_operand.hbm [shape: f32[2,1,96], index: 6, kind: input, shape index: {}]   ;;  %s5665_s7 = inlined_call_operand.vmem [shape: bf16[2,32,32], index: 7, kind: input, shape index: {}]   ;;  %s5666_s8 = inlined_call_operand.hbm [shape: f32[2,1,32], index: 8, kind: input, shape index: {}]   ;;  %s5667_s9 = inlined_call_operand.vmem [shape: bf16[2,32,32], index: 9, kind: input, shape index: {}]   ;;  %s5668_s10 = inlined_call_operand.hbm [shape: f32[2,1,32], index: 10, kind: input, shape index: {}]   ;;  %s5669_s11 = inlined_call_operand.hbm [shape: bf16[2,32,32], index: 11, kind: input, shape index: {}]   ;;  %s5670_s12 = inlined_call_operand.vmem [shape: f32[2,1,32], index: 12, kind: input, shape index: {}]   ;;  %s5671_s13 = inlined_call_operand.hbm [shape: bf16[2,32,64], index: 13, kind: input, shape index: {}]   ;;  %s5672_s14 = inlined_call_operand.vmem [shape: f32[2,1,64], index: 14, kind: input, shape index: {}]   ;;  %s5673_s15 = inlined_call_operand.vmem [shape: bf16[2,64,32], index: 15, kind: input, shape index: {}]   ;;  %s5674_s16 = inlined_call_operand.vmem [shape: f32[2,1,32], index: 16, kind: input, shape index: {}]   ;;  %s5675_s17 = inlined_call_operand.vmem [shape: f32[2,3,32], index: 17, kind: input, shape index: {}]   ;;  %s5676_s18 = inlined_call_operand.vmem [shape: f32[2,3,32], index: 18, kind: input, shape index: {}]   ;;  %s5677_s19 = inlined_call_operand.hbm [shape: bf16[4,8,32], index: 19, kind: output, shape index: {}]  }
   0x1   :  { %5700 = sst [smem:[#allocation27_spill]] %s5658_s0 }
   0x2   :  { %5701 = sst [smem:[#allocation28_spill]] %s5659_s1 }
   0x3   :  { %5702 = sst [smem:[#allocation29_spill]] %s5660_s2 }
   0x4   :  { %5703 = sst [smem:[#allocation30_spill]] %s5661_s3 }
   0x5   :  { %5704 = sst [smem:[#allocation31_spill]] %s5662_s4 }
   0x6   :  { %5705 = sst [smem:[#allocation32_spill]] %s5663_s5 }
   0x7   :  { %5706 = sst [smem:[#allocation33_spill]] %s5664_s6 }
   0x8   :  { %5707 = sst [smem:[#allocation34_spill]] %s5665_s7 }
   0x9   :  { %5708 = sst [smem:[#allocation35_spill]] %s5666_s8 }
   0xa   :  { %5709 = sst [smem:[#allocation36_spill]] %s5667_s9 }
   0xb   :  { %5710 = sst [smem:[#allocation37_spill]] %s5668_s10 }
   0xc   :  { %5711 = sst [smem:[#allocation38_spill]] %s5669_s11 }
   0xd   :  { %5712 = sst [smem:[#allocation39_spill]] %s5671_s13 }
   0xe   :  { %5713 = sst [smem:[#allocation40_spill]] %s5672_s14 }
   0xf   :  { %5714 = sst [smem:[#allocation41_spill]] %s5673_s15 }
  0x10   :  { %5715 = sst [smem:[#allocation42_spill]] %s5674_s16 }
  0x11   :  { %5716 = sst [smem:[#allocation43_spill]] %s5675_s17 }
  0x12   :  { %5717 = sst [smem:[#allocation44_spill]] %s5676_s18 }
  0x13   :  { %5718 = sst [smem:[#allocation45_spill]] %s5677_s19 }
  0x14   :  { %24 = vsyncpa [#allocation4], 0 }
  0x15   :  { %25 = vsyncpa [#allocation7], 0 }
  0x16   :  { %26 = vsyncpa [#allocation5], 0  ;;  %s4666_s0 = smov 0   ;;  %s4668_s30 = smov 0  }
  0x17   :  { %s4670_s20 = smov 0   ;;  %s4672_s21 = smov 0  }
  0x18   :  { %s4674_s1 = smov 0   ;;  %s4676_s22 = smov 0  }
  0x19 LB: > { %5719 = sst [smem:[#allocation18_spill]] %s4544_s1  ;;  %s4695_s2 = sadd.s32 4294967295, %s4548_s22   ;;  %s4548_s22 = sphi %s4676_s22, %s32_s22   ;;  %s4544_s1 = sphi %s4674_s1, %s5790_s1   ;;  %s4540_s21 = sphi %s4672_s21, %s5789_s21   ;;  %s4536_s20 = sphi %s4670_s20, %s5793_s20   ;;  %s4532_s30 = sphi %s4668_s30, %s5792_s30   ;;  %s4528_s0 = sphi %s4666_s0, %s5791_s0  }
  0x1a   : > { %5720 = sst [smem:[#allocation19_spill]] %s4548_s22  ;;  %p205_p0 = scmp.ne.s32.totalorder %s4532_s30, %s4528_s0 }
  0x1b   : > { %p5687_p1 = scmp.eq.s32.totalorder %s4695_s2, 0  ;;  %p3585_p2 = scmp.ge.s32.totalorder %s4548_s22, 1 }
  0x1c   : > { %p554_p3 = scmp.lt.s32.totalorder %s4548_s22, 3  ;;  %s4550_s25 = smov [#allocation3]  }
  0x1d   : > { %p4703_p4 = por %p5687_p1, %p205_p0  ;;  %s569_s3 = sshll.u32 %s4550_s25, 4  ;;  %s570_s3 = int_to_ptr.vmem [resolvable:$true] %s569_s3 }
  0x1e   : > { %p4707_p5 = pnand %p3585_p2, %p554_p3  ;;  %s41_s27 = sadd.s32 1, %s4544_s1 }
  0x1f   : > { %s5721_s23 = scalar_select %p4703_p4, 1, 0 }
  0x20   : > { %s5722_s24 = scalar_select %p4707_p5, 1, 0 }
  0x21   : > { %p4007_p6 = pneg %p4707_p5  ;;  %s4281_s28 = scalar_lea.vmem %s570_s3, 256 }
  0x22   : > { %p4282_p9 = scmp.ne.s32.totalorder %s570_s3, %s4281_s28  ;;  %p4289_p12 = scmp.lt.s32.totalorder %s570_s3, %s570_s3 }
  0x23   : > { %p4715_p7 = pnand %p4007_p6, %p5687_p1  ;;  %p4290_p13 = scmp.lt.s32.totalorder %s4281_s28, %s4281_s28 }
  0x25   : > { %p4272_p8 = pneg %p4715_p7  ;;  %p4291_p0 = por %p4290_p13, %p4289_p12 }
  0x27   : > { %p4284_p10 = pnand %p4282_p9, %p4272_p8 }
  0x29   : > { %p4285_p11 = pneg %p4284_p10 }
  0x2b   : > { %p4292_p2 = pnand %p4291_p0, %p4285_p11 }
  0x2d   : > { %4295 = shalt.err (!%p4292_p2)
}
  0x2e   : > { %s5680_s29 = smov 64   ;;  %s5682_s0 = smov 4  }
  0x2f   : > { %s5724_s19 = sld [smem:[#allocation27_spill]]  ;;  %p42_p3 = scmp.ge.s32.totalorder %s41_s27, 2 }
  0x30   : > { %s192_s4 = sadd.s32 1, %s4536_s20  ;;  %p199_p6 = scmp.ne.s32.totalorder %s4536_s20, %s4532_s30 }
  0x31   : > { %p200_p9 = scmp.eq.s32.totalorder %s4548_s22, 0  ;;  %s5795_s27 = smov (%p42_p3, %s41_s27), 0 }
  0x32   : > { %5725 = sst [smem:[#allocation20_spill]] %s5795_s27  ;;  %p4032_p11 = scmp.lt.s32.totalorder %s4548_s22, 2 }
  0x33   : > { %p201_p10 = por %p200_p9, %p199_p6  ;;  %s189_s18 = ssub.s32 %s4544_s1, %s5795_s27 }
  0x34   : > { %s616_s17 = sand.u32 1, %s4548_s22   ;;  %p190_p12 = scmp.eq.s32.totalorder %s189_s18, 0 }
  0x35   : > { %4010 = dma.hbm_to_vmem [thread:$0]  (!%p4715_p7), %s5724_s19, 256, %s570_s3, [#allocation4], %s5680_s29, %s5680_s29, %s5682_s0  }
  0x36   : > { %s4744_s15 = sand.u32 1, %s4536_s20   ;;  %s4747_s16 = sshll.u32 %s4544_s1, 4 }
  0x37   : > { %s4750_s19 = scalar_select %p190_p12, %s4536_s20, %s192_s4  }
  0x38   : > { %s5727_s6 = sld [smem:[#allocation33_spill]]  ;;  %s619_s29 = scalar_lea.vmem [#allocation8], %s4744_s15 }
  0x39   : > { %5726 = sst [smem:[#allocation21_spill]] %s4750_s19  ;;  %s626_s0 = sshll.u32 %s619_s29, 4  ;;  %s627_s0 = int_to_ptr.vmem [resolvable:$true] %s626_s0 }
  0x3a   : > { %p4757_p13 = pnand %p4032_p11, %p201_p10  ;;  %s5729_s8 = sld [smem:[#allocation35_spill]] }
  0x3b   : > { %s4765_s9 = scalar_lea.sflag [#allocation4], %s616_s17  ;;  %s4309_s3 = scalar_lea.vmem %s627_s0, 16 }
  0x3c   : > { %p4769_p0 = pneg %p4757_p13  ;;  %p4310_p2 = scmp.ne.s32.totalorder %s627_s0, %s4309_s3 }
  0x3d   : > { %s4553_s29 = smov [#allocation8]  }
  0x3e   : > { %s624_s28 = scalar_lea.hbm %s5727_s6, %s4747_s16  ;;  %p4312_p3 = pnand %p4310_p2, %p4769_p0 }
  0x3f   : > { %s4314_s25 = sshll.u32 %s4553_s29, 4  ;;  %s4315_s25 = int_to_ptr.vmem [resolvable:$false] %s4314_s25 }
  0x40   : > { %p4313_p6 = pneg %p4312_p3  ;;  %s4316_s6 = scalar_lea.vmem %s4315_s25, 32 }
  0x41   : > { %p4317_p9 = scmp.lt.s32.totalorder %s627_s0, %s4315_s25  ;;  %p4318_p10 = scmp.lt.s32.totalorder %s4316_s6, %s4309_s3 }
  0x43   : > { %p4319_p11 = por %p4318_p10, %p4317_p9 }
  0x45   : > { %p4320_p12 = pnand %p4319_p11, %p4313_p6 }
  0x47   : > { %4323 = shalt.err (!%p4320_p12)
}
  0x48   : > { %4017 = dma.hbm_to_vmem [thread:$0]  (!%p4757_p13), %s624_s28, 16, %s627_s0, %s4765_s9  }
  0x49   : > { %s644_s17 = scalar_lea.vmem [#allocation9], %s4744_s15  ;;  %s5731_s10 = sld [smem:[#allocation37_spill]] }
  0x4a   : > { %s651_s27 = sshll.u32 %s644_s17, 4  ;;  %s4554_s6 = smov [#allocation9]   ;;  %s652_s27 = int_to_ptr.vmem [resolvable:$true] %s651_s27 }
  0x4b   : > { %s4337_s19 = scalar_lea.vmem %s652_s27, 16  ;;  %s4342_s3 = sshll.u32 %s4554_s6, 4  ;;  %s4343_s3 = int_to_ptr.vmem [resolvable:$false] %s4342_s3 }
  0x4c   : > { %p4338_p2 = scmp.ne.s32.totalorder %s652_s27, %s4337_s19  ;;  %s4344_s25 = scalar_lea.vmem %s4343_s3, 32 }
  0x4d   : > { %p4345_p9 = scmp.lt.s32.totalorder %s652_s27, %s4343_s3  ;;  %p4346_p10 = scmp.lt.s32.totalorder %s4344_s25, %s4337_s19 }
  0x4e   : > { %p4340_p3 = pnand %p4338_p2, %p4769_p0 }
  0x4f   : > { %p4347_p11 = por %p4346_p10, %p4345_p9 }
  0x50   : > { %p4341_p6 = pneg %p4340_p3 }
  0x52   : > { %p4348_p12 = pnand %p4347_p11, %p4341_p6 }
  0x54   : > { %4351 = shalt.err (!%p4348_p12)
}
  0x55   : > { %s5732_s28 = scalar_lea.hbm %s5729_s8, %s4747_s16  ;;  %s669_s17 = scalar_lea.vmem [#allocation10], %s4744_s15 }
  0x56   : > { %4020 = dma.hbm_to_vmem [thread:$0]  (!%p4757_p13), %s5732_s28, 16, %s652_s27, %s4765_s9  }
  0x57   : > { %s676_s18 = sshll.u32 %s669_s17, 4  ;;  %s5686_s6 = sshll.u32 %s4744_s15, 4  ;;  %s677_s18 = int_to_ptr.vmem [resolvable:$true] %s676_s18 }
  0x58   : > { %s4365_s19 = scalar_lea.vmem %s677_s18, 16  ;;  %s4555_s3 = smov [#allocation10]  }
  0x59   : > { %p4366_p2 = scmp.ne.s32.totalorder %s677_s18, %s4365_s19  ;;  %s4370_s25 = sshll.u32 %s4555_s3, 4  ;;  %s4371_s25 = int_to_ptr.vmem [resolvable:$false] %s4370_s25 }
  0x5a   : > { %s4372_s29 = scalar_lea.vmem %s4371_s25, 32  ;;  %p4373_p9 = scmp.lt.s32.totalorder %s677_s18, %s4371_s25 }
  0x5b   : > { %p4368_p3 = pnand %p4366_p2, %p4769_p0  ;;  %p4374_p10 = scmp.lt.s32.totalorder %s4372_s29, %s4365_s19 }
  0x5d   : > { %p4369_p6 = pneg %p4368_p3  ;;  %p4375_p11 = por %p4374_p10, %p4373_p9 }
  0x5f   : > { %p4376_p12 = pnand %p4375_p11, %p4369_p6 }
  0x61   : > { %4379 = shalt.err (!%p4376_p12)
}
  0x62   : > { %s5733_s22 = scalar_lea.hbm %s5731_s10, %s4747_s16  ;;  %s3686_s28 = sshll.u32 %s4544_s1, 8 }
  0x63   : > { %4023 = dma.hbm_to_vmem [thread:$0]  (!%p4757_p13), %s5733_s22, 16, %s677_s18, %s4765_s9  }
  0x64   : > { %s687_s17 = scalar_lea.vmem [#allocation11], %s5686_s6  ;;  %s5734_s11 = sld [smem:[#allocation38_spill]] }
  0x65   : > { %s694_s3 = sshll.u32 %s687_s17, 4  ;;  %s4556_s27 = smov [#allocation11]   ;;  %s695_s3 = int_to_ptr.vmem [resolvable:$true] %s694_s3 }
  0x66   : > { %s4393_s8 = scalar_lea.vmem %s695_s3, 256  ;;  %s4398_s16 = sshll.u32 %s4556_s27, 4  ;;  %s4399_s16 = int_to_ptr.vmem [resolvable:$false] %s4398_s16 }
  0x67   : > { %p4394_p2 = scmp.ne.s32.totalorder %s695_s3, %s4393_s8  ;;  %s4400_s0 = scalar_lea.vmem %s4399_s16, 512 }
  0x68   : > { %p4401_p9 = scmp.lt.s32.totalorder %s695_s3, %s4399_s16  ;;  %p4402_p10 = scmp.lt.s32.totalorder %s4400_s0, %s4393_s8 }
  0x69   : > { %p4396_p3 = pnand %p4394_p2, %p4769_p0 }
  0x6a   : > { %s693_s25 = scalar_lea.hbm %s5734_s11, %s3686_s28  ;;  %p4403_p11 = por %p4402_p10, %p4401_p9 }
  0x6b   : > { %p4397_p6 = pneg %p4396_p3 }
  0x6d   : > { %p4404_p12 = pnand %p4403_p11, %p4397_p6 }
  0x6f   : > { %4407 = shalt.err (!%p4404_p12)
}
  0x70   : > { %s5735_s18 = smov 4   ;;  %s5736_s22 = smov 64  }
  0x71   : > { %4026 = dma.hbm_to_vmem [thread:$0]  (!%p4757_p13), %s693_s25, 256, %s695_s3, %s4765_s9, %s5736_s22, %s5736_s22, %s5735_s18  }
  0x72   : > { %s4557_s17 = smov [#allocation6]   ;;  %s5737_s13 = sld [smem:[#allocation39_spill]] }
  0x73   : > { %s591_s29 = sshll.u32 %s4557_s17, 4  ;;  %s5738_s8 = sshll.u32 %s4744_s15, 4  ;;  %s592_s29 = int_to_ptr.vmem [resolvable:$true] %s591_s29 }
  0x74   : > { %s714_s16 = scalar_lea.vmem [#allocation12], %s5738_s8  ;;  %s4419_s10 = scalar_lea.vmem %s592_s29, 128 }
  0x75   : > { %s721_s0 = sshll.u32 %s714_s16, 4  ;;  %p4420_p2 = scmp.ne.s32.totalorder %s592_s29, %s4419_s10  ;;  %s722_s0 = int_to_ptr.vmem [resolvable:$true] %s721_s0 }
  0x76   : > { %p4427_p9 = scmp.lt.s32.totalorder %s592_s29, %s592_s29  ;;  %p4428_p10 = scmp.lt.s32.totalorder %s4419_s10, %s4419_s10 }
  0x77   : > { %p4422_p3 = pnand %p4420_p2, %p4272_p8 }
  0x78   : > { %s4822_s6 = scalar_lea.hbm %s5737_s13, %s3686_s28  ;;  %p4429_p11 = por %p4428_p10, %p4427_p9 }
  0x79   : > { %p4423_p6 = pneg %p4422_p3 }
  0x7b   : > { %p4430_p12 = pnand %p4429_p11, %p4423_p6 }
  0x7d   : > { %4433 = shalt.err (!%p4430_p12)
}
  0x7e   : > { %s5739_s25 = sld [smem:[#allocation29_spill]]  ;;  %s4447_s15 = scalar_lea.vmem %s722_s0, 256 }
  0x7f   : > { %p4448_p1 = scmp.ne.s32.totalorder %s722_s0, %s4447_s15  ;;  %s4558_s17 = smov [#allocation12]  }
  0x80   : > { %s4452_s19 = sshll.u32 %s4558_s17, 4  ;;  %s4453_s19 = int_to_ptr.vmem [resolvable:$false] %s4452_s19 }
  0x81   : > { %p4450_p4 = pnand %p4448_p1, %p4769_p0  ;;  %s4454_s10 = scalar_lea.vmem %s4453_s19, 512 }
  0x82   : > { %p4455_p8 = scmp.lt.s32.totalorder %s722_s0, %s4453_s19  ;;  %p4456_p2 = scmp.lt.s32.totalorder %s4454_s10, %s4447_s15 }
  0x83   : > { %p4451_p5 = pneg %p4450_p4 }
  0x84   : > { %4013 = dma.hbm_to_vmem [thread:$0]  (!%p4715_p7), %s5739_s25, 128, %s592_s29, [#allocation7]  }
  0x85   : > { %p4457_p3 = por %p4456_p2, %p4455_p8 }
  0x87   : > { %p4458_p6 = pnand %p4457_p3, %p4451_p5 }
  0x89   : > { %4461 = shalt.err (!%p4458_p6)
}
  0x8a   : > { %4029 = dma.hbm_to_vmem [thread:$0]  (!%p4757_p13), %s4822_s6, 256, %s722_s0, %s4765_s9, %s5736_s22, %s5736_s22, %s5735_s18  }
  0x8b   : > { %p5740_p1 = scmp.ne.s32.totalorder %s5722_s24, 0 }
  0x8d   : > { %767 = sbr.rel (%p5740_p1) target bundleno = 6593 (0x19c1), region = 96 }
  0x92   : > { %p5741_p4 = scmp.eq.s32.totalorder %s4695_s2, 0 }
  0x94   : > { %4511 = dma.done.wait (%p5741_p4), [#allocation4], 256   ;;  %p5742_p7 = pmov %p5741_p4 }
  0x95   : > { %p5743_p5 = pmov %p5741_p4 }
  0x96   : > { %4513 = vsyncadd (%p5742_p7), [#allocation4], 4294967040 }
  0x97   : > { %4515 = dma.done.wait (%p5743_p5), [#allocation7], 128   ;;  %p5744_p0 = pmov %p5741_p4 }
  0x98   : > { %s777_s14 = sand.u32 1, %s4695_s2   ;;  %s4855_s9 = sand.u32 1, %s4532_s30  }
  0x99   : > { %4517 = vsyncadd (%p5744_p0), [#allocation7], 4294967168  ;;  %s778_s24 = scalar_lea.sflag [#allocation4], %s777_s14  ;;  %p5745_p13 = scmp.ne.s32.totalorder %s5721_s23, 0 }
  0x9b   : > { %4519 = dma.done.wait (%p5745_p13), %s778_s24, 560  }
  0x9c   : > { %4521 = vsyncadd (%p5745_p13), %s778_s24, 4294966736  ;;  %s3602_s4 = sshll.u32 %s4855_s9, 4  ;;  %p928_p9 = scmp.lt.s32.totalorder %s4540_s21, 1 }
  0x9d   : > { %s5746_s5 = sld [smem:[#allocation32_spill]]  ;;  %s788_s24 = scalar_lea.vmem [#allocation9], %s4855_s9 }
  0x9e   : > { %s4865_s6 = scalar_select %p928_p9, %s4540_s21, 1 }
  0x9f   : > { %s5747_s7 = sld [smem:[#allocation34_spill]]  ;;  %s796_s22 = scalar_lea.vmem [#allocation10], %s4855_s9 }
  0xa0   : > { %s3688_s18 = sshll.u32 %s4865_s6, 4  ;;  %s5748_s17 = sld [smem:[#allocation36_spill]] }
  0xa1   : > { %s3691_s29 = sshll.u32 %s4865_s6, 5  ;;  %s5750_s27 = sld [smem:[#allocation42_spill]] }
  0xa2   : > { %s5751_s13 = sld [smem:[#allocation41_spill]]  ;;  %s3612_s3 = sshll.u32 %s4865_s6, 2 }
  0xa3   : > { %s4875_s16 = scalar_lea.vmem %s5746_s5, %s3688_s18  ;;  %s5752_s25 = sld [smem:[#allocation43_spill]] }
  0xa4   : > { %s5753_s10 = sld [smem:[#allocation44_spill]]  ;;  %s4914_s26 = scalar_lea.vmem [#allocation11], %s3602_s4 }
  0xa5   : > { %s4880_s28 = scalar_lea.vmem %s5747_s7, %s3688_s18  ;;  %s4916_s23 = scalar_lea.vmem [#allocation12], %s3602_s4 }
  0xa6   : > { %s4885_s19 = scalar_lea.vmem %s5748_s17, %s3688_s18  ;;  %p3614_p10 = scmp.ne.s32.totalorder %s4540_s21, 0 }
  0xa7   : > { %s956_s8 = scalar_lea.vmem %s5750_s27, %s4865_s6 }
  0xa8   : > { %s4899_s0 = scalar_lea.vmem %s5751_s13, %s3691_s29  ;;  %970 = sbr.rel (%p3614_p10) target bundleno = 180 (0xb4), region = 128 }
  0xa9   : > { %s4905_s18 = scalar_lea.vmem %s5752_s25, %s3612_s3 }
  0xaa   : > { %s4910_s14 = scalar_lea.vmem %s5753_s10, %s3612_s3 }
  0xad   : > { %v3693_v0 = vld [vmem:[#allocation3] sm:$0xff]   ;;  %v979_v1 = vld [vmem:[#allocation6] sm:$0xff]  ;;  %v3700_v2 = vld [vmem:[#allocation3 + $0x8] sm:$0xff]   ;;  %vm984_vm0 = vcmask 261120  }
  0xae   : > { %v3694_v3 = vunpack.c.l.bf16 %v3693_v0  ;;  %v3695_v4 = vunpack.c.h.bf16 %v3693_v0  ;;  %v3698_v5 = vunpack.c.l.bf16 %v3700_v2  ;;  %v3699_v6 = vunpack.c.h.bf16 %v3700_v2 }
  0xb0   : > { %v980_v7 = vadd.f32 %v3694_v3, %v979_v1  ;;  %v981_v8 = vadd.f32 %v3695_v4, %v979_v1  ;;  %v982_v9 = vadd.f32 %v3698_v5, %v979_v1  ;;  %v983_v10 = vadd.f32 %v3699_v6, %v979_v1 }
  0xb2   : > { %985 = vst.msk [vmem:[#allocation2] sm:$0xff] %vm984_vm0, %v980_v7  ;;  %986 = vst.msk [vmem:[#allocation2 + $0x8] sm:$0xff] %vm984_vm0, %v981_v8 }
  0xb3   : > { %987 = vst.msk [vmem:[#allocation2 + $0x10] sm:$0xff] %vm984_vm0, %v982_v9  ;;  %988 = vst.msk [vmem:[#allocation2 + $0x18] sm:$0xff] %vm984_vm0, %v983_v10 }
  0xb4 PF: > { %v4096_v11 = vld [vmem:[%s4875_s16 + $0x8] sm:$0xff]   ;;  %v4097_v12 = vld [vmem:[%s4875_s16] sm:$0xff]   ;;  %vm1025_vm1 = vcmask 261120   ;;  %v1083_v19 = vlaneseq  ;;  %s5758_s11 = sld [smem:[#allocation31_spill]]  ;;  %s5759_s13 = scalar_lea.vmem [#allocation8], %s4855_s9  ;;  %vm4562_vm2 = vmmov 0  }
  0xb5   : > { %3789 = vmatprep.subr.bf16.mxu0 %v4096_v11  ;;  %v3615_v29 = vld [vmem:[%s5759_s13] ss:$0 sm:$0xff]  ;;  %s4559_s1 = smov 96   ;;  %s5761_s29 = sld [smem:[#allocation30_spill]]  ;;  %vm2790_vm3 = vcmask 1041409   ;;  %vm2793_vm4 = vcmask 1042434  }
  0xb6   : > { %3790 = vmatpush3.bf16.msra.mxu0 %v4096_v11  ;;  %v4923_v20 = vshrl.u32 %v1083_v19, 7  ;;  %s4560_s5 = smov 64   ;;  %s5776_s17 = sld [smem:[#allocation28_spill]]  ;;  %vm2796_vm5 = vcmask 1043459   ;;  %vm3163_vm6 = vcmask 523264  }
  0xb7   : > { %3791 = vmatprep.subr.bf16.mxu0 %v4097_v12  ;;  %p3681_p11 = scmp.ne.s32.totalorder %s4540_s21, 1 }
  0xb8   : > { %5754 = vst [vmem:[#allocation22_spill] sm:$0xff] %v4923_v20  ;;  %v4926_v21 = vsub.s32 0, %v4923_v20  ;;  %v4929_v22 = vsub.s32 1, %v4923_v20  ;;  %v4932_v23 = vsub.s32 2, %v4923_v20  ;;  %v1649_v25 = vsub.s32 3, %v4923_v20 }
  0xb9   : > { %v989_v13 = vld [vmem:[#allocation2] sm:$0xff]  ;;  %v990_v14 = vld [vmem:[#allocation2 + $0x8] sm:$0xff]  ;;  %v1831_v26 = vsub.s32 4, %v4923_v20  ;;  %v2013_v27 = vsub.s32 5, %v4923_v20  ;;  %v2195_v28 = vsub.s32 6, %v4923_v20  ;;  %v2377_v30 = vsub.s32 7, %v4923_v20 }
  0xba   : > { %v991_v15 = vld [vmem:[#allocation2 + $0x10] sm:$0xff]  ;;  %v1000_v16 = vpack.c.bf16 %v990_v14, %v989_v13  ;;  %v992_v17 = vld [vmem:[#allocation2 + $0x18] sm:$0xff]  ;;  %3792 = vmatpush3.bf16.msra.mxu0 %v4097_v12  ;;  %5755 = vst [vmem:[#allocation23_spill] sm:$0xff] %v4926_v21  ;;  %5756 = vst [vmem:[#allocation24_spill] sm:$0xff] %v4929_v22 }
  0xbb   : > { %v1001_v18 = vpack.c.bf16 %v992_v17, %v991_v15  ;;  %5757 = vst [vmem:[#allocation25_spill] sm:$0xff] %v4932_v23  ;;  %v993_v24 = vld [vmem:[%s5758_s11] sm:$0xff] }
  0xbc   : > { %3793 = vmatprep.mubr.msk.bf16.mxu0 %vm1025_vm1, %v1000_v16  ;;  %v4945_v31 = vrot.slane %v993_v24, %v4926_v21  ;;  %v4948_v32 = vrot.slane %v993_v24, %v4929_v22  ;;  %v4951_v33 = vrot.slane %v993_v24, %v4932_v23  ;;  %v4953_v35 = vrot.slane %v993_v24, %v1649_v25 }
  0xbd   : > { %3794 = vmatmul.mubr.msk.bf16.vlgmr.msra.gmra.mxu0 %vm1025_vm1, %v1001_v18  ;;  %v4955_v36 = vrot.slane %v993_v24, %v1831_v26  ;;  %v4957_v37 = vrot.slane %v993_v24, %v2013_v27  ;;  %v4959_v38 = vrot.slane %v993_v24, %v2195_v28  ;;  %v4961_v41 = vrot.slane %v993_v24, %v2377_v30 }
  0xbf   : > { %5760 = vst [vmem:[#allocation26_spill] sm:$0xff] %v4961_v41 }
 0x17d   : > { %v3795_v34 = vpop.f32.mrf.mxu0 }
 0x17e   : > { %v1075_v39 = vadd.f32 %v3795_v34, %v3615_v29 }
 0x17f   : > { %v1066_v40 = vpop.f32.mrf.mxu0 }
 0x180   : > { %v1067_v42 = vadd.f32 %v3615_v29, %v1066_v40  ;;  %v4964_v43 = vmul.f32 %v4945_v31, %v1075_v39  ;;  %v4967_v44 = vmul.f32 %v4948_v32, %v1075_v39  ;;  %v4970_v45 = vmul.f32 %v4951_v33, %v1075_v39 }
 0x181   : > { %v3796_v46 = vpop.f32.mrf.mxu0  ;;  %v4973_v47 = vmul.f32 %v4953_v35, %v1075_v39  ;;  %v4976_v48 = vmul.f32 %v4955_v36, %v1075_v39  ;;  %v4979_v49 = vmul.f32 %v4957_v37, %v1075_v39  ;;  %v4982_v50 = vmul.f32 %v4959_v38, %v1075_v39 }
 0x182   : > { %v1078_v51 = vadd.f32 %v3796_v46, %v3615_v29  ;;  %v1087_v52 = vmul.f32 %v4945_v31, %v1067_v42  ;;  %v4986_v53 = vmul.f32 %v4948_v32, %v1067_v42  ;;  %v4989_v54 = vmul.f32 %v4951_v33, %v1067_v42 }
 0x183   : > { %v1069_v55 = vpop.f32.mrf.mxu0  ;;  %v4992_v56 = vmul.f32 %v4953_v35, %v1067_v42  ;;  %v4995_v57 = vmul.f32 %v4955_v36, %v1067_v42  ;;  %v4998_v58 = vmul.f32 %v4957_v37, %v1067_v42  ;;  %v5001_v59 = vmul.f32 %v4959_v38, %v1067_v42 }
 0x184   : > { %v1070_v60 = vadd.f32 %v3615_v29, %v1069_v55  ;;  %v5003_v61 = vpack.c.bf16 %v1078_v51, %v1075_v39  ;;  %v1090_v62 = vmul.f32 %v4945_v31, %v1078_v51  ;;  %v5007_v63 = vmul.f32 %v4948_v32, %v1078_v51 }
 0x185   : > { %v5010_v0 = vmul.f32 %v4951_v33, %v1078_v51  ;;  %v5013_v1 = vmul.f32 %v4953_v35, %v1078_v51  ;;  %v5016_v2 = vmul.f32 %v4955_v36, %v1078_v51  ;;  %v5019_v3 = vmul.f32 %v4957_v37, %v1078_v51 }
 0x186   : > { %1097 = vrot.lane.b32.xlu0 %v5003_v61, %s4559_s1  ;;  %v1088_v4 = vmul.f32 %v4945_v31, %v1070_v60  ;;  %v5023_v5 = vpack.c.bf16 %v1070_v60, %v1067_v42  ;;  %v1092_v6 = vpack.c.bf16 %v1090_v62, %v4964_v43  ;;  %v5027_v7 = vmul.f32 %v4948_v32, %v1070_v60 }
 0x187   : > { %v5032_v9 = vmul.f32 %v4951_v33, %v1070_v60  ;;  %v5037_v11 = vmul.f32 %v4953_v35, %v1070_v60  ;;  %v5044_v15 = vmul.f32 %v4955_v36, %v1070_v60  ;;  %v5053_v19 = vmul.f32 %v4957_v37, %v1070_v60 }
 0x188   : > { %v1091_v12 = vpack.c.bf16 %v1088_v4, %v1087_v52  ;;  %v5062_v26 = vmul.f32 %v4959_v38, %v1070_v60  ;;  %v5067_v28 = vmul.f32 %v4959_v38, %v1078_v51  ;;  %v5070_v29 = vmul.f32 %v4961_v41, %v1067_v42  ;;  %v5111_v4 = vld [vmem:[%s5761_s29 + $0x10] sm:$0xff]  ;;  %v5116_v52 = vld [vmem:[%s5761_s29] sm:$0xff] }
 0x189   : > { %v5073_v30 = vmul.f32 %v4961_v41, %v1070_v60  ;;  %v5078_v40 = vmul.f32 %v4961_v41, %v1075_v39  ;;  %v5081_v43 = vmul.f32 %v4961_v41, %v1078_v51 }
 0x18a   : > { %3801 = vmatprep.mubr.msk.bf16.mxu1 %vm1025_vm1, %v1091_v12  ;;  %1095 = vrot.lane.b32.xlu0 %v5023_v5, %s4559_s1 }
 0x1f8   : > { %v5089_v55 = vpop.permute.xlu0 %1097 }
 0x1f9   : > { %3969 = vmatprep.subr.msk.bf16.mxu1 %vm1025_vm1, %v5089_v55  ;;  %v5095_v39 = vsel %vm1025_vm1, %v5089_v55, 0 }
 0x1fa   : > { %3798 = vmatpush3.bf16.xpose.msra.mxu1 %v5095_v39 }
 0x1fc   : > { %v5098_v51 = vpop.permute.xlu0 %1095 }
 0x1fd   : > { %3970 = vmatprep.subr.msk.bf16.mxu1 %vm1025_vm1, %v5098_v51  ;;  %v5104_v60 = vsel %vm1025_vm1, %v5098_v51, 0 }
 0x202   : > { %3800 = vmatpush3.bf16.xpose.msra.mxu1 %v5104_v60 }
 0x209   : > { %3802 = vmatmul.mubr.msk.bf16.vlgmr.msra.gmra.mxu1 %vm1025_vm1, %v1092_v6 }
 0x2c9   : > { %v3803_v62 = vpop.f32.mrf.mxu1 }
 0x2ca   : > { %v1162_v12 = vmul.f32 0.5, %v3803_v62  ;;  %v5124_v62 = vld [vmem:[%s5761_s29 + $0x8] sm:$0xff] }
 0x2cb   : > { %v1145_v42 = vpop.f32.mrf.mxu1 }
 0x2cc   : > { %v1160_v46 = vmul.f32 0.5, %v1145_v42  ;;  %v1166_v34 = vadd.f32 %v1162_v12, %v5111_v4  ;;  %v5130_v42 = vld [vmem:[%s5761_s29 + $0x18] sm:$0xff] }
 0x2cd   : > { %v3804_v25 = vpop.f32.mrf.mxu1 }
 0x2ce   : > { %v1174_v27 = vsel %vm1025_vm1, %v1166_v34, -inf  ;;  %v1164_v6 = vadd.f32 %v1160_v46, %v5116_v52  ;;  %v1163_v24 = vmul.f32 0.5, %v3804_v25 }
 0x2cf   : > { %1175 = vmax.xlane.f32.xlu0 %v1174_v27  ;;  %v1148_v18 = vpop.f32.mrf.mxu1 }
 0x2d0   : > { %v1161_v14 = vmul.f32 0.5, %v1148_v18  ;;  %v1168_v17 = vsel %vm1025_vm1, %v1164_v6, -inf  ;;  %v1167_v46 = vadd.f32 %v1163_v24, %v5130_v42 }
 0x2d1   : > { %1169 = vmax.xlane.f32.xlu1 %v1168_v17 }
 0x2d2   : > { %v1165_v12 = vadd.f32 %v1161_v14, %v5124_v62  ;;  %v1177_v10 = vsel %vm1025_vm1, %v1167_v46, -inf }
 0x2d4   : > { %v1171_v27 = vsel %vm1025_vm1, %v1165_v12, -inf }
 0x2d5   : > { %1172 = vmax.xlane.f32.xlu1 %v1171_v27 }
 0x2d9   : > { %1178 = vmax.xlane.f32.xlu1 %v1177_v10 }
 0x2e5   : > { %1214 = vrot.lane.b32.xlu0 %v5023_v5, %s4560_s5 }
 0x358   : > { %v1176_v17 = vpop.xlane.xlu0 %1175 }
 0x359   : > { %v1182_v18 = vsub.f32 %v1166_v34, %v1176_v17 }
 0x35a   : > { %v1170_v25 = vpop.xlane.xlu1 %1169 }
 0x35b   : > { %v1188_v16 = vmul.f32 1.442695, %v1182_v18  ;;  %v1180_v8 = vsub.f32 %v1164_v6, %v1170_v25 }
 0x35d   : > { %4110 = vpow2.f32 %v1188_v16  ;;  %v1184_v13 = vmul.f32 1.442695, %v1180_v8 }
 0x35e   : > { %v1173_v14 = vpop.xlane.xlu1 %1172 }
 0x35f   : > { %4112 = vpow2.f32 %v1184_v13  ;;  %v1181_v23 = vsub.f32 %v1165_v12, %v1173_v14 }
 0x361   : > { %v1186_v27 = vmul.f32 1.442695, %v1181_v23 }
 0x362   : > { %v1179_v22 = vpop.xlane.xlu1 %1178 }
 0x363   : > { %v1183_v24 = vsub.f32 %v1167_v46, %v1179_v22  ;;  %v5148_v46 = vpop.permute.xlu0 %1214 }
 0x365   : > { %v1190_v21 = vmul.f32 1.442695, %v1183_v24 }
 0x367   : > { %4114 = vpow2.f32 %v1190_v21 }
 0x368   : > { %4116 = vpow2.f32 %v1186_v27 }
 0x36a   : > { %v4111_v10 = vpop.eup %4110 }
 0x36b   : > { %v1198_v41 = vsel %vm1025_vm1, %v4111_v10, 0.0 }
 0x36c   : > { %v4113_v5 = vpop.eup %4112  ;;  %1199 = vadd.xlane.f32.xlu1 %v1198_v41 }
 0x36d   : > { %v1192_v34 = vsel %vm1025_vm1, %v4113_v5, 0.0 }
 0x370   : > { %1193 = vadd.xlane.f32.xlu1 %v1192_v34 }
 0x374   : > { %v4115_v6 = vpop.eup %4114 }
 0x375   : > { %v1201_v8 = vsel %vm1025_vm1, %v4115_v6, 0.0  ;;  %v4117_v16 = vpop.eup %4116 }
 0x376   : > { %1202 = vadd.xlane.f32.xlu1 %v1201_v8  ;;  %v1195_v13 = vsel %vm1025_vm1, %v4117_v16, 0.0 }
 0x37a   : > { %1196 = vadd.xlane.f32.xlu1 %v1195_v13 }
 0x38b   : > { %1216 = vrot.lane.b32.xlu1 %v5003_v61, %s4560_s5 }
 0x3f5   : > { %v1200_v21 = vpop.xlane.xlu1 %1199 }
 0x3f9   : > { %v1194_v22 = vpop.xlane.xlu1 %1193 }
 0x3ff   : > { %v1203_v23 = vpop.xlane.xlu1 %1202 }
 0x400   : > { %4118 = vrcp.f32 %v1203_v23 }
 0x401   : > { %4120 = vrcp.f32 %v1194_v22 }
 0x402   : > { %4122 = vrcp.f32 %v1200_v21  ;;  %v5762_v21 = vpack.c.bf16 %v5027_v7, %v4986_v53 }
 0x403   : > { %v1197_v41 = vpop.xlane.xlu1 %1196 }
 0x404   : > { %4124 = vrcp.f32 %v1197_v41 }
 0x407   : > { %v5144_v12 = vpop.permute.xlu1 %1216 }
 0x408   : > { %3805 = vmatprep.subr.bf16.mxu0 %v5144_v12  ;;  %3821 = vmatprep.subr.bf16.mxu1 %v5144_v12 }
 0x409   : > { %3806 = vmatpush3.bf16.msra.mxu0 %v5144_v12  ;;  %3822 = vmatpush3.bf16.msra.mxu1 %v5144_v12 }
 0x40a   : > { %3807 = vmatprep.subr.bf16.mxu0 %v5148_v46  ;;  %3823 = vmatprep.subr.bf16.mxu1 %v5148_v46 }
 0x40d   : > { %3808 = vmatpush3.bf16.msra.mxu0 %v5148_v46  ;;  %3824 = vmatpush3.bf16.msra.mxu1 %v5148_v46  ;;  %v4119_v61 = vpop.eup %4118 }
 0x40e   : > { %3971 = vmatprep.subr.msk.bf16.mxu0 %vm1025_vm1, %v5089_v55  ;;  %3973 = vmatprep.subr.msk.bf16.mxu1 %vm1025_vm1, %v5089_v55  ;;  %v4121_v17 = vpop.eup %4120  ;;  %v1211_v14 = vmul.f32 %v4119_v61, %v4115_v6 }
 0x40f   : > { %v4123_v18 = vpop.eup %4122  ;;  %v1208_v24 = vmul.f32 %v4121_v17, %v4113_v5 }
 0x410   : > { %v1210_v34 = vmul.f32 %v4123_v18, %v4111_v10  ;;  %v5763_v10 = vpack.c.bf16 %v5007_v63, %v4967_v44 }
 0x411   : > { %v4125_v25 = vpop.eup %4124 }
 0x412   : > { %v1209_v27 = vmul.f32 %v4125_v25, %v4117_v16  ;;  %v1213_v13 = vpack.c.bf16 %v1211_v14, %v1210_v34 }
 0x414   : > { %v1212_v8 = vpack.c.bf16 %v1209_v27, %v1208_v24 }
 0x416   : > { %3809 = vmatprep.mubr.msk.bf16.mxu0 %vm1025_vm1, %v1212_v8 }
 0x417   : > { %3810 = vmatmul.mubr.msk.bf16.vlgmr.msra.gmra.mxu0 %vm1025_vm1, %v1213_v13 }
 0x418   : > { %3814 = vmatpush3.bf16.xpose.msra.mxu0 %v5095_v39  ;;  %3817 = vmatprep.mubr.msk.bf16.mxu0 %vm1025_vm1, %v5762_v21 }
 0x419   : > { %3972 = vmatprep.subr.msk.bf16.mxu0 %vm1025_vm1, %v5098_v51 }
 0x420   : > { %3816 = vmatpush3.bf16.xpose.msra.mxu0 %v5104_v60 }
 0x421   : > { %3837 = vmatprep.subr.bf16.mxu0 %v5144_v12 }
 0x427   : > { %3818 = vmatmul.mubr.msk.bf16.vlgmr.msra.gmra.mxu0 %vm1025_vm1, %v5763_v10 }
 0x428   : > { %3838 = vmatpush3.bf16.msra.mxu0 %v5144_v12 }
 0x429   : > { %3839 = vmatprep.subr.bf16.mxu0 %v5148_v46 }
 0x42c   : > { %3840 = vmatpush3.bf16.msra.mxu0 %v5148_v46 }
 0x42d   : > { %3975 = vmatprep.subr.msk.bf16.mxu0 %vm1025_vm1, %v5089_v55 }
 0x4d7   : > { %v5180_v53 = vpop.f32.mrf.mxu0 }
 0x4d9   : > { %v5182_v7 = vpop.f32.mrf.mxu0 }
 0x4db   : > { %v5184_v5 = vpop.f32.mrf.mxu0 }
 0x4dd   : > { %v5186_v6 = vpop.f32.mrf.mxu0 }
 0x4e7   : > { %v3819_v44 = vpop.f32.mrf.mxu0 }
 0x4e8   : > { %v1350_v16 = vmul.f32 0.5, %v3819_v44 }
 0x4e9   : > { %v1333_v63 = vpop.f32.mrf.mxu0 }
 0x4ea   : > { %v1348_v22 = vmul.f32 0.5, %v1333_v63  ;;  %v1354_v14 = vadd.f32 %v1350_v16, %v5111_v4 }
 0x4eb   : > { %v3820_v23 = vpop.f32.mrf.mxu0 }
 0x4ec   : > { %v1352_v41 = vadd.f32 %v1348_v22, %v5116_v52  ;;  %v1351_v17 = vmul.f32 0.5, %v3820_v23  ;;  %v1362_v27 = vsel %vm1025_vm1, %v1354_v14, -inf }
 0x4ed   : > { %v1336_v61 = vpop.f32.mrf.mxu0 }
 0x4ee   : > { %v1349_v18 = vmul.f32 0.5, %v1336_v61  ;;  %v1356_v25 = vsel %vm1025_vm1, %v1352_v41, -inf  ;;  %v1355_v8 = vadd.f32 %v1351_v17, %v5130_v42 }
 0x4ef   : > { %1357 = vmax.xlane.f32.xlu1 %v1356_v25 }
 0x4f0   : > { %v1353_v24 = vadd.f32 %v1349_v18, %v5124_v62  ;;  %v1365_v13 = vsel %vm1025_vm1, %v1355_v8, -inf }
 0x4f2   : > { %v1359_v34 = vsel %vm1025_vm1, %v1353_v24, -inf }
 0x4f3   : > { %1363 = vmax.xlane.f32.xlu1 %v1362_v27  ;;  %1360 = vmax.xlane.f32.xlu0 %v1359_v34 }
 0x4f7   : > { %1366 = vmax.xlane.f32.xlu1 %v1365_v13 }
 0x578   : > { %v1358_v21 = vpop.xlane.xlu1 %1357 }
 0x579   : > { %v1368_v10 = vsub.f32 %v1352_v41, %v1358_v21 }
 0x57b   : > { %v1372_v44 = vmul.f32 1.442695, %v1368_v10 }
 0x57c   : > { %v1364_v63 = vpop.xlane.xlu1 %1363  ;;  %v1361_v22 = vpop.xlane.xlu0 %1360 }
 0x57d   : > { %4126 = vpow2.f32 %v1372_v44  ;;  %v1370_v16 = vsub.f32 %v1354_v14, %v1364_v63  ;;  %v1369_v23 = vsub.f32 %v1353_v24, %v1361_v22 }
 0x57f   : > { %v1376_v61 = vmul.f32 1.442695, %v1370_v16  ;;  %v1374_v18 = vmul.f32 1.442695, %v1369_v23 }
 0x580   : > { %v1367_v25 = vpop.xlane.xlu1 %1366 }
 0x581   : > { %4128 = vpow2.f32 %v1376_v61  ;;  %v1371_v20 = vsub.f32 %v1355_v8, %v1367_v25 }
 0x582   : > { %4130 = vpow2.f32 %v1374_v18 }
 0x583   : > { %v1378_v17 = vmul.f32 1.442695, %v1371_v20 }
 0x585   : > { %4132 = vpow2.f32 %v1378_v17 }
 0x58a   : > { %v4127_v27 = vpop.eup %4126 }
 0x58b   : > { %v1380_v34 = vsel %vm1025_vm1, %v4127_v27, 0.0 }
 0x58c   : > { %1381 = vadd.xlane.f32.xlu1 %v1380_v34 }
 0x58e   : > { %v4129_v13 = vpop.eup %4128 }
 0x58f   : > { %v4131_v41 = vpop.eup %4130  ;;  %v1386_v21 = vsel %vm1025_vm1, %v4129_v13, 0.0 }
 0x590   : > { %1387 = vadd.xlane.f32.xlu1 %v1386_v21  ;;  %v1383_v14 = vsel %vm1025_vm1, %v4131_v41, 0.0 }
 0x591   : > { %1384 = vadd.xlane.f32.xlu0 %v1383_v14 }
 0x592   : > { %v4133_v24 = vpop.eup %4132 }
 0x593   : > { %v1389_v10 = vsel %vm1025_vm1, %v4133_v24, 0.0 }
 0x595   : > { %1390 = vadd.xlane.f32.xlu0 %v1389_v10  ;;  %v5764_v10 = vpack.c.bf16 %v5032_v9, %v4989_v54  ;;  %v1277_v9 = vmul.f32 %v5180_v53, %v4945_v31  ;;  %v1276_v53 = vmul.f32 %v5186_v6, %v4945_v31 }
 0x615   : > { %v1382_v8 = vpop.xlane.xlu1 %1381 }
 0x616   : > { %4134 = vrcp.f32 %v1382_v8 }
 0x619   : > { %v1388_v20 = vpop.xlane.xlu1 %1387 }
 0x61a   : > { %v1385_v44 = vpop.xlane.xlu0 %1384 }
 0x61b   : > { %4136 = vrcp.f32 %v1385_v44 }
 0x61c   : > { %4138 = vrcp.f32 %v1388_v20  ;;  %v1278_v20 = vmul.f32 %v5184_v5, %v4945_v31 }
 0x61e   : > { %v1391_v63 = vpop.xlane.xlu0 %1390 }
 0x61f   : > { %4140 = vrcp.f32 %v1391_v63 }
 0x623   : > { %v4135_v22 = vpop.eup %4134 }
 0x624   : > { %v1396_v23 = vmul.f32 %v4135_v22, %v4127_v27  ;;  %v5765_v27 = vpack.c.bf16 %v5010_v0, %v4970_v45  ;;  %v1275_v45 = vmul.f32 %v5182_v7, %v4945_v31 }
 0x628   : > { %v4137_v16 = vpop.eup %4136 }
 0x629   : > { %v1397_v61 = vmul.f32 %v4137_v16, %v4131_v41  ;;  %v4139_v18 = vpop.eup %4138 }
 0x62a   : > { %v1398_v34 = vmul.f32 %v4139_v18, %v4129_v13 }
 0x62b   : > { %v1400_v25 = vpack.c.bf16 %v1397_v61, %v1396_v23 }
 0x62c   : > { %v4141_v17 = vpop.eup %4140 }
 0x62d   : > { %3825 = vmatprep.mubr.msk.bf16.mxu1 %vm1025_vm1, %v1400_v25  ;;  %v1399_v21 = vmul.f32 %v4141_v17, %v4133_v24 }
 0x62f   : > { %v1401_v14 = vpack.c.bf16 %v1399_v21, %v1398_v34 }
 0x631   : > { %3826 = vmatmul.mubr.msk.bf16.vlgmr.msra.gmra.mxu1 %vm1025_vm1, %v1401_v14 }
 0x632   : > { %3830 = vmatpush3.bf16.xpose.msra.mxu1 %v5095_v39  ;;  %3833 = vmatprep.mubr.msk.bf16.mxu1 %vm1025_vm1, %v5764_v10 }
 0x633   : > { %3974 = vmatprep.subr.msk.bf16.mxu1 %vm1025_vm1, %v5098_v51 }
 0x63a   : > { %3832 = vmatpush3.bf16.xpose.msra.mxu1 %v5104_v60 }
 0x63b   : > { %3853 = vmatprep.subr.bf16.mxu1 %v5144_v12 }
 0x641   : > { %3834 = vmatmul.mubr.msk.bf16.vlgmr.msra.gmra.mxu1 %vm1025_vm1, %v5765_v27 }
 0x642   : > { %3854 = vmatpush3.bf16.msra.mxu1 %v5144_v12 }
 0x643   : > { %3855 = vmatprep.subr.bf16.mxu1 %v5148_v46 }
 0x646   : > { %3856 = vmatpush3.bf16.msra.mxu1 %v5148_v46 }
 0x647   : > { %3977 = vmatprep.subr.msk.bf16.mxu1 %vm1025_vm1, %v5089_v55 }
 0x6f1   : > { %v3827_v54 = vpop.f32.mrf.mxu1 }
 0x6f2   : > { %v1459_v13 = vmul.f32 %v3827_v54, %v4948_v32 }
 0x6f3   : > { %v1442_v41 = vpop.f32.mrf.mxu1 }
 0x6f4   : > { %v5225_v0 = vadd.f32 %v1459_v13, %v1277_v9  ;;  %v1457_v24 = vmul.f32 %v1442_v41, %v4948_v32 }
 0x6f5   : > { %v3828_v8 = vpop.f32.mrf.mxu1 }
 0x6f6   : > { %v5230_v44 = vadd.f32 %v1457_v24, %v1275_v45  ;;  %v1460_v63 = vmul.f32 %v3828_v8, %v4948_v32 }
 0x6f7   : > { %v1445_v22 = vpop.f32.mrf.mxu1 }
 0x6f8   : > { %v5235_v16 = vadd.f32 %v1460_v63, %v1278_v20  ;;  %v1458_v7 = vmul.f32 %v1445_v22, %v4948_v32 }
 0x6fa   : > { %v5238_v23 = vadd.f32 %v1458_v7, %v1276_v53 }
 0x701   : > { %v3835_v61 = vpop.f32.mrf.mxu1 }
 0x702   : > { %v1532_v25 = vmul.f32 0.5, %v3835_v61 }
 0x703   : > { %v1515_v18 = vpop.f32.mrf.mxu1 }
 0x704   : > { %v1530_v17 = vmul.f32 0.5, %v1515_v18  ;;  %v1536_v31 = vadd.f32 %v1532_v25, %v5111_v4 }
 0x705   : > { %v3836_v34 = vpop.f32.mrf.mxu1 }
 0x706   : > { %v1534_v5 = vadd.f32 %v1530_v17, %v5116_v52  ;;  %v1533_v14 = vmul.f32 0.5, %v3836_v34  ;;  %v1544_v32 = vsel %vm1025_vm1, %v1536_v31, -inf }
 0x707   : > { %v1518_v21 = vpop.f32.mrf.mxu1 }
 0x708   : > { %v1531_v10 = vmul.f32 0.5, %v1518_v21  ;;  %v1538_v27 = vsel %vm1025_vm1, %v1534_v5, -inf  ;;  %v1537_v9 = vadd.f32 %v1533_v14, %v5130_v42 }
 0x709   : > { %1539 = vmax.xlane.f32.xlu1 %v1538_v27 }
 0x70a   : > { %v1535_v6 = vadd.f32 %v1531_v10, %v5124_v62  ;;  %v1547_v13 = vsel %vm1025_vm1, %v1537_v9, -inf }
 0x70c   : > { %v1541_v54 = vsel %vm1025_vm1, %v1535_v6, -inf }
 0x70d   : > { %1545 = vmax.xlane.f32.xlu1 %v1544_v32  ;;  %1542 = vmax.xlane.f32.xlu0 %v1541_v54 }
 0x711   : > { %1548 = vmax.xlane.f32.xlu0 %v1547_v13 }
 0x792   : > { %v1540_v41 = vpop.xlane.xlu1 %1539 }
 0x793   : > { %v1550_v45 = vsub.f32 %v1534_v5, %v1540_v41 }
 0x795   : > { %v1554_v24 = vmul.f32 1.442695, %v1550_v45 }
 0x796   : > { %v1546_v8 = vpop.xlane.xlu1 %1545  ;;  %v1543_v20 = vpop.xlane.xlu0 %1542 }
 0x797   : > { %4142 = vpow2.f32 %v1554_v24  ;;  %v1552_v63 = vsub.f32 %v1536_v31, %v1546_v8  ;;  %v1551_v22 = vsub.f32 %v1535_v6, %v1543_v20 }
 0x799   : > { %v1558_v53 = vmul.f32 1.442695, %v1552_v63  ;;  %v1556_v7 = vmul.f32 1.442695, %v1551_v22 }
 0x79a   : > { %v1549_v61 = vpop.xlane.xlu0 %1548 }
 0x79b   : > { %4144 = vpow2.f32 %v1558_v53  ;;  %v1553_v18 = vsub.f32 %v1537_v9, %v1549_v61  ;;  %v5766_v61 = vpack.c.bf16 %v5037_v11, %v4992_v56 }
 0x79c   : > { %4146 = vpow2.f32 %v1556_v7 }
 0x79d   : > { %v1560_v25 = vmul.f32 1.442695, %v1553_v18  ;;  %v5767_v18 = vpack.c.bf16 %v5013_v1, %v4973_v47 }
 0x79f   : > { %4148 = vpow2.f32 %v1560_v25 }
 0x7a4   : > { %v4143_v17 = vpop.eup %4142 }
 0x7a5   : > { %v1562_v34 = vsel %vm1025_vm1, %v4143_v17, 0.0 }
 0x7a6   : > { %1563 = vadd.xlane.f32.xlu1 %v1562_v34 }
 0x7a8   : > { %v4145_v21 = vpop.eup %4144 }
 0x7a9   : > { %v4147_v5 = vpop.eup %4146  ;;  %v1568_v14 = vsel %vm1025_vm1, %v4145_v21, 0.0 }
 0x7aa   : > { %1569 = vadd.xlane.f32.xlu1 %v1568_v14  ;;  %v1565_v10 = vsel %vm1025_vm1, %v4147_v5, 0.0 }
 0x7ab   : > { %1566 = vadd.xlane.f32.xlu0 %v1565_v10 }
 0x7ac   : > { %v4149_v27 = vpop.eup %4148 }
 0x7ad   : > { %v1571_v31 = vsel %vm1025_vm1, %v4149_v27, 0.0 }
 0x7af   : > { %1572 = vadd.xlane.f32.xlu0 %v1571_v31 }
 0x82f   : > { %v1564_v6 = vpop.xlane.xlu1 %1563 }
 0x830   : > { %4150 = vrcp.f32 %v1564_v6 }
 0x833   : > { %v1570_v32 = vpop.xlane.xlu1 %1569 }
 0x834   : > { %v1567_v54 = vpop.xlane.xlu0 %1566 }
 0x835   : > { %4152 = vrcp.f32 %v1567_v54 }
 0x836   : > { %4154 = vrcp.f32 %v1570_v32 }
 0x838   : > { %v1573_v9 = vpop.xlane.xlu0 %1572 }
 0x839   : > { %4156 = vrcp.f32 %v1573_v9 }
 0x83d   : > { %v4151_v13 = vpop.eup %4150 }
 0x83e   : > { %v1578_v45 = vmul.f32 %v4151_v13, %v4143_v17 }
 0x842   : > { %v4153_v41 = vpop.eup %4152 }
 0x843   : > { %v1579_v24 = vmul.f32 %v4153_v41, %v4147_v5  ;;  %v4155_v8 = vpop.eup %4154 }
 0x844   : > { %v1580_v22 = vmul.f32 %v4155_v8, %v4145_v21 }
 0x845   : > { %v1582_v20 = vpack.c.bf16 %v1579_v24, %v1578_v45 }
 0x846   : > { %v4157_v63 = vpop.eup %4156 }
 0x847   : > { %3841 = vmatprep.mubr.msk.bf16.mxu0 %vm1025_vm1, %v1582_v20  ;;  %v1581_v53 = vmul.f32 %v4157_v63, %v4149_v27 }
 0x849   : > { %v1583_v7 = vpack.c.bf16 %v1581_v53, %v1580_v22 }
 0x84b   : > { %3842 = vmatmul.mubr.msk.bf16.vlgmr.msra.gmra.mxu0 %vm1025_vm1, %v1583_v7 }
 0x84c   : > { %3846 = vmatpush3.bf16.xpose.msra.mxu0 %v5095_v39  ;;  %3849 = vmatprep.mubr.msk.bf16.mxu0 %vm1025_vm1, %v5766_v61 }
 0x84d   : > { %3976 = vmatprep.subr.msk.bf16.mxu0 %vm1025_vm1, %v5098_v51 }
 0x854   : > { %3848 = vmatpush3.bf16.xpose.msra.mxu0 %v5104_v60 }
 0x855   : > { %3869 = vmatprep.subr.bf16.mxu0 %v5144_v12 }
 0x85b   : > { %3850 = vmatmul.mubr.msk.bf16.vlgmr.msra.gmra.mxu0 %vm1025_vm1, %v5767_v18 }
 0x85c   : > { %3870 = vmatpush3.bf16.msra.mxu0 %v5144_v12 }
 0x85d   : > { %3871 = vmatprep.subr.bf16.mxu0 %v5148_v46 }
 0x860   : > { %3872 = vmatpush3.bf16.msra.mxu0 %v5148_v46 }
 0x861   : > { %3979 = vmatprep.subr.msk.bf16.mxu0 %vm1025_vm1, %v5089_v55 }
 0x90b   : > { %v3843_v56 = vpop.f32.mrf.mxu0 }
 0x90c   : > { %v1641_v11 = vmul.f32 %v3843_v56, %v4951_v33 }
 0x90d   : > { %v1624_v25 = vpop.f32.mrf.mxu0 }
 0x90e   : > { %v5274_v17 = vadd.f32 %v1641_v11, %v5225_v0  ;;  %v1639_v47 = vmul.f32 %v1624_v25, %v4951_v33 }
 0x90f   : > { %v3844_v1 = vpop.f32.mrf.mxu0 }
 0x910   : > { %v5278_v34 = vadd.f32 %v1639_v47, %v5230_v44  ;;  %v1642_v21 = vmul.f32 %v3844_v1, %v4951_v33 }
 0x911   : > { %v1627_v5 = vpop.f32.mrf.mxu0 }
 0x912   : > { %v5282_v14 = vadd.f32 %v1642_v21, %v5235_v16  ;;  %v1640_v10 = vmul.f32 %v1627_v5, %v4951_v33 }
 0x914   : > { %v5286_v27 = vadd.f32 %v1640_v10, %v5238_v23 }
 0x91b   : > { %v3851_v31 = vpop.f32.mrf.mxu0 }
 0x91c   : > { %v1714_v6 = vmul.f32 0.5, %v3851_v31 }
 0x91d   : > { %v1697_v0 = vpop.f32.mrf.mxu0 }
 0x91e   : > { %v1712_v32 = vmul.f32 0.5, %v1697_v0  ;;  %v1718_v16 = vadd.f32 %v1714_v6, %v5111_v4 }
 0x91f   : > { %v3852_v54 = vpop.f32.mrf.mxu0 }
 0x920   : > { %v1716_v9 = vadd.f32 %v1712_v32, %v5116_v52  ;;  %v1715_v13 = vmul.f32 0.5, %v3852_v54  ;;  %v1726_v23 = vsel %vm1025_vm1, %v1718_v16, -inf }
 0x921   : > { %v1700_v44 = vpop.f32.mrf.mxu0 }
 0x922   : > { %v1713_v41 = vmul.f32 0.5, %v1700_v44  ;;  %v1720_v45 = vsel %vm1025_vm1, %v1716_v9, -inf  ;;  %v1719_v8 = vadd.f32 %v1715_v13, %v5130_v42 }
 0x923   : > { %1721 = vmax.xlane.f32.xlu1 %v1720_v45 }
 0x924   : > { %v1717_v33 = vadd.f32 %v1713_v41, %v5124_v62  ;;  %v1729_v20 = vsel %vm1025_vm1, %v1719_v8, -inf }
 0x926   : > { %v1723_v24 = vsel %vm1025_vm1, %v1717_v33, -inf }
 0x927   : > { %1727 = vmax.xlane.f32.xlu1 %v1726_v23  ;;  %1724 = vmax.xlane.f32.xlu0 %v1723_v24 }
 0x92b   : > { %1730 = vmax.xlane.f32.xlu0 %v1729_v20 }
 0x9ac   : > { %v1722_v63 = vpop.xlane.xlu1 %1721 }
 0x9ad   : > { %v1732_v22 = vsub.f32 %v1716_v9, %v1722_v63 }
 0x9af   : > { %v1736_v53 = vmul.f32 1.442695, %v1732_v22 }
 0x9b0   : > { %v1728_v7 = vpop.xlane.xlu1 %1727  ;;  %v1725_v61 = vpop.xlane.xlu0 %1724 }
 0x9b1   : > { %4158 = vpow2.f32 %v1736_v53  ;;  %v1734_v18 = vsub.f32 %v1718_v16, %v1728_v7  ;;  %v1733_v56 = vsub.f32 %v1717_v33, %v1725_v61  ;;  %v5768_v61 = vpack.c.bf16 %v5044_v15, %v4995_v57 }
 0x9b3   : > { %v1740_v11 = vmul.f32 1.442695, %v1734_v18  ;;  %v1738_v25 = vmul.f32 1.442695, %v1733_v56  ;;  %v5769_v18 = vpack.c.bf16 %v5016_v2, %v4976_v48 }
 0x9b4   : > { %v1731_v47 = vpop.xlane.xlu0 %1730 }
 0x9b5   : > { %4160 = vpow2.f32 %v1740_v11  ;;  %v1735_v1 = vsub.f32 %v1719_v8, %v1731_v47 }
 0x9b6   : > { %4162 = vpow2.f32 %v1738_v25 }
 0x9b7   : > { %v1742_v21 = vmul.f32 1.442695, %v1735_v1 }
 0x9b9   : > { %4164 = vpow2.f32 %v1742_v21 }
 0x9be   : > { %v4159_v5 = vpop.eup %4158 }
 0x9bf   : > { %v1744_v10 = vsel %vm1025_vm1, %v4159_v5, 0.0 }
 0x9c0   : > { %1745 = vadd.xlane.f32.xlu1 %v1744_v10 }
 0x9c2   : > { %v4161_v31 = vpop.eup %4160 }
 0x9c3   : > { %v4163_v0 = vpop.eup %4162  ;;  %v1750_v6 = vsel %vm1025_vm1, %v4161_v31, 0.0 }
 0x9c4   : > { %1751 = vadd.xlane.f32.xlu1 %v1750_v6  ;;  %v1747_v32 = vsel %vm1025_vm1, %v4163_v0, 0.0 }
 0x9c5   : > { %1748 = vadd.xlane.f32.xlu0 %v1747_v32 }
 0x9c6   : > { %v4165_v54 = vpop.eup %4164 }
 0x9c7   : > { %v1753_v9 = vsel %vm1025_vm1, %v4165_v54, 0.0 }
 0x9c9   : > { %1754 = vadd.xlane.f32.xlu0 %v1753_v9 }
 0xa49   : > { %v1746_v44 = vpop.xlane.xlu1 %1745 }
 0xa4a   : > { %4166 = vrcp.f32 %v1746_v44 }
 0xa4d   : > { %v1752_v13 = vpop.xlane.xlu1 %1751 }
 0xa4e   : > { %v1749_v41 = vpop.xlane.xlu0 %1748 }
 0xa4f   : > { %4168 = vrcp.f32 %v1749_v41 }
 0xa50   : > { %4170 = vrcp.f32 %v1752_v13 }
 0xa52   : > { %v1755_v45 = vpop.xlane.xlu0 %1754 }
 0xa53   : > { %4172 = vrcp.f32 %v1755_v45 }
 0xa57   : > { %v4167_v16 = vpop.eup %4166 }
 0xa58   : > { %v1760_v23 = vmul.f32 %v4167_v16, %v4159_v5 }
 0xa5c   : > { %v4169_v33 = vpop.eup %4168 }
 0xa5d   : > { %v1761_v24 = vmul.f32 %v4169_v33, %v4163_v0  ;;  %v4171_v8 = vpop.eup %4170 }
 0xa5e   : > { %v1762_v22 = vmul.f32 %v4171_v8, %v4161_v31 }
 0xa5f   : > { %v1764_v20 = vpack.c.bf16 %v1761_v24, %v1760_v23 }
 0xa60   : > { %v4173_v63 = vpop.eup %4172 }
 0xa61   : > { %3857 = vmatprep.mubr.msk.bf16.mxu1 %vm1025_vm1, %v1764_v20  ;;  %v1763_v53 = vmul.f32 %v4173_v63, %v4165_v54 }
 0xa63   : > { %v1765_v7 = vpack.c.bf16 %v1763_v53, %v1762_v22 }
 0xa65   : > { %3858 = vmatmul.mubr.msk.bf16.vlgmr.msra.gmra.mxu1 %vm1025_vm1, %v1765_v7 }
 0xa66   : > { %3862 = vmatpush3.bf16.xpose.msra.mxu1 %v5095_v39  ;;  %3865 = vmatprep.mubr.msk.bf16.mxu1 %vm1025_vm1, %v5768_v61 }
 0xa67   : > { %3978 = vmatprep.subr.msk.bf16.mxu1 %vm1025_vm1, %v5098_v51 }
 0xa6e   : > { %3864 = vmatpush3.bf16.xpose.msra.mxu1 %v5104_v60 }
 0xa6f   : > { %3885 = vmatprep.subr.bf16.mxu1 %v5144_v12 }
 0xa75   : > { %3866 = vmatmul.mubr.msk.bf16.vlgmr.msra.gmra.mxu1 %vm1025_vm1, %v5769_v18 }
 0xa76   : > { %3886 = vmatpush3.bf16.msra.mxu1 %v5144_v12 }
 0xa77   : > { %3887 = vmatprep.subr.bf16.mxu1 %v5148_v46 }
 0xa7a   : > { %3888 = vmatpush3.bf16.msra.mxu1 %v5148_v46 }
 0xa7b   : > { %3981 = vmatprep.subr.msk.bf16.mxu1 %vm1025_vm1, %v5089_v55 }
 0xb25   : > { %v3859_v57 = vpop.f32.mrf.mxu1 }
 0xb26   : > { %v1823_v15 = vmul.f32 %v3859_v57, %v4953_v35 }
 0xb27   : > { %v1806_v56 = vpop.f32.mrf.mxu1 }
 0xb28   : > { %v5322_v11 = vadd.f32 %v1823_v15, %v5274_v17  ;;  %v1821_v48 = vmul.f32 %v1806_v56, %v4953_v35 }
 0xb29   : > { %v3860_v2 = vpop.f32.mrf.mxu1 }
 0xb2a   : > { %v5326_v25 = vadd.f32 %v1821_v48, %v5278_v34  ;;  %v1824_v47 = vmul.f32 %v3860_v2, %v4953_v35 }
 0xb2b   : > { %v1809_v1 = vpop.f32.mrf.mxu1 }
 0xb2c   : > { %v5330_v21 = vadd.f32 %v1824_v47, %v5282_v14  ;;  %v1822_v5 = vmul.f32 %v1809_v1, %v4953_v35 }
 0xb2e   : > { %v5334_v10 = vadd.f32 %v1822_v5, %v5286_v27 }
 0xb35   : > { %v3867_v31 = vpop.f32.mrf.mxu1 }
 0xb36   : > { %v1896_v0 = vmul.f32 0.5, %v3867_v31 }
 0xb37   : > { %v1879_v17 = vpop.f32.mrf.mxu1 }
 0xb38   : > { %v1894_v6 = vmul.f32 0.5, %v1879_v17  ;;  %v1900_v14 = vadd.f32 %v1896_v0, %v5111_v4 }
 0xb39   : > { %v3868_v32 = vpop.f32.mrf.mxu1 }
 0xb3a   : > { %v1898_v54 = vadd.f32 %v1894_v6, %v5116_v52  ;;  %v1897_v9 = vmul.f32 0.5, %v3868_v32  ;;  %v1908_v27 = vsel %vm1025_vm1, %v1900_v14, -inf }
 0xb3b   : > { %v1882_v34 = vpop.f32.mrf.mxu1 }
 0xb3c   : > { %v1895_v44 = vmul.f32 0.5, %v1882_v34  ;;  %v1902_v13 = vsel %vm1025_vm1, %v1898_v54, -inf  ;;  %v1901_v45 = vadd.f32 %v1897_v9, %v5130_v42 }
 0xb3d   : > { %1903 = vmax.xlane.f32.xlu1 %v1902_v13 }
 0xb3e   : > { %v1899_v35 = vadd.f32 %v1895_v44, %v5124_v62  ;;  %v1911_v16 = vsel %vm1025_vm1, %v1901_v45, -inf }
 0xb40   : > { %v1905_v41 = vsel %vm1025_vm1, %v1899_v35, -inf }
 0xb41   : > { %1909 = vmax.xlane.f32.xlu1 %v1908_v27  ;;  %1906 = vmax.xlane.f32.xlu0 %v1905_v41 }
 0xb45   : > { %1912 = vmax.xlane.f32.xlu0 %v1911_v16  ;;  %v5770_v16 = vpack.c.bf16 %v5053_v19, %v4998_v58 }
 0xbc6   : > { %v1904_v33 = vpop.xlane.xlu1 %1903 }
 0xbc7   : > { %v1914_v23 = vsub.f32 %v1898_v54, %v1904_v33  ;;  %v5771_v33 = vpack.c.bf16 %v5019_v3, %v4979_v49 }
 0xbc9   : > { %v1918_v24 = vmul.f32 1.442695, %v1914_v23 }
 0xbca   : > { %v1910_v8 = vpop.xlane.xlu1 %1909  ;;  %v1907_v20 = vpop.xlane.xlu0 %1906 }
 0xbcb   : > { %4174 = vpow2.f32 %v1918_v24  ;;  %v1916_v63 = vsub.f32 %v1900_v14, %v1910_v8  ;;  %v1915_v22 = vsub.f32 %v1899_v35, %v1907_v20 }
 0xbcd   : > { %v1922_v53 = vmul.f32 1.442695, %v1916_v63  ;;  %v1920_v7 = vmul.f32 1.442695, %v1915_v22 }
 0xbce   : > { %v1913_v61 = vpop.xlane.xlu0 %1912 }
 0xbcf   : > { %4176 = vpow2.f32 %v1922_v53  ;;  %v1917_v18 = vsub.f32 %v1901_v45, %v1913_v61 }
 0xbd0   : > { %4178 = vpow2.f32 %v1920_v7 }
 0xbd1   : > { %v1924_v57 = vmul.f32 1.442695, %v1917_v18 }
 0xbd3   : > { %4180 = vpow2.f32 %v1924_v57 }
 0xbd8   : > { %v4175_v15 = vpop.eup %4174 }
 0xbd9   : > { %v1926_v56 = vsel %vm1025_vm1, %v4175_v15, 0.0 }
 0xbda   : > { %1927 = vadd.xlane.f32.xlu1 %v1926_v56 }
 0xbdc   : > { %v4177_v48 = vpop.eup %4176 }
 0xbdd   : > { %v4179_v2 = vpop.eup %4178  ;;  %v1932_v47 = vsel %vm1025_vm1, %v4177_v48, 0.0 }
 0xbde   : > { %1933 = vadd.xlane.f32.xlu1 %v1932_v47  ;;  %v1929_v1 = vsel %vm1025_vm1, %v4179_v2, 0.0 }
 0xbdf   : > { %1930 = vadd.xlane.f32.xlu0 %v1929_v1 }
 0xbe0   : > { %v4181_v5 = vpop.eup %4180 }
 0xbe1   : > { %v1935_v31 = vsel %vm1025_vm1, %v4181_v5, 0.0 }
 0xbe3   : > { %1936 = vadd.xlane.f32.xlu0 %v1935_v31 }
 0xc63   : > { %v1928_v17 = vpop.xlane.xlu1 %1927 }
 0xc64   : > { %4182 = vrcp.f32 %v1928_v17 }
 0xc67   : > { %v1934_v0 = vpop.xlane.xlu1 %1933 }
 0xc68   : > { %v1931_v6 = vpop.xlane.xlu0 %1930 }
 0xc69   : > { %4184 = vrcp.f32 %v1931_v6 }
 0xc6a   : > { %4186 = vrcp.f32 %v1934_v0 }
 0xc6c   : > { %v1937_v32 = vpop.xlane.xlu0 %1936 }
 0xc6d   : > { %4188 = vrcp.f32 %v1937_v32 }
 0xc71   : > { %v4183_v54 = vpop.eup %4182 }
 0xc72   : > { %v1942_v9 = vmul.f32 %v4183_v54, %v4175_v15 }
 0xc76   : > { %v4185_v34 = vpop.eup %4184 }
 0xc77   : > { %v1943_v44 = vmul.f32 %v4185_v34, %v4179_v2  ;;  %v4187_v13 = vpop.eup %4186 }
 0xc78   : > { %v1944_v27 = vmul.f32 %v4187_v13, %v4177_v48 }
 0xc79   : > { %v1946_v14 = vpack.c.bf16 %v1943_v44, %v1942_v9 }
 0xc7a   : > { %v4189_v35 = vpop.eup %4188 }
 0xc7b   : > { %3873 = vmatprep.mubr.msk.bf16.mxu0 %vm1025_vm1, %v1946_v14  ;;  %v1945_v41 = vmul.f32 %v4189_v35, %v4181_v5 }
 0xc7d   : > { %v1947_v45 = vpack.c.bf16 %v1945_v41, %v1944_v27 }
 0xc7f   : > { %3874 = vmatmul.mubr.msk.bf16.vlgmr.msra.gmra.mxu0 %vm1025_vm1, %v1947_v45 }
 0xc80   : > { %3878 = vmatpush3.bf16.xpose.msra.mxu0 %v5095_v39  ;;  %3881 = vmatprep.mubr.msk.bf16.mxu0 %vm1025_vm1, %v5770_v16 }
 0xc81   : > { %3980 = vmatprep.subr.msk.bf16.mxu0 %vm1025_vm1, %v5098_v51 }
 0xc88   : > { %3880 = vmatpush3.bf16.xpose.msra.mxu0 %v5104_v60 }
 0xc89   : > { %3901 = vmatprep.subr.bf16.mxu0 %v5144_v12 }
 0xc8f   : > { %3882 = vmatmul.mubr.msk.bf16.vlgmr.msra.gmra.mxu0 %vm1025_vm1, %v5771_v33 }
 0xc90   : > { %3902 = vmatpush3.bf16.msra.mxu0 %v5144_v12 }
 0xc91   : > { %3903 = vmatprep.subr.bf16.mxu0 %v5148_v46 }
 0xc94   : > { %3904 = vmatpush3.bf16.msra.mxu0 %v5148_v46 }
 0xc95   : > { %3983 = vmatprep.subr.msk.bf16.mxu0 %vm1025_vm1, %v5089_v55 }
 0xd3f   : > { %v3875_v58 = vpop.f32.mrf.mxu0 }
 0xd40   : > { %v2005_v19 = vmul.f32 %v3875_v58, %v4955_v36 }
 0xd41   : > { %v1988_v23 = vpop.f32.mrf.mxu0 }
 0xd42   : > { %v5370_v24 = vadd.f32 %v2005_v19, %v5322_v11  ;;  %v2003_v49 = vmul.f32 %v1988_v23, %v4955_v36 }
 0xd43   : > { %v3876_v3 = vpop.f32.mrf.mxu0 }
 0xd44   : > { %v5374_v8 = vadd.f32 %v2003_v49, %v5326_v25  ;;  %v2006_v20 = vmul.f32 %v3876_v3, %v4955_v36 }
 0xd45   : > { %v1991_v63 = vpop.f32.mrf.mxu0 }
 0xd46   : > { %v5378_v22 = vadd.f32 %v2006_v20, %v5330_v21  ;;  %v2004_v55 = vmul.f32 %v1991_v63, %v4955_v36 }
 0xd48   : > { %v5382_v53 = vadd.f32 %v2004_v55, %v5334_v10 }
 0xd4f   : > { %v3883_v7 = vpop.f32.mrf.mxu0 }
 0xd50   : > { %v2078_v61 = vmul.f32 0.5, %v3883_v7 }
 0xd51   : > { %v2061_v11 = vpop.f32.mrf.mxu0 }
 0xd52   : > { %v2076_v18 = vmul.f32 0.5, %v2061_v11  ;;  %v2082_v21 = vadd.f32 %v2078_v61, %v5111_v4 }
 0xd53   : > { %v3884_v57 = vpop.f32.mrf.mxu0 }
 0xd54   : > { %v2080_v15 = vadd.f32 %v2076_v18, %v5116_v52  ;;  %v2079_v56 = vmul.f32 0.5, %v3884_v57  ;;  %v2090_v10 = vsel %vm1025_vm1, %v2082_v21, -inf }
 0xd55   : > { %v2064_v25 = vpop.f32.mrf.mxu0 }
 0xd56   : > { %v2077_v48 = vmul.f32 0.5, %v2064_v25  ;;  %v2084_v2 = vsel %vm1025_vm1, %v2080_v15, -inf  ;;  %v2083_v1 = vadd.f32 %v2079_v56, %v5130_v42  ;;  %v5773_v25 = vpack.c.bf16 %v5067_v28, %v4982_v50 }
 0xd57   : > { %2085 = vmax.xlane.f32.xlu1 %v2084_v2 }
 0xd58   : > { %v2081_v36 = vadd.f32 %v2077_v48, %v5124_v62  ;;  %v2093_v52 = vsel %vm1025_vm1, %v2083_v1, -inf }
 0xd5a   : > { %v2087_v47 = vsel %vm1025_vm1, %v2081_v36, -inf }
 0xd5b   : > { %2091 = vmax.xlane.f32.xlu1 %v2090_v10  ;;  %2088 = vmax.xlane.f32.xlu0 %v2087_v47 }
 0xd5f   : > { %2094 = vmax.xlane.f32.xlu0 %v2093_v52 }
 0xde0   : > { %v2086_v5 = vpop.xlane.xlu1 %2085 }
 0xde1   : > { %v2096_v31 = vsub.f32 %v2080_v15, %v2086_v5  ;;  %v5772_v15 = vpack.c.bf16 %v5062_v26, %v5001_v59 }
 0xde3   : > { %v2100_v17 = vmul.f32 1.442695, %v2096_v31 }
 0xde4   : > { %v2092_v0 = vpop.xlane.xlu1 %2091  ;;  %v2089_v6 = vpop.xlane.xlu0 %2088 }
 0xde5   : > { %4190 = vpow2.f32 %v2100_v17  ;;  %v2098_v4 = vsub.f32 %v2082_v21, %v2092_v0  ;;  %v2097_v32 = vsub.f32 %v2081_v36, %v2089_v6 }
 0xde7   : > { %v2104_v62 = vmul.f32 1.442695, %v2098_v4  ;;  %v2102_v54 = vmul.f32 1.442695, %v2097_v32  ;;  %v5446_v4 = vld [vmem:[%s5761_s29 + $0x8] sm:$0xff] }
 0xde8   : > { %v2095_v34 = vpop.xlane.xlu0 %2094 }
 0xde9   : > { %4192 = vpow2.f32 %v2104_v62  ;;  %v2099_v9 = vsub.f32 %v2083_v1, %v2095_v34  ;;  %v5454_v34 = vld [vmem:[%s5761_s29 + $0x18] sm:$0xff] }
 0xdea   : > { %4194 = vpow2.f32 %v2102_v54 }
 0xdeb   : > { %v2106_v42 = vmul.f32 1.442695, %v2099_v9 }
 0xded   : > { %4196 = vpow2.f32 %v2106_v42 }
 0xdf2   : > { %v4191_v44 = vpop.eup %4190 }
 0xdf3   : > { %v2108_v13 = vsel %vm1025_vm1, %v4191_v44, 0.0 }
 0xdf4   : > { %2109 = vadd.xlane.f32.xlu1 %v2108_v13 }
 0xdf6   : > { %v4193_v14 = vpop.eup %4192 }
 0xdf7   : > { %v4195_v35 = vpop.eup %4194  ;;  %v2114_v27 = vsel %vm1025_vm1, %v4193_v14, 0.0 }
 0xdf8   : > { %2115 = vadd.xlane.f32.xlu1 %v2114_v27  ;;  %v2111_v41 = vsel %vm1025_vm1, %v4195_v35, 0.0 }
 0xdf9   : > { %2112 = vadd.xlane.f32.xlu0 %v2111_v41 }
 0xdfa   : > { %v4197_v45 = vpop.eup %4196 }
 0xdfb   : > { %v2117_v16 = vsel %vm1025_vm1, %v4197_v45, 0.0 }
 0xdfd   : > { %2118 = vadd.xlane.f32.xlu0 %v2117_v16 }
 0xe7d   : > { %v2110_v33 = vpop.xlane.xlu1 %2109 }
 0xe7e   : > { %4198 = vrcp.f32 %v2110_v33 }
 0xe81   : > { %v2116_v58 = vpop.xlane.xlu1 %2115 }
 0xe82   : > { %v2113_v19 = vpop.xlane.xlu0 %2112 }
 0xe83   : > { %4200 = vrcp.f32 %v2113_v19 }
 0xe84   : > { %4202 = vrcp.f32 %v2116_v58 }
 0xe86   : > { %v2119_v23 = vpop.xlane.xlu0 %2118 }
 0xe87   : > { %4204 = vrcp.f32 %v2119_v23 }
 0xe8b   : > { %v4199_v49 = vpop.eup %4198 }
 0xe8c   : > { %v2124_v20 = vmul.f32 %v4199_v49, %v4191_v44 }
 0xe90   : > { %v4201_v3 = vpop.eup %4200 }
 0xe91   : > { %v2125_v63 = vmul.f32 %v4201_v3, %v4195_v35  ;;  %v4203_v55 = vpop.eup %4202 }
 0xe92   : > { %v2126_v61 = vmul.f32 %v4203_v55, %v4193_v14 }
 0xe93   : > { %v2128_v7 = vpack.c.bf16 %v2125_v63, %v2124_v20 }
 0xe94   : > { %v4205_v11 = vpop.eup %4204 }
 0xe95   : > { %3889 = vmatprep.mubr.msk.bf16.mxu1 %vm1025_vm1, %v2128_v7  ;;  %v2127_v18 = vmul.f32 %v4205_v11, %v4197_v45 }
 0xe97   : > { %v2129_v57 = vpack.c.bf16 %v2127_v18, %v2126_v61 }
 0xe99   : > { %3890 = vmatmul.mubr.msk.bf16.vlgmr.msra.gmra.mxu1 %vm1025_vm1, %v2129_v57 }
 0xe9a   : > { %3894 = vmatpush3.bf16.xpose.msra.mxu1 %v5095_v39  ;;  %3897 = vmatprep.mubr.msk.bf16.mxu1 %vm1025_vm1, %v5772_v15 }
 0xe9b   : > { %3982 = vmatprep.subr.msk.bf16.mxu1 %vm1025_vm1, %v5098_v51 }
 0xea2   : > { %3896 = vmatpush3.bf16.xpose.msra.mxu1 %v5104_v60 }
 0xea3   : > { %3917 = vmatprep.subr.bf16.mxu1 %v5144_v12 }
 0xea9   : > { %3898 = vmatmul.mubr.msk.bf16.vlgmr.msra.gmra.mxu1 %vm1025_vm1, %v5773_v25 }
 0xeaa   : > { %3918 = vmatpush3.bf16.msra.mxu1 %v5144_v12 }
 0xeab   : > { %3919 = vmatprep.subr.bf16.mxu1 %v5148_v46 }
 0xeae   : > { %3920 = vmatpush3.bf16.msra.mxu1 %v5148_v46 }
 0xf59   : > { %v3891_v59 = vpop.f32.mrf.mxu1 }
 0xf5a   : > { %v2187_v26 = vmul.f32 %v3891_v59, %v4957_v37 }
 0xf5b   : > { %v2170_v56 = vpop.f32.mrf.mxu1 }
 0xf5c   : > { %v5416_v48 = vadd.f32 %v2187_v26, %v5370_v24  ;;  %v2185_v2 = vmul.f32 %v2170_v56, %v4957_v37 }
 0xf5d   : > { %v3892_v21 = vpop.f32.mrf.mxu1 }
 0xf5e   : > { %v5420_v50 = vadd.f32 %v2185_v2, %v5374_v8  ;;  %v2188_v28 = vmul.f32 %v3892_v21, %v4957_v37  ;;  %v5433_v8 = vld [vmem:[%s5761_s29] sm:$0xff] }
 0xf5f   : > { %v2173_v12 = vpop.f32.mrf.mxu1 }
 0xf60   : > { %v5424_v36 = vadd.f32 %v2188_v28, %v5378_v22  ;;  %v2186_v46 = vmul.f32 %v2173_v12, %v4957_v37 }
 0xf62   : > { %v5428_v10 = vadd.f32 %v2186_v46, %v5382_v53  ;;  %v5440_v53 = vld [vmem:[%s5761_s29 + $0x10] sm:$0xff] }
 0xf69   : > { %v3899_v47 = vpop.f32.mrf.mxu1 }
 0xf6a   : > { %v2260_v1 = vmul.f32 0.5, %v3899_v47 }
 0xf6b   : > { %v2243_v24 = vpop.f32.mrf.mxu1 }
 0xf6c   : > { %v2258_v52 = vmul.f32 0.5, %v2243_v24  ;;  %v2264_v6 = vadd.f32 %v5440_v53, %v2260_v1  ;;  %v5774_v1 = vpack.c.bf16 %v5073_v30, %v5070_v29 }
 0xf6d   : > { %v3900_v5 = vpop.f32.mrf.mxu1 }
 0xf6e   : > { %v2262_v31 = vadd.f32 %v5433_v8, %v2258_v52  ;;  %v2261_v22 = vmul.f32 0.5, %v3900_v5  ;;  %v2272_v62 = vsel %vm1025_vm1, %v2264_v6, -inf  ;;  %v5775_v52 = vpack.c.bf16 %v5081_v43, %v5078_v40 }
 0xf6f   : > { %v2246_v17 = vpop.f32.mrf.mxu1 }
 0xf70   : > { %v2259_v0 = vmul.f32 0.5, %v2246_v17  ;;  %v2266_v37 = vsel %vm1025_vm1, %v2262_v31, -inf  ;;  %v2265_v9 = vadd.f32 %v5454_v34, %v2261_v22 }
 0xf71   : > { %2267 = vmax.xlane.f32.xlu1 %v2266_v37 }
 0xf72   : > { %v2263_v32 = vadd.f32 %v5446_v4, %v2259_v0  ;;  %v2275_v42 = vsel %vm1025_vm1, %v2265_v9, -inf }
 0xf74   : > { %v2269_v54 = vsel %vm1025_vm1, %v2263_v32, -inf }
 0xf75   : > { %2273 = vmax.xlane.f32.xlu1 %v2272_v62  ;;  %2270 = vmax.xlane.f32.xlu0 %v2269_v54 }
 0xf79   : > { %2276 = vmax.xlane.f32.xlu0 %v2275_v42 }
 0xffa   : > { %v2268_v44 = vpop.xlane.xlu1 %2267 }
 0xffb   : > { %v2278_v13 = vsub.f32 %v2262_v31, %v2268_v44 }
 0xffd   : > { %v2282_v14 = vmul.f32 1.442695, %v2278_v13 }
 0xffe   : > { %v2274_v35 = vpop.xlane.xlu1 %2273  ;;  %v2271_v27 = vpop.xlane.xlu0 %2270 }
 0xfff   : > { %4206 = vpow2.f32 %v2282_v14  ;;  %v2280_v41 = vsub.f32 %v2264_v6, %v2274_v35  ;;  %v2279_v45 = vsub.f32 %v2263_v32, %v2271_v27 }
0x1001   : > { %v2286_v16 = vmul.f32 1.442695, %v2280_v41  ;;  %v2284_v33 = vmul.f32 1.442695, %v2279_v45 }
0x1002   : > { %v2277_v58 = vpop.xlane.xlu0 %2276 }
0x1003   : > { %4208 = vpow2.f32 %v2286_v16  ;;  %v2281_v19 = vsub.f32 %v2265_v9, %v2277_v58 }
0x1004   : > { %4210 = vpow2.f32 %v2284_v33 }
0x1005   : > { %v2288_v23 = vmul.f32 1.442695, %v2281_v19 }
0x1007   : > { %4212 = vpow2.f32 %v2288_v23 }
0x100c   : > { %v4207_v49 = vpop.eup %4206 }
0x100d   : > { %v2290_v3 = vsel %vm1025_vm1, %v4207_v49, 0.0 }
0x100e   : > { %2291 = vadd.xlane.f32.xlu1 %v2290_v3 }
0x1010   : > { %v4209_v20 = vpop.eup %4208 }
0x1011   : > { %v4211_v63 = vpop.eup %4210  ;;  %v2296_v55 = vsel %vm1025_vm1, %v4209_v20, 0.0 }
0x1012   : > { %2297 = vadd.xlane.f32.xlu1 %v2296_v55  ;;  %v2293_v7 = vsel %vm1025_vm1, %v4211_v63, 0.0 }
0x1013   : > { %2294 = vadd.xlane.f32.xlu0 %v2293_v7 }
0x1014   : > { %v4213_v11 = vpop.eup %4212 }
0x1015   : > { %v2299_v61 = vsel %vm1025_vm1, %v4213_v11, 0.0 }
0x1017   : > { %2300 = vadd.xlane.f32.xlu0 %v2299_v61 }
0x1097   : > { %v2292_v18 = vpop.xlane.xlu1 %2291 }
0x1098   : > { %4214 = vrcp.f32 %v2292_v18 }
0x109b   : > { %v2298_v57 = vpop.xlane.xlu1 %2297 }
0x109c   : > { %v2295_v15 = vpop.xlane.xlu0 %2294 }
0x109d   : > { %4216 = vrcp.f32 %v2295_v15 }
0x109e   : > { %4218 = vrcp.f32 %v2298_v57 }
0x10a0   : > { %v2301_v25 = vpop.xlane.xlu0 %2300 }
0x10a1   : > { %4220 = vrcp.f32 %v2301_v25 }
0x10a5   : > { %v4215_v59 = vpop.eup %4214 }
0x10a6   : > { %v2306_v56 = vmul.f32 %v4215_v59, %v4207_v49 }
0x10aa   : > { %v4217_v26 = vpop.eup %4216 }
0x10ab   : > { %v2307_v2 = vmul.f32 %v4217_v26, %v4211_v63  ;;  %v4219_v21 = vpop.eup %4218 }
0x10ac   : > { %v2308_v46 = vmul.f32 %v4219_v21, %v4209_v20 }
0x10ad   : > { %v2310_v28 = vpack.c.bf16 %v2307_v2, %v2306_v56 }
0x10ae   : > { %v4221_v12 = vpop.eup %4220 }
0x10af   : > { %3905 = vmatprep.mubr.msk.bf16.mxu0 %vm1025_vm1, %v2310_v28  ;;  %v2309_v47 = vmul.f32 %v4221_v12, %v4213_v11 }
0x10b1   : > { %v2311_v24 = vpack.c.bf16 %v2309_v47, %v2308_v46 }
0x10b3   : > { %3906 = vmatmul.mubr.msk.bf16.vlgmr.msra.gmra.mxu0 %vm1025_vm1, %v2311_v24 }
0x10b4   : > { %3910 = vmatpush3.bf16.xpose.msra.mxu0 %v5095_v39  ;;  %3913 = vmatprep.mubr.msk.bf16.mxu0 %vm1025_vm1, %v5774_v1  ;;  %v4098_v1 = vld [vmem:[%s4880_s28 + $0x8] sm:$0xff]  }
0x10b5   : > { %3984 = vmatprep.subr.msk.bf16.mxu0 %vm1025_vm1, %v5098_v51  ;;  %3925 = vmatprep.subr.bf16.mxu1 %v4098_v1 }
0x10bc   : > { %3912 = vmatpush3.bf16.xpose.msra.mxu0 %v5104_v60 }
0x10c3   : > { %3914 = vmatmul.mubr.msk.bf16.vlgmr.msra.gmra.mxu0 %vm1025_vm1, %v5775_v52  ;;  %v4099_v52 = vld [vmem:[%s4880_s28] sm:$0xff]  }
0x1173   : > { %v3907_v5 = vpop.f32.mrf.mxu0 }
0x1174   : > { %v2369_v31 = vmul.f32 %v3907_v5, %v4959_v38  ;;  %v4100_v5 = vld [vmem:[%s4885_s19 + $0x8] sm:$0xff]  }
0x1175   : > { %v2352_v17 = vpop.f32.mrf.mxu0 }
0x1176   : > { %v5478_v39 = vadd.f32 %v2369_v31, %v5416_v48  ;;  %v2367_v29 = vmul.f32 %v2352_v17, %v4959_v38  ;;  %v4561_v31 = vmov 0.0   ;;  %v4563_v17 = vmov 1966171168  }
0x1177   : > { %v3908_v30 = vpop.f32.mrf.mxu0  ;;  %3933 = vmatprep.subr.bf16.mxu0 %v4561_v31  ;;  %3937 = vmatprep.mubr.msk.bf16.mxu0 %vm4562_vm2, %v4561_v31 }
0x1178   : > { %v5482_v22 = vadd.f32 %v2367_v29, %v5420_v50  ;;  %v2370_v51 = vmul.f32 %v3908_v30, %v4959_v38  ;;  %v2737_v29 = vunpack.c.l.s4 %v4563_v17  ;;  %3934 = vmatpush3.bf16.msra.mxu0 %v4100_v5  ;;  %v4101_v30 = vld [vmem:[%s4885_s19] sm:$0xff]  }
0x1179   : > { %v2355_v60 = vpop.f32.mrf.mxu0  ;;  %3935 = vmatprep.subr.bf16.mxu0 %v4561_v31 }
0x117a   : > { %v5486_v40 = vadd.f32 %v2370_v51, %v5424_v36  ;;  %v2368_v43 = vmul.f32 %v2355_v60, %v4959_v38  ;;  %v3658_v51 = vld.sshfl [vmem:[%s5776_s17] sm:$0x1 pattern:$0x75316420] }
0x117b   : > { %v3659_v60 = vld.sshfl [vmem:[%s5776_s17 + $0x1] sm:$0x1 pattern:$0x75316420] }
0x117c   : > { %v5490_v0 = vadd.f32 %v2368_v43, %v5428_v10  ;;  %v3660_v43 = vld.sshfl [vmem:[%s5776_s17 + $0x2] sm:$0x1 pattern:$0x75316420]  ;;  %3936 = vmatpush3.bf16.msra.mxu0 %v4101_v30 }
0x1183   : > { %v3915_v37 = vpop.f32.mrf.mxu0 }
0x1184   : > { %v2442_v6 = vmul.f32 0.5, %v3915_v37  ;;  %v2738_v37 = vunpack.c.0.s8 %v2737_v29 }
0x1185   : > { %v2425_v48 = vpop.f32.mrf.mxu0 }
0x1186   : > { %v2440_v32 = vmul.f32 0.5, %v2425_v48  ;;  %v2446_v36 = vadd.f32 %v5440_v53, %v2442_v6  ;;  %v3661_v48 = vld.sshfl [vmem:[%s5776_s17 + $0x3] sm:$0x1 pattern:$0x75316420]  ;;  %v5777_v6 = vld [vmem:[#allocation22_spill] sm:$0xff] }
0x1187   : > { %v3916_v62 = vpop.f32.mrf.mxu0 }
0x1188   : > { %v2444_v54 = vadd.f32 %v5433_v8, %v2440_v32  ;;  %v2443_v9 = vmul.f32 0.5, %v3916_v62  ;;  %v2454_v10 = vsel %vm1025_vm1, %v2446_v36, -inf  ;;  %v5524_v32 = vsub.s32 %v2738_v37, %v5777_v6 }
0x1189   : > { %v2428_v50 = vpop.f32.mrf.mxu0 }
0x118a   : > { %v2441_v42 = vmul.f32 0.5, %v2428_v50  ;;  %v2448_v44 = vsel %vm1025_vm1, %v2444_v54, -inf  ;;  %v2447_v14 = vadd.f32 %v5454_v34, %v2443_v9  ;;  %v2742_v62 = vrot.slane %v3658_v51, %v5524_v32  ;;  %v4269_v51 = vld [vmem:[#allocation2 + $0x18] sm:$0xff] }
0x118b   : > { %2449 = vmax.xlane.f32.xlu1 %v2448_v44  ;;  %v2770_v50 = vrot.slane %v3660_v43, %v5524_v32  ;;  %v2784_v9 = vrot.slane %v3661_v48, %v5524_v32 }
0x118c   : > { %v2445_v38 = vadd.f32 %v5446_v4, %v2441_v42  ;;  %v2457_v8 = vsel %vm1025_vm1, %v2447_v14, -inf  ;;  %v2785_v42 = vunpack.c.l.b16 %v2742_v62 }
0x118e   : > { %v2451_v13 = vsel %vm1025_vm1, %v2445_v38, -inf }
0x118f   : > { %2455 = vmax.xlane.f32.xlu1 %v2454_v10  ;;  %2452 = vmax.xlane.f32.xlu0 %v2451_v13 }
0x1193   : > { %2458 = vmax.xlane.f32.xlu0 %v2457_v8 }
0x1214   : > { %v2450_v35 = vpop.xlane.xlu1 %2449 }
0x1215   : > { %v2460_v27 = vsub.f32 %v2444_v54, %v2450_v35  ;;  %v2756_v54 = vrot.slane %v3659_v60, %v5524_v32 }
0x1217   : > { %v2464_v41 = vmul.f32 1.442695, %v2460_v27  ;;  %v2786_v44 = vunpack.c.l.b16 %v2756_v54 }
0x1218   : > { %v2456_v45 = vpop.xlane.xlu1 %2455  ;;  %v2453_v16 = vpop.xlane.xlu0 %2452 }
0x1219   : > { %4222 = vpow2.f32 %v2464_v41  ;;  %v2462_v53 = vsub.f32 %v2446_v36, %v2456_v45  ;;  %v2461_v33 = vsub.f32 %v2445_v38, %v2453_v16  ;;  %v2787_v36 = vunpack.c.l.b16 %v2770_v50 }
0x121a   : > { %v2788_v38 = vunpack.c.l.b16 %v2784_v9  ;;  %v2789_v10 = vrot.slane %v2786_v44, 7 }
0x121b   : > { %v2468_v4 = vmul.f32 1.442695, %v2462_v53  ;;  %v2466_v58 = vmul.f32 1.442695, %v2461_v33  ;;  %v2792_v13 = vrot.slane %v2787_v36, 6  ;;  %v5778_v53 = vld [vmem:[#allocation26_spill] sm:$0xff] }
0x121c   : > { %v2459_v19 = vpop.xlane.xlu0 %2458  ;;  %v2791_v8 = vsel %vm2790_vm3, %v2789_v10, %v2785_v42 }
0x121d   : > { %4224 = vpow2.f32 %v2468_v4  ;;  %v2463_v23 = vsub.f32 %v2447_v14, %v2459_v19  ;;  %v2795_v14 = vrot.slane %v2788_v38, 5  ;;  %v2794_v35 = vsel %vm2793_vm4, %v2792_v13, %v2791_v8 }
0x121e   : > { %4226 = vpow2.f32 %v2466_v58 }
0x121f   : > { %v2470_v34 = vmul.f32 1.442695, %v2463_v23  ;;  %v2797_v27 = vsel %vm2796_vm5, %v2795_v14, %v2794_v35 }
0x1220   : > { %v2798_v41 = vpack.c.b16 %v2797_v27, %v2797_v27 }
0x1221   : > { %4228 = vpow2.f32 %v2470_v34 }
0x1222   : > { %3938 = vmatmul.mubr.msk.bf16.vlgmr.msra.gmra.mxu0 %vm1025_vm1, %v2798_v41 }
0x1226   : > { %v4223_v49 = vpop.eup %4222 }
0x1227   : > { %v2472_v3 = vsel %vm1025_vm1, %v4223_v49, 0.0 }
0x1228   : > { %2473 = vadd.xlane.f32.xlu1 %v2472_v3 }
0x122a   : > { %v4225_v20 = vpop.eup %4224 }
0x122b   : > { %v4227_v63 = vpop.eup %4226  ;;  %v2478_v55 = vsel %vm1025_vm1, %v4225_v20, 0.0 }
0x122c   : > { %2479 = vadd.xlane.f32.xlu1 %v2478_v55  ;;  %v2475_v7 = vsel %vm1025_vm1, %v4227_v63, 0.0 }
0x122d   : > { %2476 = vadd.xlane.f32.xlu0 %v2475_v7 }
0x122e   : > { %v4229_v11 = vpop.eup %4228 }
0x122f   : > { %v2481_v61 = vsel %vm1025_vm1, %v4229_v11, 0.0 }
0x1231   : > { %2482 = vadd.xlane.f32.xlu0 %v2481_v61  ;;  %v4103_v61 = vld [vmem:[%s4914_s26] sm:$0xff]  }
0x12b1   : > { %v2474_v18 = vpop.xlane.xlu1 %2473 }
0x12b2   : > { %4230 = vrcp.f32 %v2474_v18 }
0x12b5   : > { %v2480_v57 = vpop.xlane.xlu1 %2479 }
0x12b6   : > { %v2477_v15 = vpop.xlane.xlu0 %2476 }
0x12b7   : > { %4232 = vrcp.f32 %v2477_v15 }
0x12b8   : > { %4234 = vrcp.f32 %v2480_v57 }
0x12ba   : > { %v2483_v25 = vpop.xlane.xlu0 %2482 }
0x12bb   : > { %4236 = vrcp.f32 %v2483_v25 }
0x12bf   : > { %v4231_v59 = vpop.eup %4230 }
0x12c0   : > { %v2488_v56 = vmul.f32 %v4231_v59, %v4223_v49  ;;  %v3652_v59 = vld [vmem:[%s788_s24] ss:$0 sm:$0xff]  ;;  %s5782_s24 = sld [smem:[#allocation40_spill]] }
0x12c4   : > { %v4233_v26 = vpop.eup %4232 }
0x12c5   : > { %v2489_v2 = vmul.f32 %v4233_v26, %v4227_v63  ;;  %v4235_v21 = vpop.eup %4234 }
0x12c6   : > { %v2490_v46 = vmul.f32 %v4235_v21, %v4225_v20 }
0x12c7   : > { %v2492_v28 = vpack.c.bf16 %v2489_v2, %v2488_v56 }
0x12c8   : > { %v4237_v12 = vpop.eup %4236 }
0x12c9   : > { %3921 = vmatprep.mubr.msk.bf16.mxu1 %vm1025_vm1, %v2492_v28  ;;  %v2491_v47 = vmul.f32 %v4237_v12, %v4229_v11  ;;  %v4102_v11 = vld [vmem:[%s4914_s26 + $0x8] sm:$0xff]   ;;  %s5783_s26 = scalar_lea.vmem %s5782_s24, %s4865_s6 }
0x12ca   : > { %v4266_v28 = vld [vmem:[#allocation2] sm:$0xff] }
0x12cb   : > { %v2493_v24 = vpack.c.bf16 %v2491_v47, %v2490_v46 }
0x12cd   : > { %3922 = vmatmul.mubr.msk.bf16.vlgmr.msra.gmra.mxu1 %vm1025_vm1, %v2493_v24 }
0x12ce   : > { %3926 = vmatpush3.bf16.msra.mxu1 %v4098_v1 }
0x12cf   : > { %3927 = vmatprep.subr.bf16.mxu1 %v4099_v52 }
0x12d2   : > { %3928 = vmatpush3.bf16.msra.mxu1 %v4099_v52  ;;  %v4267_v52 = vld [vmem:[#allocation2 + $0x10] sm:$0xff] }
0x12d3   : > { %3941 = vmatprep.subr.bf16.mxu1 %v4561_v31 }
0x138d   : > { %v3923_v45 = vpop.f32.mrf.mxu1 }
0x138e   : > { %v2551_v33 = vmul.f32 %v3923_v45, %v5778_v53 }
0x138f   : > { %v2534_v16 = vpop.f32.mrf.mxu1 }
0x1390   : > { %v2549_v58 = vmul.f32 %v2534_v16, %v5778_v53  ;;  %v2555_v34 = vadd.f32 %v2551_v33, %v5478_v39  ;;  %v3657_v39 = vld [vmem:[%s796_s22] ss:$0 sm:$0xff]  ;;  %s5779_s22 = scalar_lea.vmem %s5670_s12, %s4865_s6 }
0x1391   : > { %v3924_v4 = vpop.f32.mrf.mxu1 }
0x1392   : > { %v2552_v19 = vmul.f32 %v3924_v4, %v5778_v53  ;;  %v2553_v20 = vadd.f32 %v2549_v58, %v5482_v22 }
0x1393   : > { %v2537_v23 = vpop.f32.mrf.mxu1 }
0x1394   : > { %v2556_v49 = vadd.f32 %v2552_v19, %v5486_v40  ;;  %v2550_v3 = vmul.f32 %v2537_v23, %v5778_v53  ;;  %v2848_v40 = vpop.f32.mrf.mxu0 }
0x1395   : > { %v2849_v18 = vadd.f32 %v3657_v39, %v2848_v40 }
0x1396   : > { %v2558_v63 = vpack.c.bf16 %v2556_v49, %v2555_v34  ;;  %v2554_v55 = vadd.f32 %v2550_v3, %v5490_v0  ;;  %v3939_v22 = vpop.f32.mrf.mxu0 }
0x1397   : > { %v2854_v57 = vpack.c.bf16 %v2849_v18, %v2849_v18 }
0x1398   : > { %v2557_v7 = vpack.c.bf16 %v2554_v55, %v2553_v20  ;;  %v2851_v0 = vpop.f32.mrf.mxu0  ;;  %v3665_v55 = vld [vmem:[%s5779_s22] ss:$0 sm:$0xff] }
0x1399   : > { %v5567_v0 = vld [vmem:[%s4910_s14] sm:$0x7] }
0x139a   : > { %3929 = vmatprep.mubr.msk.bf16.mxu1 %vm1025_vm1, %v2557_v7  ;;  %v3940_v15 = vpop.f32.mrf.mxu0 }
0x139b   : > { %3930 = vmatmul.mubr.msk.bf16.vlgmr.msra.gmra.mxu1 %vm1025_vm1, %v2558_v63 }
0x139c   : > { %3945 = vmatprep.mubr.msk.bf16.mxu1 %vm4562_vm2, %v4561_v31  ;;  %3942 = vmatpush3.bf16.msra.mxu1 %v4102_v11 }
0x139d   : > { %3943 = vmatprep.subr.bf16.mxu1 %v4561_v31  ;;  %v4268_v31 = vld [vmem:[#allocation2 + $0x8] sm:$0xff] }
0x13a0   : > { %3944 = vmatpush3.bf16.msra.mxu1 %v4103_v61 }
0x13a3   : > { %3946 = vmatmul.mubr.msk.bf16.vlgmr.msra.gmra.mxu1 %vm1025_vm1, %v2854_v57  ;;  %v5564_v57 = vld [vmem:[%s4905_s18] sm:$0x7] }
0x145b   : > { %v3931_v25 = vpop.f32.mrf.mxu1 }
0x145c   : > { %v2631_v56 = vadd.f32 %v3931_v25, %v3652_v59 }
0x145d   : > { %v2622_v26 = vpop.f32.mrf.mxu1 }
0x145e   : > { %v2623_v2 = vadd.f32 %v3652_v59, %v2622_v26  ;;  %v2639_v5 = vadd.f32 %v4267_v52, %v2631_v56 }
0x145f   : > { %v3932_v21 = vpop.f32.mrf.mxu1 }
0x1460   : > { %v2637_v12 = vadd.f32 %v4266_v28, %v2623_v2  ;;  %v2634_v47 = vadd.f32 %v3932_v21, %v3652_v59  ;;  %v2647_v30 = vsel %vm1025_vm1, %v2639_v5, 0.0 }
0x1461   : > { %v2625_v46 = vpop.f32.mrf.mxu1 }
0x1462   : > { %v2626_v24 = vadd.f32 %v3652_v59, %v2625_v46  ;;  %v2641_v1 = vsel %vm1025_vm1, %v2637_v12, 0.0  ;;  %v2640_v60 = vadd.f32 %v4269_v51, %v2634_v47  ;;  %v5780_v59 = vld [vmem:[#allocation23_spill] sm:$0xff] }
0x1463   : > { %2642 = vadd.xlane.f32.xlu1 %v2641_v1  ;;  %v2915_v53 = vpop.f32.mrf.mxu1  ;;  %v2697_v26 = vrot.slane %v5564_v57, %v5780_v59  ;;  %v2705_v21 = vrot.slane %v5567_v0, %v5780_v59 }
0x1464   : > { %v2638_v17 = vadd.f32 %v4268_v31, %v2626_v24  ;;  %v2650_v43 = vsel %vm1025_vm1, %v2640_v60, 0.0  ;;  %v2916_v61 = vadd.f32 %v3665_v55, %v2915_v53 }
0x1465   : > { %v3947_v33 = vpop.f32.mrf.mxu1 }
0x1466   : > { %v2644_v29 = vsel %vm1025_vm1, %v2638_v17, 0.0  ;;  %v2928_v22 = vrot.slane %v2916_v61, %v5524_v32 }
0x1467   : > { %2645 = vadd.xlane.f32.xlu0 %v2644_v29  ;;  %2648 = vadd.xlane.f32.xlu1 %v2647_v30  ;;  %v2918_v4 = vpop.f32.mrf.mxu1 }
0x1468   : > { %v2929_v15 = vcombine.high %v2928_v22, %v2928_v22  ;;  %v2936_v25 = vrot.slane %v2928_v22, %v5524_v32 }
0x1469   : > { %v3948_v58 = vpop.f32.mrf.mxu1 }
0x146a   : > { %v2943_v46 = vrot.slane %v2929_v15, %v5524_v32  ;;  %v2944_v24 = vcombine.high %v2936_v25, %v2936_v25 }
0x146b   : > { %2651 = vadd.xlane.f32.xlu0 %v2650_v43 }
0x146c   : > { %v2953_v30 = vrot.slane %v2943_v46, %v5780_v59  ;;  %v2957_v43 = vrot.slane %v2944_v24, %v5780_v59 }
0x14ec   : > { %v2643_v37 = vpop.xlane.xlu1 %2642 }
0x14ed   : > { %v2654_v48 = vmul.f32 0.03125, %v2643_v37 }
0x14ef   : > { %v2658_v6 = vsub.f32 %v2637_v12, %v2654_v48  ;;  %v2949_v12 = vrot.slane %v2936_v25, %v5780_v59 }
0x14f0   : > { %v2646_v62 = vpop.xlane.xlu0 %2645  ;;  %v2649_v54 = vpop.xlane.xlu1 %2648 }
0x14f1   : > { %v2655_v50 = vmul.f32 0.03125, %v2646_v62  ;;  %v2656_v9 = vmul.f32 0.03125, %v2649_v54  ;;  %v2662_v42 = vmul.f32 %v2658_v6, %v2658_v6  ;;  %v2945_v62 = vcombine.high %v2943_v46, %v2943_v46  ;;  %v5781_v46 = vld [vmem:[#allocation24_spill] sm:$0xff] }
0x14f3   : > { %v2659_v44 = vsub.f32 %v2638_v17, %v2655_v50  ;;  %v2660_v36 = vsub.f32 %v2639_v5, %v2656_v9  ;;  %v2666_v38 = vsel %vm1025_vm1, %v2662_v42, 0.0 }
0x14f4   : > { %v2652_v10 = vpop.xlane.xlu0 %2651  ;;  %2667 = vadd.xlane.f32.xlu1 %v2666_v38 }
0x14f5   : > { %v2657_v13 = vmul.f32 0.03125, %v2652_v10  ;;  %v2663_v14 = vmul.f32 %v2659_v44, %v2659_v44  ;;  %v2664_v8 = vmul.f32 %v2660_v36, %v2660_v36 }
0x14f7   : > { %v2661_v35 = vsub.f32 %v2640_v60, %v2657_v13  ;;  %v2669_v27 = vsel %vm1025_vm1, %v2663_v14, 0.0  ;;  %v2672_v41 = vsel %vm1025_vm1, %v2664_v8, 0.0 }
0x14f8   : > { %2670 = vadd.xlane.f32.xlu0 %v2669_v27  ;;  %2673 = vadd.xlane.f32.xlu1 %v2672_v41 }
0x14f9   : > { %v2665_v45 = vmul.f32 %v2661_v35, %v2661_v35 }
0x14fb   : > { %v2675_v16 = vsel %vm1025_vm1, %v2665_v45, 0.0 }
0x14fc   : > { %2676 = vadd.xlane.f32.xlu0 %v2675_v16 }
0x157d   : > { %v2668_v19 = vpop.xlane.xlu1 %2667 }
0x157e   : > { %v2678_v23 = vmul.f32 0.03125, %v2668_v19 }
0x1580   : > { %v2682_v34 = vadd.f32 1e-05, %v2678_v23 }
0x1581   : > { %v2671_v49 = vpop.xlane.xlu0 %2670  ;;  %v2674_v3 = vpop.xlane.xlu1 %2673 }
0x1582   : > { %4238 = vrsqrt.f32 %v2682_v34  ;;  %v2679_v20 = vmul.f32 0.03125, %v2671_v49  ;;  %v2680_v63 = vmul.f32 0.03125, %v2674_v3 }
0x1584   : > { %v2683_v7 = vadd.f32 1e-05, %v2679_v20  ;;  %v2684_v11 = vadd.f32 1e-05, %v2680_v63 }
0x1585   : > { %v2677_v39 = vpop.xlane.xlu0 %2676 }
0x1586   : > { %4240 = vrsqrt.f32 %v2683_v7  ;;  %v2681_v40 = vmul.f32 0.03125, %v2677_v39  ;;  %v4105_v39 = vld [vmem:[%s4916_s23] sm:$0xff]  }
0x1587   : > { %4242 = vrsqrt.f32 %v2684_v11  ;;  %v4104_v11 = vld [vmem:[%s4916_s23 + $0x8] sm:$0xff]  }
0x1588   : > { %v2685_v18 = vadd.f32 1e-05, %v2681_v40  ;;  %3949 = vmatprep.subr.bf16.mxu0 %v4104_v11  ;;  %v4106_v40 = vld [vmem:[%s4899_s0 + $0x18] sm:$0xff]  }
0x1589   : > { %3950 = vmatpush3.bf16.msra.mxu0 %v4104_v11  ;;  %3957 = vmatprep.subr.bf16.mxu1 %v4106_v40 }
0x158a   : > { %4244 = vrsqrt.f32 %v2685_v18  ;;  %3951 = vmatprep.subr.bf16.mxu0 %v4105_v39  ;;  %3958 = vmatpush3.bf16.msra.mxu1 %v4106_v40 }
0x158d   : > { %3952 = vmatpush3.bf16.msra.mxu0 %v4105_v39 }
0x158f   : > { %v4239_v56 = vpop.eup %4238 }
0x1590   : > { %v2690_v2 = vmul.f32 %v4239_v56, %v2658_v6 }
0x1592   : > { %v2698_v28 = vmul.f32 %v2697_v26, %v2690_v2 }
0x1593   : > { %v4241_v47 = vpop.eup %4240 }
0x1594   : > { %v4243_v1 = vpop.eup %4242  ;;  %v2706_v52 = vadd.f32 %v2705_v21, %v2698_v28  ;;  %v2691_v5 = vmul.f32 %v4241_v47, %v2659_v44  ;;  %v3025_v47 = vrot.slane %v5564_v57, %v5781_v46 }
0x1595   : > { %v2692_v31 = vmul.f32 %v4243_v1, %v2660_v36  ;;  %v2961_v36 = vrot.slane %v2945_v62, %v5780_v59  ;;  %v3033_v1 = vrot.slane %v5567_v0, %v5781_v46 }
0x1596   : > { %v2966_v17 = vadd.f32 %v2949_v12, %v2706_v52  ;;  %v2699_v29 = vmul.f32 %v2697_v26, %v2691_v5 }
0x1597   : > { %v4245_v51 = vpop.eup %4244  ;;  %v2700_v60 = vmul.f32 %v2697_v26, %v2692_v31 }
0x1598   : > { %v2970_v37 = vsel %vm1025_vm1, %v2966_v17, 0.0  ;;  %v2707_v48 = vadd.f32 %v2705_v21, %v2699_v29  ;;  %v2693_v6 = vmul.f32 %v4245_v51, %v2661_v35 }
0x1599   : > { %2971 = vadd.xlane.f32.xlu1 %v2970_v37  ;;  %v2708_v32 = vadd.f32 %v2705_v21, %v2700_v60 }
0x159a   : > { %v2967_v54 = vadd.f32 %v2953_v30, %v2707_v48  ;;  %v2701_v50 = vmul.f32 %v2697_v26, %v2693_v6 }
0x159b   : > { %v2968_v9 = vadd.f32 %v2957_v43, %v2708_v32 }
0x159c   : > { %v2973_v42 = vsel %vm1025_vm1, %v2967_v54, 0.0  ;;  %v2709_v44 = vadd.f32 %v2705_v21, %v2701_v50 }
0x159d   : > { %2974 = vadd.xlane.f32.xlu0 %v2973_v42  ;;  %v2976_v38 = vsel %vm1025_vm1, %v2968_v9, 0.0  ;;  %v4107_v42 = vld [vmem:[%s4899_s0 + $0x10] sm:$0xff]  }
0x159e   : > { %2977 = vadd.xlane.f32.xlu1 %v2976_v38  ;;  %v2969_v10 = vadd.f32 %v2961_v36, %v2709_v44  ;;  %3959 = vmatprep.subr.bf16.mxu1 %v4107_v42  ;;  %v4108_v44 = vld [vmem:[%s4899_s0 + $0x8] sm:$0xff]   ;;  %v4109_v36 = vld [vmem:[%s4899_s0] sm:$0xff]  }
0x159f   : > { %3960 = vmatpush3.bf16.msra.mxu1 %v4107_v42 }
0x15a0   : > { %v2979_v13 = vsel %vm1025_vm1, %v2969_v10, 0.0  ;;  %3961 = vmatprep.subr.bf16.mxu1 %v4108_v44 }
0x15a1   : > { %2980 = vadd.xlane.f32.xlu0 %v2979_v13  ;;  %v3669_v13 = vld [vmem:[%s5783_s26] ss:$0 sm:$0xff] }
0x15a3   : > { %3962 = vmatpush3.bf16.msra.mxu1 %v4108_v44 }
0x15a4   : > { %3963 = vmatprep.subr.bf16.mxu1 %v4109_v36 }
0x15a7   : > { %3964 = vmatpush3.bf16.msra.mxu1 %v4109_v36 }
0x1622   : > { %v2972_v14 = vpop.xlane.xlu1 %2971 }
0x1623   : > { %v2982_v8 = vmul.f32 0.03125, %v2972_v14 }
0x1625   : > { %v2986_v35 = vsub.f32 %v2966_v17, %v2982_v8 }
0x1626   : > { %v2975_v27 = vpop.xlane.xlu0 %2974 }
0x1627   : > { %v2983_v41 = vmul.f32 0.03125, %v2975_v27  ;;  %v2978_v45 = vpop.xlane.xlu1 %2977  ;;  %v2990_v16 = vmul.f32 %v2986_v35, %v2986_v35 }
0x1628   : > { %v2984_v53 = vmul.f32 0.03125, %v2978_v45 }
0x1629   : > { %v2987_v33 = vsub.f32 %v2967_v54, %v2983_v41  ;;  %v2994_v4 = vsel %vm1025_vm1, %v2990_v16, 0.0 }
0x162a   : > { %v2988_v58 = vsub.f32 %v2968_v9, %v2984_v53  ;;  %v2981_v19 = vpop.xlane.xlu0 %2980  ;;  %2995 = vadd.xlane.f32.xlu1 %v2994_v4 }
0x162b   : > { %v2985_v23 = vmul.f32 0.03125, %v2981_v19  ;;  %v2991_v34 = vmul.f32 %v2987_v33, %v2987_v33 }
0x162c   : > { %v2992_v49 = vmul.f32 %v2988_v58, %v2988_v58 }
0x162d   : > { %v2989_v3 = vsub.f32 %v2969_v10, %v2985_v23  ;;  %v2997_v20 = vsel %vm1025_vm1, %v2991_v34, 0.0  ;;  %v3674_v34 = vld [vmem:[%s956_s8] ss:$0 sm:$0xff] }
0x162e   : > { %2998 = vadd.xlane.f32.xlu0 %v2997_v20  ;;  %v3000_v63 = vsel %vm1025_vm1, %v2992_v49, 0.0 }
0x162f   : > { %3001 = vadd.xlane.f32.xlu1 %v3000_v63  ;;  %v2993_v55 = vmul.f32 %v2989_v3, %v2989_v3 }
0x1631   : > { %v3003_v7 = vsel %vm1025_vm1, %v2993_v55, 0.0 }
0x1632   : > { %3004 = vadd.xlane.f32.xlu0 %v3003_v7 }
0x16b3   : > { %v2996_v61 = vpop.xlane.xlu1 %2995 }
0x16b4   : > { %v3006_v18 = vmul.f32 0.03125, %v2996_v61 }
0x16b6   : > { %v3010_v22 = vadd.f32 1e-05, %v3006_v18 }
0x16b7   : > { %v2999_v15 = vpop.xlane.xlu0 %2998 }
0x16b8   : > { %4246 = vrsqrt.f32 %v3010_v22  ;;  %v3007_v25 = vmul.f32 0.03125, %v2999_v15  ;;  %v3002_v59 = vpop.xlane.xlu1 %3001 }
0x16b9   : > { %v3008_v26 = vmul.f32 0.03125, %v3002_v59 }
0x16ba   : > { %v3011_v56 = vadd.f32 1e-05, %v3007_v25 }
0x16bb   : > { %v3012_v2 = vadd.f32 1e-05, %v3008_v26  ;;  %v3005_v21 = vpop.xlane.xlu0 %3004 }
0x16bc   : > { %4248 = vrsqrt.f32 %v3011_v56  ;;  %v3009_v28 = vmul.f32 0.03125, %v3005_v21 }
0x16bd   : > { %4250 = vrsqrt.f32 %v3012_v2 }
0x16be   : > { %v3013_v12 = vadd.f32 1e-05, %v3009_v28 }
0x16c0   : > { %4252 = vrsqrt.f32 %v3013_v12 }
0x16c5   : > { %v4247_v24 = vpop.eup %4246 }
0x16c6   : > { %v3018_v52 = vmul.f32 %v4247_v24, %v2986_v35 }
0x16c8   : > { %v3026_v5 = vmul.f32 %v3025_v47, %v3018_v52 }
0x16c9   : > { %v4249_v31 = vpop.eup %4248 }
0x16ca   : > { %v4251_v17 = vpop.eup %4250  ;;  %v3019_v29 = vmul.f32 %v4249_v31, %v2987_v33  ;;  %v3034_v30 = vadd.f32 %v3033_v1, %v3026_v5 }
0x16cb   : > { %v3020_v51 = vmul.f32 %v4251_v17, %v2988_v58 }
0x16cc   : > { %v3027_v60 = vmul.f32 %v3025_v47, %v3019_v29 }
0x16cd   : > { %v4253_v43 = vpop.eup %4252  ;;  %v3028_v37 = vmul.f32 %v3025_v47, %v3020_v51 }
0x16ce   : > { %v3021_v48 = vmul.f32 %v4253_v43, %v2989_v3  ;;  %v3035_v6 = vadd.f32 %v3033_v1, %v3027_v60 }
0x16cf   : > { %v3036_v62 = vadd.f32 %v3033_v1, %v3028_v37 }
0x16d0   : > { %v3038_v32 = vpack.c.bf16 %v3035_v6, %v3034_v30  ;;  %v3029_v54 = vmul.f32 %v3025_v47, %v3021_v48 }
0x16d2   : > { %3953 = vmatprep.mubr.msk.bf16.mxu0 %vm1025_vm1, %v3038_v32  ;;  %v3037_v50 = vadd.f32 %v3033_v1, %v3029_v54 }
0x16d4   : > { %v3039_v9 = vpack.c.bf16 %v3037_v50, %v3036_v62 }
0x16d6   : > { %3954 = vmatmul.mubr.msk.bf16.vlgmr.msra.gmra.mxu0 %vm1025_vm1, %v3039_v9 }
0x1796   : > { %v3955_v38 = vpop.f32.mrf.mxu0 }
0x1797   : > { %v3112_v27 = vadd.f32 %v3955_v38, %v3669_v13 }
0x1798   : > { %v3103_v10 = vpop.f32.mrf.mxu0 }
0x1799   : > { %v3104_v8 = vadd.f32 %v3669_v13, %v3103_v10  ;;  %v3120_v4 = vmax.f32 %v3112_v27, 0.0 }
0x179a   : > { %v3956_v14 = vpop.f32.mrf.mxu0 }
0x179b   : > { %v3115_v35 = vadd.f32 %v3956_v14, %v3669_v13  ;;  %v3118_v53 = vmax.f32 %v3104_v8, 0.0 }
0x179c   : > { %v3106_v41 = vpop.f32.mrf.mxu0 }
0x179d   : > { %v3107_v45 = vadd.f32 %v3669_v13, %v3106_v41  ;;  %v3121_v16 = vmax.f32 %v3115_v35, 0.0  ;;  %v5785_v13 = vld [vmem:[#allocation25_spill] sm:$0xff] }
0x179e   : > { %v3278_v14 = vrot.slane %v5564_v57, %v5785_v13  ;;  %v3286_v35 = vrot.slane %v5567_v0, %v5785_v13 }
0x179f   : > { %v3119_v33 = vmax.f32 %v3107_v45, 0.0  ;;  %v3123_v19 = vpack.c.bf16 %v3121_v16, %v3120_v4 }
0x17a1   : > { %v3122_v58 = vpack.c.bf16 %v3119_v33, %v3118_v53 }
0x17a3   : > { %3965 = vmatprep.mubr.msk.bf16.mxu1 %vm3163_vm6, %v3122_v58 }
0x17a4   : > { %3966 = vmatmul.mubr.msk.bf16.vlgmr.msra.gmra.mxu1 %vm3163_vm6, %v3123_v19 }
0x1864   : > { %v3967_v23 = vpop.f32.mrf.mxu1 }
0x1865   : > { %v3213_v3 = vadd.f32 %v3967_v23, %v3674_v34 }
0x1866   : > { %v3204_v49 = vpop.f32.mrf.mxu1 }
0x1867   : > { %v3205_v20 = vadd.f32 %v3674_v34, %v3204_v49  ;;  %v3221_v61 = vadd.f32 %v3213_v3, %v3036_v62 }
0x1868   : > { %v3968_v63 = vpop.f32.mrf.mxu1 }
0x1869   : > { %v3219_v55 = vadd.f32 %v3205_v20, %v3034_v30  ;;  %v3216_v11 = vadd.f32 %v3968_v63, %v3674_v34  ;;  %v3229_v15 = vsel %vm1025_vm1, %v3221_v61, 0.0 }
0x186a   : > { %v3207_v7 = vpop.f32.mrf.mxu1 }
0x186b   : > { %v3208_v39 = vadd.f32 %v3674_v34, %v3207_v7  ;;  %v3223_v40 = vsel %vm1025_vm1, %v3219_v55, 0.0  ;;  %v3222_v25 = vadd.f32 %v3216_v11, %v3037_v50 }
0x186c   : > { %3224 = vadd.xlane.f32.xlu1 %v3223_v40 }
0x186d   : > { %v3220_v18 = vadd.f32 %v3208_v39, %v3035_v6  ;;  %v3232_v59 = vsel %vm1025_vm1, %v3222_v25, 0.0 }
0x186f   : > { %v3226_v22 = vsel %vm1025_vm1, %v3220_v18, 0.0 }
0x1870   : > { %3227 = vadd.xlane.f32.xlu0 %v3226_v22  ;;  %3230 = vadd.xlane.f32.xlu1 %v3229_v15 }
0x1874   : > { %3233 = vadd.xlane.f32.xlu0 %v3232_v59 }
0x18f5   : > { %v3225_v26 = vpop.xlane.xlu1 %3224 }
0x18f6   : > { %v3235_v56 = vmul.f32 0.03125, %v3225_v26 }
0x18f8   : > { %v3239_v2 = vsub.f32 %v3219_v55, %v3235_v56 }
0x18f9   : > { %v3228_v21 = vpop.xlane.xlu0 %3227  ;;  %v3231_v28 = vpop.xlane.xlu1 %3230 }
0x18fa   : > { %v3236_v12 = vmul.f32 0.03125, %v3228_v21  ;;  %v3237_v46 = vmul.f32 0.03125, %v3231_v28  ;;  %v3243_v47 = vmul.f32 %v3239_v2, %v3239_v2 }
0x18fc   : > { %v3240_v24 = vsub.f32 %v3220_v18, %v3236_v12  ;;  %v3241_v1 = vsub.f32 %v3221_v61, %v3237_v46  ;;  %v3247_v52 = vsel %vm1025_vm1, %v3243_v47, 0.0 }
0x18fd   : > { %v3234_v5 = vpop.xlane.xlu0 %3233  ;;  %3248 = vadd.xlane.f32.xlu1 %v3247_v52 }
0x18fe   : > { %v3238_v31 = vmul.f32 0.03125, %v3234_v5  ;;  %v3244_v17 = vmul.f32 %v3240_v24, %v3240_v24  ;;  %v3245_v29 = vmul.f32 %v3241_v1, %v3241_v1 }
0x1900   : > { %v3242_v30 = vsub.f32 %v3222_v25, %v3238_v31  ;;  %v3250_v51 = vsel %vm1025_vm1, %v3244_v17, 0.0  ;;  %v3253_v60 = vsel %vm1025_vm1, %v3245_v29, 0.0 }
0x1901   : > { %3251 = vadd.xlane.f32.xlu0 %v3250_v51  ;;  %3254 = vadd.xlane.f32.xlu1 %v3253_v60 }
0x1902   : > { %v3246_v43 = vmul.f32 %v3242_v30, %v3242_v30 }
0x1904   : > { %v3256_v37 = vsel %vm1025_vm1, %v3246_v43, 0.0 }
0x1905   : > { %3257 = vadd.xlane.f32.xlu0 %v3256_v37 }
0x1986   : > { %v3249_v48 = vpop.xlane.xlu1 %3248 }
0x1987   : > { %v3259_v6 = vmul.f32 0.03125, %v3249_v48 }
0x1989   : > { %v3263_v62 = vadd.f32 1e-05, %v3259_v6 }
0x198a   : > { %v3252_v32 = vpop.xlane.xlu0 %3251  ;;  %v3255_v54 = vpop.xlane.xlu1 %3254 }
0x198b   : > { %4254 = vrsqrt.f32 %v3263_v62  ;;  %v3260_v50 = vmul.f32 0.03125, %v3252_v32  ;;  %v3261_v9 = vmul.f32 0.03125, %v3255_v54 }
0x198d   : > { %v3264_v42 = vadd.f32 1e-05, %v3260_v50  ;;  %v3265_v44 = vadd.f32 1e-05, %v3261_v9 }
0x198e   : > { %v3258_v36 = vpop.xlane.xlu0 %3257 }
0x198f   : > { %4256 = vrsqrt.f32 %v3264_v42  ;;  %v3262_v38 = vmul.f32 0.03125, %v3258_v36 }
0x1990   : > { %4258 = vrsqrt.f32 %v3265_v44 }
0x1991   : > { %v3266_v10 = vadd.f32 1e-05, %v3262_v38 }
0x1993   : > { %4260 = vrsqrt.f32 %v3266_v10 }
0x1998   : > { %v4255_v8 = vpop.eup %4254 }
0x1999   : > { %v3271_v27 = vmul.f32 %v4255_v8, %v3239_v2 }
0x199b   : > { %v3279_v41 = vmul.f32 %v3278_v14, %v3271_v27 }
0x199c   : > { %v4257_v45 = vpop.eup %4256 }
0x199d   : > { %v4259_v16 = vpop.eup %4258  ;;  %v3287_v53 = vadd.f32 %v3286_v35, %v3279_v41  ;;  %v3272_v33 = vmul.f32 %v4257_v45, %v3240_v24 }
0x199e   : > { %v3273_v4 = vmul.f32 %v4259_v16, %v3241_v1 }
0x199f   : > { %3291 = vst.msk [vmem:[#allocation2] sm:$0xff] %vm1025_vm1, %v3287_v53  ;;  %v3280_v58 = vmul.f32 %v3278_v14, %v3272_v33 }
0x19a0   : > { %v4261_v19 = vpop.eup %4260  ;;  %v3281_v23 = vmul.f32 %v3278_v14, %v3273_v4 }
0x19a1   : > { %v3288_v34 = vadd.f32 %v3286_v35, %v3280_v58  ;;  %v3274_v49 = vmul.f32 %v4261_v19, %v3242_v30 }
0x19a2   : > { %v3289_v3 = vadd.f32 %v3286_v35, %v3281_v23 }
0x19a3   : > { %3292 = vst.msk [vmem:[#allocation2 + $0x8] sm:$0xff] %vm1025_vm1, %v3288_v34  ;;  %v3282_v57 = vmul.f32 %v3278_v14, %v3274_v49  ;;  %3298 = sbr.rel (%p3681_p11) target bundleno = 6572 (0x19ac), region = 132 }
0x19a4   : > { %3293 = vst.msk [vmem:[#allocation2 + $0x10] sm:$0xff] %vm1025_vm1, %v3289_v3 }
0x19a5   : > { %v3290_v0 = vadd.f32 %v3286_v35, %v3282_v57 }
0x19a7   : > { %3294 = vst.msk [vmem:[#allocation2 + $0x18] sm:$0xff] %vm1025_vm1, %v3290_v0 }
0x19a8   : > { %v3299_v20 = vpack.c.bf16 %v3287_v53, %v3287_v53  ;;  %vm3303_vm7 = vcmask 257024   ;;  %v3300_v63 = vpack.c.bf16 %v3288_v34, %v3288_v34  ;;  %v3301_v55 = vpack.c.bf16 %v3289_v3, %v3289_v3 }
0x19a9   : > { %v3302_v7 = vpack.c.bf16 %v3290_v0, %v3290_v0 }
0x19aa   : > { %3304 = vst.msk [vmem:[#allocation13] sm:$0xf] %vm3303_vm7, %v3299_v20  ;;  %3305 = vst.msk [vmem:[#allocation13 + $0x4] sm:$0xf] %vm3303_vm7, %v3300_v63 }
0x19ab   : > { %3306 = vst.msk [vmem:[#allocation13 + $0x8] sm:$0xf] %vm3303_vm7, %v3301_v55  ;;  %3307 = vst.msk [vmem:[#allocation13 + $0xc] sm:$0xf] %vm3303_vm7, %v3302_v7 }
0x19ac PF: > { %p4035_p12 = scmp.eq.s32.totalorder %s4695_s2, 1  ;;  %s4564_s6 = smov [#allocation13]  }
0x19ad   : > { %s3317_s8 = sshll.u32 %s4564_s6, 4  ;;  %s3318_s8 = int_to_ptr.vmem [resolvable:$true] %s3317_s8 }
0x19ae   : > { %s4462_s16 = scalar_lea.vmem %s3318_s8, 256  ;;  %p4469_p6 = scmp.lt.s32.totalorder %s3318_s8, %s3318_s8 }
0x19af   : > { %p4463_p8 = scmp.ne.s32.totalorder %s3318_s8, %s4462_s16  ;;  %p4470_p1 = scmp.lt.s32.totalorder %s4462_s16, %s4462_s16 }
0x19b1   : > { %p4464_p2 = pnand %p4463_p8, %p4035_p12  ;;  %p4471_p4 = por %p4470_p1, %p4469_p6 }
0x19b3   : > { %p4465_p3 = pneg %p4464_p2 }
0x19b5   : > { %p4472_p7 = pnand %p4471_p4, %p4465_p3 }
0x19b7   : > { %4475 = shalt.err (!%p4472_p7)
}
0x19b8   : > { %s4565_s21 = smov 4   ;;  %s5786_s25 = sld [smem:[#allocation45_spill]] }
0x19be   : > { %4004 = dma.vmem_to_hbm [thread:$0]  (%p4035_p12), %s3318_s8, 256, %s5786_s25, [#allocation5], %s4560_s5, %s4560_s5, %s4565_s21  }
0x19bf   : > { %4523 = dma.done.wait (%p4035_p12), [#allocation5], 256  }
0x19c0   : > { %4525 = vsyncadd (%p4035_p12), [#allocation5], 4294967040 }
0x19c1 PF: > { %s5787_s15 = sld [smem:[#allocation19_spill]]  ;;  %s5791_s0 = smov %s4532_s30 }
0x19c2   : > { %s5788_s10 = sld [smem:[#allocation21_spill]]  ;;  %s5792_s30 = smov %s4536_s20 }
0x19c3   : > { %s5789_s21 = sld [smem:[#allocation18_spill]] }
0x19c4   : > { %s5790_s1 = sld [smem:[#allocation20_spill]] }
0x19c7   : > { %s32_s22 = sadd.s32 1, %s5787_s15  }
0x19c8   : > { %p29_p5 = scmp.ge.s32.totalorder %s32_s22, 4   ;;  %s5793_s20 = smov %s5788_s10 }
0x19ca   :  { %31 = sbr.rel (!%p29_p5) target bundleno = 25 (0x19), region = 224 }
0x19cf   :  { %3333 = vsyncpa [#allocation4], 1 }
0x19d0   :  { %3335 = vsyncpa [#allocation4 + $0x1], 1 }
0x19d1   :  { %3336 = vsyncpa [#allocation7], 1 }
0x19d2   :  { %3337 = vsyncpa [#allocation5], 1 }
0x19d3   :  { %3339 = vsyncpa [#allocation5 + $0x1], 1 }

// kernel: tpu_custom_call.1
= control target key start
LH: loop header
LB: loop body
LE: loop exit
PB: predicated region body
PF: predicated region fallthrough
CT: control target
= control target key end

     0   :  { %s5658_s0 = inlined_call_operand.hbm [shape: bf16[4,8,32], index: 0, kind: input, shape index: {}]   ;;  %s5659_s1 = inlined_call_operand.vmem [shape: bf16[4,1,32], index: 1, kind: input, shape index: {}]   ;;  %s5660_s2 = inlined_call_operand.hbm [shape: f32[8,32], index: 2, kind: input, shape index: {}]   ;;  %s5661_s3 = inlined_call_operand.vmem [shape: f32[32,32], index: 3, kind: input, shape index: {}]   ;;  %s5662_s4 = inlined_call_operand.vmem [shape: f32[8,32], index: 4, kind: input, shape index: {}]   ;;  %s5663_s5 = inlined_call_operand.vmem [shape: bf16[2,32,96], index: 5, kind: input, shape index: {}]   ;;  %s5664_s6 = inlined_call_operand.hbm [shape: f32[2,1,96], index: 6, kind: input, shape index: {}]   ;;  %s5665_s7 = inlined_call_operand.vmem [shape: bf16[2,32,32], index: 7, kind: input, shape index: {}]   ;;  %s5666_s8 = inlined_call_operand.hbm [shape: f32[2,1,32], index: 8, kind: input, shape index: {}]   ;;  %s5667_s9 = inlined_call_operand.vmem [shape: bf16[2,32,32], index: 9, kind: input, shape index: {}]   ;;  %s5668_s10 = inlined_call_operand.hbm [shape: f32[2,1,32], index: 10, kind: input, shape index: {}]   ;;  %s5669_s11 = inlined_call_operand.hbm [shape: bf16[2,32,32], index: 11, kind: input, shape index: {}]   ;;  %s5670_s12 = inlined_call_operand.vmem [shape: f32[2,1,32], index: 12, kind: input, shape index: {}]   ;;  %s5671_s13 = inlined_call_operand.hbm [shape: bf16[2,32,64], index: 13, kind: input, shape index: {}]   ;;  %s5672_s14 = inlined_call_operand.vmem [shape: f32[2,1,64], index: 14, kind: input, shape index: {}]   ;;  %s5673_s15 = inlined_call_operand.vmem [shape: bf16[2,64,32], index: 15, kind: input, shape index: {}]   ;;  %s5674_s16 = inlined_call_operand.vmem [shape: f32[2,1,32], index: 16, kind: input, shape index: {}]   ;;  %s5675_s17 = inlined_call_operand.vmem [shape: f32[2,3,32], index: 17, kind: input, shape index: {}]   ;;  %s5676_s18 = inlined_call_operand.vmem [shape: f32[2,3,32], index: 18, kind: input, shape index: {}]   ;;  %s5677_s19 = inlined_call_operand.hbm [shape: bf16[4,8,32], index: 19, kind: output, shape index: {}]  }
   0x1   :  { %5700 = sst [smem:[#allocation27_spill]] %s5658_s0 }
   0x2   :  { %5701 = sst [smem:[#allocation28_spill]] %s5659_s1 }
   0x3   :  { %5702 = sst [smem:[#allocation29_spill]] %s5660_s2 }
   0x4   :  { %5703 = sst [smem:[#allocation30_spill]] %s5661_s3 }
   0x5   :  { %5704 = sst [smem:[#allocation31_spill]] %s5662_s4 }
   0x6   :  { %5705 = sst [smem:[#allocation32_spill]] %s5663_s5 }
   0x7   :  { %5706 = sst [smem:[#allocation33_spill]] %s5664_s6 }
   0x8   :  { %5707 = sst [smem:[#allocation34_spill]] %s5665_s7 }
   0x9   :  { %5708 = sst [smem:[#allocation35_spill]] %s5666_s8 }
   0xa   :  { %5709 = sst [smem:[#allocation36_spill]] %s5667_s9 }
   0xb   :  { %5710 = sst [smem:[#allocation37_spill]] %s5668_s10 }
   0xc   :  { %5711 = sst [smem:[#allocation38_spill]] %s5669_s11 }
   0xd   :  { %5712 = sst [smem:[#allocation39_spill]] %s5671_s13 }
   0xe   :  { %5713 = sst [smem:[#allocation40_spill]] %s5672_s14 }
   0xf   :  { %5714 = sst [smem:[#allocation41_spill]] %s5673_s15 }
  0x10   :  { %5715 = sst [smem:[#allocation42_spill]] %s5674_s16 }
  0x11   :  { %5716 = sst [smem:[#allocation43_spill]] %s5675_s17 }
  0x12   :  { %5717 = sst [smem:[#allocation44_spill]] %s5676_s18 }
  0x13   :  { %5718 = sst [smem:[#allocation45_spill]] %s5677_s19 }
  0x14   :  { %24 = vsyncpa [#allocation4], 0 }
  0x15   :  { %25 = vsyncpa [#allocation7], 0 }
  0x16   :  { %26 = vsyncpa [#allocation5], 0  ;;  %s4666_s0 = smov 0   ;;  %s4668_s30 = smov 0  }
  0x17   :  { %s4670_s20 = smov 0   ;;  %s4672_s21 = smov 0  }
  0x18   :  { %s4674_s1 = smov 0   ;;  %s4676_s22 = smov 0  }
  0x19 LB: > { %5719 = sst [smem:[#allocation18_spill]] %s4544_s1  ;;  %s4695_s2 = sadd.s32 4294967295, %s4548_s22   ;;  %s4548_s22 = sphi %s4676_s22, %s32_s22   ;;  %s4544_s1 = sphi %s4674_s1, %s5790_s1   ;;  %s4540_s21 = sphi %s4672_s21, %s5789_s21   ;;  %s4536_s20 = sphi %s4670_s20, %s5793_s20   ;;  %s4532_s30 = sphi %s4668_s30, %s5792_s30   ;;  %s4528_s0 = sphi %s4666_s0, %s5791_s0  }
  0x1a   : > { %5720 = sst [smem:[#allocation19_spill]] %s4548_s22  ;;  %p205_p0 = scmp.ne.s32.totalorder %s4532_s30, %s4528_s0 }
  0x1b   : > { %p5687_p1 = scmp.eq.s32.totalorder %s4695_s2, 0  ;;  %p3585_p2 = scmp.ge.s32.totalorder %s4548_s22, 1 }
  0x1c   : > { %p554_p3 = scmp.lt.s32.totalorder %s4548_s22, 3  ;;  %s4550_s25 = smov [#allocation3]  }
  0x1d   : > { %p4703_p4 = por %p5687_p1, %p205_p0  ;;  %s569_s3 = sshll.u32 %s4550_s25, 4  ;;  %s570_s3 = int_to_ptr.vmem [resolvable:$true] %s569_s3 }
  0x1e   : > { %p4707_p5 = pnand %p3585_p2, %p554_p3  ;;  %s41_s27 = sadd.s32 1, %s4544_s1 }
  0x1f   : > { %s5721_s23 = scalar_select %p4703_p4, 1, 0 }
  0x20   : > { %s5722_s24 = scalar_select %p4707_p5, 1, 0 }
  0x21   : > { %p4007_p6 = pneg %p4707_p5  ;;  %s4281_s28 = scalar_lea.vmem %s570_s3, 256 }
  0x22   : > { %p4282_p9 = scmp.ne.s32.totalorder %s570_s3, %s4281_s28  ;;  %p4289_p12 = scmp.lt.s32.totalorder %s570_s3, %s570_s3 }
  0x23   : > { %p4715_p7 = pnand %p4007_p6, %p5687_p1  ;;  %p4290_p13 = scmp.lt.s32.totalorder %s4281_s28, %s4281_s28 }
  0x25   : > { %p4272_p8 = pneg %p4715_p7  ;;  %p4291_p0 = por %p4290_p13, %p4289_p12 }
  0x27   : > { %p4284_p10 = pnand %p4282_p9, %p4272_p8 }
  0x29   : > { %p4285_p11 = pneg %p4284_p10 }
  0x2b   : > { %p4292_p2 = pnand %p4291_p0, %p4285_p11 }
  0x2d   : > { %4295 = shalt.err (!%p4292_p2)
}
  0x2e   : > { %s5680_s29 = smov 64   ;;  %s5682_s0 = smov 4  }
  0x2f   : > { %s5724_s19 = sld [smem:[#allocation27_spill]]  ;;  %p42_p3 = scmp.ge.s32.totalorder %s41_s27, 2 }
  0x30   : > { %s192_s4 = sadd.s32 1, %s4536_s20  ;;  %p199_p6 = scmp.ne.s32.totalorder %s4536_s20, %s4532_s30 }
  0x31   : > { %p200_p9 = scmp.eq.s32.totalorder %s4548_s22, 0  ;;  %s5795_s27 = smov (%p42_p3, %s41_s27), 0 }
  0x32   : > { %5725 = sst [smem:[#allocation20_spill]] %s5795_s27  ;;  %p4032_p11 = scmp.lt.s32.totalorder %s4548_s22, 2 }
  0x33   : > { %p201_p10 = por %p200_p9, %p199_p6  ;;  %s189_s18 = ssub.s32 %s4544_s1, %s5795_s27 }
  0x34   : > { %s616_s17 = sand.u32 1, %s4548_s22   ;;  %p190_p12 = scmp.eq.s32.totalorder %s189_s18, 0 }
  0x35   : > { %4010 = dma.hbm_to_vmem [thread:$0]  (!%p4715_p7), %s5724_s19, 256, %s570_s3, [#allocation4], %s5680_s29, %s5680_s29, %s5682_s0  }
  0x36   : > { %s4744_s15 = sand.u32 1, %s4536_s20   ;;  %s4747_s16 = sshll.u32 %s4544_s1, 4 }
  0x37   : > { %s4750_s19 = scalar_select %p190_p12, %s4536_s20, %s192_s4  }
  0x38   : > { %s5727_s6 = sld [smem:[#allocation33_spill]]  ;;  %s619_s29 = scalar_lea.vmem [#allocation8], %s4744_s15 }
  0x39   : > { %5726 = sst [smem:[#allocation21_spill]] %s4750_s19  ;;  %s626_s0 = sshll.u32 %s619_s29, 4  ;;  %s627_s0 = int_to_ptr.vmem [resolvable:$true] %s626_s0 }
  0x3a   : > { %p4757_p13 = pnand %p4032_p11, %p201_p10  ;;  %s5729_s8 = sld [smem:[#allocation35_spill]] }
  0x3b   : > { %s4765_s9 = scalar_lea.sflag [#allocation4], %s616_s17  ;;  %s4309_s3 = scalar_lea.vmem %s627_s0, 16 }
  0x3c   : > { %p4769_p0 = pneg %p4757_p13  ;;  %p4310_p2 = scmp.ne.s32.totalorder %s627_s0, %s4309_s3 }
  0x3d   : > { %s4553_s29 = smov [#allocation8]  }
  0x3e   : > { %s624_s28 = scalar_lea.hbm %s5727_s6, %s4747_s16  ;;  %p4312_p3 = pnand %p4310_p2, %p4769_p0 }
  0x3f   : > { %s4314_s25 = sshll.u32 %s4553_s29, 4  ;;  %s4315_s25 = int_to_ptr.vmem [resolvable:$false] %s4314_s25 }
  0x40   : > { %p4313_p6 = pneg %p4312_p3  ;;  %s4316_s6 = scalar_lea.vmem %s4315_s25, 32 }
  0x41   : > { %p4317_p9 = scmp.lt.s32.totalorder %s627_s0, %s4315_s25  ;;  %p4318_p10 = scmp.lt.s32.totalorder %s4316_s6, %s4309_s3 }
  0x43   : > { %p4319_p11 = por %p4318_p10, %p4317_p9 }
  0x45   : > { %p4320_p12 = pnand %p4319_p11, %p4313_p6 }
  0x47   : > { %4323 = shalt.err (!%p4320_p12)
}
  0x48   : > { %4017 = dma.hbm_to_vmem [thread:$0]  (!%p4757_p13), %s624_s28, 16, %s627_s0, %s4765_s9  }
  0x49   : > { %s644_s17 = scalar_lea.vmem [#allocation9], %s4744_s15  ;;  %s5731_s10 = sld [smem:[#allocation37_spill]] }
  0x4a   : > { %s651_s27 = sshll.u32 %s644_s17, 4  ;;  %s4554_s6 = smov [#allocation9]   ;;  %s652_s27 = int_to_ptr.vmem [resolvable:$true] %s651_s27 }
  0x4b   : > { %s4337_s19 = scalar_lea.vmem %s652_s27, 16  ;;  %s4342_s3 = sshll.u32 %s4554_s6, 4  ;;  %s4343_s3 = int_to_ptr.vmem [resolvable:$false] %s4342_s3 }
  0x4c   : > { %p4338_p2 = scmp.ne.s32.totalorder %s652_s27, %s4337_s19  ;;  %s4344_s25 = scalar_lea.vmem %s4343_s3, 32 }
  0x4d   : > { %p4345_p9 = scmp.lt.s32.totalorder %s652_s27, %s4343_s3  ;;  %p4346_p10 = scmp.lt.s32.totalorder %s4344_s25, %s4337_s19 }
  0x4e   : > { %p4340_p3 = pnand %p4338_p2, %p4769_p0 }
  0x4f   : > { %p4347_p11 = por %p4346_p10, %p4345_p9 }
  0x50   : > { %p4341_p6 = pneg %p4340_p3 }
  0x52   : > { %p4348_p12 = pnand %p4347_p11, %p4341_p6 }
  0x54   : > { %4351 = shalt.err (!%p4348_p12)
}
  0x55   : > { %s5732_s28 = scalar_lea.hbm %s5729_s8, %s4747_s16  ;;  %s669_s17 = scalar_lea.vmem [#allocation10], %s4744_s15 }
  0x56   : > { %4020 = dma.hbm_to_vmem [thread:$0]  (!%p4757_p13), %s5732_s28, 16, %s652_s27, %s4765_s9  }
  0x57   : > { %s676_s18 = sshll.u32 %s669_s17, 4  ;;  %s5686_s6 = sshll.u32 %s4744_s15, 4  ;;  %s677_s18 = int_to_ptr.vmem [resolvable:$true] %s676_s18 }
  0x58   : > { %s4365_s19 = scalar_lea.vmem %s677_s18, 16  ;;  %s4555_s3 = smov [#allocation10]  }
  0x59   : > { %p4366_p2 = scmp.ne.s32.totalorder %s677_s18, %s4365_s19  ;;  %s4370_s25 = sshll.u32 %s4555_s3, 4  ;;  %s4371_s25 = int_to_ptr.vmem [resolvable:$false] %s4370_s25 }
  0x5a   : > { %s4372_s29 = scalar_lea.vmem %s4371_s25, 32  ;;  %p4373_p9 = scmp.lt.s32.totalorder %s677_s18, %s4371_s25 }
  0x5b   : > { %p4368_p3 = pnand %p4366_p2, %p4769_p0  ;;  %p4374_p10 = scmp.lt.s32.totalorder %s4372_s29, %s4365_s19 }
  0x5d   : > { %p4369_p6 = pneg %p4368_p3  ;;  %p4375_p11 = por %p4374_p10, %p4373_p9 }
  0x5f   : > { %p4376_p12 = pnand %p4375_p11, %p4369_p6 }
  0x61   : > { %4379 = shalt.err (!%p4376_p12)
}
  0x62   : > { %s5733_s22 = scalar_lea.hbm %s5731_s10, %s4747_s16  ;;  %s3686_s28 = sshll.u32 %s4544_s1, 8 }
  0x63   : > { %4023 = dma.hbm_to_vmem [thread:$0]  (!%p4757_p13), %s5733_s22, 16, %s677_s18, %s4765_s9  }
  0x64   : > { %s687_s17 = scalar_lea.vmem [#allocation11], %s5686_s6  ;;  %s5734_s11 = sld [smem:[#allocation38_spill]] }
  0x65   : > { %s694_s3 = sshll.u32 %s687_s17, 4  ;;  %s4556_s27 = smov [#allocation11]   ;;  %s695_s3 = int_to_ptr.vmem [resolvable:$true] %s694_s3 }
  0x66   : > { %s4393_s8 = scalar_lea.vmem %s695_s3, 256  ;;  %s4398_s16 = sshll.u32 %s4556_s27, 4  ;;  %s4399_s16 = int_to_ptr.vmem [resolvable:$false] %s4398_s16 }
  0x67   : > { %p4394_p2 = scmp.ne.s32.totalorder %s695_s3, %s4393_s8  ;;  %s4400_s0 = scalar_lea.vmem %s4399_s16, 512 }
  0x68   : > { %p4401_p9 = scmp.lt.s32.totalorder %s695_s3, %s4399_s16  ;;  %p4402_p10 = scmp.lt.s32.totalorder %s4400_s0, %s4393_s8 }
  0x69   : > { %p4396_p3 = pnand %p4394_p2, %p4769_p0 }
  0x6a   : > { %s693_s25 = scalar_lea.hbm %s5734_s11, %s3686_s28  ;;  %p4403_p11 = por %p4402_p10, %p4401_p9 }
  0x6b   : > { %p4397_p6 = pneg %p4396_p3 }
  0x6d   : > { %p4404_p12 = pnand %p4403_p11, %p4397_p6 }
  0x6f   : > { %4407 = shalt.err (!%p4404_p12)
}
  0x70   : > { %s5735_s18 = smov 4   ;;  %s5736_s22 = smov 64  }
  0x71   : > { %4026 = dma.hbm_to_vmem [thread:$0]  (!%p4757_p13), %s693_s25, 256, %s695_s3, %s4765_s9, %s5736_s22, %s5736_s22, %s5735_s18  }
  0x72   : > { %s4557_s17 = smov [#allocation6]   ;;  %s5737_s13 = sld [smem:[#allocation39_spill]] }
  0x73   : > { %s591_s29 = sshll.u32 %s4557_s17, 4  ;;  %s5738_s8 = sshll.u32 %s4744_s15, 4  ;;  %s592_s29 = int_to_ptr.vmem [resolvable:$true] %s591_s29 }
  0x74   : > { %s714_s16 = scalar_lea.vmem [#allocation12], %s5738_s8  ;;  %s4419_s10 = scalar_lea.vmem %s592_s29, 128 }
  0x75   : > { %s721_s0 = sshll.u32 %s714_s16, 4  ;;  %p4420_p2 = scmp.ne.s32.totalorder %s592_s29, %s4419_s10  ;;  %s722_s0 = int_to_ptr.vmem [resolvable:$true] %s721_s0 }
  0x76   : > { %p4427_p9 = scmp.lt.s32.totalorder %s592_s29, %s592_s29  ;;  %p4428_p10 = scmp.lt.s32.totalorder %s4419_s10, %s4419_s10 }
  0x77   : > { %p4422_p3 = pnand %p4420_p2, %p4272_p8 }
  0x78   : > { %s4822_s6 = scalar_lea.hbm %s5737_s13, %s3686_s28  ;;  %p4429_p11 = por %p4428_p10, %p4427_p9 }
  0x79   : > { %p4423_p6 = pneg %p4422_p3 }
  0x7b   : > { %p4430_p12 = pnand %p4429_p11, %p4423_p6 }
  0x7d   : > { %4433 = shalt.err (!%p4430_p12)
}
  0x7e   : > { %s5739_s25 = sld [smem:[#allocation29_spill]]  ;;  %s4447_s15 = scalar_lea.vmem %s722_s0, 256 }
  0x7f   : > { %p4448_p1 = scmp.ne.s32.totalorder %s722_s0, %s4447_s15  ;;  %s4558_s17 = smov [#allocation12]  }
  0x80   : > { %s4452_s19 = sshll.u32 %s4558_s17, 4  ;;  %s4453_s19 = int_to_ptr.vmem [resolvable:$false] %s4452_s19 }
  0x81   : > { %p4450_p4 = pnand %p4448_p1, %p4769_p0  ;;  %s4454_s10 = scalar_lea.vmem %s4453_s19, 512 }
  0x82   : > { %p4455_p8 = scmp.lt.s32.totalorder %s722_s0, %s4453_s19  ;;  %p4456_p2 = scmp.lt.s32.totalorder %s4454_s10, %s4447_s15 }
  0x83   : > { %p4451_p5 = pneg %p4450_p4 }
  0x84   : > { %4013 = dma.hbm_to_vmem [thread:$0]  (!%p4715_p7), %s5739_s25, 128, %s592_s29, [#allocation7]  }
  0x85   : > { %p4457_p3 = por %p4456_p2, %p4455_p8 }
  0x87   : > { %p4458_p6 = pnand %p4457_p3, %p4451_p5 }
  0x89   : > { %4461 = shalt.err (!%p4458_p6)
}
  0x8a   : > { %4029 = dma.hbm_to_vmem [thread:$0]  (!%p4757_p13), %s4822_s6, 256, %s722_s0, %s4765_s9, %s5736_s22, %s5736_s22, %s5735_s18  }
  0x8b   : > { %p5740_p1 = scmp.ne.s32.totalorder %s5722_s24, 0 }
  0x8d   : > { %767 = sbr.rel (%p5740_p1) target bundleno = 6593 (0x19c1), region = 96 }
  0x92   : > { %p5741_p4 = scmp.eq.s32.totalorder %s4695_s2, 0 }
  0x94   : > { %4511 = dma.done.wait (%p5741_p4), [#allocation4], 256   ;;  %p5742_p7 = pmov %p5741_p4 }
  0x95   : > { %p5743_p5 = pmov %p5741_p4 }
  0x96   : > { %4513 = vsyncadd (%p5742_p7), [#allocation4], 4294967040 }
  0x97   : > { %4515 = dma.done.wait (%p5743_p5), [#allocation7], 128   ;;  %p5744_p0 = pmov %p5741_p4 }
  0x98   : > { %s777_s14 = sand.u32 1, %s4695_s2   ;;  %s4855_s9 = sand.u32 1, %s4532_s30  }
  0x99   : > { %4517 = vsyncadd (%p5744_p0), [#allocation7], 4294967168  ;;  %s778_s24 = scalar_lea.sflag [#allocation4], %s777_s14  ;;  %p5745_p13 = scmp.ne.s32.totalorder %s5721_s23, 0 }
  0x9b   : > { %4519 = dma.done.wait (%p5745_p13), %s778_s24, 560  }
  0x9c   : > { %4521 = vsyncadd (%p5745_p13), %s778_s24, 4294966736  ;;  %s3602_s4 = sshll.u32 %s4855_s9, 4  ;;  %p928_p9 = scmp.lt.s32.totalorder %s4540_s21, 1 }
  0x9d   : > { %s5746_s5 = sld [smem:[#allocation32_spill]]  ;;  %s788_s24 = scalar_lea.vmem [#allocation9], %s4855_s9 }
  0x9e   : > { %s4865_s6 = scalar_select %p928_p9, %s4540_s21, 1 }
  0x9f   : > { %s5747_s7 = sld [smem:[#allocation34_spill]]  ;;  %s796_s22 = scalar_lea.vmem [#allocation10], %s4855_s9 }
  0xa0   : > { %s3688_s18 = sshll.u32 %s4865_s6, 4  ;;  %s5748_s17 = sld [smem:[#allocation36_spill]] }
  0xa1   : > { %s3691_s29 = sshll.u32 %s4865_s6, 5  ;;  %s5750_s27 = sld [smem:[#allocation42_spill]] }
  0xa2   : > { %s5751_s13 = sld [smem:[#allocation41_spill]]  ;;  %s3612_s3 = sshll.u32 %s4865_s6, 2 }
  0xa3   : > { %s4875_s16 = scalar_lea.vmem %s5746_s5, %s3688_s18  ;;  %s5752_s25 = sld [smem:[#allocation43_spill]] }
  0xa4   : > { %s5753_s10 = sld [smem:[#allocation44_spill]]  ;;  %s4914_s26 = scalar_lea.vmem [#allocation11], %s3602_s4 }
  0xa5   : > { %s4880_s28 = scalar_lea.vmem %s5747_s7, %s3688_s18  ;;  %s4916_s23 = scalar_lea.vmem [#allocation12], %s3602_s4 }
  0xa6   : > { %s4885_s19 = scalar_lea.vmem %s5748_s17, %s3688_s18  ;;  %p3614_p10 = scmp.ne.s32.totalorder %s4540_s21, 0 }
  0xa7   : > { %s956_s8 = scalar_lea.vmem %s5750_s27, %s4865_s6 }
  0xa8   : > { %s4899_s0 = scalar_lea.vmem %s5751_s13, %s3691_s29  ;;  %970 = sbr.rel (%p3614_p10) target bundleno = 180 (0xb4), region = 128 }
  0xa9   : > { %s4905_s18 = scalar_lea.vmem %s5752_s25, %s3612_s3 }
  0xaa   : > { %s4910_s14 = scalar_lea.vmem %s5753_s10, %s3612_s3 }
  0xad   : > { %v3693_v0 = vld [vmem:[#allocation3] sm:$0xff]   ;;  %v979_v1 = vld [vmem:[#allocation6] sm:$0xff]  ;;  %v3700_v2 = vld [vmem:[#allocation3 + $0x8] sm:$0xff]   ;;  %vm984_vm0 = vcmask 261120  }
  0xae   : > { %v3694_v3 = vunpack.c.l.bf16 %v3693_v0  ;;  %v3695_v4 = vunpack.c.h.bf16 %v3693_v0  ;;  %v3698_v5 = vunpack.c.l.bf16 %v3700_v2  ;;  %v3699_v6 = vunpack.c.h.bf16 %v3700_v2 }
  0xb0   : > { %v980_v7 = vadd.f32 %v3694_v3, %v979_v1  ;;  %v981_v8 = vadd.f32 %v3695_v4, %v979_v1  ;;  %v982_v9 = vadd.f32 %v3698_v5, %v979_v1  ;;  %v983_v10 = vadd.f32 %v3699_v6, %v979_v1 }
  0xb2   : > { %985 = vst.msk [vmem:[#allocation2] sm:$0xff] %vm984_vm0, %v980_v7  ;;  %986 = vst.msk [vmem:[#allocation2 + $0x8] sm:$0xff] %vm984_vm0, %v981_v8 }
  0xb3   : > { %987 = vst.msk [vmem:[#allocation2 + $0x10] sm:$0xff] %vm984_vm0, %v982_v9  ;;  %988 = vst.msk [vmem:[#allocation2 + $0x18] sm:$0xff] %vm984_vm0, %v983_v10 }
  0xb4 PF: > { %v4096_v11 = vld [vmem:[%s4875_s16 + $0x8] sm:$0xff]   ;;  %v4097_v12 = vld [vmem:[%s4875_s16] sm:$0xff]   ;;  %vm1025_vm1 = vcmask 261120   ;;  %v1083_v19 = vlaneseq  ;;  %s5758_s11 = sld [smem:[#allocation31_spill]]  ;;  %s5759_s13 = scalar_lea.vmem [#allocation8], %s4855_s9  ;;  %vm4562_vm2 = vmmov 0  }
  0xb5   : > { %3789 = vmatprep.subr.bf16.mxu0 %v4096_v11  ;;  %v3615_v29 = vld [vmem:[%s5759_s13] ss:$0 sm:$0xff]  ;;  %s4559_s1 = smov 96   ;;  %s5761_s29 = sld [smem:[#allocation30_spill]]  ;;  %vm2790_vm3 = vcmask 1041409   ;;  %vm2793_vm4 = vcmask 1042434  }
  0xb6   : > { %3790 = vmatpush3.bf16.msra.mxu0 %v4096_v11  ;;  %v4923_v20 = vshrl.u32 %v1083_v19, 7  ;;  %s4560_s5 = smov 64   ;;  %s5776_s17 = sld [smem:[#allocation28_spill]]  ;;  %vm2796_vm5 = vcmask 1043459   ;;  %vm3163_vm6 = vcmask 523264  }
  0xb7   : > { %3791 = vmatprep.subr.bf16.mxu0 %v4097_v12  ;;  %p3681_p11 = scmp.ne.s32.totalorder %s4540_s21, 1 }
  0xb8   : > { %5754 = vst [vmem:[#allocation22_spill] sm:$0xff] %v4923_v20  ;;  %v4926_v21 = vsub.s32 0, %v4923_v20  ;;  %v4929_v22 = vsub.s32 1, %v4923_v20  ;;  %v4932_v23 = vsub.s32 2, %v4923_v20  ;;  %v1649_v25 = vsub.s32 3, %v4923_v20 }
  0xb9   : > { %v989_v13 = vld [vmem:[#allocation2] sm:$0xff]  ;;  %v990_v14 = vld [vmem:[#allocation2 + $0x8] sm:$0xff]  ;;  %v1831_v26 = vsub.s32 4, %v4923_v20  ;;  %v2013_v27 = vsub.s32 5, %v4923_v20  ;;  %v2195_v28 = vsub.s32 6, %v4923_v20  ;;  %v2377_v30 = vsub.s32 7, %v4923_v20 }
  0xba   : > { %v991_v15 = vld [vmem:[#allocation2 + $0x10] sm:$0xff]  ;;  %v1000_v16 = vpack.c.bf16 %v990_v14, %v989_v13  ;;  %v992_v17 = vld [vmem:[#allocation2 + $0x18] sm:$0xff]  ;;  %3792 = vmatpush3.bf16.msra.mxu0 %v4097_v12  ;;  %5755 = vst [vmem:[#allocation23_spill] sm:$0xff] %v4926_v21  ;;  %5756 = vst [vmem:[#allocation24_spill] sm:$0xff] %v4929_v22 }
  0xbb   : > { %v1001_v18 = vpack.c.bf16 %v992_v17, %v991_v15  ;;  %5757 = vst [vmem:[#allocation25_spill] sm:$0xff] %v4932_v23  ;;  %v993_v24 = vld [vmem:[%s5758_s11] sm:$0xff] }
  0xbc   : > { %3793 = vmatprep.mubr.msk.bf16.mxu0 %vm1025_vm1, %v1000_v16  ;;  %v4945_v31 = vrot.slane %v993_v24, %v4926_v21  ;;  %v4948_v32 = vrot.slane %v993_v24, %v4929_v22  ;;  %v4951_v33 = vrot.slane %v993_v24, %v4932_v23  ;;  %v4953_v35 = vrot.slane %v993_v24, %v1649_v25 }
  0xbd   : > { %3794 = vmatmul.mubr.msk.bf16.vlgmr.msra.gmra.mxu0 %vm1025_vm1, %v1001_v18  ;;  %v4955_v36 = vrot.slane %v993_v24, %v1831_v26  ;;  %v4957_v37 = vrot.slane %v993_v24, %v2013_v27  ;;  %v4959_v38 = vrot.slane %v993_v24, %v2195_v28  ;;  %v4961_v41 = vrot.slane %v993_v24, %v2377_v30 }
  0xbf   : > { %5760 = vst [vmem:[#allocation26_spill] sm:$0xff] %v4961_v41 }
 0x17d   : > { %v3795_v34 = vpop.f32.mrf.mxu0 }
 0x17e   : > { %v1075_v39 = vadd.f32 %v3795_v34, %v3615_v29 }
 0x17f   : > { %v1066_v40 = vpop.f32.mrf.mxu0 }
 0x180   : > { %v1067_v42 = vadd.f32 %v3615_v29, %v1066_v40  ;;  %v4964_v43 = vmul.f32 %v4945_v31, %v1075_v39  ;;  %v4967_v44 = vmul.f32 %v4948_v32, %v1075_v39  ;;  %v4970_v45 = vmul.f32 %v4951_v33, %v1075_v39 }
 0x181   : > { %v3796_v46 = vpop.f32.mrf.mxu0  ;;  %v4973_v47 = vmul.f32 %v4953_v35, %v1075_v39  ;;  %v4976_v48 = vmul.f32 %v4955_v36, %v1075_v39  ;;  %v4979_v49 = vmul.f32 %v4957_v37, %v1075_v39  ;;  %v4982_v50 = vmul.f32 %v4959_v38, %v1075_v39 }
 0x182   : > { %v1078_v51 = vadd.f32 %v3796_v46, %v3615_v29  ;;  %v1087_v52 = vmul.f32 %v4945_v31, %v1067_v42  ;;  %v4986_v53 = vmul.f32 %v4948_v32, %v1067_v42  ;;  %v4989_v54 = vmul.f32 %v4951_v33, %v1067_v42 }
 0x183   : > { %v1069_v55 = vpop.f32.mrf.mxu0  ;;  %v4992_v56 = vmul.f32 %v4953_v35, %v1067_v42  ;;  %v4995_v57 = vmul.f32 %v4955_v36, %v1067_v42  ;;  %v4998_v58 = vmul.f32 %v4957_v37, %v1067_v42  ;;  %v5001_v59 = vmul.f32 %v4959_v38, %v1067_v42 }
 0x184   : > { %v1070_v60 = vadd.f32 %v3615_v29, %v1069_v55  ;;  %v5003_v61 = vpack.c.bf16 %v1078_v51, %v1075_v39  ;;  %v1090_v62 = vmul.f32 %v4945_v31, %v1078_v51  ;;  %v5007_v63 = vmul.f32 %v4948_v32, %v1078_v51 }
 0x185   : > { %v5010_v0 = vmul.f32 %v4951_v33, %v1078_v51  ;;  %v5013_v1 = vmul.f32 %v4953_v35, %v1078_v51  ;;  %v5016_v2 = vmul.f32 %v4955_v36, %v1078_v51  ;;  %v5019_v3 = vmul.f32 %v4957_v37, %v1078_v51 }
 0x186   : > { %1097 = vrot.lane.b32.xlu0 %v5003_v61, %s4559_s1  ;;  %v1088_v4 = vmul.f32 %v4945_v31, %v1070_v60  ;;  %v5023_v5 = vpack.c.bf16 %v1070_v60, %v1067_v42  ;;  %v1092_v6 = vpack.c.bf16 %v1090_v62, %v4964_v43  ;;  %v5027_v7 = vmul.f32 %v4948_v32, %v1070_v60 }
 0x187   : > { %v5032_v9 = vmul.f32 %v4951_v33, %v1070_v60  ;;  %v5037_v11 = vmul.f32 %v4953_v35, %v1070_v60  ;;  %v5044_v15 = vmul.f32 %v4955_v36, %v1070_v60  ;;  %v5053_v19 = vmul.f32 %v4957_v37, %v1070_v60 }
 0x188   : > { %v1091_v12 = vpack.c.bf16 %v1088_v4, %v1087_v52  ;;  %v5062_v26 = vmul.f32 %v4959_v38, %v1070_v60  ;;  %v5067_v28 = vmul.f32 %v4959_v38, %v1078_v51  ;;  %v5070_v29 = vmul.f32 %v4961_v41, %v1067_v42  ;;  %v5111_v4 = vld [vmem:[%s5761_s29 + $0x10] sm:$0xff]  ;;  %v5116_v52 = vld [vmem:[%s5761_s29] sm:$0xff] }
 0x189   : > { %v5073_v30 = vmul.f32 %v4961_v41, %v1070_v60  ;;  %v5078_v40 = vmul.f32 %v4961_v41, %v1075_v39  ;;  %v5081_v43 = vmul.f32 %v4961_v41, %v1078_v51 }
 0x18a   : > { %3801 = vmatprep.mubr.msk.bf16.mxu1 %vm1025_vm1, %v1091_v12  ;;  %1095 = vrot.lane.b32.xlu0 %v5023_v5, %s4559_s1 }
 0x1f8   : > { %v5089_v55 = vpop.permute.xlu0 %1097 }
 0x1f9   : > { %3969 = vmatprep.subr.msk.bf16.mxu1 %vm1025_vm1, %v5089_v55  ;;  %v5095_v39 = vsel %vm1025_vm1, %v5089_v55, 0 }
 0x1fa   : > { %3798 = vmatpush3.bf16.xpose.msra.mxu1 %v5095_v39 }
 0x1fc   : > { %v5098_v51 = vpop.permute.xlu0 %1095 }
 0x1fd   : > { %3970 = vmatprep.subr.msk.bf16.mxu1 %vm1025_vm1, %v5098_v51  ;;  %v5104_v60 = vsel %vm1025_vm1, %v5098_v51, 0 }
 0x202   : > { %3800 = vmatpush3.bf16.xpose.msra.mxu1 %v5104_v60 }
 0x209   : > { %3802 = vmatmul.mubr.msk.bf16.vlgmr.msra.gmra.mxu1 %vm1025_vm1, %v1092_v6 }
 0x2c9   : > { %v3803_v62 = vpop.f32.mrf.mxu1 }
 0x2ca   : > { %v1162_v12 = vmul.f32 0.5, %v3803_v62  ;;  %v5124_v62 = vld [vmem:[%s5761_s29 + $0x8] sm:$0xff] }
 0x2cb   : > { %v1145_v42 = vpop.f32.mrf.mxu1 }
 0x2cc   : > { %v1160_v46 = vmul.f32 0.5, %v1145_v42  ;;  %v1166_v34 = vadd.f32 %v1162_v12, %v5111_v4  ;;  %v5130_v42 = vld [vmem:[%s5761_s29 + $0x18] sm:$0xff] }
 0x2cd   : > { %v3804_v25 = vpop.f32.mrf.mxu1 }
 0x2ce   : > { %v1174_v27 = vsel %vm1025_vm1, %v1166_v34, -inf  ;;  %v1164_v6 = vadd.f32 %v1160_v46, %v5116_v52  ;;  %v1163_v24 = vmul.f32 0.5, %v3804_v25 }
 0x2cf   : > { %1175 = vmax.xlane.f32.xlu0 %v1174_v27  ;;  %v1148_v18 = vpop.f32.mrf.mxu1 }
 0x2d0   : > { %v1161_v14 = vmul.f32 0.5, %v1148_v18  ;;  %v1168_v17 = vsel %vm1025_vm1, %v1164_v6, -inf  ;;  %v1167_v46 = vadd.f32 %v1163_v24, %v5130_v42 }
 0x2d1   : > { %1169 = vmax.xlane.f32.xlu1 %v1168_v17 }
 0x2d2   : > { %v1165_v12 = vadd.f32 %v1161_v14, %v5124_v62  ;;  %v1177_v10 = vsel %vm1025_vm1, %v1167_v46, -inf }
 0x2d4   : > { %v1171_v27 = vsel %vm1025_vm1, %v1165_v12, -inf }
 0x2d5   : > { %1172 = vmax.xlane.f32.xlu1 %v1171_v27 }
 0x2d9   : > { %1178 = vmax.xlane.f32.xlu1 %v1177_v10 }
 0x2e5   : > { %1214 = vrot.lane.b32.xlu0 %v5023_v5, %s4560_s5 }
 0x358   : > { %v1176_v17 = vpop.xlane.xlu0 %1175 }
 0x359   : > { %v1182_v18 = vsub.f32 %v1166_v34, %v1176_v17 }
 0x35a   : > { %v1170_v25 = vpop.xlane.xlu1 %1169 }
 0x35b   : > { %v1188_v16 = vmul.f32 1.442695, %v1182_v18  ;;  %v1180_v8 = vsub.f32 %v1164_v6, %v1170_v25 }
 0x35d   : > { %4110 = vpow2.f32 %v1188_v16  ;;  %v1184_v13 = vmul.f32 1.442695, %v1180_v8 }
 0x35e   : > { %v1173_v14 = vpop.xlane.xlu1 %1172 }
 0x35f   : > { %4112 = vpow2.f32 %v1184_v13  ;;  %v1181_v23 = vsub.f32 %v1165_v12, %v1173_v14 }
 0x361   : > { %v1186_v27 = vmul.f32 1.442695, %v1181_v23 }
 0x362   : > { %v1179_v22 = vpop.xlane.xlu1 %1178 }
 0x363   : > { %v1183_v24 = vsub.f32 %v1167_v46, %v1179_v22  ;;  %v5148_v46 = vpop.permute.xlu0 %1214 }
 0x365   : > { %v1190_v21 = vmul.f32 1.442695, %v1183_v24 }
 0x367   : > { %4114 = vpow2.f32 %v1190_v21 }
 0x368   : > { %4116 = vpow2.f32 %v1186_v27 }
 0x36a   : > { %v4111_v10 = vpop.eup %4110 }
 0x36b   : > { %v1198_v41 = vsel %vm1025_vm1, %v4111_v10, 0.0 }
 0x36c   : > { %v4113_v5 = vpop.eup %4112  ;;  %1199 = vadd.xlane.f32.xlu1 %v1198_v41 }
 0x36d   : > { %v1192_v34 = vsel %vm1025_vm1, %v4113_v5, 0.0 }
 0x370   : > { %1193 = vadd.xlane.f32.xlu1 %v1192_v34 }
 0x374   : > { %v4115_v6 = vpop.eup %4114 }
 0x375   : > { %v1201_v8 = vsel %vm1025_vm1, %v4115_v6, 0.0  ;;  %v4117_v16 = vpop.eup %4116 }
 0x376   : > { %1202 = vadd.xlane.f32.xlu1 %v1201_v8  ;;  %v1195_v13 = vsel %vm1025_vm1, %v4117_v16, 0.0 }
 0x37a   : > { %1196 = vadd.xlane.f32.xlu1 %v1195_v13 }
 0x38b   : > { %1216 = vrot.lane.b32.xlu1 %v5003_v61, %s4560_s5 }
 0x3f5   : > { %v1200_v21 = vpop.xlane.xlu1 %1199 }
 0x3f9   : > { %v1194_v22 = vpop.xlane.xlu1 %1193 }
 0x3ff   : > { %v1203_v23 = vpop.xlane.xlu1 %1202 }
 0x400   : > { %4118 = vrcp.f32 %v1203_v23 }
 0x401   : > { %4120 = vrcp.f32 %v1194_v22 }
 0x402   : > { %4122 = vrcp.f32 %v1200_v21  ;;  %v5762_v21 = vpack.c.bf16 %v5027_v7, %v4986_v53 }
 0x403   : > { %v1197_v41 = vpop.xlane.xlu1 %1196 }
 0x404   : > { %4124 = vrcp.f32 %v1197_v41 }
 0x407   : > { %v5144_v12 = vpop.permute.xlu1 %1216 }
 0x408   : > { %3805 = vmatprep.subr.bf16.mxu0 %v5144_v12  ;;  %3821 = vmatprep.subr.bf16.mxu1 %v5144_v12 }
 0x409   : > { %3806 = vmatpush3.bf16.msra.mxu0 %v5144_v12  ;;  %3822 = vmatpush3.bf16.msra.mxu1 %v5144_v12 }
 0x40a   : > { %3807 = vmatprep.subr.bf16.mxu0 %v5148_v46  ;;  %3823 = vmatprep.subr.bf16.mxu1 %v5148_v46 }
 0x40d   : > { %3808 = vmatpush3.bf16.msra.mxu0 %v5148_v46  ;;  %3824 = vmatpush3.bf16.msra.mxu1 %v5148_v46  ;;  %v4119_v61 = vpop.eup %4118 }
 0x40e   : > { %3971 = vmatprep.subr.msk.bf16.mxu0 %vm1025_vm1, %v5089_v55  ;;  %3973 = vmatprep.subr.msk.bf16.mxu1 %vm1025_vm1, %v5089_v55  ;;  %v4121_v17 = vpop.eup %4120  ;;  %v1211_v14 = vmul.f32 %v4119_v61, %v4115_v6 }
 0x40f   : > { %v4123_v18 = vpop.eup %4122  ;;  %v1208_v24 = vmul.f32 %v4121_v17, %v4113_v5 }
 0x410   : > { %v1210_v34 = vmul.f32 %v4123_v18, %v4111_v10  ;;  %v5763_v10 = vpack.c.bf16 %v5007_v63, %v4967_v44 }
 0x411   : > { %v4125_v25 = vpop.eup %4124 }
 0x412   : > { %v1209_v27 = vmul.f32 %v4125_v25, %v4117_v16  ;;  %v1213_v13 = vpack.c.bf16 %v1211_v14, %v1210_v34 }
 0x414   : > { %v1212_v8 = vpack.c.bf16 %v1209_v27, %v1208_v24 }
 0x416   : > { %3809 = vmatprep.mubr.msk.bf16.mxu0 %vm1025_vm1, %v1212_v8 }
 0x417   : > { %3810 = vmatmul.mubr.msk.bf16.vlgmr.msra.gmra.mxu0 %vm1025_vm1, %v1213_v13 }
 0x418   : > { %3814 = vmatpush3.bf16.xpose.msra.mxu0 %v5095_v39  ;;  %3817 = vmatprep.mubr.msk.bf16.mxu0 %vm1025_vm1, %v5762_v21 }
 0x419   : > { %3972 = vmatprep.subr.msk.bf16.mxu0 %vm1025_vm1, %v5098_v51 }
 0x420   : > { %3816 = vmatpush3.bf16.xpose.msra.mxu0 %v5104_v60 }
 0x421   : > { %3837 = vmatprep.subr.bf16.mxu0 %v5144_v12 }
 0x427   : > { %3818 = vmatmul.mubr.msk.bf16.vlgmr.msra.gmra.mxu0 %vm1025_vm1, %v5763_v10 }
 0x428   : > { %3838 = vmatpush3.bf16.msra.mxu0 %v5144_v12 }
 0x429   : > { %3839 = vmatprep.subr.bf16.mxu0 %v5148_v46 }
 0x42c   : > { %3840 = vmatpush3.bf16.msra.mxu0 %v5148_v46 }
 0x42d   : > { %3975 = vmatprep.subr.msk.bf16.mxu0 %vm1025_vm1, %v5089_v55 }
 0x4d7   : > { %v5180_v53 = vpop.f32.mrf.mxu0 }
 0x4d9   : > { %v5182_v7 = vpop.f32.mrf.mxu0 }
 0x4db   : > { %v5184_v5 = vpop.f32.mrf.mxu0 }
 0x4dd   : > { %v5186_v6 = vpop.f32.mrf.mxu0 }
 0x4e7   : > { %v3819_v44 = vpop.f32.mrf.mxu0 }
 0x4e8   : > { %v1350_v16 = vmul.f32 0.5, %v3819_v44 }
 0x4e9   : > { %v1333_v63 = vpop.f32.mrf.mxu0 }
 0x4ea   : > { %v1348_v22 = vmul.f32 0.5, %v1333_v63  ;;  %v1354_v14 = vadd.f32 %v1350_v16, %v5111_v4 }
 0x4eb   : > { %v3820_v23 = vpop.f32.mrf.mxu0 }
 0x4ec   : > { %v1352_v41 = vadd.f32 %v1348_v22, %v5116_v52  ;;  %v1351_v17 = vmul.f32 0.5, %v3820_v23  ;;  %v1362_v27 = vsel %vm1025_vm1, %v1354_v14, -inf }
 0x4ed   : > { %v1336_v61 = vpop.f32.mrf.mxu0 }
 0x4ee   : > { %v1349_v18 = vmul.f32 0.5, %v1336_v61  ;;  %v1356_v25 = vsel %vm1025_vm1, %v1352_v41, -inf  ;;  %v1355_v8 = vadd.f32 %v1351_v17, %v5130_v42 }
 0x4ef   : > { %1357 = vmax.xlane.f32.xlu1 %v1356_v25 }
 0x4f0   : > { %v1353_v24 = vadd.f32 %v1349_v18, %v5124_v62  ;;  %v1365_v13 = vsel %vm1025_vm1, %v1355_v8, -inf }
 0x4f2   : > { %v1359_v34 = vsel %vm1025_vm1, %v1353_v24, -inf }
 0x4f3   : > { %1363 = vmax.xlane.f32.xlu1 %v1362_v27  ;;  %1360 = vmax.xlane.f32.xlu0 %v1359_v34 }
 0x4f7   : > { %1366 = vmax.xlane.f32.xlu1 %v1365_v13 }
 0x578   : > { %v1358_v21 = vpop.xlane.xlu1 %1357 }
 0x579   : > { %v1368_v10 = vsub.f32 %v1352_v41, %v1358_v21 }
 0x57b   : > { %v1372_v44 = vmul.f32 1.442695, %v1368_v10 }
 0x57c   : > { %v1364_v63 = vpop.xlane.xlu1 %1363  ;;  %v1361_v22 = vpop.xlane.xlu0 %1360 }
 0x57d   : > { %4126 = vpow2.f32 %v1372_v44  ;;  %v1370_v16 = vsub.f32 %v1354_v14, %v1364_v63  ;;  %v1369_v23 = vsub.f32 %v1353_v24, %v1361_v22 }
 0x57f   : > { %v1376_v61 = vmul.f32 1.442695, %v1370_v16  ;;  %v1374_v18 = vmul.f32 1.442695, %v1369_v23 }
 0x580   : > { %v1367_v25 = vpop.xlane.xlu1 %1366 }
 0x581   : > { %4128 = vpow2.f32 %v1376_v61  ;;  %v1371_v20 = vsub.f32 %v1355_v8, %v1367_v25 }
 0x582   : > { %4130 = vpow2.f32 %v1374_v18 }
 0x583   : > { %v1378_v17 = vmul.f32 1.442695, %v1371_v20 }
 0x585   : > { %4132 = vpow2.f32 %v1378_v17 }
 0x58a   : > { %v4127_v27 = vpop.eup %4126 }
 0x58b   : > { %v1380_v34 = vsel %vm1025_vm1, %v4127_v27, 0.0 }
 0x58c   : > { %1381 = vadd.xlane.f32.xlu1 %v1380_v34 }
 0x58e   : > { %v4129_v13 = vpop.eup %4128 }
 0x58f   : > { %v4131_v41 = vpop.eup %4130  ;;  %v1386_v21 = vsel %vm1025_vm1, %v4129_v13, 0.0 }
 0x590   : > { %1387 = vadd.xlane.f32.xlu1 %v1386_v21  ;;  %v1383_v14 = vsel %vm1025_vm1, %v4131_v41, 0.0 }
 0x591   : > { %1384 = vadd.xlane.f32.xlu0 %v1383_v14 }
 0x592   : > { %v4133_v24 = vpop.eup %4132 }
 0x593   : > { %v1389_v10 = vsel %vm1025_vm1, %v4133_v24, 0.0 }
 0x595   : > { %1390 = vadd.xlane.f32.xlu0 %v1389_v10  ;;  %v5764_v10 = vpack.c.bf16 %v5032_v9, %v4989_v54  ;;  %v1277_v9 = vmul.f32 %v5180_v53, %v4945_v31  ;;  %v1276_v53 = vmul.f32 %v5186_v6, %v4945_v31 }
 0x615   : > { %v1382_v8 = vpop.xlane.xlu1 %1381 }
 0x616   : > { %4134 = vrcp.f32 %v1382_v8 }
 0x619   : > { %v1388_v20 = vpop.xlane.xlu1 %1387 }
 0x61a   : > { %v1385_v44 = vpop.xlane.xlu0 %1384 }
 0x61b   : > { %4136 = vrcp.f32 %v1385_v44 }
 0x61c   : > { %4138 = vrcp.f32 %v1388_v20  ;;  %v1278_v20 = vmul.f32 %v5184_v5, %v4945_v31 }
 0x61e   : > { %v1391_v63 = vpop.xlane.xlu0 %1390 }
 0x61f   : > { %4140 = vrcp.f32 %v1391_v63 }
 0x623   : > { %v4135_v22 = vpop.eup %4134 }
 0x624   : > { %v1396_v23 = vmul.f32 %v4135_v22, %v4127_v27  ;;  %v5765_v27 = vpack.c.bf16 %v5010_v0, %v4970_v45  ;;  %v1275_v45 = vmul.f32 %v5182_v7, %v4945_v31 }
 0x628   : > { %v4137_v16 = vpop.eup %4136 }
 0x629   : > { %v1397_v61 = vmul.f32 %v4137_v16, %v4131_v41  ;;  %v4139_v18 = vpop.eup %4138 }
 0x62a   : > { %v1398_v34 = vmul.f32 %v4139_v18, %v4129_v13 }
 0x62b   : > { %v1400_v25 = vpack.c.bf16 %v1397_v61, %v1396_v23 }
 0x62c   : > { %v4141_v17 = vpop.eup %4140 }
 0x62d   : > { %3825 = vmatprep.mubr.msk.bf16.mxu1 %vm1025_vm1, %v1400_v25  ;;  %v1399_v21 = vmul.f32 %v4141_v17, %v4133_v24 }
 0x62f   : > { %v1401_v14 = vpack.c.bf16 %v1399_v21, %v1398_v34 }
 0x631   : > { %3826 = vmatmul.mubr.msk.bf16.vlgmr.msra.gmra.mxu1 %vm1025_vm1, %v1401_v14 }
 0x632   : > { %3830 = vmatpush3.bf16.xpose.msra.mxu1 %v5095_v39  ;;  %3833 = vmatprep.mubr.msk.bf16.mxu1 %vm1025_vm1, %v5764_v10 }
 0x633   : > { %3974 = vmatprep.subr.msk.bf16.mxu1 %vm1025_vm1, %v5098_v51 }
 0x63a   : > { %3832 = vmatpush3.bf16.xpose.msra.mxu1 %v5104_v60 }
 0x63b   : > { %3853 = vmatprep.subr.bf16.mxu1 %v5144_v12 }
 0x641   : > { %3834 = vmatmul.mubr.msk.bf16.vlgmr.msra.gmra.mxu1 %vm1025_vm1, %v5765_v27 }
 0x642   : > { %3854 = vmatpush3.bf16.msra.mxu1 %v5144_v12 }
 0x643   : > { %3855 = vmatprep.subr.bf16.mxu1 %v5148_v46 }
 0x646   : > { %3856 = vmatpush3.bf16.msra.mxu1 %v5148_v46 }
 0x647   : > { %3977 = vmatprep.subr.msk.bf16.mxu1 %vm1025_vm1, %v5089_v55 }
 0x6f1   : > { %v3827_v54 = vpop.f32.mrf.mxu1 }
 0x6f2   : > { %v1459_v13 = vmul.f32 %v3827_v54, %v4948_v32 }
 0x6f3   : > { %v1442_v41 = vpop.f32.mrf.mxu1 }
 0x6f4   : > { %v5225_v0 = vadd.f32 %v1459_v13, %v1277_v9  ;;  %v1457_v24 = vmul.f32 %v1442_v41, %v4948_v32 }
 0x6f5   : > { %v3828_v8 = vpop.f32.mrf.mxu1 }
 0x6f6   : > { %v5230_v44 = vadd.f32 %v1457_v24, %v1275_v45  ;;  %v1460_v63 = vmul.f32 %v3828_v8, %v4948_v32 }
 0x6f7   : > { %v1445_v22 = vpop.f32.mrf.mxu1 }
 0x6f8   : > { %v5235_v16 = vadd.f32 %v1460_v63, %v1278_v20  ;;  %v1458_v7 = vmul.f32 %v1445_v22, %v4948_v32 }
 0x6fa   : > { %v5238_v23 = vadd.f32 %v1458_v7, %v1276_v53 }
 0x701   : > { %v3835_v61 = vpop.f32.mrf.mxu1 }
 0x702   : > { %v1532_v25 = vmul.f32 0.5, %v3835_v61 }
 0x703   : > { %v1515_v18 = vpop.f32.mrf.mxu1 }
 0x704   : > { %v1530_v17 = vmul.f32 0.5, %v1515_v18  ;;  %v1536_v31 = vadd.f32 %v1532_v25, %v5111_v4 }
 0x705   : > { %v3836_v34 = vpop.f32.mrf.mxu1 }
 0x706   : > { %v1534_v5 = vadd.f32 %v1530_v17, %v5116_v52  ;;  %v1533_v14 = vmul.f32 0.5, %v3836_v34  ;;  %v1544_v32 = vsel %vm1025_vm1, %v1536_v31, -inf }
 0x707   : > { %v1518_v21 = vpop.f32.mrf.mxu1 }
 0x708   : > { %v1531_v10 = vmul.f32 0.5, %v1518_v21  ;;  %v1538_v27 = vsel %vm1025_vm1, %v1534_v5, -inf  ;;  %v1537_v9 = vadd.f32 %v1533_v14, %v5130_v42 }
 0x709   : > { %1539 = vmax.xlane.f32.xlu1 %v1538_v27 }
 0x70a   : > { %v1535_v6 = vadd.f32 %v1531_v10, %v5124_v62  ;;  %v1547_v13 = vsel %vm1025_vm1, %v1537_v9, -inf }
 0x70c   : > { %v1541_v54 = vsel %vm1025_vm1, %v1535_v6, -inf }
 0x70d   : > { %1545 = vmax.xlane.f32.xlu1 %v1544_v32  ;;  %1542 = vmax.xlane.f32.xlu0 %v1541_v54 }
 0x711   : > { %1548 = vmax.xlane.f32.xlu0 %v1547_v13 }
 0x792   : > { %v1540_v41 = vpop.xlane.xlu1 %1539 }
 0x793   : > { %v1550_v45 = vsub.f32 %v1534_v5, %v1540_v41 }
 0x795   : > { %v1554_v24 = vmul.f32 1.442695, %v1550_v45 }
 0x796   : > { %v1546_v8 = vpop.xlane.xlu1 %1545  ;;  %v1543_v20 = vpop.xlane.xlu0 %1542 }
 0x797   : > { %4142 = vpow2.f32 %v1554_v24  ;;  %v1552_v63 = vsub.f32 %v1536_v31, %v1546_v8  ;;  %v1551_v22 = vsub.f32 %v1535_v6, %v1543_v20 }
 0x799   : > { %v1558_v53 = vmul.f32 1.442695, %v1552_v63  ;;  %v1556_v7 = vmul.f32 1.442695, %v1551_v22 }
 0x79a   : > { %v1549_v61 = vpop.xlane.xlu0 %1548 }
 0x79b   : > { %4144 = vpow2.f32 %v1558_v53  ;;  %v1553_v18 = vsub.f32 %v1537_v9, %v1549_v61  ;;  %v5766_v61 = vpack.c.bf16 %v5037_v11, %v4992_v56 }
 0x79c   : > { %4146 = vpow2.f32 %v1556_v7 }
 0x79d   : > { %v1560_v25 = vmul.f32 1.442695, %v1553_v18  ;;  %v5767_v18 = vpack.c.bf16 %v5013_v1, %v4973_v47 }
 0x79f   : > { %4148 = vpow2.f32 %v1560_v25 }
 0x7a4   : > { %v4143_v17 = vpop.eup %4142 }
 0x7a5   : > { %v1562_v34 = vsel %vm1025_vm1, %v4143_v17, 0.0 }
 0x7a6   : > { %1563 = vadd.xlane.f32.xlu1 %v1562_v34 }
 0x7a8   : > { %v4145_v21 = vpop.eup %4144 }
 0x7a9   : > { %v4147_v5 = vpop.eup %4146  ;;  %v1568_v14 = vsel %vm1025_vm1, %v4145_v21, 0.0 }
 0x7aa   : > { %1569 = vadd.xlane.f32.xlu1 %v1568_v14  ;;  %v1565_v10 = vsel %vm1025_vm1, %v4147_v5, 0.0 }
 0x7ab   : > { %1566 = vadd.xlane.f32.xlu0 %v1565_v10 }
 0x7ac   : > { %v4149_v27 = vpop.eup %4148 }
 0x7ad   : > { %v1571_v31 = vsel %vm1025_vm1, %v4149_v27, 0.0 }
 0x7af   : > { %1572 = vadd.xlane.f32.xlu0 %v1571_v31 }
 0x82f   : > { %v1564_v6 = vpop.xlane.xlu1 %1563 }
 0x830   : > { %4150 = vrcp.f32 %v1564_v6 }
 0x833   : > { %v1570_v32 = vpop.xlane.xlu1 %1569 }
 0x834   : > { %v1567_v54 = vpop.xlane.xlu0 %1566 }
 0x835   : > { %4152 = vrcp.f32 %v1567_v54 }
 0x836   : > { %4154 = vrcp.f32 %v1570_v32 }
 0x838   : > { %v1573_v9 = vpop.xlane.xlu0 %1572 }
 0x839   : > { %4156 = vrcp.f32 %v1573_v9 }
 0x83d   : > { %v4151_v13 = vpop.eup %4150 }
 0x83e   : > { %v1578_v45 = vmul.f32 %v4151_v13, %v4143_v17 }
 0x842   : > { %v4153_v41 = vpop.eup %4152 }
 0x843   : > { %v1579_v24 = vmul.f32 %v4153_v41, %v4147_v5  ;;  %v4155_v8 = vpop.eup %4154 }
 0x844   : > { %v1580_v22 = vmul.f32 %v4155_v8, %v4145_v21 }
 0x845   : > { %v1582_v20 = vpack.c.bf16 %v1579_v24, %v1578_v45 }
 0x846   : > { %v4157_v63 = vpop.eup %4156 }
 0x847   : > { %3841 = vmatprep.mubr.msk.bf16.mxu0 %vm1025_vm1, %v1582_v20  ;;  %v1581_v53 = vmul.f32 %v4157_v63, %v4149_v27 }
 0x849   : > { %v1583_v7 = vpack.c.bf16 %v1581_v53, %v1580_v22 }
 0x84b   : > { %3842 = vmatmul.mubr.msk.bf16.vlgmr.msra.gmra.mxu0 %vm1025_vm1, %v1583_v7 }
 0x84c   : > { %3846 = vmatpush3.bf16.xpose.msra.mxu0 %v5095_v39  ;;  %3849 = vmatprep.mubr.msk.bf16.mxu0 %vm1025_vm1, %v5766_v61 }
 0x84d   : > { %3976 = vmatprep.subr.msk.bf16.mxu0 %vm1025_vm1, %v5098_v51 }
 0x854   : > { %3848 = vmatpush3.bf16.xpose.msra.mxu0 %v5104_v60 }
 0x855   : > { %3869 = vmatprep.subr.bf16.mxu0 %v5144_v12 }
 0x85b   : > { %3850 = vmatmul.mubr.msk.bf16.vlgmr.msra.gmra.mxu0 %vm1025_vm1, %v5767_v18 }
 0x85c   : > { %3870 = vmatpush3.bf16.msra.mxu0 %v5144_v12 }
 0x85d   : > { %3871 = vmatprep.subr.bf16.mxu0 %v5148_v46 }
 0x860   : > { %3872 = vmatpush3.bf16.msra.mxu0 %v5148_v46 }
 0x861   : > { %3979 = vmatprep.subr.msk.bf16.mxu0 %vm1025_vm1, %v5089_v55 }
 0x90b   : > { %v3843_v56 = vpop.f32.mrf.mxu0 }
 0x90c   : > { %v1641_v11 = vmul.f32 %v3843_v56, %v4951_v33 }
 0x90d   : > { %v1624_v25 = vpop.f32.mrf.mxu0 }
 0x90e   : > { %v5274_v17 = vadd.f32 %v1641_v11, %v5225_v0  ;;  %v1639_v47 = vmul.f32 %v1624_v25, %v4951_v33 }
 0x90f   : > { %v3844_v1 = vpop.f32.mrf.mxu0 }
 0x910   : > { %v5278_v34 = vadd.f32 %v1639_v47, %v5230_v44  ;;  %v1642_v21 = vmul.f32 %v3844_v1, %v4951_v33 }
 0x911   : > { %v1627_v5 = vpop.f32.mrf.mxu0 }
 0x912   : > { %v5282_v14 = vadd.f32 %v1642_v21, %v5235_v16  ;;  %v1640_v10 = vmul.f32 %v1627_v5, %v4951_v33 }
 0x914   : > { %v5286_v27 = vadd.f32 %v1640_v10, %v5238_v23 }
 0x91b   : > { %v3851_v31 = vpop.f32.mrf.mxu0 }
 0x91c   : > { %v1714_v6 = vmul.f32 0.5, %v3851_v31 }
 0x91d   : > { %v1697_v0 = vpop.f32.mrf.mxu0 }
 0x91e   : > { %v1712_v32 = vmul.f32 0.5, %v1697_v0  ;;  %v1718_v16 = vadd.f32 %v1714_v6, %v5111_v4 }
 0x91f   : > { %v3852_v54 = vpop.f32.mrf.mxu0 }
 0x920   : > { %v1716_v9 = vadd.f32 %v1712_v32, %v5116_v52  ;;  %v1715_v13 = vmul.f32 0.5, %v3852_v54  ;;  %v1726_v23 = vsel %vm1025_vm1, %v1718_v16, -inf }
 0x921   : > { %v1700_v44 = vpop.f32.mrf.mxu0 }
 0x922   : > { %v1713_v41 = vmul.f32 0.5, %v1700_v44  ;;  %v1720_v45 = vsel %vm1025_vm1, %v1716_v9, -inf  ;;  %v1719_v8 = vadd.f32 %v1715_v13, %v5130_v42 }
 0x923   : > { %1721 = vmax.xlane.f32.xlu1 %v1720_v45 }
 0x924   : > { %v1717_v33 = vadd.f32 %v1713_v41, %v5124_v62  ;;  %v1729_v20 = vsel %vm1025_vm1, %v1719_v8, -inf }
 0x926   : > { %v1723_v24 = vsel %vm1025_vm1, %v1717_v33, -inf }
 0x927   : > { %1727 = vmax.xlane.f32.xlu1 %v1726_v23  ;;  %1724 = vmax.xlane.f32.xlu0 %v1723_v24 }
 0x92b   : > { %1730 = vmax.xlane.f32.xlu0 %v1729_v20 }
 0x9ac   : > { %v1722_v63 = vpop.xlane.xlu1 %1721 }
 0x9ad   : > { %v1732_v22 = vsub.f32 %v1716_v9, %v1722_v63 }
 0x9af   : > { %v1736_v53 = vmul.f32 1.442695, %v1732_v22 }
 0x9b0   : > { %v1728_v7 = vpop.xlane.xlu1 %1727  ;;  %v1725_v61 = vpop.xlane.xlu0 %1724 }
 0x9b1   : > { %4158 = vpow2.f32 %v1736_v53  ;;  %v1734_v18 = vsub.f32 %v1718_v16, %v1728_v7  ;;  %v1733_v56 = vsub.f32 %v1717_v33, %v1725_v61  ;;  %v5768_v61 = vpack.c.bf16 %v5044_v15, %v4995_v57 }
 0x9b3   : > { %v1740_v11 = vmul.f32 1.442695, %v1734_v18  ;;  %v1738_v25 = vmul.f32 1.442695, %v1733_v56  ;;  %v5769_v18 = vpack.c.bf16 %v5016_v2, %v4976_v48 }
 0x9b4   : > { %v1731_v47 = vpop.xlane.xlu0 %1730 }
 0x9b5   : > { %4160 = vpow2.f32 %v1740_v11  ;;  %v1735_v1 = vsub.f32 %v1719_v8, %v1731_v47 }
 0x9b6   : > { %4162 = vpow2.f32 %v1738_v25 }
 0x9b7   : > { %v1742_v21 = vmul.f32 1.442695, %v1735_v1 }
 0x9b9   : > { %4164 = vpow2.f32 %v1742_v21 }
 0x9be   : > { %v4159_v5 = vpop.eup %4158 }
 0x9bf   : > { %v1744_v10 = vsel %vm1025_vm1, %v4159_v5, 0.0 }
 0x9c0   : > { %1745 = vadd.xlane.f32.xlu1 %v1744_v10 }
 0x9c2   : > { %v4161_v31 = vpop.eup %4160 }
 0x9c3   : > { %v4163_v0 = vpop.eup %4162  ;;  %v1750_v6 = vsel %vm1025_vm1, %v4161_v31, 0.0 }
 0x9c4   : > { %1751 = vadd.xlane.f32.xlu1 %v1750_v6  ;;  %v1747_v32 = vsel %vm1025_vm1, %v4163_v0, 0.0 }
 0x9c5   : > { %1748 = vadd.xlane.f32.xlu0 %v1747_v32 }
 0x9c6   : > { %v4165_v54 = vpop.eup %4164 }
 0x9c7   : > { %v1753_v9 = vsel %vm1025_vm1, %v4165_v54, 0.0 }
 0x9c9   : > { %1754 = vadd.xlane.f32.xlu0 %v1753_v9 }
 0xa49   : > { %v1746_v44 = vpop.xlane.xlu1 %1745 }
 0xa4a   : > { %4166 = vrcp.f32 %v1746_v44 }
 0xa4d   : > { %v1752_v13 = vpop.xlane.xlu1 %1751 }
 0xa4e   : > { %v1749_v41 = vpop.xlane.xlu0 %1748 }
 0xa4f   : > { %4168 = vrcp.f32 %v1749_v41 }
 0xa50   : > { %4170 = vrcp.f32 %v1752_v13 }
 0xa52   : > { %v1755_v45 = vpop.xlane.xlu0 %1754 }
 0xa53   : > { %4172 = vrcp.f32 %v1755_v45 }
 0xa57   : > { %v4167_v16 = vpop.eup %4166 }
 0xa58   : > { %v1760_v23 = vmul.f32 %v4167_v16, %v4159_v5 }
 0xa5c   : > { %v4169_v33 = vpop.eup %4168 }
 0xa5d   : > { %v1761_v24 = vmul.f32 %v4169_v33, %v4163_v0  ;;  %v4171_v8 = vpop.eup %4170 }
 0xa5e   : > { %v1762_v22 = vmul.f32 %v4171_v8, %v4161_v31 }
 0xa5f   : > { %v1764_v20 = vpack.c.bf16 %v1761_v24, %v1760_v23 }
 0xa60   : > { %v4173_v63 = vpop.eup %4172 }
 0xa61   : > { %3857 = vmatprep.mubr.msk.bf16.mxu1 %vm1025_vm1, %v1764_v20  ;;  %v1763_v53 = vmul.f32 %v4173_v63, %v4165_v54 }
 0xa63   : > { %v1765_v7 = vpack.c.bf16 %v1763_v53, %v1762_v22 }
 0xa65   : > { %3858 = vmatmul.mubr.msk.bf16.vlgmr.msra.gmra.mxu1 %vm1025_vm1, %v1765_v7 }
 0xa66   : > { %3862 = vmatpush3.bf16.xpose.msra.mxu1 %v5095_v39  ;;  %3865 = vmatprep.mubr.msk.bf16.mxu1 %vm1025_vm1, %v5768_v61 }
 0xa67   : > { %3978 = vmatprep.subr.msk.bf16.mxu1 %vm1025_vm1, %v5098_v51 }
 0xa6e   : > { %3864 = vmatpush3.bf16.xpose.msra.mxu1 %v5104_v60 }
 0xa6f   : > { %3885 = vmatprep.subr.bf16.mxu1 %v5144_v12 }
 0xa75   : > { %3866 = vmatmul.mubr.msk.bf16.vlgmr.msra.gmra.mxu1 %vm1025_vm1, %v5769_v18 }
 0xa76   : > { %3886 = vmatpush3.bf16.msra.mxu1 %v5144_v12 }
 0xa77   : > { %3887 = vmatprep.subr.bf16.mxu1 %v5148_v46 }
 0xa7a   : > { %3888 = vmatpush3.bf16.msra.mxu1 %v5148_v46 }
 0xa7b   : > { %3981 = vmatprep.subr.msk.bf16.mxu1 %vm1025_vm1, %v5089_v55 }
 0xb25   : > { %v3859_v57 = vpop.f32.mrf.mxu1 }
 0xb26   : > { %v1823_v15 = vmul.f32 %v3859_v57, %v4953_v35 }
 0xb27   : > { %v1806_v56 = vpop.f32.mrf.mxu1 }
 0xb28   : > { %v5322_v11 = vadd.f32 %v1823_v15, %v5274_v17  ;;  %v1821_v48 = vmul.f32 %v1806_v56, %v4953_v35 }
 0xb29   : > { %v3860_v2 = vpop.f32.mrf.mxu1 }
 0xb2a   : > { %v5326_v25 = vadd.f32 %v1821_v48, %v5278_v34  ;;  %v1824_v47 = vmul.f32 %v3860_v2, %v4953_v35 }
 0xb2b   : > { %v1809_v1 = vpop.f32.mrf.mxu1 }
 0xb2c   : > { %v5330_v21 = vadd.f32 %v1824_v47, %v5282_v14  ;;  %v1822_v5 = vmul.f32 %v1809_v1, %v4953_v35 }
 0xb2e   : > { %v5334_v10 = vadd.f32 %v1822_v5, %v5286_v27 }
 0xb35   : > { %v3867_v31 = vpop.f32.mrf.mxu1 }
 0xb36   : > { %v1896_v0 = vmul.f32 0.5, %v3867_v31 }
 0xb37   : > { %v1879_v17 = vpop.f32.mrf.mxu1 }
 0xb38   : > { %v1894_v6 = vmul.f32 0.5, %v1879_v17  ;;  %v1900_v14 = vadd.f32 %v1896_v0, %v5111_v4 }
 0xb39   : > { %v3868_v32 = vpop.f32.mrf.mxu1 }
 0xb3a   : > { %v1898_v54 = vadd.f32 %v1894_v6, %v5116_v52  ;;  %v1897_v9 = vmul.f32 0.5, %v3868_v32  ;;  %v1908_v27 = vsel %vm1025_vm1, %v1900_v14, -inf }
 0xb3b   : > { %v1882_v34 = vpop.f32.mrf.mxu1 }
 0xb3c   : > { %v1895_v44 = vmul.f32 0.5, %v1882_v34  ;;  %v1902_v13 = vsel %vm1025_vm1, %v1898_v54, -inf  ;;  %v1901_v45 = vadd.f32 %v1897_v9, %v5130_v42 }
 0xb3d   : > { %1903 = vmax.xlane.f32.xlu1 %v1902_v13 }
 0xb3e   : > { %v1899_v35 = vadd.f32 %v1895_v44, %v5124_v62  ;;  %v1911_v16 = vsel %vm1025_vm1, %v1901_v45, -inf }
 0xb40   : > { %v1905_v41 = vsel %vm1025_vm1, %v1899_v35, -inf }
 0xb41   : > { %1909 = vmax.xlane.f32.xlu1 %v1908_v27  ;;  %1906 = vmax.xlane.f32.xlu0 %v1905_v41 }
 0xb45   : > { %1912 = vmax.xlane.f32.xlu0 %v1911_v16  ;;  %v5770_v16 = vpack.c.bf16 %v5053_v19, %v4998_v58 }
 0xbc6   : > { %v1904_v33 = vpop.xlane.xlu1 %1903 }
 0xbc7   : > { %v1914_v23 = vsub.f32 %v1898_v54, %v1904_v33  ;;  %v5771_v33 = vpack.c.bf16 %v5019_v3, %v4979_v49 }
 0xbc9   : > { %v1918_v24 = vmul.f32 1.442695, %v1914_v23 }
 0xbca   : > { %v1910_v8 = vpop.xlane.xlu1 %1909  ;;  %v1907_v20 = vpop.xlane.xlu0 %1906 }
 0xbcb   : > { %4174 = vpow2.f32 %v1918_v24  ;;  %v1916_v63 = vsub.f32 %v1900_v14, %v1910_v8  ;;  %v1915_v22 = vsub.f32 %v1899_v35, %v1907_v20 }
 0xbcd   : > { %v1922_v53 = vmul.f32 1.442695, %v1916_v63  ;;  %v1920_v7 = vmul.f32 1.442695, %v1915_v22 }
 0xbce   : > { %v1913_v61 = vpop.xlane.xlu0 %1912 }
 0xbcf   : > { %4176 = vpow2.f32 %v1922_v53  ;;  %v1917_v18 = vsub.f32 %v1901_v45, %v1913_v61 }
 0xbd0   : > { %4178 = vpow2.f32 %v1920_v7 }
 0xbd1   : > { %v1924_v57 = vmul.f32 1.442695, %v1917_v18 }
 0xbd3   : > { %4180 = vpow2.f32 %v1924_v57 }
 0xbd8   : > { %v4175_v15 = vpop.eup %4174 }
 0xbd9   : > { %v1926_v56 = vsel %vm1025_vm1, %v4175_v15, 0.0 }
 0xbda   : > { %1927 = vadd.xlane.f32.xlu1 %v1926_v56 }
 0xbdc   : > { %v4177_v48 = vpop.eup %4176 }
 0xbdd   : > { %v4179_v2 = vpop.eup %4178  ;;  %v1932_v47 = vsel %vm1025_vm1, %v4177_v48, 0.0 }
 0xbde   : > { %1933 = vadd.xlane.f32.xlu1 %v1932_v47  ;;  %v1929_v1 = vsel %vm1025_vm1, %v4179_v2, 0.0 }
 0xbdf   : > { %1930 = vadd.xlane.f32.xlu0 %v1929_v1 }
 0xbe0   : > { %v4181_v5 = vpop.eup %4180 }
 0xbe1   : > { %v1935_v31 = vsel %vm1025_vm1, %v4181_v5, 0.0 }
 0xbe3   : > { %1936 = vadd.xlane.f32.xlu0 %v1935_v31 }
 0xc63   : > { %v1928_v17 = vpop.xlane.xlu1 %1927 }
 0xc64   : > { %4182 = vrcp.f32 %v1928_v17 }
 0xc67   : > { %v1934_v0 = vpop.xlane.xlu1 %1933 }
 0xc68   : > { %v1931_v6 = vpop.xlane.xlu0 %1930 }
 0xc69   : > { %4184 = vrcp.f32 %v1931_v6 }
 0xc6a   : > { %4186 = vrcp.f32 %v1934_v0 }
 0xc6c   : > { %v1937_v32 = vpop.xlane.xlu0 %1936 }
 0xc6d   : > { %4188 = vrcp.f32 %v1937_v32 }
 0xc71   : > { %v4183_v54 = vpop.eup %4182 }
 0xc72   : > { %v1942_v9 = vmul.f32 %v4183_v54, %v4175_v15 }
 0xc76   : > { %v4185_v34 = vpop.eup %4184 }
 0xc77   : > { %v1943_v44 = vmul.f32 %v4185_v34, %v4179_v2  ;;  %v4187_v13 = vpop.eup %4186 }
 0xc78   : > { %v1944_v27 = vmul.f32 %v4187_v13, %v4177_v48 }
 0xc79   : > { %v1946_v14 = vpack.c.bf16 %v1943_v44, %v1942_v9 }
 0xc7a   : > { %v4189_v35 = vpop.eup %4188 }
 0xc7b   : > { %3873 = vmatprep.mubr.msk.bf16.mxu0 %vm1025_vm1, %v1946_v14  ;;  %v1945_v41 = vmul.f32 %v4189_v35, %v4181_v5 }
 0xc7d   : > { %v1947_v45 = vpack.c.bf16 %v1945_v41, %v1944_v27 }
 0xc7f   : > { %3874 = vmatmul.mubr.msk.bf16.vlgmr.msra.gmra.mxu0 %vm1025_vm1, %v1947_v45 }
 0xc80   : > { %3878 = vmatpush3.bf16.xpose.msra.mxu0 %v5095_v39  ;;  %3881 = vmatprep.mubr.msk.bf16.mxu0 %vm1025_vm1, %v5770_v16 }
 0xc81   : > { %3980 = vmatprep.subr.msk.bf16.mxu0 %vm1025_vm1, %v5098_v51 }
 0xc88   : > { %3880 = vmatpush3.bf16.xpose.msra.mxu0 %v5104_v60 }
 0xc89   : > { %3901 = vmatprep.subr.bf16.mxu0 %v5144_v12 }
 0xc8f   : > { %3882 = vmatmul.mubr.msk.bf16.vlgmr.msra.gmra.mxu0 %vm1025_vm1, %v5771_v33 }
 0xc90   : > { %3902 = vmatpush3.bf16.msra.mxu0 %v5144_v12 }
 0xc91   : > { %3903 = vmatprep.subr.bf16.mxu0 %v5148_v46 }
 0xc94   : > { %3904 = vmatpush3.bf16.msra.mxu0 %v5148_v46 }
 0xc95   : > { %3983 = vmatprep.subr.msk.bf16.mxu0 %vm1025_vm1, %v5089_v55 }
 0xd3f   : > { %v3875_v58 = vpop.f32.mrf.mxu0 }
 0xd40   : > { %v2005_v19 = vmul.f32 %v3875_v58, %v4955_v36 }
 0xd41   : > { %v1988_v23 = vpop.f32.mrf.mxu0 }
 0xd42   : > { %v5370_v24 = vadd.f32 %v2005_v19, %v5322_v11  ;;  %v2003_v49 = vmul.f32 %v1988_v23, %v4955_v36 }
 0xd43   : > { %v3876_v3 = vpop.f32.mrf.mxu0 }
 0xd44   : > { %v5374_v8 = vadd.f32 %v2003_v49, %v5326_v25  ;;  %v2006_v20 = vmul.f32 %v3876_v3, %v4955_v36 }
 0xd45   : > { %v1991_v63 = vpop.f32.mrf.mxu0 }
 0xd46   : > { %v5378_v22 = vadd.f32 %v2006_v20, %v5330_v21  ;;  %v2004_v55 = vmul.f32 %v1991_v63, %v4955_v36 }
 0xd48   : > { %v5382_v53 = vadd.f32 %v2004_v55, %v5334_v10 }
 0xd4f   : > { %v3883_v7 = vpop.f32.mrf.mxu0 }
 0xd50   : > { %v2078_v61 = vmul.f32 0.5, %v3883_v7 }
 0xd51   : > { %v2061_v11 = vpop.f32.mrf.mxu0 }
 0xd52   : > { %v2076_v18 = vmul.f32 0.5, %v2061_v11  ;;  %v2082_v21 = vadd.f32 %v2078_v61, %v5111_v4 }
 0xd53   : > { %v3884_v57 = vpop.f32.mrf.mxu0 }
 0xd54   : > { %v2080_v15 = vadd.f32 %v2076_v18, %v5116_v52  ;;  %v2079_v56 = vmul.f32 0.5, %v3884_v57  ;;  %v2090_v10 = vsel %vm1025_vm1, %v2082_v21, -inf }
 0xd55   : > { %v2064_v25 = vpop.f32.mrf.mxu0 }
 0xd56   : > { %v2077_v48 = vmul.f32 0.5, %v2064_v25  ;;  %v2084_v2 = vsel %vm1025_vm1, %v2080_v15, -inf  ;;  %v2083_v1 = vadd.f32 %v2079_v56, %v5130_v42  ;;  %v5773_v25 = vpack.c.bf16 %v5067_v28, %v4982_v50 }
 0xd57   : > { %2085 = vmax.xlane.f32.xlu1 %v2084_v2 }
 0xd58   : > { %v2081_v36 = vadd.f32 %v2077_v48, %v5124_v62  ;;  %v2093_v52 = vsel %vm1025_vm1, %v2083_v1, -inf }
 0xd5a   : > { %v2087_v47 = vsel %vm1025_vm1, %v2081_v36, -inf }
 0xd5b   : > { %2091 = vmax.xlane.f32.xlu1 %v2090_v10  ;;  %2088 = vmax.xlane.f32.xlu0 %v2087_v47 }
 0xd5f   : > { %2094 = vmax.xlane.f32.xlu0 %v2093_v52 }
 0xde0   : > { %v2086_v5 = vpop.xlane.xlu1 %2085 }
 0xde1   : > { %v2096_v31 = vsub.f32 %v2080_v15, %v2086_v5  ;;  %v5772_v15 = vpack.c.bf16 %v5062_v26, %v5001_v59 }
 0xde3   : > { %v2100_v17 = vmul.f32 1.442695, %v2096_v31 }
 0xde4   : > { %v2092_v0 = vpop.xlane.xlu1 %2091  ;;  %v2089_v6 = vpop.xlane.xlu0 %2088 }
 0xde5   : > { %4190 = vpow2.f32 %v2100_v17  ;;  %v2098_v4 = vsub.f32 %v2082_v21, %v2092_v0  ;;  %v2097_v32 = vsub.f32 %v2081_v36, %v2089_v6 }
 0xde7   : > { %v2104_v62 = vmul.f32 1.442695, %v2098_v4  ;;  %v2102_v54 = vmul.f32 1.442695, %v2097_v32  ;;  %v5446_v4 = vld [vmem:[%s5761_s29 + $0x8] sm:$0xff] }
 0xde8   : > { %v2095_v34 = vpop.xlane.xlu0 %2094 }
 0xde9   : > { %4192 = vpow2.f32 %v2104_v62  ;;  %v2099_v9 = vsub.f32 %v2083_v1, %v2095_v34  ;;  %v5454_v34 = vld [vmem:[%s5761_s29 + $0x18] sm:$0xff] }
 0xdea   : > { %4194 = vpow2.f32 %v2102_v54 }
 0xdeb   : > { %v2106_v42 = vmul.f32 1.442695, %v2099_v9 }
 0xded   : > { %4196 = vpow2.f32 %v2106_v42 }
 0xdf2   : > { %v4191_v44 = vpop.eup %4190 }
 0xdf3   : > { %v2108_v13 = vsel %vm1025_vm1, %v4191_v44, 0.0 }
 0xdf4   : > { %2109 = vadd.xlane.f32.xlu1 %v2108_v13 }
 0xdf6   : > { %v4193_v14 = vpop.eup %4192 }
 0xdf7   : > { %v4195_v35 = vpop.eup %4194  ;;  %v2114_v27 = vsel %vm1025_vm1, %v4193_v14, 0.0 }
 0xdf8   : > { %2115 = vadd.xlane.f32.xlu1 %v2114_v27  ;;  %v2111_v41 = vsel %vm1025_vm1, %v4195_v35, 0.0 }
 0xdf9   : > { %2112 = vadd.xlane.f32.xlu0 %v2111_v41 }
 0xdfa   : > { %v4197_v45 = vpop.eup %4196 }
 0xdfb   : > { %v2117_v16 = vsel %vm1025_vm1, %v4197_v45, 0.0 }
 0xdfd   : > { %2118 = vadd.xlane.f32.xlu0 %v2117_v16 }
 0xe7d   : > { %v2110_v33 = vpop.xlane.xlu1 %2109 }
 0xe7e   : > { %4198 = vrcp.f32 %v2110_v33 }
 0xe81   : > { %v2116_v58 = vpop.xlane.xlu1 %2115 }
 0xe82   : > { %v2113_v19 = vpop.xlane.xlu0 %2112 }
 0xe83   : > { %4200 = vrcp.f32 %v2113_v19 }
 0xe84   : > { %4202 = vrcp.f32 %v2116_v58 }
 0xe86   : > { %v2119_v23 = vpop.xlane.xlu0 %2118 }
 0xe87   : > { %4204 = vrcp.f32 %v2119_v23 }
 0xe8b   : > { %v4199_v49 = vpop.eup %4198 }
 0xe8c   : > { %v2124_v20 = vmul.f32 %v4199_v49, %v4191_v44 }
 0xe90   : > { %v4201_v3 = vpop.eup %4200 }
 0xe91   : > { %v2125_v63 = vmul.f32 %v4201_v3, %v4195_v35  ;;  %v4203_v55 = vpop.eup %4202 }
 0xe92   : > { %v2126_v61 = vmul.f32 %v4203_v55, %v4193_v14 }
 0xe93   : > { %v2128_v7 = vpack.c.bf16 %v2125_v63, %v2124_v20 }
 0xe94   : > { %v4205_v11 = vpop.eup %4204 }
 0xe95   : > { %3889 = vmatprep.mubr.msk.bf16.mxu1 %vm1025_vm1, %v2128_v7  ;;  %v2127_v18 = vmul.f32 %v4205_v11, %v4197_v45 }
 0xe97   : > { %v2129_v57 = vpack.c.bf16 %v2127_v18, %v2126_v61 }
 0xe99   : > { %3890 = vmatmul.mubr.msk.bf16.vlgmr.msra.gmra.mxu1 %vm1025_vm1, %v2129_v57 }
 0xe9a   : > { %3894 = vmatpush3.bf16.xpose.msra.mxu1 %v5095_v39  ;;  %3897 = vmatprep.mubr.msk.bf16.mxu1 %vm1025_vm1, %v5772_v15 }
 0xe9b   : > { %3982 = vmatprep.subr.msk.bf16.mxu1 %vm1025_vm1, %v5098_v51 }
 0xea2   : > { %3896 = vmatpush3.bf16.xpose.msra.mxu1 %v5104_v60 }
 0xea3   : > { %3917 = vmatprep.subr.bf16.mxu1 %v5144_v12 }
 0xea9   : > { %3898 = vmatmul.mubr.msk.bf16.vlgmr.msra.gmra.mxu1 %vm1025_vm1, %v5773_v25 }
 0xeaa   : > { %3918 = vmatpush3.bf16.msra.mxu1 %v5144_v12 }
 0xeab   : > { %3919 = vmatprep.subr.bf16.mxu1 %v5148_v46 }
 0xeae   : > { %3920 = vmatpush3.bf16.msra.mxu1 %v5148_v46 }
 0xf59   : > { %v3891_v59 = vpop.f32.mrf.mxu1 }
 0xf5a   : > { %v2187_v26 = vmul.f32 %v3891_v59, %v4957_v37 }
 0xf5b   : > { %v2170_v56 = vpop.f32.mrf.mxu1 }
 0xf5c   : > { %v5416_v48 = vadd.f32 %v2187_v26, %v5370_v24  ;;  %v2185_v2 = vmul.f32 %v2170_v56, %v4957_v37 }
 0xf5d   : > { %v3892_v21 = vpop.f32.mrf.mxu1 }
 0xf5e   : > { %v5420_v50 = vadd.f32 %v2185_v2, %v5374_v8  ;;  %v2188_v28 = vmul.f32 %v3892_v21, %v4957_v37  ;;  %v5433_v8 = vld [vmem:[%s5761_s29] sm:$0xff] }
 0xf5f   : > { %v2173_v12 = vpop.f32.mrf.mxu1 }
 0xf60   : > { %v5424_v36 = vadd.f32 %v2188_v28, %v5378_v22  ;;  %v2186_v46 = vmul.f32 %v2173_v12, %v4957_v37 }
 0xf62   : > { %v5428_v10 = vadd.f32 %v2186_v46, %v5382_v53  ;;  %v5440_v53 = vld [vmem:[%s5761_s29 + $0x10] sm:$0xff] }
 0xf69   : > { %v3899_v47 = vpop.f32.mrf.mxu1 }
 0xf6a   : > { %v2260_v1 = vmul.f32 0.5, %v3899_v47 }
 0xf6b   : > { %v2243_v24 = vpop.f32.mrf.mxu1 }
 0xf6c   : > { %v2258_v52 = vmul.f32 0.5, %v2243_v24  ;;  %v2264_v6 = vadd.f32 %v5440_v53, %v2260_v1  ;;  %v5774_v1 = vpack.c.bf16 %v5073_v30, %v5070_v29 }
 0xf6d   : > { %v3900_v5 = vpop.f32.mrf.mxu1 }
 0xf6e   : > { %v2262_v31 = vadd.f32 %v5433_v8, %v2258_v52  ;;  %v2261_v22 = vmul.f32 0.5, %v3900_v5  ;;  %v2272_v62 = vsel %vm1025_vm1, %v2264_v6, -inf  ;;  %v5775_v52 = vpack.c.bf16 %v5081_v43, %v5078_v40 }
 0xf6f   : > { %v2246_v17 = vpop.f32.mrf.mxu1 }
 0xf70   : > { %v2259_v0 = vmul.f32 0.5, %v2246_v17  ;;  %v2266_v37 = vsel %vm1025_vm1, %v2262_v31, -inf  ;;  %v2265_v9 = vadd.f32 %v5454_v34, %v2261_v22 }
 0xf71   : > { %2267 = vmax.xlane.f32.xlu1 %v2266_v37 }
 0xf72   : > { %v2263_v32 = vadd.f32 %v5446_v4, %v2259_v0  ;;  %v2275_v42 = vsel %vm1025_vm1, %v2265_v9, -inf }
 0xf74   : > { %v2269_v54 = vsel %vm1025_vm1, %v2263_v32, -inf }
 0xf75   : > { %2273 = vmax.xlane.f32.xlu1 %v2272_v62  ;;  %2270 = vmax.xlane.f32.xlu0 %v2269_v54 }
 0xf79   : > { %2276 = vmax.xlane.f32.xlu0 %v2275_v42 }
 0xffa   : > { %v2268_v44 = vpop.xlane.xlu1 %2267 }
 0xffb   : > { %v2278_v13 = vsub.f32 %v2262_v31, %v2268_v44 }
 0xffd   : > { %v2282_v14 = vmul.f32 1.442695, %v2278_v13 }
 0xffe   : > { %v2274_v35 = vpop.xlane.xlu1 %2273  ;;  %v2271_v27 = vpop.xlane.xlu0 %2270 }
 0xfff   : > { %4206 = vpow2.f32 %v2282_v14  ;;  %v2280_v41 = vsub.f32 %v2264_v6, %v2274_v35  ;;  %v2279_v45 = vsub.f32 %v2263_v32, %v2271_v27 }
0x1001   : > { %v2286_v16 = vmul.f32 1.442695, %v2280_v41  ;;  %v2284_v33 = vmul.f32 1.442695, %v2279_v45 }
0x1002   : > { %v2277_v58 = vpop.xlane.xlu0 %2276 }
0x1003   : > { %4208 = vpow2.f32 %v2286_v16  ;;  %v2281_v19 = vsub.f32 %v2265_v9, %v2277_v58 }
0x1004   : > { %4210 = vpow2.f32 %v2284_v33 }
0x1005   : > { %v2288_v23 = vmul.f32 1.442695, %v2281_v19 }
0x1007   : > { %4212 = vpow2.f32 %v2288_v23 }
0x100c   : > { %v4207_v49 = vpop.eup %4206 }
0x100d   : > { %v2290_v3 = vsel %vm1025_vm1, %v4207_v49, 0.0 }
0x100e   : > { %2291 = vadd.xlane.f32.xlu1 %v2290_v3 }
0x1010   : > { %v4209_v20 = vpop.eup %4208 }
0x1011   : > { %v4211_v63 = vpop.eup %4210  ;;  %v2296_v55 = vsel %vm1025_vm1, %v4209_v20, 0.0 }
0x1012   : > { %2297 = vadd.xlane.f32.xlu1 %v2296_v55  ;;  %v2293_v7 = vsel %vm1025_vm1, %v4211_v63, 0.0 }
0x1013   : > { %2294 = vadd.xlane.f32.xlu0 %v2293_v7 }
0x1014   : > { %v4213_v11 = vpop.eup %4212 }
0x1015   : > { %v2299_v61 = vsel %vm1025_vm1, %v4213_v11, 0.0 }
0x1017   : > { %2300 = vadd.xlane.f32.xlu0 %v2299_v61 }
0x1097   : > { %v2292_v18 = vpop.xlane.xlu1 %2291 }
0x1098   : > { %4214 = vrcp.f32 %v2292_v18 }
0x109b   : > { %v2298_v57 = vpop.xlane.xlu1 %2297 }
0x109c   : > { %v2295_v15 = vpop.xlane.xlu0 %2294 }
0x109d   : > { %4216 = vrcp.f32 %v2295_v15 }
0x109e   : > { %4218 = vrcp.f32 %v2298_v57 }
0x10a0   : > { %v2301_v25 = vpop.xlane.xlu0 %2300 }
0x10a1   : > { %4220 = vrcp.f32 %v2301_v25 }
0x10a5   : > { %v4215_v59 = vpop.eup %4214 }
0x10a6   : > { %v2306_v56 = vmul.f32 %v4215_v59, %v4207_v49 }
0x10aa   : > { %v4217_v26 = vpop.eup %4216 }
0x10ab   : > { %v2307_v2 = vmul.f32 %v4217_v26, %v4211_v63  ;;  %v4219_v21 = vpop.eup %4218 }
0x10ac   : > { %v2308_v46 = vmul.f32 %v4219_v21, %v4209_v20 }
0x10ad   : > { %v2310_v28 = vpack.c.bf16 %v2307_v2, %v2306_v56 }
0x10ae   : > { %v4221_v12 = vpop.eup %4220 }
0x10af   : > { %3905 = vmatprep.mubr.msk.bf16.mxu0 %vm1025_vm1, %v2310_v28  ;;  %v2309_v47 = vmul.f32 %v4221_v12, %v4213_v11 }
0x10b1   : > { %v2311_v24 = vpack.c.bf16 %v2309_v47, %v2308_v46 }
0x10b3   : > { %3906 = vmatmul.mubr.msk.bf16.vlgmr.msra.gmra.mxu0 %vm1025_vm1, %v2311_v24 }
0x10b4   : > { %3910 = vmatpush3.bf16.xpose.msra.mxu0 %v5095_v39  ;;  %3913 = vmatprep.mubr.msk.bf16.mxu0 %vm1025_vm1, %v5774_v1  ;;  %v4098_v1 = vld [vmem:[%s4880_s28 + $0x8] sm:$0xff]  }
0x10b5   : > { %3984 = vmatprep.subr.msk.bf16.mxu0 %vm1025_vm1, %v5098_v51  ;;  %3925 = vmatprep.subr.bf16.mxu1 %v4098_v1 }
0x10bc   : > { %3912 = vmatpush3.bf16.xpose.msra.mxu0 %v5104_v60 }
0x10c3   : > { %3914 = vmatmul.mubr.msk.bf16.vlgmr.msra.gmra.mxu0 %vm1025_vm1, %v5775_v52  ;;  %v4099_v52 = vld [vmem:[%s4880_s28] sm:$0xff]  }
0x1173   : > { %v3907_v5 = vpop.f32.mrf.mxu0 }
0x1174   : > { %v2369_v31 = vmul.f32 %v3907_v5, %v4959_v38  ;;  %v4100_v5 = vld [vmem:[%s4885_s19 + $0x8] sm:$0xff]  }
0x1175   : > { %v2352_v17 = vpop.f32.mrf.mxu0 }
0x1176   : > { %v5478_v39 = vadd.f32 %v2369_v31, %v5416_v48  ;;  %v2367_v29 = vmul.f32 %v2352_v17, %v4959_v38  ;;  %v4561_v31 = vmov 0.0   ;;  %v4563_v17 = vmov 1966171168  }
0x1177   : > { %v3908_v30 = vpop.f32.mrf.mxu0  ;;  %3933 = vmatprep.subr.bf16.mxu0 %v4561_v31  ;;  %3937 = vmatprep.mubr.msk.bf16.mxu0 %vm4562_vm2, %v4561_v31 }
0x1178   : > { %v5482_v22 = vadd.f32 %v2367_v29, %v5420_v50  ;;  %v2370_v51 = vmul.f32 %v3908_v30, %v4959_v38  ;;  %v2737_v29 = vunpack.c.l.s4 %v4563_v17  ;;  %3934 = vmatpush3.bf16.msra.mxu0 %v4100_v5  ;;  %v4101_v30 = vld [vmem:[%s4885_s19] sm:$0xff]  }
0x1179   : > { %v2355_v60 = vpop.f32.mrf.mxu0  ;;  %3935 = vmatprep.subr.bf16.mxu0 %v4561_v31 }
0x117a   : > { %v5486_v40 = vadd.f32 %v2370_v51, %v5424_v36  ;;  %v2368_v43 = vmul.f32 %v2355_v60, %v4959_v38  ;;  %v3658_v51 = vld.sshfl [vmem:[%s5776_s17] sm:$0x1 pattern:$0x75316420] }
0x117b   : > { %v3659_v60 = vld.sshfl [vmem:[%s5776_s17 + $0x1] sm:$0x1 pattern:$0x75316420] }
0x117c   : > { %v5490_v0 = vadd.f32 %v2368_v43, %v5428_v10  ;;  %v3660_v43 = vld.sshfl [vmem:[%s5776_s17 + $0x2] sm:$0x1 pattern:$0x75316420]  ;;  %3936 = vmatpush3.bf16.msra.mxu0 %v4101_v30 }
0x1183   : > { %v3915_v37 = vpop.f32.mrf.mxu0 }
0x1184   : > { %v2442_v6 = vmul.f32 0.5, %v3915_v37  ;;  %v2738_v37 = vunpack.c.0.s8 %v2737_v29 }
0x1185   : > { %v2425_v48 = vpop.f32.mrf.mxu0 }
0x1186   : > { %v2440_v32 = vmul.f32 0.5, %v2425_v48  ;;  %v2446_v36 = vadd.f32 %v5440_v53, %v2442_v6  ;;  %v3661_v48 = vld.sshfl [vmem:[%s5776_s17 + $0x3] sm:$0x1 pattern:$0x75316420]  ;;  %v5777_v6 = vld [vmem:[#allocation22_spill] sm:$0xff] }
0x1187   : > { %v3916_v62 = vpop.f32.mrf.mxu0 }
0x1188   : > { %v2444_v54 = vadd.f32 %v5433_v8, %v2440_v32  ;;  %v2443_v9 = vmul.f32 0.5, %v3916_v62  ;;  %v2454_v10 = vsel %vm1025_vm1, %v2446_v36, -inf  ;;  %v5524_v32 = vsub.s32 %v2738_v37, %v5777_v6 }
0x1189   : > { %v2428_v50 = vpop.f32.mrf.mxu0 }
0x118a   : > { %v2441_v42 = vmul.f32 0.5, %v2428_v50  ;;  %v2448_v44 = vsel %vm1025_vm1, %v2444_v54, -inf  ;;  %v2447_v14 = vadd.f32 %v5454_v34, %v2443_v9  ;;  %v2742_v62 = vrot.slane %v3658_v51, %v5524_v32  ;;  %v4269_v51 = vld [vmem:[#allocation2 + $0x18] sm:$0xff] }
0x118b   : > { %2449 = vmax.xlane.f32.xlu1 %v2448_v44  ;;  %v2770_v50 = vrot.slane %v3660_v43, %v5524_v32  ;;  %v2784_v9 = vrot.slane %v3661_v48, %v5524_v32 }
0x118c   : > { %v2445_v38 = vadd.f32 %v5446_v4, %v2441_v42  ;;  %v2457_v8 = vsel %vm1025_vm1, %v2447_v14, -inf  ;;  %v2785_v42 = vunpack.c.l.b16 %v2742_v62 }
0x118e   : > { %v2451_v13 = vsel %vm1025_vm1, %v2445_v38, -inf }
0x118f   : > { %2455 = vmax.xlane.f32.xlu1 %v2454_v10  ;;  %2452 = vmax.xlane.f32.xlu0 %v2451_v13 }
0x1193   : > { %2458 = vmax.xlane.f32.xlu0 %v2457_v8 }
0x1214   : > { %v2450_v35 = vpop.xlane.xlu1 %2449 }
0x1215   : > { %v2460_v27 = vsub.f32 %v2444_v54, %v2450_v35  ;;  %v2756_v54 = vrot.slane %v3659_v60, %v5524_v32 }
0x1217   : > { %v2464_v41 = vmul.f32 1.442695, %v2460_v27  ;;  %v2786_v44 = vunpack.c.l.b16 %v2756_v54 }
0x1218   : > { %v2456_v45 = vpop.xlane.xlu1 %2455  ;;  %v2453_v16 = vpop.xlane.xlu0 %2452 }
0x1219   : > { %4222 = vpow2.f32 %v2464_v41  ;;  %v2462_v53 = vsub.f32 %v2446_v36, %v2456_v45  ;;  %v2461_v33 = vsub.f32 %v2445_v38, %v2453_v16  ;;  %v2787_v36 = vunpack.c.l.b16 %v2770_v50 }
0x121a   : > { %v2788_v38 = vunpack.c.l.b16 %v2784_v9  ;;  %v2789_v10 = vrot.slane %v2786_v44, 7 }
0x121b   : > { %v2468_v4 = vmul.f32 1.442695, %v2462_v53  ;;  %v2466_v58 = vmul.f32 1.442695, %v2461_v33  ;;  %v2792_v13 = vrot.slane %v2787_v36, 6  ;;  %v5778_v53 = vld [vmem:[#allocation26_spill] sm:$0xff] }
0x121c   : > { %v2459_v19 = vpop.xlane.xlu0 %2458  ;;  %v2791_v8 = vsel %vm2790_vm3, %v2789_v10, %v2785_v42 }
0x121d   : > { %4224 = vpow2.f32 %v2468_v4  ;;  %v2463_v23 = vsub.f32 %v2447_v14, %v2459_v19  ;;  %v2795_v14 = vrot.slane %v2788_v38, 5  ;;  %v2794_v35 = vsel %vm2793_vm4, %v2792_v13, %v2791_v8 }
0x121e   : > { %4226 = vpow2.f32 %v2466_v58 }
0x121f   : > { %v2470_v34 = vmul.f32 1.442695, %v2463_v23  ;;  %v2797_v27 = vsel %vm2796_vm5, %v2795_v14, %v2794_v35 }
0x1220   : > { %v2798_v41 = vpack.c.b16 %v2797_v27, %v2797_v27 }
0x1221   : > { %4228 = vpow2.f32 %v2470_v34 }
0x1222   : > { %3938 = vmatmul.mubr.msk.bf16.vlgmr.msra.gmra.mxu0 %vm1025_vm1, %v2798_v41 }
0x1226   : > { %v4223_v49 = vpop.eup %4222 }
0x1227   : > { %v2472_v3 = vsel %vm1025_vm1, %v4223_v49, 0.0 }
0x1228   : > { %2473 = vadd.xlane.f32.xlu1 %v2472_v3 }
0x122a   : > { %v4225_v20 = vpop.eup %4224 }
0x122b   : > { %v4227_v63 = vpop.eup %4226  ;;  %v2478_v55 = vsel %vm1025_vm1, %v4225_v20, 0.0 }
0x122c   : > { %2479 = vadd.xlane.f32.xlu1 %v2478_v55  ;;  %v2475_v7 = vsel %vm1025_vm1, %v4227_v63, 0.0 }
0x122d   : > { %2476 = vadd.xlane.f32.xlu0 %v2475_v7 }
0x122e   : > { %v4229_v11 = vpop.eup %4228 }
0x122f   : > { %v2481_v61 = vsel %vm1025_vm1, %v4229_v11, 0.0 }
0x1231   : > { %2482 = vadd.xlane.f32.xlu0 %v2481_v61  ;;  %v4103_v61 = vld [vmem:[%s4914_s26] sm:$0xff]  }
0x12b1   : > { %v2474_v18 = vpop.xlane.xlu1 %2473 }
0x12b2   : > { %4230 = vrcp.f32 %v2474_v18 }
0x12b5   : > { %v2480_v57 = vpop.xlane.xlu1 %2479 }
0x12b6   : > { %v2477_v15 = vpop.xlane.xlu0 %2476 }
0x12b7   : > { %4232 = vrcp.f32 %v2477_v15 }
0x12b8   : > { %4234 = vrcp.f32 %v2480_v57 }
0x12ba   : > { %v2483_v25 = vpop.xlane.xlu0 %2482 }
0x12bb   : > { %4236 = vrcp.f32 %v2483_v25 }
0x12bf   : > { %v4231_v59 = vpop.eup %4230 }
0x12c0   : > { %v2488_v56 = vmul.f32 %v4231_v59, %v4223_v49  ;;  %v3652_v59 = vld [vmem:[%s788_s24] ss:$0 sm:$0xff]  ;;  %s5782_s24 = sld [smem:[#allocation40_spill]] }
0x12c4   : > { %v4233_v26 = vpop.eup %4232 }
0x12c5   : > { %v2489_v2 = vmul.f32 %v4233_v26, %v4227_v63  ;;  %v4235_v21 = vpop.eup %4234 }
0x12c6   : > { %v2490_v46 = vmul.f32 %v4235_v21, %v4225_v20 }
0x12c7   : > { %v2492_v28 = vpack.c.bf16 %v2489_v2, %v2488_v56 }
0x12c8   : > { %v4237_v12 = vpop.eup %4236 }
0x12c9   : > { %3921 = vmatprep.mubr.msk.bf16.mxu1 %vm1025_vm1, %v2492_v28  ;;  %v2491_v47 = vmul.f32 %v4237_v12, %v4229_v11  ;;  %v4102_v11 = vld [vmem:[%s4914_s26 + $0x8] sm:$0xff]   ;;  %s5783_s26 = scalar_lea.vmem %s5782_s24, %s4865_s6 }
0x12ca   : > { %v4266_v28 = vld [vmem:[#allocation2] sm:$0xff] }
0x12cb   : > { %v2493_v24 = vpack.c.bf16 %v2491_v47, %v2490_v46 }
0x12cd   : > { %3922 = vmatmul.mubr.msk.bf16.vlgmr.msra.gmra.mxu1 %vm1025_vm1, %v2493_v24 }
0x12ce   : > { %3926 = vmatpush3.bf16.msra.mxu1 %v4098_v1 }
0x12cf   : > { %3927 = vmatprep.subr.bf16.mxu1 %v4099_v52 }
0x12d2   : > { %3928 = vmatpush3.bf16.msra.mxu1 %v4099_v52  ;;  %v4267_v52 = vld [vmem:[#allocation2 + $0x10] sm:$0xff] }
0x12d3   : > { %3941 = vmatprep.subr.bf16.mxu1 %v4561_v31 }
0x138d   : > { %v3923_v45 = vpop.f32.mrf.mxu1 }
0x138e   : > { %v2551_v33 = vmul.f32 %v3923_v45, %v5778_v53 }
0x138f   : > { %v2534_v16 = vpop.f32.mrf.mxu1 }
0x1390   : > { %v2549_v58 = vmul.f32 %v2534_v16, %v5778_v53  ;;  %v2555_v34 = vadd.f32 %v2551_v33, %v5478_v39  ;;  %v3657_v39 = vld [vmem:[%s796_s22] ss:$0 sm:$0xff]  ;;  %s5779_s22 = scalar_lea.vmem %s5670_s12, %s4865_s6 }
0x1391   : > { %v3924_v4 = vpop.f32.mrf.mxu1 }
0x1392   : > { %v2552_v19 = vmul.f32 %v3924_v4, %v5778_v53  ;;  %v2553_v20 = vadd.f32 %v2549_v58, %v5482_v22 }
0x1393   : > { %v2537_v23 = vpop.f32.mrf.mxu1 }
0x1394   : > { %v2556_v49 = vadd.f32 %v2552_v19, %v5486_v40  ;;  %v2550_v3 = vmul.f32 %v2537_v23, %v5778_v53  ;;  %v2848_v40 = vpop.f32.mrf.mxu0 }
0x1395   : > { %v2849_v18 = vadd.f32 %v3657_v39, %v2848_v40 }
0x1396   : > { %v2558_v63 = vpack.c.bf16 %v2556_v49, %v2555_v34  ;;  %v2554_v55 = vadd.f32 %v2550_v3, %v5490_v0  ;;  %v3939_v22 = vpop.f32.mrf.mxu0 }
0x1397   : > { %v2854_v57 = vpack.c.bf16 %v2849_v18, %v2849_v18 }
0x1398   : > { %v2557_v7 = vpack.c.bf16 %v2554_v55, %v2553_v20  ;;  %v2851_v0 = vpop.f32.mrf.mxu0  ;;  %v3665_v55 = vld [vmem:[%s5779_s22] ss:$0 sm:$0xff] }
0x1399   : > { %v5567_v0 = vld [vmem:[%s4910_s14] sm:$0x7] }
0x139a   : > { %3929 = vmatprep.mubr.msk.bf16.mxu1 %vm1025_vm1, %v2557_v7  ;;  %v3940_v15 = vpop.f32.mrf.mxu0 }
0x139b   : > { %3930 = vmatmul.mubr.msk.bf16.vlgmr.msra.gmra.mxu1 %vm1025_vm1, %v2558_v63 }
0x139c   : > { %3945 = vmatprep.mubr.msk.bf16.mxu1 %vm4562_vm2, %v4561_v31  ;;  %3942 = vmatpush3.bf16.msra.mxu1 %v4102_v11 }
0x139d   : > { %3943 = vmatprep.subr.bf16.mxu1 %v4561_v31  ;;  %v4268_v31 = vld [vmem:[#allocation2 + $0x8] sm:$0xff] }
0x13a0   : > { %3944 = vmatpush3.bf16.msra.mxu1 %v4103_v61 }
0x13a3   : > { %3946 = vmatmul.mubr.msk.bf16.vlgmr.msra.gmra.mxu1 %vm1025_vm1, %v2854_v57  ;;  %v5564_v57 = vld [vmem:[%s4905_s18] sm:$0x7] }
0x145b   : > { %v3931_v25 = vpop.f32.mrf.mxu1 }
0x145c   : > { %v2631_v56 = vadd.f32 %v3931_v25, %v3652_v59 }
0x145d   : > { %v2622_v26 = vpop.f32.mrf.mxu1 }
0x145e   : > { %v2623_v2 = vadd.f32 %v3652_v59, %v2622_v26  ;;  %v2639_v5 = vadd.f32 %v4267_v52, %v2631_v56 }
0x145f   : > { %v3932_v21 = vpop.f32.mrf.mxu1 }
0x1460   : > { %v2637_v12 = vadd.f32 %v4266_v28, %v2623_v2  ;;  %v2634_v47 = vadd.f32 %v3932_v21, %v3652_v59  ;;  %v2647_v30 = vsel %vm1025_vm1, %v2639_v5, 0.0 }
0x1461   : > { %v2625_v46 = vpop.f32.mrf.mxu1 }
0x1462   : > { %v2626_v24 = vadd.f32 %v3652_v59, %v2625_v46  ;;  %v2641_v1 = vsel %vm1025_vm1, %v2637_v12, 0.0  ;;  %v2640_v60 = vadd.f32 %v4269_v51, %v2634_v47  ;;  %v5780_v59 = vld [vmem:[#allocation23_spill] sm:$0xff] }
0x1463   : > { %2642 = vadd.xlane.f32.xlu1 %v2641_v1  ;;  %v2915_v53 = vpop.f32.mrf.mxu1  ;;  %v2697_v26 = vrot.slane %v5564_v57, %v5780_v59  ;;  %v2705_v21 = vrot.slane %v5567_v0, %v5780_v59 }
0x1464   : > { %v2638_v17 = vadd.f32 %v4268_v31, %v2626_v24  ;;  %v2650_v43 = vsel %vm1025_vm1, %v2640_v60, 0.0  ;;  %v2916_v61 = vadd.f32 %v3665_v55, %v2915_v53 }
0x1465   : > { %v3947_v33 = vpop.f32.mrf.mxu1 }
0x1466   : > { %v2644_v29 = vsel %vm1025_vm1, %v2638_v17, 0.0  ;;  %v2928_v22 = vrot.slane %v2916_v61, %v5524_v32 }
0x1467   : > { %2645 = vadd.xlane.f32.xlu0 %v2644_v29  ;;  %2648 = vadd.xlane.f32.xlu1 %v2647_v30  ;;  %v2918_v4 = vpop.f32.mrf.mxu1 }
0x1468   : > { %v2929_v15 = vcombine.high %v2928_v22, %v2928_v22  ;;  %v2936_v25 = vrot.slane %v2928_v22, %v5524_v32 }
0x1469   : > { %v3948_v58 = vpop.f32.mrf.mxu1 }
0x146a   : > { %v2943_v46 = vrot.slane %v2929_v15, %v5524_v32  ;;  %v2944_v24 = vcombine.high %v2936_v25, %v2936_v25 }
0x146b   : > { %2651 = vadd.xlane.f32.xlu0 %v2650_v43 }
0x146c   : > { %v2953_v30 = vrot.slane %v2943_v46, %v5780_v59  ;;  %v2957_v43 = vrot.slane %v2944_v24, %v5780_v59 }
0x14ec   : > { %v2643_v37 = vpop.xlane.xlu1 %2642 }
0x14ed   : > { %v2654_v48 = vmul.f32 0.03125, %v2643_v37 }
0x14ef   : > { %v2658_v6 = vsub.f32 %v2637_v12, %v2654_v48  ;;  %v2949_v12 = vrot.slane %v2936_v25, %v5780_v59 }
0x14f0   : > { %v2646_v62 = vpop.xlane.xlu0 %2645  ;;  %v2649_v54 = vpop.xlane.xlu1 %2648 }
0x14f1   : > { %v2655_v50 = vmul.f32 0.03125, %v2646_v62  ;;  %v2656_v9 = vmul.f32 0.03125, %v2649_v54  ;;  %v2662_v42 = vmul.f32 %v2658_v6, %v2658_v6  ;;  %v2945_v62 = vcombine.high %v2943_v46, %v2943_v46  ;;  %v5781_v46 = vld [vmem:[#allocation24_spill] sm:$0xff] }
0x14f3   : > { %v2659_v44 = vsub.f32 %v2638_v17, %v2655_v50  ;;  %v2660_v36 = vsub.f32 %v2639_v5, %v2656_v9  ;;  %v2666_v38 = vsel %vm1025_vm1, %v2662_v42, 0.0 }
0x14f4   : > { %v2652_v10 = vpop.xlane.xlu0 %2651  ;;  %2667 = vadd.xlane.f32.xlu1 %v2666_v38 }
0x14f5   : > { %v2657_v13 = vmul.f32 0.03125, %v2652_v10  ;;  %v2663_v14 = vmul.f32 %v2659_v44, %v2659_v44  ;;  %v2664_v8 = vmul.f32 %v2660_v36, %v2660_v36 }
0x14f7   : > { %v2661_v35 = vsub.f32 %v2640_v60, %v2657_v13  ;;  %v2669_v27 = vsel %vm1025_vm1, %v2663_v14, 0.0  ;;  %v2672_v41 = vsel %vm1025_vm1, %v2664_v8, 0.0 }
0x14f8   : > { %2670 = vadd.xlane.f32.xlu0 %v2669_v27  ;;  %2673 = vadd.xlane.f32.xlu1 %v2672_v41 }
0x14f9   : > { %v2665_v45 = vmul.f32 %v2661_v35, %v2661_v35 }
0x14fb   : > { %v2675_v16 = vsel %vm1025_vm1, %v2665_v45, 0.0 }
0x14fc   : > { %2676 = vadd.xlane.f32.xlu0 %v2675_v16 }
0x157d   : > { %v2668_v19 = vpop.xlane.xlu1 %2667 }
0x157e   : > { %v2678_v23 = vmul.f32 0.03125, %v2668_v19 }
0x1580   : > { %v2682_v34 = vadd.f32 1e-05, %v2678_v23 }
0x1581   : > { %v2671_v49 = vpop.xlane.xlu0 %2670  ;;  %v2674_v3 = vpop.xlane.xlu1 %2673 }
0x1582   : > { %4238 = vrsqrt.f32 %v2682_v34  ;;  %v2679_v20 = vmul.f32 0.03125, %v2671_v49  ;;  %v2680_v63 = vmul.f32 0.03125, %v2674_v3 }
0x1584   : > { %v2683_v7 = vadd.f32 1e-05, %v2679_v20  ;;  %v2684_v11 = vadd.f32 1e-05, %v2680_v63 }
0x1585   : > { %v2677_v39 = vpop.xlane.xlu0 %2676 }
0x1586   : > { %4240 = vrsqrt.f32 %v2683_v7  ;;  %v2681_v40 = vmul.f32 0.03125, %v2677_v39  ;;  %v4105_v39 = vld [vmem:[%s4916_s23] sm:$0xff]  }
0x1587   : > { %4242 = vrsqrt.f32 %v2684_v11  ;;  %v4104_v11 = vld [vmem:[%s4916_s23 + $0x8] sm:$0xff]  }
0x1588   : > { %v2685_v18 = vadd.f32 1e-05, %v2681_v40  ;;  %3949 = vmatprep.subr.bf16.mxu0 %v4104_v11  ;;  %v4106_v40 = vld [vmem:[%s4899_s0 + $0x18] sm:$0xff]  }
0x1589   : > { %3950 = vmatpush3.bf16.msra.mxu0 %v4104_v11  ;;  %3957 = vmatprep.subr.bf16.mxu1 %v4106_v40 }
0x158a   : > { %4244 = vrsqrt.f32 %v2685_v18  ;;  %3951 = vmatprep.subr.bf16.mxu0 %v4105_v39  ;;  %3958 = vmatpush3.bf16.msra.mxu1 %v4106_v40 }
0x158d   : > { %3952 = vmatpush3.bf16.msra.mxu0 %v4105_v39 }
0x158f   : > { %v4239_v56 = vpop.eup %4238 }
0x1590   : > { %v2690_v2 = vmul.f32 %v4239_v56, %v2658_v6 }
0x1592   : > { %v2698_v28 = vmul.f32 %v2697_v26, %v2690_v2 }
0x1593   : > { %v4241_v47 = vpop.eup %4240 }
0x1594   : > { %v4243_v1 = vpop.eup %4242  ;;  %v2706_v52 = vadd.f32 %v2705_v21, %v2698_v28  ;;  %v2691_v5 = vmul.f32 %v4241_v47, %v2659_v44  ;;  %v3025_v47 = vrot.slane %v5564_v57, %v5781_v46 }
0x1595   : > { %v2692_v31 = vmul.f32 %v4243_v1, %v2660_v36  ;;  %v2961_v36 = vrot.slane %v2945_v62, %v5780_v59  ;;  %v3033_v1 = vrot.slane %v5567_v0, %v5781_v46 }
0x1596   : > { %v2966_v17 = vadd.f32 %v2949_v12, %v2706_v52  ;;  %v2699_v29 = vmul.f32 %v2697_v26, %v2691_v5 }
0x1597   : > { %v4245_v51 = vpop.eup %4244  ;;  %v2700_v60 = vmul.f32 %v2697_v26, %v2692_v31 }
0x1598   : > { %v2970_v37 = vsel %vm1025_vm1, %v2966_v17, 0.0  ;;  %v2707_v48 = vadd.f32 %v2705_v21, %v2699_v29  ;;  %v2693_v6 = vmul.f32 %v4245_v51, %v2661_v35 }
0x1599   : > { %2971 = vadd.xlane.f32.xlu1 %v2970_v37  ;;  %v2708_v32 = vadd.f32 %v2705_v21, %v2700_v60 }
0x159a   : > { %v2967_v54 = vadd.f32 %v2953_v30, %v2707_v48  ;;  %v2701_v50 = vmul.f32 %v2697_v26, %v2693_v6 }
0x159b   : > { %v2968_v9 = vadd.f32 %v2957_v43, %v2708_v32 }
0x159c   : > { %v2973_v42 = vsel %vm1025_vm1, %v2967_v54, 0.0  ;;  %v2709_v44 = vadd.f32 %v2705_v21, %v2701_v50 }
0x159d   : > { %2974 = vadd.xlane.f32.xlu0 %v2973_v42  ;;  %v2976_v38 = vsel %vm1025_vm1, %v2968_v9, 0.0  ;;  %v4107_v42 = vld [vmem:[%s4899_s0 + $0x10] sm:$0xff]  }
0x159e   : > { %2977 = vadd.xlane.f32.xlu1 %v2976_v38  ;;  %v2969_v10 = vadd.f32 %v2961_v36, %v2709_v44  ;;  %3959 = vmatprep.subr.bf16.mxu1 %v4107_v42  ;;  %v4108_v44 = vld [vmem:[%s4899_s0 + $0x8] sm:$0xff]   ;;  %v4109_v36 = vld [vmem:[%s4899_s0] sm:$0xff]  }
0x159f   : > { %3960 = vmatpush3.bf16.msra.mxu1 %v4107_v42 }
0x15a0   : > { %v2979_v13 = vsel %vm1025_vm1, %v2969_v10, 0.0  ;;  %3961 = vmatprep.subr.bf16.mxu1 %v4108_v44 }
0x15a1   : > { %2980 = vadd.xlane.f32.xlu0 %v2979_v13  ;;  %v3669_v13 = vld [vmem:[%s5783_s26] ss:$0 sm:$0xff] }
0x15a3   : > { %3962 = vmatpush3.bf16.msra.mxu1 %v4108_v44 }
0x15a4   : > { %3963 = vmatprep.subr.bf16.mxu1 %v4109_v36 }
0x15a7   : > { %3964 = vmatpush3.bf16.msra.mxu1 %v4109_v36 }
0x1622   : > { %v2972_v14 = vpop.xlane.xlu1 %2971 }
0x1623   : > { %v2982_v8 = vmul.f32 0.03125, %v2972_v14 }
0x1625   : > { %v2986_v35 = vsub.f32 %v2966_v17, %v2982_v8 }
0x1626   : > { %v2975_v27 = vpop.xlane.xlu0 %2974 }
0x1627   : > { %v2983_v41 = vmul.f32 0.03125, %v2975_v27  ;;  %v2978_v45 = vpop.xlane.xlu1 %2977  ;;  %v2990_v16 = vmul.f32 %v2986_v35, %v2986_v35 }
0x1628   : > { %v2984_v53 = vmul.f32 0.03125, %v2978_v45 }
0x1629   : > { %v2987_v33 = vsub.f32 %v2967_v54, %v2983_v41  ;;  %v2994_v4 = vsel %vm1025_vm1, %v2990_v16, 0.0 }
0x162a   : > { %v2988_v58 = vsub.f32 %v2968_v9, %v2984_v53  ;;  %v2981_v19 = vpop.xlane.xlu0 %2980  ;;  %2995 = vadd.xlane.f32.xlu1 %v2994_v4 }
0x162b   : > { %v2985_v23 = vmul.f32 0.03125, %v2981_v19  ;;  %v2991_v34 = vmul.f32 %v2987_v33, %v2987_v33 }
0x162c   : > { %v2992_v49 = vmul.f32 %v2988_v58, %v2988_v58 }
0x162d   : > { %v2989_v3 = vsub.f32 %v2969_v10, %v2985_v23  ;;  %v2997_v20 = vsel %vm1025_vm1, %v2991_v34, 0.0  ;;  %v3674_v34 = vld [vmem:[%s956_s8] ss:$0 sm:$0xff] }
0x162e   : > { %2998 = vadd.xlane.f32.xlu0 %v2997_v20  ;;  %v3000_v63 = vsel %vm1025_vm1, %v2992_v49, 0.0 }
0x162f   : > { %3001 = vadd.xlane.f32.xlu1 %v3000_v63  ;;  %v2993_v55 = vmul.f32 %v2989_v3, %v2989_v3 }
0x1631   : > { %v3003_v7 = vsel %vm1025_vm1, %v2993_v55, 0.0 }
0x1632   : > { %3004 = vadd.xlane.f32.xlu0 %v3003_v7 }
0x16b3   : > { %v2996_v61 = vpop.xlane.xlu1 %2995 }
0x16b4   : > { %v3006_v18 = vmul.f32 0.03125, %v2996_v61 }
0x16b6   : > { %v3010_v22 = vadd.f32 1e-05, %v3006_v18 }
0x16b7   : > { %v2999_v15 = vpop.xlane.xlu0 %2998 }
0x16b8   : > { %4246 = vrsqrt.f32 %v3010_v22  ;;  %v3007_v25 = vmul.f32 0.03125, %v2999_v15  ;;  %v3002_v59 = vpop.xlane.xlu1 %3001 }
0x16b9   : > { %v3008_v26 = vmul.f32 0.03125, %v3002_v59 }
0x16ba   : > { %v3011_v56 = vadd.f32 1e-05, %v3007_v25 }
0x16bb   : > { %v3012_v2 = vadd.f32 1e-05, %v3008_v26  ;;  %v3005_v21 = vpop.xlane.xlu0 %3004 }
0x16bc   : > { %4248 = vrsqrt.f32 %v3011_v56  ;;  %v3009_v28 = vmul.f32 0.03125, %v3005_v21 }
0x16bd   : > { %4250 = vrsqrt.f32 %v3012_v2 }
0x16be   : > { %v3013_v12 = vadd.f32 1e-05, %v3009_v28 }
0x16c0   : > { %4252 = vrsqrt.f32 %v3013_v12 }
0x16c5   : > { %v4247_v24 = vpop.eup %4246 }
0x16c6   : > { %v3018_v52 = vmul.f32 %v4247_v24, %v2986_v35 }
0x16c8   : > { %v3026_v5 = vmul.f32 %v3025_v47, %v3018_v52 }
0x16c9   : > { %v4249_v31 = vpop.eup %4248 }
0x16ca   : > { %v4251_v17 = vpop.eup %4250  ;;  %v3019_v29 = vmul.f32 %v4249_v31, %v2987_v33  ;;  %v3034_v30 = vadd.f32 %v3033_v1, %v3026_v5 }
0x16cb   : > { %v3020_v51 = vmul.f32 %v4251_v17, %v2988_v58 }
0x16cc   : > { %v3027_v60 = vmul.f32 %v3025_v47, %v3019_v29 }
0x16cd   : > { %v4253_v43 = vpop.eup %4252  ;;  %v3028_v37 = vmul.f32 %v3025_v47, %v3020_v51 }
0x16ce   : > { %v3021_v48 = vmul.f32 %v4253_v43, %v2989_v3  ;;  %v3035_v6 = vadd.f32 %v3033_v1, %v3027_v60 }
0x16cf   : > { %v3036_v62 = vadd.f32 %v3033_v1, %v3028_v37 }
0x16d0   : > { %v3038_v32 = vpack.c.bf16 %v3035_v6, %v3034_v30  ;;  %v3029_v54 = vmul.f32 %v3025_v47, %v3021_v48 }
0x16d2   : > { %3953 = vmatprep.mubr.msk.bf16.mxu0 %vm1025_vm1, %v3038_v32  ;;  %v3037_v50 = vadd.f32 %v3033_v1, %v3029_v54 }
0x16d4   : > { %v3039_v9 = vpack.c.bf16 %v3037_v50, %v3036_v62 }
0x16d6   : > { %3954 = vmatmul.mubr.msk.bf16.vlgmr.msra.gmra.mxu0 %vm1025_vm1, %v3039_v9 }
0x1796   : > { %v3955_v38 = vpop.f32.mrf.mxu0 }
0x1797   : > { %v3112_v27 = vadd.f32 %v3955_v38, %v3669_v13 }
0x1798   : > { %v3103_v10 = vpop.f32.mrf.mxu0 }
0x1799   : > { %v3104_v8 = vadd.f32 %v3669_v13, %v3103_v10  ;;  %v3120_v4 = vmax.f32 %v3112_v27, 0.0 }
0x179a   : > { %v3956_v14 = vpop.f32.mrf.mxu0 }
0x179b   : > { %v3115_v35 = vadd.f32 %v3956_v14, %v3669_v13  ;;  %v3118_v53 = vmax.f32 %v3104_v8, 0.0 }
0x179c   : > { %v3106_v41 = vpop.f32.mrf.mxu0 }
0x179d   : > { %v3107_v45 = vadd.f32 %v3669_v13, %v3106_v41  ;;  %v3121_v16 = vmax.f32 %v3115_v35, 0.0  ;;  %v5785_v13 = vld [vmem:[#allocation25_spill] sm:$0xff] }
0x179e   : > { %v3278_v14 = vrot.slane %v5564_v57, %v5785_v13  ;;  %v3286_v35 = vrot.slane %v5567_v0, %v5785_v13 }
0x179f   : > { %v3119_v33 = vmax.f32 %v3107_v45, 0.0  ;;  %v3123_v19 = vpack.c.bf16 %v3121_v16, %v3120_v4 }
0x17a1   : > { %v3122_v58 = vpack.c.bf16 %v3119_v33, %v3118_v53 }
0x17a3   : > { %3965 = vmatprep.mubr.msk.bf16.mxu1 %vm3163_vm6, %v3122_v58 }
0x17a4   : > { %3966 = vmatmul.mubr.msk.bf16.vlgmr.msra.gmra.mxu1 %vm3163_vm6, %v3123_v19 }
0x1864   : > { %v3967_v23 = vpop.f32.mrf.mxu1 }
0x1865   : > { %v3213_v3 = vadd.f32 %v3967_v23, %v3674_v34 }
0x1866   : > { %v3204_v49 = vpop.f32.mrf.mxu1 }
0x1867   : > { %v3205_v20 = vadd.f32 %v3674_v34, %v3204_v49  ;;  %v3221_v61 = vadd.f32 %v3213_v3, %v3036_v62 }
0x1868   : > { %v3968_v63 = vpop.f32.mrf.mxu1 }
0x1869   : > { %v3219_v55 = vadd.f32 %v3205_v20, %v3034_v30  ;;  %v3216_v11 = vadd.f32 %v3968_v63, %v3674_v34  ;;  %v3229_v15 = vsel %vm1025_vm1, %v3221_v61, 0.0 }
0x186a   : > { %v3207_v7 = vpop.f32.mrf.mxu1 }
0x186b   : > { %v3208_v39 = vadd.f32 %v3674_v34, %v3207_v7  ;;  %v3223_v40 = vsel %vm1025_vm1, %v3219_v55, 0.0  ;;  %v3222_v25 = vadd.f32 %v3216_v11, %v3037_v50 }
0x186c   : > { %3224 = vadd.xlane.f32.xlu1 %v3223_v40 }
0x186d   : > { %v3220_v18 = vadd.f32 %v3208_v39, %v3035_v6  ;;  %v3232_v59 = vsel %vm1025_vm1, %v3222_v25, 0.0 }
0x186f   : > { %v3226_v22 = vsel %vm1025_vm1, %v3220_v18, 0.0 }
0x1870   : > { %3227 = vadd.xlane.f32.xlu0 %v3226_v22  ;;  %3230 = vadd.xlane.f32.xlu1 %v3229_v15 }
0x1874   : > { %3233 = vadd.xlane.f32.xlu0 %v3232_v59 }
0x18f5   : > { %v3225_v26 = vpop.xlane.xlu1 %3224 }
0x18f6   : > { %v3235_v56 = vmul.f32 0.03125, %v3225_v26 }
0x18f8   : > { %v3239_v2 = vsub.f32 %v3219_v55, %v3235_v56 }
0x18f9   : > { %v3228_v21 = vpop.xlane.xlu0 %3227  ;;  %v3231_v28 = vpop.xlane.xlu1 %3230 }
0x18fa   : > { %v3236_v12 = vmul.f32 0.03125, %v3228_v21  ;;  %v3237_v46 = vmul.f32 0.03125, %v3231_v28  ;;  %v3243_v47 = vmul.f32 %v3239_v2, %v3239_v2 }
0x18fc   : > { %v3240_v24 = vsub.f32 %v3220_v18, %v3236_v12  ;;  %v3241_v1 = vsub.f32 %v3221_v61, %v3237_v46  ;;  %v3247_v52 = vsel %vm1025_vm1, %v3243_v47, 0.0 }
0x18fd   : > { %v3234_v5 = vpop.xlane.xlu0 %3233  ;;  %3248 = vadd.xlane.f32.xlu1 %v3247_v52 }
0x18fe   : > { %v3238_v31 = vmul.f32 0.03125, %v3234_v5  ;;  %v3244_v17 = vmul.f32 %v3240_v24, %v3240_v24  ;;  %v3245_v29 = vmul.f32 %v3241_v1, %v3241_v1 }
0x1900   : > { %v3242_v30 = vsub.f32 %v3222_v25, %v3238_v31  ;;  %v3250_v51 = vsel %vm1025_vm1, %v3244_v17, 0.0  ;;  %v3253_v60 = vsel %vm1025_vm1, %v3245_v29, 0.0 }
0x1901   : > { %3251 = vadd.xlane.f32.xlu0 %v3250_v51  ;;  %3254 = vadd.xlane.f32.xlu1 %v3253_v60 }
0x1902   : > { %v3246_v43 = vmul.f32 %v3242_v30, %v3242_v30 }
0x1904   : > { %v3256_v37 = vsel %vm1025_vm1, %v3246_v43, 0.0 }
0x1905   : > { %3257 = vadd.xlane.f32.xlu0 %v3256_v37 }
0x1986   : > { %v3249_v48 = vpop.xlane.xlu1 %3248 }
0x1987   : > { %v3259_v6 = vmul.f32 0.03125, %v3249_v48 }
0x1989   : > { %v3263_v62 = vadd.f32 1e-05, %v3259_v6 }
0x198a   : > { %v3252_v32 = vpop.xlane.xlu0 %3251  ;;  %v3255_v54 = vpop.xlane.xlu1 %3254 }
0x198b   : > { %4254 = vrsqrt.f32 %v3263_v62  ;;  %v3260_v50 = vmul.f32 0.03125, %v3252_v32  ;;  %v3261_v9 = vmul.f32 0.03125, %v3255_v54 }
0x198d   : > { %v3264_v42 = vadd.f32 1e-05, %v3260_v50  ;;  %v3265_v44 = vadd.f32 1e-05, %v3261_v9 }
0x198e   : > { %v3258_v36 = vpop.xlane.xlu0 %3257 }
0x198f   : > { %4256 = vrsqrt.f32 %v3264_v42  ;;  %v3262_v38 = vmul.f32 0.03125, %v3258_v36 }
0x1990   : > { %4258 = vrsqrt.f32 %v3265_v44 }
0x1991   : > { %v3266_v10 = vadd.f32 1e-05, %v3262_v38 }
0x1993   : > { %4260 = vrsqrt.f32 %v3266_v10 }
0x1998   : > { %v4255_v8 = vpop.eup %4254 }
0x1999   : > { %v3271_v27 = vmul.f32 %v4255_v8, %v3239_v2 }
0x199b   : > { %v3279_v41 = vmul.f32 %v3278_v14, %v3271_v27 }
0x199c   : > { %v4257_v45 = vpop.eup %4256 }
0x199d   : > { %v4259_v16 = vpop.eup %4258  ;;  %v3287_v53 = vadd.f32 %v3286_v35, %v3279_v41  ;;  %v3272_v33 = vmul.f32 %v4257_v45, %v3240_v24 }
0x199e   : > { %v3273_v4 = vmul.f32 %v4259_v16, %v3241_v1 }
0x199f   : > { %3291 = vst.msk [vmem:[#allocation2] sm:$0xff] %vm1025_vm1, %v3287_v53  ;;  %v3280_v58 = vmul.f32 %v3278_v14, %v3272_v33 }
0x19a0   : > { %v4261_v19 = vpop.eup %4260  ;;  %v3281_v23 = vmul.f32 %v3278_v14, %v3273_v4 }
0x19a1   : > { %v3288_v34 = vadd.f32 %v3286_v35, %v3280_v58  ;;  %v3274_v49 = vmul.f32 %v4261_v19, %v3242_v30 }
0x19a2   : > { %v3289_v3 = vadd.f32 %v3286_v35, %v3281_v23 }
0x19a3   : > { %3292 = vst.msk [vmem:[#allocation2 + $0x8] sm:$0xff] %vm1025_vm1, %v3288_v34  ;;  %v3282_v57 = vmul.f32 %v3278_v14, %v3274_v49  ;;  %3298 = sbr.rel (%p3681_p11) target bundleno = 6572 (0x19ac), region = 132 }
0x19a4   : > { %3293 = vst.msk [vmem:[#allocation2 + $0x10] sm:$0xff] %vm1025_vm1, %v3289_v3 }
0x19a5   : > { %v3290_v0 = vadd.f32 %v3286_v35, %v3282_v57 }
0x19a7   : > { %3294 = vst.msk [vmem:[#allocation2 + $0x18] sm:$0xff] %vm1025_vm1, %v3290_v0 }
0x19a8   : > { %v3299_v20 = vpack.c.bf16 %v3287_v53, %v3287_v53  ;;  %vm3303_vm7 = vcmask 257024   ;;  %v3300_v63 = vpack.c.bf16 %v3288_v34, %v3288_v34  ;;  %v3301_v55 = vpack.c.bf16 %v3289_v3, %v3289_v3 }
0x19a9   : > { %v3302_v7 = vpack.c.bf16 %v3290_v0, %v3290_v0 }
0x19aa   : > { %3304 = vst.msk [vmem:[#allocation13] sm:$0xf] %vm3303_vm7, %v3299_v20  ;;  %3305 = vst.msk [vmem:[#allocation13 + $0x4] sm:$0xf] %vm3303_vm7, %v3300_v63 }
0x19ab   : > { %3306 = vst.msk [vmem:[#allocation13 + $0x8] sm:$0xf] %vm3303_vm7, %v3301_v55  ;;  %3307 = vst.msk [vmem:[#allocation13 + $0xc] sm:$0xf] %vm3303_vm7, %v3302_v7 }
0x19ac PF: > { %p4035_p12 = scmp.eq.s32.totalorder %s4695_s2, 1  ;;  %s4564_s6 = smov [#allocation13]  }
0x19ad   : > { %s3317_s8 = sshll.u32 %s4564_s6, 4  ;;  %s3318_s8 = int_to_ptr.vmem [resolvable:$true] %s3317_s8 }
0x19ae   : > { %s4462_s16 = scalar_lea.vmem %s3318_s8, 256  ;;  %p4469_p6 = scmp.lt.s32.totalorder %s3318_s8, %s3318_s8 }
0x19af   : > { %p4463_p8 = scmp.ne.s32.totalorder %s3318_s8, %s4462_s16  ;;  %p4470_p1 = scmp.lt.s32.totalorder %s4462_s16, %s4462_s16 }
0x19b1   : > { %p4464_p2 = pnand %p4463_p8, %p4035_p12  ;;  %p4471_p4 = por %p4470_p1, %p4469_p6 }
0x19b3   : > { %p4465_p3 = pneg %p4464_p2 }
0x19b5   : > { %p4472_p7 = pnand %p4471_p4, %p4465_p3 }
0x19b7   : > { %4475 = shalt.err (!%p4472_p7)
}
0x19b8   : > { %s4565_s21 = smov 4   ;;  %s5786_s25 = sld [smem:[#allocation45_spill]] }
0x19be   : > { %4004 = dma.vmem_to_hbm [thread:$0]  (%p4035_p12), %s3318_s8, 256, %s5786_s25, [#allocation5], %s4560_s5, %s4560_s5, %s4565_s21  }
0x19bf   : > { %4523 = dma.done.wait (%p4035_p12), [#allocation5], 256  }
0x19c0   : > { %4525 = vsyncadd (%p4035_p12), [#allocation5], 4294967040 }
0x19c1 PF: > { %s5787_s15 = sld [smem:[#allocation19_spill]]  ;;  %s5791_s0 = smov %s4532_s30 }
0x19c2   : > { %s5788_s10 = sld [smem:[#allocation21_spill]]  ;;  %s5792_s30 = smov %s4536_s20 }
0x19c3   : > { %s5789_s21 = sld [smem:[#allocation18_spill]] }
0x19c4   : > { %s5790_s1 = sld [smem:[#allocation20_spill]] }
0x19c7   : > { %s32_s22 = sadd.s32 1, %s5787_s15  }
0x19c8   : > { %p29_p5 = scmp.ge.s32.totalorder %s32_s22, 4   ;;  %s5793_s20 = smov %s5788_s10 }
0x19ca   :  { %31 = sbr.rel (!%p29_p5) target bundleno = 25 (0x19), region = 224 }
0x19cf   :  { %3333 = vsyncpa [#allocation4], 1 }
0x19d0   :  { %3335 = vsyncpa [#allocation4 + $0x1], 1 }
0x19d1   :  { %3336 = vsyncpa [#allocation7], 1 }
0x19d2   :  { %3337 = vsyncpa [#allocation5], 1 }
0x19d3   :  { %3339 = vsyncpa [#allocation5 + $0x1], 1 }

</bundles_post_ra>
